<compile_context>
chip_gen: v5e
topology: v5e:2x2
jax: 0.10.0
libtpu: 0.0.40
codegen_flags: <defaults>
</compile_context>

<pallas_src>
import functools

import jax
import jax.numpy as jnp
from jax.experimental import pallas as pl
from jax.experimental.pallas import tpu as pltpu


VMEM_LIMIT = 48 * 1024 * 1024   # > v5e/v6e scoped defaults, < v7x physical 64 MiB
                                # TODO(synk): on v5e/v6e with big row tiles raise to ~100 MiB.

VGG_MEAN = jnp.array([0.485, 0.456, 0.406], jnp.float32)
VGG_STD = jnp.array([0.229, 0.224, 0.225], jnp.float32)

LAYER_WEIGHTS = {'conv1_2': 0.5, 'conv2_2': 1.0}
PERCEPTUAL_WEIGHT = 1.0
STYLE_WEIGHT = 1.0


# ----------------------------- Pallas kernels -------------------------------

def _conv3x3_kernel(x_ref, w_ref, b_ref, o_ref, *, H, W, relu):
    """3x3 same-padding conv on one image as ONE long-K MXU matmul.

    x_ref: (1, M, Cin)    bf16  flattened-spatial channels-last input
    w_ref: (9*Cin, Cout)  bf16  tap-major / channel-minor weight rows
    b_ref: (1, Cout)      f32   bias
    o_ref: (1, M, Cout)   bf16
    """
    M = H * W
    # f32 working copy for the sublane rolls / selects (portable on v5e, avoids
    # packed-bf16 rotate paths).  Downcast to bf16 once, just before the matmul.
    x = x_ref[0].astype(jnp.float32)

    idx = jax.lax.broadcasted_iota(jnp.int32, (M, 1), 0)
    # col = idx % W via f32 (vector int div/mod is not a native VPU op).  Exact:
    # the true quotient is >= 0.5/W away from the rounding edge for idx < 2^22.
    idx_f = idx.astype(jnp.float32)
    col_f = idx_f - W * jnp.floor((idx_f + 0.5) * (1.0 / W))

    taps = []
    for dy in (-1, 0, 1):
        for dx in (-1, 0, 1):
            shift = (-(dy * W + dx)) % M
            xs = pltpu.roll(x, shift=shift, axis=0) if shift else x
            conds = []
            if dy < 0:
                conds.append(idx >= W)            # first row has no row above
            if dy > 0:
                conds.append(idx < M - W)         # last row has no row below
            if dx < 0:
                conds.append(col_f > 0.5)         # first column: nothing left
            if dx > 0:
                conds.append(col_f < W - 1.5)     # last column: nothing right
            if conds:
                ok = functools.reduce(jnp.logical_and, conds)   # (M, 1) bool
                xs = jnp.where(ok, xs, 0.0)
            taps.append(xs)

    # (M, 9*Cin) bf16 operand -> single MXU matmul accumulating internally.
    xcat = jnp.concatenate(taps, axis=-1).astype(jnp.bfloat16)
    y = jnp.dot(xcat, w_ref[...], preferred_element_type=jnp.float32) + b_ref[...]
    if relu:
        y = jnp.maximum(y, 0.0)
    o_ref[0] = y.astype(o_ref.dtype)


def _gram_kernel(f_ref, o_ref, acc_ref, *, scale):
    """Accumulate f^T f over HW tiles.  f_ref: (1, tk, C) bf16, acc: (C, C) f32."""
    k = pl.program_id(1)

    @pl.when(k == 0)
    def _():
        acc_ref[...] = jnp.zeros_like(acc_ref)

    f = f_ref[0]
    # Contract dim 0 of both operands directly on the MXU (no explicit f.T).
    acc_ref[...] += jax.lax.dot_general(
        f, f, dimension_numbers=(((0,), (0,)), ((), ())),
        preferred_element_type=jnp.float32)

    @pl.when(k == pl.num_programs(1) - 1)
    def _():
        o_ref[0] = (acc_ref[...] * scale).astype(o_ref.dtype)


def _l1_partial_kernel(a_ref, b_ref, o_ref):
    """Tiled sum(|a - b|) into an (8, C) f32 vector accumulator (output block).

    a_ref/b_ref: (1, tr, C) bf16/f32;  o_ref: (1, 8, C) f32, same block for all
    steps of the arbitrary axis, so it stays resident in VMEM; the cross-lane
    reduce of the partials happens once, in XLA, in the wrapper.
    """
    i = pl.program_id(1)

    @pl.when(i == 0)
    def _():
        o_ref[...] = jnp.zeros_like(o_ref)

    d = a_ref[0].astype(jnp.float32) - b_ref[0].astype(jnp.float32)
    tr, c = d.shape
    # (tr, C) -> (tr//8, 8, C): pure vreg regrouping; the leading-axis sum is
    # plain VPU adds (no XLU cross-lane work per step).
    o_ref[0] += jnp.sum(jnp.abs(d).reshape(tr // 8, 8, c), axis=0)


# ----------------------------- Pallas wrappers -------------------------------

def conv3x3(x_bmc, H, W, layer, relu):
    """3x3 conv, padding=1.  x_bmc: (B, H*W, Cin) bf16 -> (B, H*W, Cout) bf16."""
    B, M, cin = x_bmc.shape
    assert M == H * W
    w, b = layer['w'], layer['b']
    kh, kw, cin_w, cout = w.shape
    assert (kh, kw) == (3, 3) and cin_w == cin
    # (3, 3, Cin, Cout) -> (9*Cin, Cout): tap-major rows matching the in-kernel
    # concat order (dy outer, dx inner, then channel).
    w9 = w.reshape(9 * cin, cout).astype(jnp.bfloat16)
    b2 = b.reshape(1, cout).astype(jnp.float32)

    # TODO(synk): at realistic resolutions, tile M (with a row halo) so
    # double-buffered blocks stay inside v7x's 64 MiB VMEM and the f32 working
    # copy shrinks; whole-image blocks are fine at these test sizes.
    return pl.pallas_call(
        functools.partial(_conv3x3_kernel, H=H, W=W, relu=relu),
        out_shape=jax.ShapeDtypeStruct((B, M, cout), jnp.bfloat16),
        grid=(B,),
        in_specs=[
            pl.BlockSpec((1, M, cin), lambda n: (n, 0, 0)),
            pl.BlockSpec((9 * cin, cout), lambda n: (0, 0)),
            pl.BlockSpec((1, cout), lambda n: (0, 0)),
        ],
        out_specs=pl.BlockSpec((1, M, cout), lambda n: (n, 0, 0)),
        compiler_params=pltpu.CompilerParams(
            dimension_semantics=("parallel",),
            vmem_limit_bytes=VMEM_LIMIT),
        cost_estimate=pl.CostEstimate(
            flops=2 * B * M * 9 * cin * cout,
            transcendentals=0,
            bytes_accessed=2 * (x_bmc.size + B * M * cout + w9.size) + 4 * b2.size),
    )(x_bmc, w9, b2)


def gram_matrix(f_bmc, h, w):
    """basicsr PerceptualLoss._gram_mat: f^T f / (c*h*w), batched over B."""
    B, HW, C = f_bmc.shape
    assert HW % 8 == 0
    tk = min(HW, 512)                 # big HW tiles amortize per-step overhead
    while HW % tk:
        tk -= 8
    scale = 1.0 / (C * h * w)
    return pl.pallas_call(
        functools.partial(_gram_kernel, scale=scale),
        out_shape=jax.ShapeDtypeStruct((B, C, C), jnp.float32),
        grid=(B, HW // tk),
        in_specs=[pl.BlockSpec((1, tk, C), lambda n, k: (n, k, 0))],
        out_specs=pl.BlockSpec((1, C, C), lambda n, k: (n, 0, 0)),
        scratch_shapes=[pltpu.VMEM((C, C), jnp.float32)],
        compiler_params=pltpu.CompilerParams(
            dimension_semantics=("parallel", "arbitrary"),
            vmem_limit_bytes=VMEM_LIMIT),
        cost_estimate=pl.CostEstimate(
            flops=2 * B * HW * C * C,
            transcendentals=0,
            bytes_accessed=2 * f_bmc.size + 4 * B * C * C),
    )(f_bmc)


def l1_mean(a, b):
    """torch.nn.L1Loss(): mean(|a-b|), keeping the arrays' native trailing-dim
    layout (no lane relayout).  Zero row padding adds |0-0| = 0 to the sum."""
    assert a.shape == b.shape
    n = a.size
    C = a.shape[-1]
    a2 = a.reshape(-1, C)
    b2 = b.reshape(-1, C)
    R = a2.shape[0]

    P = 2                                           # 2-way core split for v7x
    rows_per_core = -(-R // P)
    tr = min(1024, ((rows_per_core + 7) // 8) * 8)  # rows per grid step
    rp = -(-rows_per_core // tr) * tr               # padded rows per core
    pad = P * rp - R
    if pad:
        a2 = jnp.pad(a2, ((0, pad), (0, 0)))
        b2 = jnp.pad(b2, ((0, pad), (0, 0)))
    a3 = a2.reshape(P, rp, C)
    b3 = b2.reshape(P, rp, C)

    partial = pl.pallas_call(
        _l1_partial_kernel,
        out_shape=jax.ShapeDtypeStruct((P, 8, C), jnp.float32),
        grid=(P, rp // tr),
        in_specs=[pl.BlockSpec((1, tr, C), lambda p, i: (p, i, 0)),
                  pl.BlockSpec((1, tr, C), lambda p, i: (p, i, 0))],
        out_specs=pl.BlockSpec((1, 8, C), lambda p, i: (p, 0, 0)),
        compiler_params=pltpu.CompilerParams(
            dimension_semantics=("parallel", "arbitrary"),
            vmem_limit_bytes=VMEM_LIMIT),
    )(a3, b3)
    return jnp.sum(partial) / jnp.float32(n)


# ------------------------ mini VGG feature extractor -------------------------

def init_vgg_params(key):
    # vgg19 prefix: conv1_1(3->64), conv1_2(64->64), pool1,
    #               conv2_1(64->128), conv2_2(128->128)
    # TODO(synk): real PerceptualLoss loads pretrained VGG19 weights; here they
    # are synthetic deterministic random weights.
    cfg = [('conv1_1', 3, 64), ('conv1_2', 64, 64),
           ('conv2_1', 64, 128), ('conv2_2', 128, 128)]
    params = {}
    for i, (name, cin, cout) in enumerate(cfg):
        kw, kb = jax.random.split(jax.random.fold_in(key, i))
        params[name] = {
            'w': 0.05 * jax.random.normal(kw, (3, 3, cin, cout), jnp.float32),
            'b': 0.01 * jax.random.normal(kb, (cout,), jnp.float32),
        }
    return params


def vgg_features(x_nchw, params, use_input_norm=True, range_norm=False):
    x = x_nchw
    if range_norm:
        x = (x + 1.0) / 2.0
    if use_input_norm:
        x = (x - VGG_MEAN.reshape(1, 3, 1, 1)) / VGG_STD.reshape(1, 3, 1, 1)
    B, C, H, W = x.shape
    # NCHW -> flattened-spatial channels-last, bf16 (halves DMA bytes, MXU dtype).
    x = jnp.transpose(x, (0, 2, 3, 1)).reshape(B, H * W, C).astype(jnp.bfloat16)
    # TODO(synk): the RGB input block is 3/128 lane-utilized in VMEM; at large
    # resolutions conv1_1 could be special-cased (lane-packed input or plain XLA).

    feats = {}
    x = conv3x3(x, H, W, params['conv1_1'], relu=True)
    x = conv3x3(x, H, W, params['conv1_2'], relu=False)
    feats['conv1_2'] = (x, H, W)            # pre-relu feature (basicsr semantics)

    # relu1_2 + maxpool1 (2x2, stride 2), plain-JAX glue on the bf16 feature map.
    # TODO(synk): fuse relu+pool into the conv1_2 epilogue (second pooled output)
    # to save one (B, H*W, 64) HBM read; needs sublane-strided extraction in-kernel.
    H2, W2 = H // 2, W // 2
    c1 = x.shape[-1]
    xr = jnp.maximum(x, 0).reshape(B, H2, 2, W2, 2, c1)
    x = xr.max(axis=(2, 4)).reshape(B, H2 * W2, c1)

    x = conv3x3(x, H2, W2, params['conv2_1'], relu=True)
    x = conv3x3(x, H2, W2, params['conv2_2'], relu=False)
    feats['conv2_2'] = (x, H2, W2)
    return feats


# --------------------------------- the loss ----------------------------------

def perceptual_loss(x, gt, params):
    # TODO(synk): forward only; a training loss would need custom_vjp backward kernels.
    N = x.shape[0]
    # Run x and gt.detach() through the extractor in ONE batched pass.
    both = jnp.concatenate([x, jax.lax.stop_gradient(gt)], axis=0)
    feats = vgg_features(both, params)

    percep = jnp.float32(0.0)
    style = jnp.float32(0.0)
    for k, lw in LAYER_WEIGHTS.items():
        f, h, w = feats[k]
        xf, gf = f[:N], f[N:]
        percep = percep + l1_mean(xf, gf) * lw

        g = gram_matrix(f, h, w)            # one batched call covers x and gt
        # Style L1 on the tiny (N, C, C) grams in plain XLA: launch overhead
        # would exceed the sub-microsecond compute.
        style = style + jnp.mean(jnp.abs(g[:N] - g[N:])) * lw

    return percep * PERCEPTUAL_WEIGHT, style * STYLE_WEIGHT


# ----------------------------------- main ------------------------------------

if __name__ == "__main__":
    key = jax.random.PRNGKey(0)
    kx, kg, kp = jax.random.split(key, 3)
    x = jax.random.uniform(kx, (2, 3, 16, 16), jnp.float32)   # (n, c, h, w)
    gt = jax.random.uniform(kg, (2, 3, 16, 16), jnp.float32)  # (n, c, h, w)
    params = init_vgg_params(kp)

    percep, style = jax.jit(perceptual_loss)(x, gt, params)
    jax.block_until_ready((percep, style))
    assert bool(jnp.isfinite(percep)) and bool(jnp.isfinite(style))
    print("KERNEL_OK")
</pallas_src>

<mosaic_0001>
module attributes {stable_mosaic.version = 11 : i64} {
  func.func @_conv3x3_kernel(%arg0: i32, %arg1: memref<1x256x3xbf16, #tpu.memory_space<vmem>>, %arg2: memref<27x64xbf16, #tpu.memory_space<vmem>>, %arg3: memref<1x64xf32, #tpu.memory_space<vmem>>, %arg4: memref<1x256x64xbf16, #tpu.memory_space<vmem>>) attributes {dimension_semantics = [#tpu.dimension_semantics<parallel>], iteration_bounds = array<i64: 4>, scalar_prefetch = 0 : i64, scratch_operands = 0 : i64, tpu.core_type = #tpu.core_type<tc>, window_params = [{transform_indices = @transform_0, window_bounds = array<i64: 1, 256, 3>}, {pipeline_mode = #tpu.pipeline_mode<synchronous>, transform_indices = @transform_1, window_bounds = array<i64: 27, 64>}, {pipeline_mode = #tpu.pipeline_mode<synchronous>, transform_indices = @transform_2, window_bounds = array<i64: 1, 64>}, {transform_indices = @transform_3, window_bounds = array<i64: 1, 256, 64>}]} {
    %c0 = arith.constant 0 : index
    %c0_0 = arith.constant 0 : index
    %c0_1 = arith.constant 0 : index
    %0 = vector.load %arg1[%c0, %c0_0, %c0_1] : memref<1x256x3xbf16, #tpu.memory_space<vmem>>, vector<1x256x3xbf16>
    %1 = vector.shape_cast %0 : vector<1x256x3xbf16> to vector<256x3xbf16>
    %2 = arith.extf %1 : vector<256x3xbf16> to vector<256x3xf32>
    %3 = tpu.iota {dimensions = array<i32: 0>} : vector<256x1xi32>
    %4 = arith.sitofp %3 : vector<256x1xi32> to vector<256x1xf32>
    %cst = arith.constant 5.000000e-01 : f32
    %5 = vector.broadcast %cst : f32 to vector<256x1xf32>
    %6 = arith.addf %4, %5 : vector<256x1xf32>
    %cst_2 = arith.constant 6.250000e-02 : f32
    %7 = vector.broadcast %cst_2 : f32 to vector<256x1xf32>
    %8 = arith.mulf %6, %7 : vector<256x1xf32>
    %9 = math.floor %8 : vector<256x1xf32>
    %cst_3 = arith.constant 1.600000e+01 : f32
    %10 = vector.broadcast %cst_3 : f32 to vector<256x1xf32>
    %11 = arith.mulf %10, %9 : vector<256x1xf32>
    %12 = arith.subf %4, %11 : vector<256x1xf32>
    %c17_i32 = arith.constant 17 : i32
    %13 = tpu.dynamic_rotate %2 by %c17_i32 dim 0 : vector<256x3xf32>, i32 -> vector<256x3xf32>
    %c16_i32 = arith.constant 16 : i32
    %14 = vector.broadcast %c16_i32 : i32 to vector<256x1xi32>
    %15 = arith.cmpi sge, %3, %14 : vector<256x1xi32>
    %cst_4 = arith.constant 5.000000e-01 : f32
    %16 = vector.broadcast %cst_4 : f32 to vector<256x1xf32>
    %17 = arith.cmpf ogt, %12, %16 : vector<256x1xf32>
    %18 = arith.andi %15, %17 : vector<256x1xi1>
    %cst_5 = arith.constant 0.000000e+00 : f32
    %19 = vector.shape_cast %18 : vector<256x1xi1> to vector<256x1xi1>
    %20 = vector.broadcast %19 : vector<256x1xi1> to vector<256x3xi1>
    %21 = vector.broadcast %cst_5 : f32 to vector<256x3xf32>
    %22 = arith.select %20, %13, %21 : vector<256x3xi1>, vector<256x3xf32>
    %c16_i32_6 = arith.constant 16 : i32
    %23 = tpu.dynamic_rotate %2 by %c16_i32_6 dim 0 : vector<256x3xf32>, i32 -> vector<256x3xf32>
    %c16_i32_7 = arith.constant 16 : i32
    %24 = vector.broadcast %c16_i32_7 : i32 to vector<256x1xi32>
    %25 = arith.cmpi sge, %3, %24 : vector<256x1xi32>
    %cst_8 = arith.constant 0.000000e+00 : f32
    %26 = vector.shape_cast %25 : vector<256x1xi1> to vector<256x1xi1>
    %27 = vector.broadcast %26 : vector<256x1xi1> to vector<256x3xi1>
    %28 = vector.broadcast %cst_8 : f32 to vector<256x3xf32>
    %29 = arith.select %27, %23, %28 : vector<256x3xi1>, vector<256x3xf32>
    %c15_i32 = arith.constant 15 : i32
    %30 = tpu.dynamic_rotate %2 by %c15_i32 dim 0 : vector<256x3xf32>, i32 -> vector<256x3xf32>
    %c16_i32_9 = arith.constant 16 : i32
    %31 = vector.broadcast %c16_i32_9 : i32 to vector<256x1xi32>
    %32 = arith.cmpi sge, %3, %31 : vector<256x1xi32>
    %cst_10 = arith.constant 1.450000e+01 : f32
    %33 = vector.broadcast %cst_10 : f32 to vector<256x1xf32>
    %34 = arith.cmpf olt, %12, %33 : vector<256x1xf32>
    %35 = arith.andi %32, %34 : vector<256x1xi1>
    %cst_11 = arith.constant 0.000000e+00 : f32
    %36 = vector.shape_cast %35 : vector<256x1xi1> to vector<256x1xi1>
    %37 = vector.broadcast %36 : vector<256x1xi1> to vector<256x3xi1>
    %38 = vector.broadcast %cst_11 : f32 to vector<256x3xf32>
    %39 = arith.select %37, %30, %38 : vector<256x3xi1>, vector<256x3xf32>
    %c1_i32 = arith.constant 1 : i32
    %40 = tpu.dynamic_rotate %2 by %c1_i32 dim 0 : vector<256x3xf32>, i32 -> vector<256x3xf32>
    %cst_12 = arith.constant 5.000000e-01 : f32
    %41 = vector.broadcast %cst_12 : f32 to vector<256x1xf32>
    %42 = arith.cmpf ogt, %12, %41 : vector<256x1xf32>
    %cst_13 = arith.constant 0.000000e+00 : f32
    %43 = vector.shape_cast %42 : vector<256x1xi1> to vector<256x1xi1>
    %44 = vector.broadcast %43 : vector<256x1xi1> to vector<256x3xi1>
    %45 = vector.broadcast %cst_13 : f32 to vector<256x3xf32>
    %46 = arith.select %44, %40, %45 : vector<256x3xi1>, vector<256x3xf32>
    %c255_i32 = arith.constant 255 : i32
    %47 = tpu.dynamic_rotate %2 by %c255_i32 dim 0 : vector<256x3xf32>, i32 -> vector<256x3xf32>
    %cst_14 = arith.constant 1.450000e+01 : f32
    %48 = vector.broadcast %cst_14 : f32 to vector<256x1xf32>
    %49 = arith.cmpf olt, %12, %48 : vector<256x1xf32>
    %cst_15 = arith.constant 0.000000e+00 : f32
    %50 = vector.shape_cast %49 : vector<256x1xi1> to vector<256x1xi1>
    %51 = vector.broadcast %50 : vector<256x1xi1> to vector<256x3xi1>
    %52 = vector.broadcast %cst_15 : f32 to vector<256x3xf32>
    %53 = arith.select %51, %47, %52 : vector<256x3xi1>, vector<256x3xf32>
    %c241_i32 = arith.constant 241 : i32
    %54 = tpu.dynamic_rotate %2 by %c241_i32 dim 0 : vector<256x3xf32>, i32 -> vector<256x3xf32>
    %c240_i32 = arith.constant 240 : i32
    %55 = vector.broadcast %c240_i32 : i32 to vector<256x1xi32>
    %56 = arith.cmpi slt, %3, %55 : vector<256x1xi32>
    %cst_16 = arith.constant 5.000000e-01 : f32
    %57 = vector.broadcast %cst_16 : f32 to vector<256x1xf32>
    %58 = arith.cmpf ogt, %12, %57 : vector<256x1xf32>
    %59 = arith.andi %56, %58 : vector<256x1xi1>
    %cst_17 = arith.constant 0.000000e+00 : f32
    %60 = vector.shape_cast %59 : vector<256x1xi1> to vector<256x1xi1>
    %61 = vector.broadcast %60 : vector<256x1xi1> to vector<256x3xi1>
    %62 = vector.broadcast %cst_17 : f32 to vector<256x3xf32>
    %63 = arith.select %61, %54, %62 : vector<256x3xi1>, vector<256x3xf32>
    %c240_i32_18 = arith.constant 240 : i32
    %64 = tpu.dynamic_rotate %2 by %c240_i32_18 dim 0 : vector<256x3xf32>, i32 -> vector<256x3xf32>
    %c240_i32_19 = arith.constant 240 : i32
    %65 = vector.broadcast %c240_i32_19 : i32 to vector<256x1xi32>
    %66 = arith.cmpi slt, %3, %65 : vector<256x1xi32>
    %cst_20 = arith.constant 0.000000e+00 : f32
    %67 = vector.shape_cast %66 : vector<256x1xi1> to vector<256x1xi1>
    %68 = vector.broadcast %67 : vector<256x1xi1> to vector<256x3xi1>
    %69 = vector.broadcast %cst_20 : f32 to vector<256x3xf32>
    %70 = arith.select %68, %64, %69 : vector<256x3xi1>, vector<256x3xf32>
    %c239_i32 = arith.constant 239 : i32
    %71 = tpu.dynamic_rotate %2 by %c239_i32 dim 0 : vector<256x3xf32>, i32 -> vector<256x3xf32>
    %c240_i32_21 = arith.constant 240 : i32
    %72 = vector.broadcast %c240_i32_21 : i32 to vector<256x1xi32>
    %73 = arith.cmpi slt, %3, %72 : vector<256x1xi32>
    %cst_22 = arith.constant 1.450000e+01 : f32
    %74 = vector.broadcast %cst_22 : f32 to vector<256x1xf32>
    %75 = arith.cmpf olt, %12, %74 : vector<256x1xf32>
    %76 = arith.andi %73, %75 : vector<256x1xi1>
    %cst_23 = arith.constant 0.000000e+00 : f32
    %77 = vector.shape_cast %76 : vector<256x1xi1> to vector<256x1xi1>
    %78 = vector.broadcast %77 : vector<256x1xi1> to vector<256x3xi1>
    %79 = vector.broadcast %cst_23 : f32 to vector<256x3xf32>
    %80 = arith.select %78, %71, %79 : vector<256x3xi1>, vector<256x3xf32>
    %81 = tpu.concatenate %22, %29, %39, %46, %2, %53, %63, %70, %80 in 1 : vector<256x3xf32>, vector<256x3xf32>, vector<256x3xf32>, vector<256x3xf32>, vector<256x3xf32>, vector<256x3xf32>, vector<256x3xf32>, vector<256x3xf32>, vector<256x3xf32> -> vector<256x27xf32>
    %82 = arith.truncf %81 : vector<256x27xf32> to vector<256x27xbf16>
    %c0_24 = arith.constant 0 : index
    %c0_25 = arith.constant 0 : index
    %83 = vector.load %arg2[%c0_24, %c0_25] : memref<27x64xbf16, #tpu.memory_space<vmem>>, vector<27x64xbf16>
    %cst_26 = arith.constant dense<0.000000e+00> : vector<256x64xf32>
    %84 = tpu.matmul %82, %83, %cst_26 {dimension_numbers = #tpu.dot_dimension_numbers<[1], [0], [0], [1], [0, 0, 1, 1], [], []>} : vector<256x27xbf16>, vector<27x64xbf16>, vector<256x64xf32> -> vector<256x64xf32>
    %c0_27 = arith.constant 0 : index
    %c0_28 = arith.constant 0 : index
    %85 = vector.load %arg3[%c0_27, %c0_28] : memref<1x64xf32, #tpu.memory_space<vmem>>, vector<1x64xf32>
    %86 = vector.broadcast %85 : vector<1x64xf32> to vector<256x64xf32>
    %87 = arith.addf %84, %86 : vector<256x64xf32>
    %cst_29 = arith.constant 0.000000e+00 : f32
    %88 = vector.broadcast %cst_29 : f32 to vector<256x64xf32>
    %89 = arith.maximumf %87, %88 : vector<256x64xf32>
    %90 = arith.truncf %89 : vector<256x64xf32> to vector<256x64xbf16>
    %c0_30 = arith.constant 0 : index
    %c0_31 = arith.constant 0 : index
    %c0_32 = arith.constant 0 : index
    %91 = vector.load %arg4[%c0_30, %c0_31, %c0_32] : memref<1x256x64xbf16, #tpu.memory_space<vmem>>, vector<1x256x64xbf16>
    %92 = vector.shape_cast %91 : vector<1x256x64xbf16> to vector<256x64xbf16>
    %93 = vector.shape_cast %90 : vector<256x64xbf16> to vector<1x256x64xbf16>
    tpu.vector_store %arg4[%c0_30, %c0_31, %c0_32], %93 {strides = array<i32>} : memref<1x256x64xbf16, #tpu.memory_space<vmem>>, vector<1x256x64xbf16>,
    return
  }
  func.func @transform_0(%arg0: i32) -> (i32, i32, i32) {
    %c0_i32 = arith.constant 0 : i32
    %c0_i32_0 = arith.constant 0 : i32
    %c0_i32_1 = arith.constant 0 : i32
    return %arg0, %c0_i32, %c0_i32_0 : i32, i32, i32
  }
  func.func @transform_1(%arg0: i32) -> (i32, i32) {
    %c0_i32 = arith.constant 0 : i32
    %c0_i32_0 = arith.constant 0 : i32
    %c0_i32_1 = arith.constant 0 : i32
    return %c0_i32, %c0_i32_0 : i32, i32
  }
  func.func @transform_2(%arg0: i32) -> (i32, i32) {
    %c0_i32 = arith.constant 0 : i32
    %c0_i32_0 = arith.constant 0 : i32
    %c0_i32_1 = arith.constant 0 : i32
    return %c0_i32, %c0_i32_0 : i32, i32
  }
  func.func @transform_3(%arg0: i32) -> (i32, i32, i32) {
    %c0_i32 = arith.constant 0 : i32
    %c0_i32_0 = arith.constant 0 : i32
    %c0_i32_1 = arith.constant 0 : i32
    return %arg0, %c0_i32, %c0_i32_0 : i32, i32, i32
  }
}

module attributes {stable_mosaic.version = 11 : i64} {
  func.func @_conv3x3_kernel(%arg0: i32, %arg1: memref<1x256x64xbf16, #tpu.memory_space<vmem>>, %arg2: memref<576x64xbf16, #tpu.memory_space<vmem>>, %arg3: memref<1x64xf32, #tpu.memory_space<vmem>>, %arg4: memref<1x256x64xbf16, #tpu.memory_space<vmem>>) attributes {dimension_semantics = [#tpu.dimension_semantics<parallel>], iteration_bounds = array<i64: 4>, scalar_prefetch = 0 : i64, scratch_operands = 0 : i64, tpu.core_type = #tpu.core_type<tc>, window_params = [{transform_indices = @transform_0, window_bounds = array<i64: 1, 256, 64>}, {pipeline_mode = #tpu.pipeline_mode<synchronous>, transform_indices = @transform_1, window_bounds = array<i64: 576, 64>}, {pipeline_mode = #tpu.pipeline_mode<synchronous>, transform_indices = @transform_2, window_bounds = array<i64: 1, 64>}, {transform_indices = @transform_3, window_bounds = array<i64: 1, 256, 64>}]} {
    %c0 = arith.constant 0 : index
    %c0_0 = arith.constant 0 : index
    %c0_1 = arith.constant 0 : index
    %0 = vector.load %arg1[%c0, %c0_0, %c0_1] : memref<1x256x64xbf16, #tpu.memory_space<vmem>>, vector<1x256x64xbf16>
    %1 = vector.shape_cast %0 : vector<1x256x64xbf16> to vector<256x64xbf16>
    %2 = arith.extf %1 : vector<256x64xbf16> to vector<256x64xf32>
    %3 = tpu.iota {dimensions = array<i32: 0>} : vector<256x1xi32>
    %4 = arith.sitofp %3 : vector<256x1xi32> to vector<256x1xf32>
    %cst = arith.constant 5.000000e-01 : f32
    %5 = vector.broadcast %cst : f32 to vector<256x1xf32>
    %6 = arith.addf %4, %5 : vector<256x1xf32>
    %cst_2 = arith.constant 6.250000e-02 : f32
    %7 = vector.broadcast %cst_2 : f32 to vector<256x1xf32>
    %8 = arith.mulf %6, %7 : vector<256x1xf32>
    %9 = math.floor %8 : vector<256x1xf32>
    %cst_3 = arith.constant 1.600000e+01 : f32
    %10 = vector.broadcast %cst_3 : f32 to vector<256x1xf32>
    %11 = arith.mulf %10, %9 : vector<256x1xf32>
    %12 = arith.subf %4, %11 : vector<256x1xf32>
    %c17_i32 = arith.constant 17 : i32
    %13 = tpu.dynamic_rotate %2 by %c17_i32 dim 0 : vector<256x64xf32>, i32 -> vector<256x64xf32>
    %c16_i32 = arith.constant 16 : i32
    %14 = vector.broadcast %c16_i32 : i32 to vector<256x1xi32>
    %15 = arith.cmpi sge, %3, %14 : vector<256x1xi32>
    %cst_4 = arith.constant 5.000000e-01 : f32
    %16 = vector.broadcast %cst_4 : f32 to vector<256x1xf32>
    %17 = arith.cmpf ogt, %12, %16 : vector<256x1xf32>
    %18 = arith.andi %15, %17 : vector<256x1xi1>
    %cst_5 = arith.constant 0.000000e+00 : f32
    %19 = vector.shape_cast %18 : vector<256x1xi1> to vector<256x1xi1>
    %20 = vector.broadcast %19 : vector<256x1xi1> to vector<256x64xi1>
    %21 = vector.broadcast %cst_5 : f32 to vector<256x64xf32>
    %22 = arith.select %20, %13, %21 : vector<256x64xi1>, vector<256x64xf32>
    %c16_i32_6 = arith.constant 16 : i32
    %23 = tpu.dynamic_rotate %2 by %c16_i32_6 dim 0 : vector<256x64xf32>, i32 -> vector<256x64xf32>
    %c16_i32_7 = arith.constant 16 : i32
    %24 = vector.broadcast %c16_i32_7 : i32 to vector<256x1xi32>
    %25 = arith.cmpi sge, %3, %24 : vector<256x1xi32>
    %cst_8 = arith.constant 0.000000e+00 : f32
    %26 = vector.shape_cast %25 : vector<256x1xi1> to vector<256x1xi1>
    %27 = vector.broadcast %26 : vector<256x1xi1> to vector<256x64xi1>
    %28 = vector.broadcast %cst_8 : f32 to vector<256x64xf32>
    %29 = arith.select %27, %23, %28 : vector<256x64xi1>, vector<256x64xf32>
    %c15_i32 = arith.constant 15 : i32
    %30 = tpu.dynamic_rotate %2 by %c15_i32 dim 0 : vector<256x64xf32>, i32 -> vector<256x64xf32>
    %c16_i32_9 = arith.constant 16 : i32
    %31 = vector.broadcast %c16_i32_9 : i32 to vector<256x1xi32>
    %32 = arith.cmpi sge, %3, %31 : vector<256x1xi32>
    %cst_10 = arith.constant 1.450000e+01 : f32
    %33 = vector.broadcast %cst_10 : f32 to vector<256x1xf32>
    %34 = arith.cmpf olt, %12, %33 : vector<256x1xf32>
    %35 = arith.andi %32, %34 : vector<256x1xi1>
    %cst_11 = arith.constant 0.000000e+00 : f32
    %36 = vector.shape_cast %35 : vector<256x1xi1> to vector<256x1xi1>
    %37 = vector.broadcast %36 : vector<256x1xi1> to vector<256x64xi1>
    %38 = vector.broadcast %cst_11 : f32 to vector<256x64xf32>
    %39 = arith.select %37, %30, %38 : vector<256x64xi1>, vector<256x64xf32>
    %c1_i32 = arith.constant 1 : i32
    %40 = tpu.dynamic_rotate %2 by %c1_i32 dim 0 : vector<256x64xf32>, i32 -> vector<256x64xf32>
    %cst_12 = arith.constant 5.000000e-01 : f32
    %41 = vector.broadcast %cst_12 : f32 to vector<256x1xf32>
    %42 = arith.cmpf ogt, %12, %41 : vector<256x1xf32>
    %cst_13 = arith.constant 0.000000e+00 : f32
    %43 = vector.shape_cast %42 : vector<256x1xi1> to vector<256x1xi1>
    %44 = vector.broadcast %43 : vector<256x1xi1> to vector<256x64xi1>
    %45 = vector.broadcast %cst_13 : f32 to vector<256x64xf32>
    %46 = arith.select %44, %40, %45 : vector<256x64xi1>, vector<256x64xf32>
    %c255_i32 = arith.constant 255 : i32
    %47 = tpu.dynamic_rotate %2 by %c255_i32 dim 0 : vector<256x64xf32>, i32 -> vector<256x64xf32>
    %cst_14 = arith.constant 1.450000e+01 : f32
    %48 = vector.broadcast %cst_14 : f32 to vector<256x1xf32>
    %49 = arith.cmpf olt, %12, %48 : vector<256x1xf32>
    %cst_15 = arith.constant 0.000000e+00 : f32
    %50 = vector.shape_cast %49 : vector<256x1xi1> to vector<256x1xi1>
    %51 = vector.broadcast %50 : vector<256x1xi1> to vector<256x64xi1>
    %52 = vector.broadcast %cst_15 : f32 to vector<256x64xf32>
    %53 = arith.select %51, %47, %52 : vector<256x64xi1>, vector<256x64xf32>
    %c241_i32 = arith.constant 241 : i32
    %54 = tpu.dynamic_rotate %2 by %c241_i32 dim 0 : vector<256x64xf32>, i32 -> vector<256x64xf32>
    %c240_i32 = arith.constant 240 : i32
    %55 = vector.broadcast %c240_i32 : i32 to vector<256x1xi32>
    %56 = arith.cmpi slt, %3, %55 : vector<256x1xi32>
    %cst_16 = arith.constant 5.000000e-01 : f32
    %57 = vector.broadcast %cst_16 : f32 to vector<256x1xf32>
    %58 = arith.cmpf ogt, %12, %57 : vector<256x1xf32>
    %59 = arith.andi %56, %58 : vector<256x1xi1>
    %cst_17 = arith.constant 0.000000e+00 : f32
    %60 = vector.shape_cast %59 : vector<256x1xi1> to vector<256x1xi1>
    %61 = vector.broadcast %60 : vector<256x1xi1> to vector<256x64xi1>
    %62 = vector.broadcast %cst_17 : f32 to vector<256x64xf32>
    %63 = arith.select %61, %54, %62 : vector<256x64xi1>, vector<256x64xf32>
    %c240_i32_18 = arith.constant 240 : i32
    %64 = tpu.dynamic_rotate %2 by %c240_i32_18 dim 0 : vector<256x64xf32>, i32 -> vector<256x64xf32>
    %c240_i32_19 = arith.constant 240 : i32
    %65 = vector.broadcast %c240_i32_19 : i32 to vector<256x1xi32>
    %66 = arith.cmpi slt, %3, %65 : vector<256x1xi32>
    %cst_20 = arith.constant 0.000000e+00 : f32
    %67 = vector.shape_cast %66 : vector<256x1xi1> to vector<256x1xi1>
    %68 = vector.broadcast %67 : vector<256x1xi1> to vector<256x64xi1>
    %69 = vector.broadcast %cst_20 : f32 to vector<256x64xf32>
    %70 = arith.select %68, %64, %69 : vector<256x64xi1>, vector<256x64xf32>
    %c239_i32 = arith.constant 239 : i32
    %71 = tpu.dynamic_rotate %2 by %c239_i32 dim 0 : vector<256x64xf32>, i32 -> vector<256x64xf32>
    %c240_i32_21 = arith.constant 240 : i32
    %72 = vector.broadcast %c240_i32_21 : i32 to vector<256x1xi32>
    %73 = arith.cmpi slt, %3, %72 : vector<256x1xi32>
    %cst_22 = arith.constant 1.450000e+01 : f32
    %74 = vector.broadcast %cst_22 : f32 to vector<256x1xf32>
    %75 = arith.cmpf olt, %12, %74 : vector<256x1xf32>
    %76 = arith.andi %73, %75 : vector<256x1xi1>
    %cst_23 = arith.constant 0.000000e+00 : f32
    %77 = vector.shape_cast %76 : vector<256x1xi1> to vector<256x1xi1>
    %78 = vector.broadcast %77 : vector<256x1xi1> to vector<256x64xi1>
    %79 = vector.broadcast %cst_23 : f32 to vector<256x64xf32>
    %80 = arith.select %78, %71, %79 : vector<256x64xi1>, vector<256x64xf32>
    %81 = tpu.concatenate %22, %29, %39, %46, %2, %53, %63, %70, %80 in 1 : vector<256x64xf32>, vector<256x64xf32>, vector<256x64xf32>, vector<256x64xf32>, vector<256x64xf32>, vector<256x64xf32>, vector<256x64xf32>, vector<256x64xf32>, vector<256x64xf32> -> vector<256x576xf32>
    %82 = arith.truncf %81 : vector<256x576xf32> to vector<256x576xbf16>
    %c0_24 = arith.constant 0 : index
    %c0_25 = arith.constant 0 : index
    %83 = vector.load %arg2[%c0_24, %c0_25] : memref<576x64xbf16, #tpu.memory_space<vmem>>, vector<576x64xbf16>
    %cst_26 = arith.constant dense<0.000000e+00> : vector<256x64xf32>
    %84 = tpu.matmul %82, %83, %cst_26 {dimension_numbers = #tpu.dot_dimension_numbers<[1], [0], [0], [1], [0, 0, 1, 1], [], []>} : vector<256x576xbf16>, vector<576x64xbf16>, vector<256x64xf32> -> vector<256x64xf32>
    %c0_27 = arith.constant 0 : index
    %c0_28 = arith.constant 0 : index
    %85 = vector.load %arg3[%c0_27, %c0_28] : memref<1x64xf32, #tpu.memory_space<vmem>>, vector<1x64xf32>
    %86 = vector.broadcast %85 : vector<1x64xf32> to vector<256x64xf32>
    %87 = arith.addf %84, %86 : vector<256x64xf32>
    %88 = arith.truncf %87 : vector<256x64xf32> to vector<256x64xbf16>
    %c0_29 = arith.constant 0 : index
    %c0_30 = arith.constant 0 : index
    %c0_31 = arith.constant 0 : index
    %89 = vector.load %arg4[%c0_29, %c0_30, %c0_31] : memref<1x256x64xbf16, #tpu.memory_space<vmem>>, vector<1x256x64xbf16>
    %90 = vector.shape_cast %89 : vector<1x256x64xbf16> to vector<256x64xbf16>
    %91 = vector.shape_cast %88 : vector<256x64xbf16> to vector<1x256x64xbf16>
    tpu.vector_store %arg4[%c0_29, %c0_30, %c0_31], %91 {strides = array<i32>} : memref<1x256x64xbf16, #tpu.memory_space<vmem>>, vector<1x256x64xbf16>,
    return
  }
  func.func @transform_0(%arg0: i32) -> (i32, i32, i32) {
    %c0_i32 = arith.constant 0 : i32
    %c0_i32_0 = arith.constant 0 : i32
    %c0_i32_1 = arith.constant 0 : i32
    return %arg0, %c0_i32, %c0_i32_0 : i32, i32, i32
  }
  func.func @transform_1(%arg0: i32) -> (i32, i32) {
    %c0_i32 = arith.constant 0 : i32
    %c0_i32_0 = arith.constant 0 : i32
    %c0_i32_1 = arith.constant 0 : i32
    return %c0_i32, %c0_i32_0 : i32, i32
  }
  func.func @transform_2(%arg0: i32) -> (i32, i32) {
    %c0_i32 = arith.constant 0 : i32
    %c0_i32_0 = arith.constant 0 : i32
    %c0_i32_1 = arith.constant 0 : i32
    return %c0_i32, %c0_i32_0 : i32, i32
  }
  func.func @transform_3(%arg0: i32) -> (i32, i32, i32) {
    %c0_i32 = arith.constant 0 : i32
    %c0_i32_0 = arith.constant 0 : i32
    %c0_i32_1 = arith.constant 0 : i32
    return %arg0, %c0_i32, %c0_i32_0 : i32, i32, i32
  }
}

module attributes {stable_mosaic.version = 11 : i64} {
  func.func @_conv3x3_kernel(%arg0: i32, %arg1: memref<1x64x64xbf16, #tpu.memory_space<vmem>>, %arg2: memref<576x128xbf16, #tpu.memory_space<vmem>>, %arg3: memref<1x128xf32, #tpu.memory_space<vmem>>, %arg4: memref<1x64x128xbf16, #tpu.memory_space<vmem>>) attributes {dimension_semantics = [#tpu.dimension_semantics<parallel>], iteration_bounds = array<i64: 4>, scalar_prefetch = 0 : i64, scratch_operands = 0 : i64, tpu.core_type = #tpu.core_type<tc>, window_params = [{transform_indices = @transform_0, window_bounds = array<i64: 1, 64, 64>}, {pipeline_mode = #tpu.pipeline_mode<synchronous>, transform_indices = @transform_1, window_bounds = array<i64: 576, 128>}, {pipeline_mode = #tpu.pipeline_mode<synchronous>, transform_indices = @transform_2, window_bounds = array<i64: 1, 128>}, {transform_indices = @transform_3, window_bounds = array<i64: 1, 64, 128>}]} {
    %c0 = arith.constant 0 : index
    %c0_0 = arith.constant 0 : index
    %c0_1 = arith.constant 0 : index
    %0 = vector.load %arg1[%c0, %c0_0, %c0_1] : memref<1x64x64xbf16, #tpu.memory_space<vmem>>, vector<1x64x64xbf16>
    %1 = vector.shape_cast %0 : vector<1x64x64xbf16> to vector<64x64xbf16>
    %2 = arith.extf %1 : vector<64x64xbf16> to vector<64x64xf32>
    %3 = tpu.iota {dimensions = array<i32: 0>} : vector<64x1xi32>
    %4 = arith.sitofp %3 : vector<64x1xi32> to vector<64x1xf32>
    %cst = arith.constant 5.000000e-01 : f32
    %5 = vector.broadcast %cst : f32 to vector<64x1xf32>
    %6 = arith.addf %4, %5 : vector<64x1xf32>
    %cst_2 = arith.constant 1.250000e-01 : f32
    %7 = vector.broadcast %cst_2 : f32 to vector<64x1xf32>
    %8 = arith.mulf %6, %7 : vector<64x1xf32>
    %9 = math.floor %8 : vector<64x1xf32>
    %cst_3 = arith.constant 8.000000e+00 : f32
    %10 = vector.broadcast %cst_3 : f32 to vector<64x1xf32>
    %11 = arith.mulf %10, %9 : vector<64x1xf32>
    %12 = arith.subf %4, %11 : vector<64x1xf32>
    %c9_i32 = arith.constant 9 : i32
    %13 = tpu.dynamic_rotate %2 by %c9_i32 dim 0 : vector<64x64xf32>, i32 -> vector<64x64xf32>
    %c8_i32 = arith.constant 8 : i32
    %14 = vector.broadcast %c8_i32 : i32 to vector<64x1xi32>
    %15 = arith.cmpi sge, %3, %14 : vector<64x1xi32>
    %cst_4 = arith.constant 5.000000e-01 : f32
    %16 = vector.broadcast %cst_4 : f32 to vector<64x1xf32>
    %17 = arith.cmpf ogt, %12, %16 : vector<64x1xf32>
    %18 = arith.andi %15, %17 : vector<64x1xi1>
    %cst_5 = arith.constant 0.000000e+00 : f32
    %19 = vector.shape_cast %18 : vector<64x1xi1> to vector<64x1xi1>
    %20 = vector.broadcast %19 : vector<64x1xi1> to vector<64x64xi1>
    %21 = vector.broadcast %cst_5 : f32 to vector<64x64xf32>
    %22 = arith.select %20, %13, %21 : vector<64x64xi1>, vector<64x64xf32>
    %c8_i32_6 = arith.constant 8 : i32
    %23 = tpu.dynamic_rotate %2 by %c8_i32_6 dim 0 : vector<64x64xf32>, i32 -> vector<64x64xf32>
    %c8_i32_7 = arith.constant 8 : i32
    %24 = vector.broadcast %c8_i32_7 : i32 to vector<64x1xi32>
    %25 = arith.cmpi sge, %3, %24 : vector<64x1xi32>
    %cst_8 = arith.constant 0.000000e+00 : f32
    %26 = vector.shape_cast %25 : vector<64x1xi1> to vector<64x1xi1>
    %27 = vector.broadcast %26 : vector<64x1xi1> to vector<64x64xi1>
    %28 = vector.broadcast %cst_8 : f32 to vector<64x64xf32>
    %29 = arith.select %27, %23, %28 : vector<64x64xi1>, vector<64x64xf32>
    %c7_i32 = arith.constant 7 : i32
    %30 = tpu.dynamic_rotate %2 by %c7_i32 dim 0 : vector<64x64xf32>, i32 -> vector<64x64xf32>
    %c8_i32_9 = arith.constant 8 : i32
    %31 = vector.broadcast %c8_i32_9 : i32 to vector<64x1xi32>
    %32 = arith.cmpi sge, %3, %31 : vector<64x1xi32>
    %cst_10 = arith.constant 6.500000e+00 : f32
    %33 = vector.broadcast %cst_10 : f32 to vector<64x1xf32>
    %34 = arith.cmpf olt, %12, %33 : vector<64x1xf32>
    %35 = arith.andi %32, %34 : vector<64x1xi1>
    %cst_11 = arith.constant 0.000000e+00 : f32
    %36 = vector.shape_cast %35 : vector<64x1xi1> to vector<64x1xi1>
    %37 = vector.broadcast %36 : vector<64x1xi1> to vector<64x64xi1>
    %38 = vector.broadcast %cst_11 : f32 to vector<64x64xf32>
    %39 = arith.select %37, %30, %38 : vector<64x64xi1>, vector<64x64xf32>
    %c1_i32 = arith.constant 1 : i32
    %40 = tpu.dynamic_rotate %2 by %c1_i32 dim 0 : vector<64x64xf32>, i32 -> vector<64x64xf32>
    %cst_12 = arith.constant 5.000000e-01 : f32
    %41 = vector.broadcast %cst_12 : f32 to vector<64x1xf32>
    %42 = arith.cmpf ogt, %12, %41 : vector<64x1xf32>
    %cst_13 = arith.constant 0.000000e+00 : f32
    %43 = vector.shape_cast %42 : vector<64x1xi1> to vector<64x1xi1>
    %44 = vector.broadcast %43 : vector<64x1xi1> to vector<64x64xi1>
    %45 = vector.broadcast %cst_13 : f32 to vector<64x64xf32>
    %46 = arith.select %44, %40, %45 : vector<64x64xi1>, vector<64x64xf32>
    %c63_i32 = arith.constant 63 : i32
    %47 = tpu.dynamic_rotate %2 by %c63_i32 dim 0 : vector<64x64xf32>, i32 -> vector<64x64xf32>
    %cst_14 = arith.constant 6.500000e+00 : f32
    %48 = vector.broadcast %cst_14 : f32 to vector<64x1xf32>
    %49 = arith.cmpf olt, %12, %48 : vector<64x1xf32>
    %cst_15 = arith.constant 0.000000e+00 : f32
    %50 = vector.shape_cast %49 : vector<64x1xi1> to vector<64x1xi1>
    %51 = vector.broadcast %50 : vector<64x1xi1> to vector<64x64xi1>
    %52 = vector.broadcast %cst_15 : f32 to vector<64x64xf32>
    %53 = arith.select %51, %47, %52 : vector<64x64xi1>, vector<64x64xf32>
    %c57_i32 = arith.constant 57 : i32
    %54 = tpu.dynamic_rotate %2 by %c57_i32 dim 0 : vector<64x64xf32>, i32 -> vector<64x64xf32>
    %c56_i32 = arith.constant 56 : i32
    %55 = vector.broadcast %c56_i32 : i32 to vector<64x1xi32>
    %56 = arith.cmpi slt, %3, %55 : vector<64x1xi32>
    %cst_16 = arith.constant 5.000000e-01 : f32
    %57 = vector.broadcast %cst_16 : f32 to vector<64x1xf32>
    %58 = arith.cmpf ogt, %12, %57 : vector<64x1xf32>
    %59 = arith.andi %56, %58 : vector<64x1xi1>
    %cst_17 = arith.constant 0.000000e+00 : f32
    %60 = vector.shape_cast %59 : vector<64x1xi1> to vector<64x1xi1>
    %61 = vector.broadcast %60 : vector<64x1xi1> to vector<64x64xi1>
    %62 = vector.broadcast %cst_17 : f32 to vector<64x64xf32>
    %63 = arith.select %61, %54, %62 : vector<64x64xi1>, vector<64x64xf32>
    %c56_i32_18 = arith.constant 56 : i32
    %64 = tpu.dynamic_rotate %2 by %c56_i32_18 dim 0 : vector<64x64xf32>, i32 -> vector<64x64xf32>
    %c56_i32_19 = arith.constant 56 : i32
    %65 = vector.broadcast %c56_i32_19 : i32 to vector<64x1xi32>
    %66 = arith.cmpi slt, %3, %65 : vector<64x1xi32>
    %cst_20 = arith.constant 0.000000e+00 : f32
    %67 = vector.shape_cast %66 : vector<64x1xi1> to vector<64x1xi1>
    %68 = vector.broadcast %67 : vector<64x1xi1> to vector<64x64xi1>
    %69 = vector.broadcast %cst_20 : f32 to vector<64x64xf32>
    %70 = arith.select %68, %64, %69 : vector<64x64xi1>, vector<64x64xf32>
    %c55_i32 = arith.constant 55 : i32
    %71 = tpu.dynamic_rotate %2 by %c55_i32 dim 0 : vector<64x64xf32>, i32 -> vector<64x64xf32>
    %c56_i32_21 = arith.constant 56 : i32
    %72 = vector.broadcast %c56_i32_21 : i32 to vector<64x1xi32>
    %73 = arith.cmpi slt, %3, %72 : vector<64x1xi32>
    %cst_22 = arith.constant 6.500000e+00 : f32
    %74 = vector.broadcast %cst_22 : f32 to vector<64x1xf32>
    %75 = arith.cmpf olt, %12, %74 : vector<64x1xf32>
    %76 = arith.andi %73, %75 : vector<64x1xi1>
    %cst_23 = arith.constant 0.000000e+00 : f32
    %77 = vector.shape_cast %76 : vector<64x1xi1> to vector<64x1xi1>
    %78 = vector.broadcast %77 : vector<64x1xi1> to vector<64x64xi1>
    %79 = vector.broadcast %cst_23 : f32 to vector<64x64xf32>
    %80 = arith.select %78, %71, %79 : vector<64x64xi1>, vector<64x64xf32>
    %81 = tpu.concatenate %22, %29, %39, %46, %2, %53, %63, %70, %80 in 1 : vector<64x64xf32>, vector<64x64xf32>, vector<64x64xf32>, vector<64x64xf32>, vector<64x64xf32>, vector<64x64xf32>, vector<64x64xf32>, vector<64x64xf32>, vector<64x64xf32> -> vector<64x576xf32>
    %82 = arith.truncf %81 : vector<64x576xf32> to vector<64x576xbf16>
    %c0_24 = arith.constant 0 : index
    %c0_25 = arith.constant 0 : index
    %83 = vector.load %arg2[%c0_24, %c0_25] : memref<576x128xbf16, #tpu.memory_space<vmem>>, vector<576x128xbf16>
    %cst_26 = arith.constant dense<0.000000e+00> : vector<64x128xf32>
    %84 = tpu.matmul %82, %83, %cst_26 {dimension_numbers = #tpu.dot_dimension_numbers<[1], [0], [0], [1], [0, 0, 1, 1], [], []>} : vector<64x576xbf16>, vector<576x128xbf16>, vector<64x128xf32> -> vector<64x128xf32>
    %c0_27 = arith.constant 0 : index
    %c0_28 = arith.constant 0 : index
    %85 = vector.load %arg3[%c0_27, %c0_28] : memref<1x128xf32, #tpu.memory_space<vmem>>, vector<1x128xf32>
    %86 = vector.broadcast %85 : vector<1x128xf32> to vector<64x128xf32>
    %87 = arith.addf %84, %86 : vector<64x128xf32>
    %cst_29 = arith.constant 0.000000e+00 : f32
    %88 = vector.broadcast %cst_29 : f32 to vector<64x128xf32>
    %89 = arith.maximumf %87, %88 : vector<64x128xf32>
    %90 = arith.truncf %89 : vector<64x128xf32> to vector<64x128xbf16>
    %c0_30 = arith.constant 0 : index
    %c0_31 = arith.constant 0 : index
    %c0_32 = arith.constant 0 : index
    %91 = vector.load %arg4[%c0_30, %c0_31, %c0_32] : memref<1x64x128xbf16, #tpu.memory_space<vmem>>, vector<1x64x128xbf16>
    %92 = vector.shape_cast %91 : vector<1x64x128xbf16> to vector<64x128xbf16>
    %93 = vector.shape_cast %90 : vector<64x128xbf16> to vector<1x64x128xbf16>
    tpu.vector_store %arg4[%c0_30, %c0_31, %c0_32], %93 {strides = array<i32>} : memref<1x64x128xbf16, #tpu.memory_space<vmem>>, vector<1x64x128xbf16>,
    return
  }
  func.func @transform_0(%arg0: i32) -> (i32, i32, i32) {
    %c0_i32 = arith.constant 0 : i32
    %c0_i32_0 = arith.constant 0 : i32
    %c0_i32_1 = arith.constant 0 : i32
    return %arg0, %c0_i32, %c0_i32_0 : i32, i32, i32
  }
  func.func @transform_1(%arg0: i32) -> (i32, i32) {
    %c0_i32 = arith.constant 0 : i32
    %c0_i32_0 = arith.constant 0 : i32
    %c0_i32_1 = arith.constant 0 : i32
    return %c0_i32, %c0_i32_0 : i32, i32
  }
  func.func @transform_2(%arg0: i32) -> (i32, i32) {
    %c0_i32 = arith.constant 0 : i32
    %c0_i32_0 = arith.constant 0 : i32
    %c0_i32_1 = arith.constant 0 : i32
    return %c0_i32, %c0_i32_0 : i32, i32
  }
  func.func @transform_3(%arg0: i32) -> (i32, i32, i32) {
    %c0_i32 = arith.constant 0 : i32
    %c0_i32_0 = arith.constant 0 : i32
    %c0_i32_1 = arith.constant 0 : i32
    return %arg0, %c0_i32, %c0_i32_0 : i32, i32, i32
  }
}

module attributes {stable_mosaic.version = 11 : i64} {
  func.func @_conv3x3_kernel(%arg0: i32, %arg1: memref<1x64x128xbf16, #tpu.memory_space<vmem>>, %arg2: memref<1152x128xbf16, #tpu.memory_space<vmem>>, %arg3: memref<1x128xf32, #tpu.memory_space<vmem>>, %arg4: memref<1x64x128xbf16, #tpu.memory_space<vmem>>) attributes {dimension_semantics = [#tpu.dimension_semantics<parallel>], iteration_bounds = array<i64: 4>, scalar_prefetch = 0 : i64, scratch_operands = 0 : i64, tpu.core_type = #tpu.core_type<tc>, window_params = [{transform_indices = @transform_0, window_bounds = array<i64: 1, 64, 128>}, {pipeline_mode = #tpu.pipeline_mode<synchronous>, transform_indices = @transform_1, window_bounds = array<i64: 1152, 128>}, {pipeline_mode = #tpu.pipeline_mode<synchronous>, transform_indices = @transform_2, window_bounds = array<i64: 1, 128>}, {transform_indices = @transform_3, window_bounds = array<i64: 1, 64, 128>}]} {
    %c0 = arith.constant 0 : index
    %c0_0 = arith.constant 0 : index
    %c0_1 = arith.constant 0 : index
    %0 = vector.load %arg1[%c0, %c0_0, %c0_1] : memref<1x64x128xbf16, #tpu.memory_space<vmem>>, vector<1x64x128xbf16>
    %1 = vector.shape_cast %0 : vector<1x64x128xbf16> to vector<64x128xbf16>
    %2 = arith.extf %1 : vector<64x128xbf16> to vector<64x128xf32>
    %3 = tpu.iota {dimensions = array<i32: 0>} : vector<64x1xi32>
    %4 = arith.sitofp %3 : vector<64x1xi32> to vector<64x1xf32>
    %cst = arith.constant 5.000000e-01 : f32
    %5 = vector.broadcast %cst : f32 to vector<64x1xf32>
    %6 = arith.addf %4, %5 : vector<64x1xf32>
    %cst_2 = arith.constant 1.250000e-01 : f32
    %7 = vector.broadcast %cst_2 : f32 to vector<64x1xf32>
    %8 = arith.mulf %6, %7 : vector<64x1xf32>
    %9 = math.floor %8 : vector<64x1xf32>
    %cst_3 = arith.constant 8.000000e+00 : f32
    %10 = vector.broadcast %cst_3 : f32 to vector<64x1xf32>
    %11 = arith.mulf %10, %9 : vector<64x1xf32>
    %12 = arith.subf %4, %11 : vector<64x1xf32>
    %c9_i32 = arith.constant 9 : i32
    %13 = tpu.dynamic_rotate %2 by %c9_i32 dim 0 : vector<64x128xf32>, i32 -> vector<64x128xf32>
    %c8_i32 = arith.constant 8 : i32
    %14 = vector.broadcast %c8_i32 : i32 to vector<64x1xi32>
    %15 = arith.cmpi sge, %3, %14 : vector<64x1xi32>
    %cst_4 = arith.constant 5.000000e-01 : f32
    %16 = vector.broadcast %cst_4 : f32 to vector<64x1xf32>
    %17 = arith.cmpf ogt, %12, %16 : vector<64x1xf32>
    %18 = arith.andi %15, %17 : vector<64x1xi1>
    %cst_5 = arith.constant 0.000000e+00 : f32
    %19 = vector.shape_cast %18 : vector<64x1xi1> to vector<64x1xi1>
    %20 = vector.broadcast %19 : vector<64x1xi1> to vector<64x128xi1>
    %21 = vector.broadcast %cst_5 : f32 to vector<64x128xf32>
    %22 = arith.select %20, %13, %21 : vector<64x128xi1>, vector<64x128xf32>
    %c8_i32_6 = arith.constant 8 : i32
    %23 = tpu.dynamic_rotate %2 by %c8_i32_6 dim 0 : vector<64x128xf32>, i32 -> vector<64x128xf32>
    %c8_i32_7 = arith.constant 8 : i32
    %24 = vector.broadcast %c8_i32_7 : i32 to vector<64x1xi32>
    %25 = arith.cmpi sge, %3, %24 : vector<64x1xi32>
    %cst_8 = arith.constant 0.000000e+00 : f32
    %26 = vector.shape_cast %25 : vector<64x1xi1> to vector<64x1xi1>
    %27 = vector.broadcast %26 : vector<64x1xi1> to vector<64x128xi1>
    %28 = vector.broadcast %cst_8 : f32 to vector<64x128xf32>
    %29 = arith.select %27, %23, %28 : vector<64x128xi1>, vector<64x128xf32>
    %c7_i32 = arith.constant 7 : i32
    %30 = tpu.dynamic_rotate %2 by %c7_i32 dim 0 : vector<64x128xf32>, i32 -> vector<64x128xf32>
    %c8_i32_9 = arith.constant 8 : i32
    %31 = vector.broadcast %c8_i32_9 : i32 to vector<64x1xi32>
    %32 = arith.cmpi sge, %3, %31 : vector<64x1xi32>
    %cst_10 = arith.constant 6.500000e+00 : f32
    %33 = vector.broadcast %cst_10 : f32 to vector<64x1xf32>
    %34 = arith.cmpf olt, %12, %33 : vector<64x1xf32>
    %35 = arith.andi %32, %34 : vector<64x1xi1>
    %cst_11 = arith.constant 0.000000e+00 : f32
    %36 = vector.shape_cast %35 : vector<64x1xi1> to vector<64x1xi1>
    %37 = vector.broadcast %36 : vector<64x1xi1> to vector<64x128xi1>
    %38 = vector.broadcast %cst_11 : f32 to vector<64x128xf32>
    %39 = arith.select %37, %30, %38 : vector<64x128xi1>, vector<64x128xf32>
    %c1_i32 = arith.constant 1 : i32
    %40 = tpu.dynamic_rotate %2 by %c1_i32 dim 0 : vector<64x128xf32>, i32 -> vector<64x128xf32>
    %cst_12 = arith.constant 5.000000e-01 : f32
    %41 = vector.broadcast %cst_12 : f32 to vector<64x1xf32>
    %42 = arith.cmpf ogt, %12, %41 : vector<64x1xf32>
    %cst_13 = arith.constant 0.000000e+00 : f32
    %43 = vector.shape_cast %42 : vector<64x1xi1> to vector<64x1xi1>
    %44 = vector.broadcast %43 : vector<64x1xi1> to vector<64x128xi1>
    %45 = vector.broadcast %cst_13 : f32 to vector<64x128xf32>
    %46 = arith.select %44, %40, %45 : vector<64x128xi1>, vector<64x128xf32>
    %c63_i32 = arith.constant 63 : i32
    %47 = tpu.dynamic_rotate %2 by %c63_i32 dim 0 : vector<64x128xf32>, i32 -> vector<64x128xf32>
    %cst_14 = arith.constant 6.500000e+00 : f32
    %48 = vector.broadcast %cst_14 : f32 to vector<64x1xf32>
    %49 = arith.cmpf olt, %12, %48 : vector<64x1xf32>
    %cst_15 = arith.constant 0.000000e+00 : f32
    %50 = vector.shape_cast %49 : vector<64x1xi1> to vector<64x1xi1>
    %51 = vector.broadcast %50 : vector<64x1xi1> to vector<64x128xi1>
    %52 = vector.broadcast %cst_15 : f32 to vector<64x128xf32>
    %53 = arith.select %51, %47, %52 : vector<64x128xi1>, vector<64x128xf32>
    %c57_i32 = arith.constant 57 : i32
    %54 = tpu.dynamic_rotate %2 by %c57_i32 dim 0 : vector<64x128xf32>, i32 -> vector<64x128xf32>
    %c56_i32 = arith.constant 56 : i32
    %55 = vector.broadcast %c56_i32 : i32 to vector<64x1xi32>
    %56 = arith.cmpi slt, %3, %55 : vector<64x1xi32>
    %cst_16 = arith.constant 5.000000e-01 : f32
    %57 = vector.broadcast %cst_16 : f32 to vector<64x1xf32>
    %58 = arith.cmpf ogt, %12, %57 : vector<64x1xf32>
    %59 = arith.andi %56, %58 : vector<64x1xi1>
    %cst_17 = arith.constant 0.000000e+00 : f32
    %60 = vector.shape_cast %59 : vector<64x1xi1> to vector<64x1xi1>
    %61 = vector.broadcast %60 : vector<64x1xi1> to vector<64x128xi1>
    %62 = vector.broadcast %cst_17 : f32 to vector<64x128xf32>
    %63 = arith.select %61, %54, %62 : vector<64x128xi1>, vector<64x128xf32>
    %c56_i32_18 = arith.constant 56 : i32
    %64 = tpu.dynamic_rotate %2 by %c56_i32_18 dim 0 : vector<64x128xf32>, i32 -> vector<64x128xf32>
    %c56_i32_19 = arith.constant 56 : i32
    %65 = vector.broadcast %c56_i32_19 : i32 to vector<64x1xi32>
    %66 = arith.cmpi slt, %3, %65 : vector<64x1xi32>
    %cst_20 = arith.constant 0.000000e+00 : f32
    %67 = vector.shape_cast %66 : vector<64x1xi1> to vector<64x1xi1>
    %68 = vector.broadcast %67 : vector<64x1xi1> to vector<64x128xi1>
    %69 = vector.broadcast %cst_20 : f32 to vector<64x128xf32>
    %70 = arith.select %68, %64, %69 : vector<64x128xi1>, vector<64x128xf32>
    %c55_i32 = arith.constant 55 : i32
    %71 = tpu.dynamic_rotate %2 by %c55_i32 dim 0 : vector<64x128xf32>, i32 -> vector<64x128xf32>
    %c56_i32_21 = arith.constant 56 : i32
    %72 = vector.broadcast %c56_i32_21 : i32 to vector<64x1xi32>
    %73 = arith.cmpi slt, %3, %72 : vector<64x1xi32>
    %cst_22 = arith.constant 6.500000e+00 : f32
    %74 = vector.broadcast %cst_22 : f32 to vector<64x1xf32>
    %75 = arith.cmpf olt, %12, %74 : vector<64x1xf32>
    %76 = arith.andi %73, %75 : vector<64x1xi1>
    %cst_23 = arith.constant 0.000000e+00 : f32
    %77 = vector.shape_cast %76 : vector<64x1xi1> to vector<64x1xi1>
    %78 = vector.broadcast %77 : vector<64x1xi1> to vector<64x128xi1>
    %79 = vector.broadcast %cst_23 : f32 to vector<64x128xf32>
    %80 = arith.select %78, %71, %79 : vector<64x128xi1>, vector<64x128xf32>
    %81 = tpu.concatenate %22, %29, %39, %46, %2, %53, %63, %70, %80 in 1 : vector<64x128xf32>, vector<64x128xf32>, vector<64x128xf32>, vector<64x128xf32>, vector<64x128xf32>, vector<64x128xf32>, vector<64x128xf32>, vector<64x128xf32>, vector<64x128xf32> -> vector<64x1152xf32>
    %82 = arith.truncf %81 : vector<64x1152xf32> to vector<64x1152xbf16>
    %c0_24 = arith.constant 0 : index
    %c0_25 = arith.constant 0 : index
    %83 = vector.load %arg2[%c0_24, %c0_25] : memref<1152x128xbf16, #tpu.memory_space<vmem>>, vector<1152x128xbf16>
    %cst_26 = arith.constant dense<0.000000e+00> : vector<64x128xf32>
    %84 = tpu.matmul %82, %83, %cst_26 {dimension_numbers = #tpu.dot_dimension_numbers<[1], [0], [0], [1], [0, 0, 1, 1], [], []>} : vector<64x1152xbf16>, vector<1152x128xbf16>, vector<64x128xf32> -> vector<64x128xf32>
    %c0_27 = arith.constant 0 : index
    %c0_28 = arith.constant 0 : index
    %85 = vector.load %arg3[%c0_27, %c0_28] : memref<1x128xf32, #tpu.memory_space<vmem>>, vector<1x128xf32>
    %86 = vector.broadcast %85 : vector<1x128xf32> to vector<64x128xf32>
    %87 = arith.addf %84, %86 : vector<64x128xf32>
    %88 = arith.truncf %87 : vector<64x128xf32> to vector<64x128xbf16>
    %c0_29 = arith.constant 0 : index
    %c0_30 = arith.constant 0 : index
    %c0_31 = arith.constant 0 : index
    %89 = vector.load %arg4[%c0_29, %c0_30, %c0_31] : memref<1x64x128xbf16, #tpu.memory_space<vmem>>, vector<1x64x128xbf16>
    %90 = vector.shape_cast %89 : vector<1x64x128xbf16> to vector<64x128xbf16>
    %91 = vector.shape_cast %88 : vector<64x128xbf16> to vector<1x64x128xbf16>
    tpu.vector_store %arg4[%c0_29, %c0_30, %c0_31], %91 {strides = array<i32>} : memref<1x64x128xbf16, #tpu.memory_space<vmem>>, vector<1x64x128xbf16>,
    return
  }
  func.func @transform_0(%arg0: i32) -> (i32, i32, i32) {
    %c0_i32 = arith.constant 0 : i32
    %c0_i32_0 = arith.constant 0 : i32
    %c0_i32_1 = arith.constant 0 : i32
    return %arg0, %c0_i32, %c0_i32_0 : i32, i32, i32
  }
  func.func @transform_1(%arg0: i32) -> (i32, i32) {
    %c0_i32 = arith.constant 0 : i32
    %c0_i32_0 = arith.constant 0 : i32
    %c0_i32_1 = arith.constant 0 : i32
    return %c0_i32, %c0_i32_0 : i32, i32
  }
  func.func @transform_2(%arg0: i32) -> (i32, i32) {
    %c0_i32 = arith.constant 0 : i32
    %c0_i32_0 = arith.constant 0 : i32
    %c0_i32_1 = arith.constant 0 : i32
    return %c0_i32, %c0_i32_0 : i32, i32
  }
  func.func @transform_3(%arg0: i32) -> (i32, i32, i32) {
    %c0_i32 = arith.constant 0 : i32
    %c0_i32_0 = arith.constant 0 : i32
    %c0_i32_1 = arith.constant 0 : i32
    return %arg0, %c0_i32, %c0_i32_0 : i32, i32, i32
  }
}

module attributes {stable_mosaic.version = 11 : i64} {
  func.func @_l1_partial_kernel(%arg0: i32, %arg1: i32, %arg2: memref<1x64x128xbf16, #tpu.memory_space<vmem>>, %arg3: memref<1x64x128xbf16, #tpu.memory_space<vmem>>, %arg4: memref<1x8x128xf32, #tpu.memory_space<vmem>>) attributes {dimension_semantics = [#tpu.dimension_semantics<parallel>, #tpu.dimension_semantics<arbitrary>], iteration_bounds = array<i64: 2, 1>, scalar_prefetch = 0 : i64, scratch_operands = 0 : i64, tpu.core_type = #tpu.core_type<tc>, window_params = [{transform_indices = @transform_0, window_bounds = array<i64: 1, 64, 128>}, {transform_indices = @transform_1, window_bounds = array<i64: 1, 64, 128>}, {transform_indices = @transform_2, window_bounds = array<i64: 1, 8, 128>}]} {
    %c0_i32 = arith.constant 0 : i32
    %0 = arith.cmpi eq, %arg1, %c0_i32 : i32
    %1 = arith.extui %0 : i1 to i32
    %c0_i32_0 = arith.constant 0 : i32
    %2 = arith.cmpi ne, %1, %c0_i32_0 : i32
    scf.if %2 {
      %cst_12 = arith.constant 0.000000e+00 : f32
      %19 = vector.broadcast %cst_12 : f32 to vector<1x8x128xf32>
      %c0_13 = arith.constant 0 : index
      %c0_14 = arith.constant 0 : index
      %c0_15 = arith.constant 0 : index
      %20 = vector.load %arg4[%c0_13, %c0_14, %c0_15] : memref<1x8x128xf32, #tpu.memory_space<vmem>>, vector<1x8x128xf32>
      tpu.vector_store %arg4[%c0_13, %c0_14, %c0_15], %19 {strides = array<i32>} : memref<1x8x128xf32, #tpu.memory_space<vmem>>, vector<1x8x128xf32>,
    } else {
    }
    %c0 = arith.constant 0 : index
    %c0_1 = arith.constant 0 : index
    %c0_2 = arith.constant 0 : index
    %3 = vector.load %arg2[%c0, %c0_1, %c0_2] : memref<1x64x128xbf16, #tpu.memory_space<vmem>>, vector<1x64x128xbf16>
    %4 = vector.shape_cast %3 : vector<1x64x128xbf16> to vector<64x128xbf16>
    %5 = arith.extf %4 : vector<64x128xbf16> to vector<64x128xf32>
    %c0_3 = arith.constant 0 : index
    %c0_4 = arith.constant 0 : index
    %c0_5 = arith.constant 0 : index
    %6 = vector.load %arg3[%c0_3, %c0_4, %c0_5] : memref<1x64x128xbf16, #tpu.memory_space<vmem>>, vector<1x64x128xbf16>
    %7 = vector.shape_cast %6 : vector<1x64x128xbf16> to vector<64x128xbf16>
    %8 = arith.extf %7 : vector<64x128xbf16> to vector<64x128xf32>
    %9 = arith.subf %5, %8 : vector<64x128xf32>
    %c0_6 = arith.constant 0 : index
    %c0_7 = arith.constant 0 : index
    %c0_8 = arith.constant 0 : index
    %10 = vector.load %arg4[%c0_6, %c0_7, %c0_8] : memref<1x8x128xf32, #tpu.memory_space<vmem>>, vector<1x8x128xf32>
    %11 = vector.shape_cast %10 : vector<1x8x128xf32> to vector<8x128xf32>
    %12 = math.absf %9 : vector<64x128xf32>
    %13 = vector.shape_cast %12 : vector<64x128xf32> to vector<8x8x128xf32>
    %cst = arith.constant dense<0.000000e+00> : vector<8x128xf32>
    %14 = vector.multi_reduction <add>, %13, %cst [0] : vector<8x8x128xf32> to vector<8x128xf32>
    %15 = arith.addf %11, %14 : vector<8x128xf32>
    %c0_9 = arith.constant 0 : index
    %c0_10 = arith.constant 0 : index
    %c0_11 = arith.constant 0 : index
    %16 = vector.load %arg4[%c0_9, %c0_10, %c0_11] : memref<1x8x128xf32, #tpu.memory_space<vmem>>, vector<1x8x128xf32>
    %17 = vector.shape_cast %16 : vector<1x8x128xf32> to vector<8x128xf32>
    %18 = vector.shape_cast %15 : vector<8x128xf32> to vector<1x8x128xf32>
    tpu.vector_store %arg4[%c0_9, %c0_10, %c0_11], %18 {strides = array<i32>} : memref<1x8x128xf32, #tpu.memory_space<vmem>>, vector<1x8x128xf32>,
    return
  }
  func.func @transform_0(%arg0: i32, %arg1: i32) -> (i32, i32, i32) {
    %c0_i32 = arith.constant 0 : i32
    %c0_i32_0 = arith.constant 0 : i32
    return %arg0, %arg1, %c0_i32 : i32, i32, i32
  }
  func.func @transform_1(%arg0: i32, %arg1: i32) -> (i32, i32, i32) {
    %c0_i32 = arith.constant 0 : i32
    %c0_i32_0 = arith.constant 0 : i32
    return %arg0, %arg1, %c0_i32 : i32, i32, i32
  }
  func.func @transform_2(%arg0: i32, %arg1: i32) -> (i32, i32, i32) {
    %c0_i32 = arith.constant 0 : i32
    %c0_i32_0 = arith.constant 0 : i32
    %c0_i32_1 = arith.constant 0 : i32
    return %arg0, %c0_i32, %c0_i32_0 : i32, i32, i32
  }
}

module attributes {stable_mosaic.version = 11 : i64} {
  func.func @_l1_partial_kernel(%arg0: i32, %arg1: i32, %arg2: memref<1x256x64xbf16, #tpu.memory_space<vmem>>, %arg3: memref<1x256x64xbf16, #tpu.memory_space<vmem>>, %arg4: memref<1x8x64xf32, #tpu.memory_space<vmem>>) attributes {dimension_semantics = [#tpu.dimension_semantics<parallel>, #tpu.dimension_semantics<arbitrary>], iteration_bounds = array<i64: 2, 1>, scalar_prefetch = 0 : i64, scratch_operands = 0 : i64, tpu.core_type = #tpu.core_type<tc>, window_params = [{transform_indices = @transform_0, window_bounds = array<i64: 1, 256, 64>}, {transform_indices = @transform_1, window_bounds = array<i64: 1, 256, 64>}, {transform_indices = @transform_2, window_bounds = array<i64: 1, 8, 64>}]} {
    %c0_i32 = arith.constant 0 : i32
    %0 = arith.cmpi eq, %arg1, %c0_i32 : i32
    %1 = arith.extui %0 : i1 to i32
    %c0_i32_0 = arith.constant 0 : i32
    %2 = arith.cmpi ne, %1, %c0_i32_0 : i32
    scf.if %2 {
      %cst_12 = arith.constant 0.000000e+00 : f32
      %19 = vector.broadcast %cst_12 : f32 to vector<1x8x64xf32>
      %c0_13 = arith.constant 0 : index
      %c0_14 = arith.constant 0 : index
      %c0_15 = arith.constant 0 : index
      %20 = vector.load %arg4[%c0_13, %c0_14, %c0_15] : memref<1x8x64xf32, #tpu.memory_space<vmem>>, vector<1x8x64xf32>
      tpu.vector_store %arg4[%c0_13, %c0_14, %c0_15], %19 {strides = array<i32>} : memref<1x8x64xf32, #tpu.memory_space<vmem>>, vector<1x8x64xf32>,
    } else {
    }
    %c0 = arith.constant 0 : index
    %c0_1 = arith.constant 0 : index
    %c0_2 = arith.constant 0 : index
    %3 = vector.load %arg2[%c0, %c0_1, %c0_2] : memref<1x256x64xbf16, #tpu.memory_space<vmem>>, vector<1x256x64xbf16>
    %4 = vector.shape_cast %3 : vector<1x256x64xbf16> to vector<256x64xbf16>
    %5 = arith.extf %4 : vector<256x64xbf16> to vector<256x64xf32>
    %c0_3 = arith.constant 0 : index
    %c0_4 = arith.constant 0 : index
    %c0_5 = arith.constant 0 : index
    %6 = vector.load %arg3[%c0_3, %c0_4, %c0_5] : memref<1x256x64xbf16, #tpu.memory_space<vmem>>, vector<1x256x64xbf16>
    %7 = vector.shape_cast %6 : vector<1x256x64xbf16> to vector<256x64xbf16>
    %8 = arith.extf %7 : vector<256x64xbf16> to vector<256x64xf32>
    %9 = arith.subf %5, %8 : vector<256x64xf32>
    %c0_6 = arith.constant 0 : index
    %c0_7 = arith.constant 0 : index
    %c0_8 = arith.constant 0 : index
    %10 = vector.load %arg4[%c0_6, %c0_7, %c0_8] : memref<1x8x64xf32, #tpu.memory_space<vmem>>, vector<1x8x64xf32>
    %11 = vector.shape_cast %10 : vector<1x8x64xf32> to vector<8x64xf32>
    %12 = math.absf %9 : vector<256x64xf32>
    %13 = vector.shape_cast %12 : vector<256x64xf32> to vector<32x8x64xf32>
    %cst = arith.constant dense<0.000000e+00> : vector<8x64xf32>
    %14 = vector.multi_reduction <add>, %13, %cst [0] : vector<32x8x64xf32> to vector<8x64xf32>
    %15 = arith.addf %11, %14 : vector<8x64xf32>
    %c0_9 = arith.constant 0 : index
    %c0_10 = arith.constant 0 : index
    %c0_11 = arith.constant 0 : index
    %16 = vector.load %arg4[%c0_9, %c0_10, %c0_11] : memref<1x8x64xf32, #tpu.memory_space<vmem>>, vector<1x8x64xf32>
    %17 = vector.shape_cast %16 : vector<1x8x64xf32> to vector<8x64xf32>
    %18 = vector.shape_cast %15 : vector<8x64xf32> to vector<1x8x64xf32>
    tpu.vector_store %arg4[%c0_9, %c0_10, %c0_11], %18 {strides = array<i32>} : memref<1x8x64xf32, #tpu.memory_space<vmem>>, vector<1x8x64xf32>,
    return
  }
  func.func @transform_0(%arg0: i32, %arg1: i32) -> (i32, i32, i32) {
    %c0_i32 = arith.constant 0 : i32
    %c0_i32_0 = arith.constant 0 : i32
    return %arg0, %arg1, %c0_i32 : i32, i32, i32
  }
  func.func @transform_1(%arg0: i32, %arg1: i32) -> (i32, i32, i32) {
    %c0_i32 = arith.constant 0 : i32
    %c0_i32_0 = arith.constant 0 : i32
    return %arg0, %arg1, %c0_i32 : i32, i32, i32
  }
  func.func @transform_2(%arg0: i32, %arg1: i32) -> (i32, i32, i32) {
    %c0_i32 = arith.constant 0 : i32
    %c0_i32_0 = arith.constant 0 : i32
    %c0_i32_1 = arith.constant 0 : i32
    return %arg0, %c0_i32, %c0_i32_0 : i32, i32, i32
  }
}

module attributes {stable_mosaic.version = 11 : i64} {
  func.func @_gram_kernel(%arg0: i32, %arg1: i32, %arg2: memref<1x64x128xbf16, #tpu.memory_space<vmem>>, %arg3: memref<1x128x128xf32, #tpu.memory_space<vmem>>, %arg4: memref<128x128xf32, #tpu.memory_space<vmem>>) attributes {dimension_semantics = [#tpu.dimension_semantics<parallel>, #tpu.dimension_semantics<arbitrary>], iteration_bounds = array<i64: 4, 1>, scalar_prefetch = 0 : i64, scratch_operands = 1 : i64, tpu.core_type = #tpu.core_type<tc>, window_params = [{transform_indices = @transform_0, window_bounds = array<i64: 1, 64, 128>}, {transform_indices = @transform_1, window_bounds = array<i64: 1, 128, 128>}]} {
    %c0_i32 = arith.constant 0 : i32
    %0 = arith.cmpi eq, %arg1, %c0_i32 : i32
    %1 = arith.extui %0 : i1 to i32
    %c0_i32_0 = arith.constant 0 : i32
    %2 = arith.cmpi ne, %1, %c0_i32_0 : i32
    scf.if %2 {
      %cst_9 = arith.constant 0.000000e+00 : f32
      %12 = vector.broadcast %cst_9 : f32 to vector<128x128xf32>
      %c0_10 = arith.constant 0 : index
      %c0_11 = arith.constant 0 : index
      %13 = vector.load %arg4[%c0_10, %c0_11] : memref<128x128xf32, #tpu.memory_space<vmem>>, vector<128x128xf32>
      tpu.vector_store %arg4[%c0_10, %c0_11], %12 {strides = array<i32>} : memref<128x128xf32, #tpu.memory_space<vmem>>, vector<128x128xf32>,
    } else {
    }
    %c0 = arith.constant 0 : index
    %c0_1 = arith.constant 0 : index
    %c0_2 = arith.constant 0 : index
    %3 = vector.load %arg2[%c0, %c0_1, %c0_2] : memref<1x64x128xbf16, #tpu.memory_space<vmem>>, vector<1x64x128xbf16>
    %4 = vector.shape_cast %3 : vector<1x64x128xbf16> to vector<64x128xbf16>
    %c0_3 = arith.constant 0 : index
    %c0_4 = arith.constant 0 : index
    %5 = vector.load %arg4[%c0_3, %c0_4] : memref<128x128xf32, #tpu.memory_space<vmem>>, vector<128x128xf32>
    %cst = arith.constant dense<0.000000e+00> : vector<128x128xf32>
    %6 = tpu.matmul %4, %4, %cst {dimension_numbers = #tpu.dot_dimension_numbers<[0], [0], [1], [1], [0, 1, 1, 1], [], []>} : vector<64x128xbf16>, vector<64x128xbf16>, vector<128x128xf32> -> vector<128x128xf32>
    %7 = arith.addf %5, %6 : vector<128x128xf32>
    %c0_5 = arith.constant 0 : index
    %c0_6 = arith.constant 0 : index
    %8 = vector.load %arg4[%c0_5, %c0_6] : memref<128x128xf32, #tpu.memory_space<vmem>>, vector<128x128xf32>
    tpu.vector_store %arg4[%c0_5, %c0_6], %7 {strides = array<i32>} : memref<128x128xf32, #tpu.memory_space<vmem>>, vector<128x128xf32>,
    %c0_i32_7 = arith.constant 0 : i32
    %9 = arith.cmpi eq, %arg1, %c0_i32_7 : i32
    %10 = arith.extui %9 : i1 to i32
    %c0_i32_8 = arith.constant 0 : i32
    %11 = arith.cmpi ne, %10, %c0_i32_8 : i32
    scf.if %11 {
      %c0_9 = arith.constant 0 : index
      %c0_10 = arith.constant 0 : index
      %12 = vector.load %arg4[%c0_9, %c0_10] : memref<128x128xf32, #tpu.memory_space<vmem>>, vector<128x128xf32>
      %cst_11 = arith.constant 1.22070313E-4 : f32
      %13 = vector.broadcast %cst_11 : f32 to vector<128x128xf32>
      %14 = arith.mulf %12, %13 : vector<128x128xf32>
      %c0_12 = arith.constant 0 : index
      %c0_13 = arith.constant 0 : index
      %c0_14 = arith.constant 0 : index
      %15 = vector.load %arg3[%c0_12, %c0_13, %c0_14] : memref<1x128x128xf32, #tpu.memory_space<vmem>>, vector<1x128x128xf32>
      %16 = vector.shape_cast %15 : vector<1x128x128xf32> to vector<128x128xf32>
      %17 = vector.shape_cast %14 : vector<128x128xf32> to vector<1x128x128xf32>
      tpu.vector_store %arg3[%c0_12, %c0_13, %c0_14], %17 {strides = array<i32>} : memref<1x128x128xf32, #tpu.memory_space<vmem>>, vector<1x128x128xf32>,
    } else {
    }
    return
  }
  func.func @transform_0(%arg0: i32, %arg1: i32) -> (i32, i32, i32) {
    %c0_i32 = arith.constant 0 : i32
    %c0_i32_0 = arith.constant 0 : i32
    return %arg0, %arg1, %c0_i32 : i32, i32, i32
  }
  func.func @transform_1(%arg0: i32, %arg1: i32) -> (i32, i32, i32) {
    %c0_i32 = arith.constant 0 : i32
    %c0_i32_0 = arith.constant 0 : i32
    %c0_i32_1 = arith.constant 0 : i32
    return %arg0, %c0_i32, %c0_i32_0 : i32, i32, i32
  }
}

module attributes {stable_mosaic.version = 11 : i64} {
  func.func @_gram_kernel(%arg0: i32, %arg1: i32, %arg2: memref<1x256x64xbf16, #tpu.memory_space<vmem>>, %arg3: memref<1x64x64xf32, #tpu.memory_space<vmem>>, %arg4: memref<64x64xf32, #tpu.memory_space<vmem>>) attributes {dimension_semantics = [#tpu.dimension_semantics<parallel>, #tpu.dimension_semantics<arbitrary>], iteration_bounds = array<i64: 4, 1>, scalar_prefetch = 0 : i64, scratch_operands = 1 : i64, tpu.core_type = #tpu.core_type<tc>, window_params = [{transform_indices = @transform_0, window_bounds = array<i64: 1, 256, 64>}, {transform_indices = @transform_1, window_bounds = array<i64: 1, 64, 64>}]} {
    %c0_i32 = arith.constant 0 : i32
    %0 = arith.cmpi eq, %arg1, %c0_i32 : i32
    %1 = arith.extui %0 : i1 to i32
    %c0_i32_0 = arith.constant 0 : i32
    %2 = arith.cmpi ne, %1, %c0_i32_0 : i32
    scf.if %2 {
      %cst_9 = arith.constant 0.000000e+00 : f32
      %12 = vector.broadcast %cst_9 : f32 to vector<64x64xf32>
      %c0_10 = arith.constant 0 : index
      %c0_11 = arith.constant 0 : index
      %13 = vector.load %arg4[%c0_10, %c0_11] : memref<64x64xf32, #tpu.memory_space<vmem>>, vector<64x64xf32>
      tpu.vector_store %arg4[%c0_10, %c0_11], %12 {strides = array<i32>} : memref<64x64xf32, #tpu.memory_space<vmem>>, vector<64x64xf32>,
    } else {
    }
    %c0 = arith.constant 0 : index
    %c0_1 = arith.constant 0 : index
    %c0_2 = arith.constant 0 : index
    %3 = vector.load %arg2[%c0, %c0_1, %c0_2] : memref<1x256x64xbf16, #tpu.memory_space<vmem>>, vector<1x256x64xbf16>
    %4 = vector.shape_cast %3 : vector<1x256x64xbf16> to vector<256x64xbf16>
    %c0_3 = arith.constant 0 : index
    %c0_4 = arith.constant 0 : index
    %5 = vector.load %arg4[%c0_3, %c0_4] : memref<64x64xf32, #tpu.memory_space<vmem>>, vector<64x64xf32>
    %cst = arith.constant dense<0.000000e+00> : vector<64x64xf32>
    %6 = tpu.matmul %4, %4, %cst {dimension_numbers = #tpu.dot_dimension_numbers<[0], [0], [1], [1], [0, 1, 1, 1], [], []>} : vector<256x64xbf16>, vector<256x64xbf16>, vector<64x64xf32> -> vector<64x64xf32>
    %7 = arith.addf %5, %6 : vector<64x64xf32>
    %c0_5 = arith.constant 0 : index
    %c0_6 = arith.constant 0 : index
    %8 = vector.load %arg4[%c0_5, %c0_6] : memref<64x64xf32, #tpu.memory_space<vmem>>, vector<64x64xf32>
    tpu.vector_store %arg4[%c0_5, %c0_6], %7 {strides = array<i32>} : memref<64x64xf32, #tpu.memory_space<vmem>>, vector<64x64xf32>,
    %c0_i32_7 = arith.constant 0 : i32
    %9 = arith.cmpi eq, %arg1, %c0_i32_7 : i32
    %10 = arith.extui %9 : i1 to i32
    %c0_i32_8 = arith.constant 0 : i32
    %11 = arith.cmpi ne, %10, %c0_i32_8 : i32
    scf.if %11 {
      %c0_9 = arith.constant 0 : index
      %c0_10 = arith.constant 0 : index
      %12 = vector.load %arg4[%c0_9, %c0_10] : memref<64x64xf32, #tpu.memory_space<vmem>>, vector<64x64xf32>
      %cst_11 = arith.constant 6.10351563E-5 : f32
      %13 = vector.broadcast %cst_11 : f32 to vector<64x64xf32>
      %14 = arith.mulf %12, %13 : vector<64x64xf32>
      %c0_12 = arith.constant 0 : index
      %c0_13 = arith.constant 0 : index
      %c0_14 = arith.constant 0 : index
      %15 = vector.load %arg3[%c0_12, %c0_13, %c0_14] : memref<1x64x64xf32, #tpu.memory_space<vmem>>, vector<1x64x64xf32>
      %16 = vector.shape_cast %15 : vector<1x64x64xf32> to vector<64x64xf32>
      %17 = vector.shape_cast %14 : vector<64x64xf32> to vector<1x64x64xf32>
      tpu.vector_store %arg3[%c0_12, %c0_13, %c0_14], %17 {strides = array<i32>} : memref<1x64x64xf32, #tpu.memory_space<vmem>>, vector<1x64x64xf32>,
    } else {
    }
    return
  }
  func.func @transform_0(%arg0: i32, %arg1: i32) -> (i32, i32, i32) {
    %c0_i32 = arith.constant 0 : i32
    %c0_i32_0 = arith.constant 0 : i32
    return %arg0, %arg1, %c0_i32 : i32, i32, i32
  }
  func.func @transform_1(%arg0: i32, %arg1: i32) -> (i32, i32, i32) {
    %c0_i32 = arith.constant 0 : i32
    %c0_i32_0 = arith.constant 0 : i32
    %c0_i32_1 = arith.constant 0 : i32
    return %arg0, %c0_i32, %c0_i32_0 : i32, i32, i32
  }
}

</mosaic_0001>

<bundles_post_ra>
// kernel: perceptual_loss.10
= control target key start
LH: loop header
LB: loop body
LE: loop exit
PB: predicated region body
PF: predicated region fallthrough
CT: control target
= control target key end

     0   :  { %s1633_s12 = smov 0   ;;  %s2188_s0 = inlined_call_operand.vmem [shape: bf16[4,64,64], index: 0, kind: input, shape index: {}]   ;;  %s2189_s1 = inlined_call_operand.vmem [shape: bf16[576,128], index: 1, kind: input, shape index: {}]   ;;  %s2190_s2 = inlined_call_operand.vmem [shape: f32[1,128], index: 2, kind: input, shape index: {}]   ;;  %s2191_s3 = inlined_call_operand.vmem [shape: bf16[4,64,128], index: 3, kind: output, shape index: {}]  }
   0x1 LB: > { %s1244_s13 = sadd.s32 4294967295, %s1609_s12   ;;  %p1248_p0 = scmp.ge.s32.totalorder %s1609_s12, 1  ;;  %s1609_s12 = sphi %s1633_s12, %s13_s12  }
   0x2   : > { %p137_p1 = scmp.lt.s32.totalorder %s1609_s12, 5 }
   0x4   : > { %p138_p2 = pnand %p1248_p0, %p137_p1 }
   0x5   : > { %p161_p3 = scmp.lt.s32.totalorder (!%p138_p2), %s1244_s13, 3  ;;  %s1611_s18 = smov (!%p138_p2), 64  }
   0x6   : > { %141 = sbr.rel (%p138_p2) target bundleno = 367 (0x16f), region = 32 }
   0xb   : > { %v188_v0 = vlaneseq  ;;  %s2197_s13 = smov (!%p161_p3, %s1244_s13), 3  ;;  %v1424_v59 = vld [vmem:[%s2189_s1 + $0x38] sm:$0xff] }
   0xc   : > { %s1415_s14 = sshll.u32 %s2197_s13, 5  ;;  %1496 = vmatpush.bf16.msra.mxu2 %v1424_v59  ;;  %1495 = vmatpush.bf16.msra.mxu1 %v1424_v59 }
   0xd   : > { %v1643_v1 = vshrl.u32 %v188_v0, 7  ;;  %s165_s17 = scalar_lea.vmem %s2188_s0, %s1415_s14  ;;  %1020 = vmatpush.bf16.msra.mxu0 %v1424_v59  ;;  %s2172_s24 = scalar_lea.vmem %s2191_s3, %s1415_s14 }
   0xe   : > { %v1454_v4 = vld [vmem:[%s165_s17] sm:$0xff]   ;;  %v1489_v5 = vld [vmem:[%s165_s17 + $0x8] sm:$0xff]   ;;  %v1490_v6 = vld [vmem:[%s165_s17 + $0x10] sm:$0xff]  }
   0xf   : > { %v190_v2 = vadd.s32 8, %v1643_v1  ;;  %v197_v3 = vcvt.s32.f32 %v1643_v1  ;;  %vm253_vm0 = vcmp.lt.s32.totalorder %v1643_v1, 1  ;;  %vm342_vm1 = vcmp.lt.s32.totalorder %v1643_v1, 7  ;;  %v1491_v14 = vld [vmem:[%s165_s17 + $0x18] sm:$0xff]  }
  0x10   : > { %v1656_v9 = vadd.s32 16, %v1643_v1  ;;  %v1658_v10 = vunpack.c.h.bf16 %v1454_v4  ;;  %v1660_v11 = vunpack.c.l.bf16 %v1489_v5  ;;  %v1662_v12 = vunpack.c.h.bf16 %v1489_v5  ;;  %v1423_v5 = vld [vmem:[%s2189_s1 + $0x30] sm:$0xff] }
  0x11   : > { %v198_v7 = vcvt.s32.f32 %v190_v2  ;;  %v205_v8 = vadd.f32 0.5, %v197_v3  ;;  %v1664_v13 = vunpack.c.l.bf16 %v1490_v6  ;;  %v1666_v15 = vunpack.c.h.bf16 %v1490_v6  ;;  %1498 = vmatpush.bf16.msra.mxu2 %v1423_v5  ;;  %1497 = vmatpush.bf16.msra.mxu1 %v1423_v5 }
  0x12   : > { %v1668_v16 = vunpack.c.l.bf16 %v1491_v14  ;;  %v1670_v17 = vunpack.c.l.bf16 %v1454_v4  ;;  %v1672_v18 = vunpack.c.h.bf16 %v1491_v14  ;;  %v1676_v19 = vpack.i.bf16 %v1660_v11, %v1658_v10  ;;  %1021 = vmatpush.bf16.msra.mxu0 %v1423_v5 }
  0x13   : > { %v1680_v20 = vpack.i.bf16 %v1664_v13, %v1662_v12  ;;  %v206_v21 = vadd.f32 0.5, %v198_v7  ;;  %v213_v22 = vmul.f32 0.125, %v205_v8  ;;  %v246_v24 = vrot.slane %v1658_v10, 7 }
  0x14   : > { %v245_v23 = vrot.slane %v1670_v17, 7  ;;  %v1685_v25 = vadd.s32 24, %v1643_v1  ;;  %v1688_v26 = vadd.s32 32, %v1643_v1  ;;  %1523 = vrot.lane.b32.xlu0 %v1676_v19, %s1611_s18  ;;  %v252_v29 = vrot.slane %v1672_v18, 7 }
  0x15   : > { %1533 = vrot.lane.b32.xlu1 %v1680_v20, %s1611_s18  ;;  %v214_v27 = vmul.f32 0.125, %v206_v21  ;;  %v221_v28 = vfloor.f32 %v213_v22  ;;  %v334_v30 = vrot.slane %v1670_v17, 1  ;;  %v335_v31 = vrot.slane %v1658_v10, 1 }
  0x16   : > { %v336_v32 = vrot.slane %v1660_v11, 1  ;;  %v337_v33 = vrot.slane %v1662_v12, 1  ;;  %v1700_v34 = vadd.s32 40, %v1643_v1  ;;  %v1704_v35 = vpack.i.bf16 %v1668_v16, %v1666_v15 }
  0x17   : > { %v222_v36 = vfloor.f32 %v214_v27  ;;  %v229_v37 = vmul.f32 8.0, %v221_v28  ;;  %v199_v38 = vcvt.s32.f32 %v1656_v9  ;;  %v1537_v39 = vpack.i.bf16 0.0, %v1670_v17 }
  0x18   : > { %v1712_v40 = vsel %vm253_vm0, %v245_v23, %v246_v24  ;;  %v1718_v41 = vsel %vm253_vm0, %v252_v29, %v245_v23  ;;  %v200_v42 = vcvt.s32.f32 %v1685_v25  ;;  %v349_v45 = vsel %vm342_vm1, %v334_v30, %v335_v31  ;;  %v1448_v25 = vld [vmem:[%s2189_s1 + $0xf8] sm:$0xff] }
  0x19   : > { %v230_v43 = vmul.f32 8.0, %v222_v36  ;;  %v1721_v44 = vsub.f32 %v197_v3, %v229_v37  ;;  %v207_v46 = vadd.f32 0.5, %v199_v38  ;;  %v1729_v47 = vsel %vm342_vm1, %v336_v32, %v337_v33  ;;  %1107 = vmatpush.bf16.msra.mxu3 %v1448_v25 }
  0x1a   : > { %v1733_v48 = vsel %vm342_vm1, %v335_v31, %v336_v32  ;;  %v208_v49 = vadd.f32 0.5, %v200_v42  ;;  %v338_v50 = vrot.slane %v1664_v13, 1  ;;  %v247_v56 = vrot.slane %v1660_v11, 7 }
  0x1b   : > { %v1736_v51 = vsub.f32 %v198_v7, %v230_v43  ;;  %vm270_vm2 = vcmp.gt.f32.partialorder %v1721_v44, 0.5  ;;  %vm351_vm3 = vcmp.lt.f32.partialorder %v1721_v44, 6.5  ;;  %v215_v52 = vmul.f32 0.125, %v207_v46  ;;  %v1447_v43 = vld [vmem:[%s2189_s1 + $0xf0] sm:$0xff]  ;;  %v1425_v44 = vld [vmem:[%s2189_s1 + $0x40] sm:$0xff] }
  0x1c   : > { %v431_v53 = vsel %vm351_vm3, %v349_v45, 0.0  ;;  %v1741_v54 = vsel %vm351_vm3, %v1733_v48, 0.0  ;;  %v216_v55 = vmul.f32 0.125, %v208_v49  ;;  %1528 = vrot.lane.b32.xlu0 %v1704_v35, %s1611_s18  ;;  %v407_v57 = vsel %vm270_vm2, %v1718_v41, 0.0 }
  0x1d   : > { %1538 = vrot.lane.b32.xlu1 %v1537_v39, %s1611_s18  ;;  %vm271_vm4 = vcmp.gt.f32.partialorder %v1736_v51, 0.5  ;;  %vm352_vm5 = vcmp.lt.f32.partialorder %v1736_v51, 6.5  ;;  %v223_v58 = vfloor.f32 %v215_v52  ;;  %v248_v4 = vrot.slane %v1662_v12, 7  ;;  %1108 = vmatpush.bf16.msra.mxu3 %v1447_v43 }
  0x1e   : > { %v408_v60 = vsel %vm271_vm4, %v1712_v40, 0.0  ;;  %v432_v61 = vsel %vm352_vm5, %v1733_v48, 0.0  ;;  %v1760_v62 = vsel %vm352_vm5, %v1729_v47, 0.0  ;;  %v1762_v63 = vsel %vm352_vm5, %v349_v45, 0.0 }
  0x1f   : > { %v700_v0 = vpack.c.bf16 %v1760_v62, %v1741_v54  ;;  %v1542_v2 = vpack.i.bf16 %v432_v61, %v431_v53  ;;  %v224_v3 = vfloor.f32 %v216_v55  ;;  %v231_v6 = vmul.f32 8.0, %v223_v58  ;;  %v1421_v53 = vld [vmem:[%s2189_s1 + $0x20] sm:$0xff] }
  0x20   : > { %v201_v7 = vcvt.s32.f32 %v1688_v26  ;;  %v1552_v8 = vpack.i.bf16 %v407_v57, %v408_v60  ;;  %v202_v14 = vcvt.s32.f32 %v1700_v34  ;;  %v1779_v22 = vsel %vm253_vm0, %v246_v24, %v247_v56  ;;  %v1422_v24 = vld [vmem:[%s2189_s1 + $0x28] sm:$0xff] }
  0x21   : > { %1543 = vrot.lane.b32.xlu2 %v1542_v2, %s1611_s18  ;;  %v232_v9 = vmul.f32 8.0, %v224_v3  ;;  %v1773_v21 = vsub.f32 %v199_v38, %v231_v6  ;;  %v1790_v27 = vsel %vm342_vm1, %v337_v33, %v338_v50  ;;  %v1794_v28 = vsel %vm253_vm0, %v247_v56, %v248_v4  ;;  %1500 = vmatpush.bf16.msra.mxu2 %v1422_v24 }
  0x22   : > { %v209_v23 = vadd.f32 0.5, %v201_v7  ;;  %v210_v31 = vadd.f32 0.5, %v202_v14  ;;  %v339_v34 = vrot.slane %v1666_v15, 1  ;;  %v340_v46 = vrot.slane %v1668_v16, 1  ;;  %1499 = vmatpush.bf16.msra.mxu1 %v1422_v24  ;;  %1022 = vmatpush.bf16.msra.mxu0 %v1422_v24 }
  0x23   : > { %v1784_v26 = vsub.f32 %v200_v42, %v232_v9  ;;  %vm353_vm6 = vcmp.lt.f32.partialorder %v1773_v21, 6.5  ;;  %vm272_vm7 = vcmp.gt.f32.partialorder %v1773_v21, 0.5  ;;  %v249_v49 = vrot.slane %v1664_v13, 7 }
  0x24   : > { %v217_v32 = vmul.f32 0.125, %v209_v23  ;;  %1553 = vrot.lane.b32.xlu0 %v1552_v8, %s1611_s18  ;;  %v433_v33 = vsel %vm353_vm6, %v1729_v47, 0.0  ;;  %v409_v36 = vsel %vm272_vm7, %v1779_v22, 0.0  ;;  %v218_v39 = vmul.f32 0.125, %v210_v31 }
  0x25   : > { %vm354_vm8 = vcmp.lt.f32.partialorder %v1784_v26, 6.5  ;;  %vm273_vm9 = vcmp.gt.f32.partialorder %v1784_v26, 0.5  ;;  %v250_v52 = vrot.slane %v1666_v15, 7  ;;  %v195_v57 = vadd.s32 48, %v1643_v1  ;;  %1502 = vmatpush.bf16.msra.mxu2 %v1421_v53 }
  0x26   : > { %v434_v37 = vsel %vm354_vm8, %v1790_v27, 0.0  ;;  %v410_v38 = vsel %vm273_vm9, %v1794_v28, 0.0  ;;  %v225_v42 = vfloor.f32 %v217_v32  ;;  %v226_v55 = vfloor.f32 %v218_v39  ;;  %1501 = vmatpush.bf16.msra.mxu1 %v1421_v53  ;;  %1023 = vmatpush.bf16.msra.mxu0 %v1421_v53 }
  0x27   : > { %v1557_v45 = vpack.i.bf16 %v434_v37, %v433_v33  ;;  %v196_v58 = vadd.s32 56, %v1643_v1  ;;  %v1567_v59 = vpack.i.bf16 %v410_v38, %v409_v36  ;;  %v1835_v60 = vsel %vm342_vm1, %v338_v50, %v339_v34  ;;  %v1420_v50 = vld [vmem:[%s2189_s1 + $0x18] sm:$0xff]  ;;  %v1417_v1 = vld [vmem:[%s2189_s1] sm:$0xff] }
  0x28   : > { %v233_v56 = vmul.f32 8.0, %v225_v42  ;;  %v234_v61 = vmul.f32 8.0, %v226_v55  ;;  %v203_v3 = vcvt.s32.f32 %v195_v57  ;;  %v1841_v6 = vsel %vm342_vm1, %v339_v34, %v340_v46  ;;  %v1419_v34 = vld [vmem:[%s2189_s1 + $0x10] sm:$0xff] }
  0x29   : > { %1558 = vrot.lane.b32.xlu1 %v1557_v45, %s1611_s18  ;;  %1548 = vrot.lane.b32.xlu2 %v1676_v19, %s1611_s18  ;;  %v204_v5 = vcvt.s32.f32 %v196_v58  ;;  %v1845_v19 = vsel %vm253_vm0, %v249_v49, %v250_v52  ;;  %v1849_v8 = vsel %vm253_vm0, %v248_v4, %v249_v49  ;;  %v341_v37 = vrot.slane %v1672_v18, 1  ;;  %v1418_v49 = vld [vmem:[%s2189_s1 + $0x8] sm:$0xff] }
  0x2a   : > { %v1837_v2 = vsub.f32 %v201_v7, %v233_v56  ;;  %v1854_v7 = vsub.f32 %v202_v14, %v234_v61  ;;  %v211_v9 = vadd.f32 0.5, %v203_v3  ;;  %1504 = vmatpush.bf16.msra.mxu2 %v1420_v50  ;;  %v251_v38 = vrot.slane %v1668_v16, 7  ;;  %1503 = vmatpush.bf16.msra.mxu1 %v1420_v50 }
  0x2b   : > { %v212_v23 = vadd.f32 0.5, %v204_v5  ;;  %1024 = vmatpush.bf16.msra.mxu0 %v1420_v50  ;;  %v1888_v55 = vsel %vm342_vm1, %v340_v46, %v341_v37  ;;  %v1901_v57 = vsel %vm342_vm1, %v341_v37, %v334_v30  ;;  %v1439_v50 = vld [vmem:[%s2189_s1 + $0xb0] sm:$0xff]  ;;  %v1442_v37 = vld [vmem:[%s2189_s1 + $0xc8] sm:$0xff] }
  0x2c   : > { %vm355_vm10 = vcmp.lt.f32.partialorder %v1837_v2, 6.5  ;;  %vm274_vm11 = vcmp.gt.f32.partialorder %v1837_v2, 0.5  ;;  %1568 = vrot.lane.b32.xlu0 %v1567_v59, %s1611_s18  ;;  %vm356_vm12 = vcmp.lt.f32.partialorder %v1854_v7, 6.5  ;;  %vm275_vm13 = vcmp.gt.f32.partialorder %v1854_v7, 0.5  ;;  %v1440_v59 = vld [vmem:[%s2189_s1 + $0xb8] sm:$0xff] }
  0x2d   : > { %v435_v4 = vsel %vm355_vm10, %v1835_v60, 0.0  ;;  %v411_v14 = vsel %vm274_vm11, %v1849_v8, 0.0  ;;  %v219_v25 = vmul.f32 0.125, %v211_v9  ;;  %v436_v31 = vsel %vm356_vm12, %v1841_v6, 0.0  ;;  %v1432_v9 = vld [vmem:[%s2189_s1 + $0x78] sm:$0xff] }
  0x2e   : > { %v412_v24 = vsel %vm275_vm13, %v1845_v19, 0.0  ;;  %v220_v32 = vmul.f32 0.125, %v212_v23  ;;  %v1572_v33 = vpack.i.bf16 %v436_v31, %v435_v4  ;;  %1506 = vmatpush.bf16.msra.mxu2 %v1419_v34  ;;  %1505 = vmatpush.bf16.msra.mxu1 %v1419_v34  ;;  %v1907_v46 = vsel %vm253_vm0, %v251_v38, %v252_v29  ;;  %v1438_v4 = vld [vmem:[%s2189_s1 + $0xa8] sm:$0xff]  ;;  %v1445_v23 = vld [vmem:[%s2189_s1 + $0xe0] sm:$0xff]  ;;  %v1444_v31 = vld [vmem:[%s2189_s1 + $0xd8] sm:$0xff] }
  0x2f   : > { %v227_v36 = vfloor.f32 %v219_v25  ;;  %v1582_v39 = vpack.i.bf16 %v412_v24, %v411_v14  ;;  %1025 = vmatpush.bf16.msra.mxu0 %v1419_v34  ;;  %v1431_v14 = vld [vmem:[%s2189_s1 + $0x70] sm:$0xff]  ;;  %v1437_v25 = vld [vmem:[%s2189_s1 + $0xa0] sm:$0xff]  ;;  %v1430_v24 = vld [vmem:[%s2189_s1 + $0x68] sm:$0xff] }
  0x30   : > { %v228_v42 = vfloor.f32 %v220_v32  ;;  %v1436_v32 = vld [vmem:[%s2189_s1 + $0x98] sm:$0xff]  ;;  %v1443_v34 = vld [vmem:[%s2189_s1 + $0xd0] sm:$0xff] }
  0x31   : > { %1563 = vrot.lane.b32.xlu2 %v1680_v20, %s1611_s18  ;;  %1573 = vrot.lane.b32.xlu1 %v1572_v33, %s1611_s18  ;;  %v235_v43 = vmul.f32 8.0, %v227_v36  ;;  %v1892_v20 = vsel %vm253_vm0, %v250_v52, %v251_v38  ;;  %v1429_v33 = vld [vmem:[%s2189_s1 + $0x60] sm:$0xff]  ;;  %v1435_v36 = vld [vmem:[%s2189_s1 + $0x90] sm:$0xff]  ;;  %vm663_vm0 = vcmask 523264  }
  0x32   : > { %v236_v45 = vmul.f32 8.0, %v228_v42  ;;  %1508 = vmatpush.bf16.msra.mxu2 %v1418_v49  ;;  %1507 = vmatpush.bf16.msra.mxu1 %v1418_v49  ;;  %v1452_v38 = vld [vmem:[%s2189_s1 + $0x118] sm:$0xff]  ;;  %vm2043_vm1 = vmneg %vm663_vm0 }
  0x33   : > { %v1884_v53 = vsub.f32 %v203_v3, %v235_v43  ;;  %1026 = vmatpush.bf16.msra.mxu0 %v1418_v49  ;;  %v1428_v42 = vld [vmem:[%s2189_s1 + $0x58] sm:$0xff]  ;;  %v1434_v43 = vld [vmem:[%s2189_s1 + $0x88] sm:$0xff]  ;;  %v1451_v49 = vld [vmem:[%s2189_s1 + $0x110] sm:$0xff] }
  0x34   : > { %1583 = vrot.lane.b32.xlu0 %v1582_v39, %s1611_s18  ;;  %v1895_v56 = vsub.f32 %v204_v5, %v236_v45  ;;  %v1592_v5 = vpack.i.bf16 0.0, %v1672_v18  ;;  %v1441_v45 = vld [vmem:[%s2189_s1 + $0xc0] sm:$0xff] }
  0x35   : > { %vm357_vm14 = vcmp.lt.f32.partialorder %v1884_v53, 6.5  ;;  %vm276_vm15 = vcmp.gt.f32.partialorder %v1884_v53, 0.5 }
  0x36   : > { %vm358_vm3 = vcmp.lt.f32.partialorder %v1895_v56, 6.5  ;;  %v437_v52 = vsel %vm357_vm14, %v1888_v55, 0.0  ;;  %vm277_vm5 = vcmp.gt.f32.partialorder %v1895_v56, 0.5  ;;  %v413_v30 = vsel %vm276_vm15, %v1892_v20, 0.0  ;;  %1510 = vmatpush.bf16.msra.mxu2 %v1417_v1  ;;  %1509 = vmatpush.bf16.msra.mxu1 %v1417_v1 }
  0x37   : > { %v438_v29 = vsel %vm358_vm3, %v1901_v57, 0.0  ;;  %v414_v58 = vsel %vm277_vm5, %v1907_v46, 0.0  ;;  %1027 = vmatpush.bf16.msra.mxu0 %v1417_v1  ;;  %v1450_v1 = vld [vmem:[%s2189_s1 + $0x108] sm:$0xff] }
  0x38   : > { %v1587_v61 = vpack.i.bf16 %v438_v29, %v437_v52  ;;  %v1597_v3 = vpack.i.bf16 %v414_v58, %v413_v30  ;;  %v1427_v52 = vld [vmem:[%s2189_s1 + $0x50] sm:$0xff]  ;;  %v1433_v30 = vld [vmem:[%s2189_s1 + $0x80] sm:$0xff]  ;;  %v1426_v29 = vld [vmem:[%s2189_s1 + $0x48] sm:$0xff] }
  0x39   : > { %1578 = vrot.lane.b32.xlu2 %v1704_v35, %s1611_s18  ;;  %v1446_v35 = vld [vmem:[%s2189_s1 + $0xe8] sm:$0xff] }
  0x3a   : > { %1588 = vrot.lane.b32.xlu1 %v1587_v61, %s1611_s18  ;;  %1078 = vmatpush.bf16.msrb.mxu2 %v1440_v59  ;;  %v471_v59 = vsel %vm270_vm2, %v1712_v40, 0.0  ;;  %v472_v61 = vsel %vm271_vm4, %v1779_v22, 0.0  ;;  %vm1612_vm2 = vmmov 1  }
  0x3b   : > { %1109 = vmatpush.bf16.msra.mxu3 %v1446_v35  ;;  %1049 = vmatpush.bf16.msrb.mxu1 %v1432_v9 }
  0x3c   : > { %1598 = vrot.lane.b32.xlu0 %v1597_v3, %s1611_s18  ;;  %1140 = vmatpush.bf16.msrb.mxu0 %v1452_v38 }
  0x3e   : > { %1079 = vmatpush.bf16.msrb.mxu2 %v1439_v50  ;;  %v1449_v50 = vld [vmem:[%s2189_s1 + $0x100] sm:$0xff] }
  0x3f   : > { %1110 = vmatpush.bf16.msra.mxu3 %v1445_v23  ;;  %1050 = vmatpush.bf16.msrb.mxu1 %v1431_v14  ;;  %v304_v14 = vsel %vm272_vm7, %v1712_v40, 0.0  ;;  %v303_v40 = vsel %vm271_vm4, %v1718_v41, 0.0  ;;  %v474_v41 = vsel %vm273_vm9, %v1849_v8, 0.0  ;;  %vm2057_vm4 = vmpackc.low %vm1612_vm2, %vm2043_vm1 }
  0x40   : > { %1141 = vmatpush.bf16.msrb.mxu0 %v1451_v49  ;;  %v308_v49 = vsel %vm276_vm15, %v1845_v19, 0.0 }
  0x41   : > { %1593 = vrot.lane.b32.xlu2 %v1592_v5, %s1611_s18 }
  0x42   : > { %1080 = vmatpush.bf16.msrb.mxu2 %v1438_v4 }
  0x43   : > { %1111 = vmatpush.bf16.msra.mxu3 %v1444_v31  ;;  %1051 = vmatpush.bf16.msrb.mxu1 %v1430_v24 }
  0x44   : > { %1142 = vmatpush.bf16.msrb.mxu0 %v1450_v1 }
  0x46   : > { %1081 = vmatpush.bf16.msrb.mxu2 %v1437_v25  ;;  %v305_v25 = vsel %vm273_vm9, %v1779_v22, 0.0  ;;  %v473_v22 = vsel %vm272_vm7, %v1794_v28, 0.0  ;;  %vm1406_vm7 = vmpackc.low %vm2043_vm1, %vm1612_vm2 }
  0x47   : > { %1112 = vmatpush.bf16.msra.mxu3 %v1443_v34  ;;  %1052 = vmatpush.bf16.msrb.mxu1 %v1429_v33 }
  0x48   : > { %1143 = vmatpush.bf16.msrb.mxu0 %v1449_v50 }
  0x4a   : > { %1082 = vmatpush.bf16.msrb.mxu2 %v1436_v32 }
  0x4b   : > { %1113 = vmatpush.bf16.msra.mxu3 %v1442_v37  ;;  %1053 = vmatpush.bf16.msrb.mxu1 %v1428_v42 }
  0x4e   : > { %1083 = vmatpush.bf16.msrb.mxu2 %v1435_v36 }
  0x4f   : > { %1114 = vmatpush.bf16.msra.mxu3 %v1441_v45  ;;  %1054 = vmatpush.bf16.msrb.mxu1 %v1427_v52  ;;  %v309_v52 = vsel %vm277_vm5, %v1892_v20, 0.0 }
  0x52   : > { %1084 = vmatpush.bf16.msrb.mxu2 %v1434_v43 }
  0x53   : > { %1055 = vmatpush.bf16.msrb.mxu1 %v1426_v29 }
  0x56   : > { %1085 = vmatpush.bf16.msrb.mxu2 %v1433_v30  ;;  %v532_v30 = vsel %vm356_vm12, %v1888_v55, 0.0 }
  0x57   : > { %1056 = vmatpush.bf16.msrb.mxu1 %v1425_v44 }
  0x7b   : > { %v1982_v39 = vpop.permute.xlu2 %1543 }
  0x83   : > { %v1549_v58 = vpop.permute.xlu2 %1548 }
  0x84   : > { %v1551_v3 = vunpack.i.h.bf16 %v1549_v58  ;;  %v1550_v5 = vunpack.i.l.bf16 %v1549_v58 }
  0x86   : > { %v688_v35 = vsel %vm663_vm0, %v471_v59, %v1550_v5  ;;  %v689_v9 = vsel %vm663_vm0, %v472_v61, %v1551_v3  ;;  %v1524_v4 = vpop.permute.xlu0 %1523 }
  0x87   : > { %v1534_v23 = vpop.permute.xlu1 %1533  ;;  %v699_v31 = vpack.c.bf16 %v689_v9, %v688_v35  ;;  %v1526_v24 = vunpack.i.h.bf16 %v1524_v4  ;;  %v1525_v32 = vunpack.i.l.bf16 %v1524_v4 }
  0x88   : > { %v1536_v4 = vunpack.i.h.bf16 %v1534_v23 }
  0x89   : > { %1115 = vmatmul.bf16.vlgmr.msra.gmra.mxu3 %v699_v31  ;;  %v666_v34 = vsel %vm663_vm0, %v304_v14, %v1525_v32  ;;  %v667_v33 = vsel %vm663_vm0, %v305_v25, %v1526_v24  ;;  %v1535_v14 = vunpack.i.l.bf16 %v1534_v23  ;;  %v306_v25 = vsel %vm274_vm11, %v1794_v28, 0.0 }
  0x8a   : > { %v701_v36 = vpack.c.bf16 %v667_v33, %v666_v34  ;;  %v307_v31 = vsel %vm275_vm13, %v1849_v8, 0.0  ;;  %v475_v8 = vsel %vm274_vm11, %v1845_v19, 0.0 }
  0x8b   : > { %v1564_v37 = vpop.permute.xlu2 %1563  ;;  %v668_v32 = vsel %vm663_vm0, %v306_v25, %v1535_v14  ;;  %v669_v34 = vsel %vm663_vm0, %v307_v31, %v1536_v4 }
  0x8c   : > { %1033 = vmatmul.bf16.vlgmr.msra.gmra.mxu1 %v701_v36  ;;  %v1565_v38 = vunpack.i.l.bf16 %v1564_v37  ;;  %v1566_v42 = vunpack.i.h.bf16 %v1564_v37  ;;  %v706_v33 = vpack.c.bf16 %v669_v34, %v668_v32  ;;  %v1546_v36 = vunpack.i.h.bf16 %v1982_v39 }
  0x8d   : > { %v1545_v37 = vunpack.i.l.bf16 %v1982_v39 }
  0x8e   : > { %v1529_v43 = vpop.permute.xlu0 %1528  ;;  %v690_v59 = vsel %vm663_vm0, %v473_v22, %v1565_v38  ;;  %v691_v35 = vsel %vm663_vm0, %v474_v41, %v1566_v42  ;;  %v476_v42 = vsel %vm275_vm13, %v1892_v20, 0.0 }
  0x8f   : > { %v1539_v45 = vpop.permute.xlu1 %1538  ;;  %v1531_v51 = vunpack.i.h.bf16 %v1529_v43  ;;  %v1530_v1 = vunpack.i.l.bf16 %v1529_v43  ;;  %v704_v24 = vpack.c.bf16 %v691_v35, %v690_v59  ;;  %v680_v22 = vsel %vm663_vm0, %v1670_v17, %v1545_v37 }
  0x90   : > { %v1541_v29 = vunpack.i.h.bf16 %v1539_v45  ;;  %v1540_v58 = vunpack.i.l.bf16 %v1539_v45  ;;  %v681_v43 = vsel %vm663_vm0, %v1658_v10, %v1546_v36 }
  0x91   : > { %v670_v3 = vsel %vm663_vm0, %v308_v49, %v1530_v1  ;;  %v671_v5 = vsel %vm663_vm0, %v309_v52, %v1531_v51  ;;  %v698_v52 = vpack.c.bf16 %v681_v43, %v680_v22 }
  0x92   : > { %v665_v61 = vsel %vm663_vm0, %v303_v40, %v1540_v58  ;;  %v711_v44 = vpack.c.bf16 %v671_v5, %v670_v3  ;;  %v529_v58 = vsel %vm353_vm6, %v1790_v27, 0.0 }
  0x93   : > { %v1399_v9 = vpack.c.bf16 %v665_v61, %v1541_v29  ;;  %v1579_v23 = vpop.permute.xlu2 %1578  ;;  %v477_v61 = vsel %vm276_vm15, %v1907_v46, 0.0 }
  0x94   : > { %1043 = vmatmul.bf16.vlgmr.msra.gmra.mxu2 %v711_v44  ;;  %v1581_v38 = vunpack.i.h.bf16 %v1579_v23  ;;  %v1580_v40 = vunpack.i.l.bf16 %v1579_v23  ;;  %v386_v44 = vsel %vm354_vm8, %v1729_v47, 0.0 }
  0x95   : > { %1400 = vmatmul.msk.bf16.vlgmr.msra.gmra.mxu0 %vm2057_vm4, %v1399_v9 }
  0x96   : > { %v1554_v28 = vpop.permute.xlu0 %1553  ;;  %v692_v39 = vsel %vm663_vm0, %v475_v8, %v1580_v40  ;;  %v693_v49 = vsel %vm663_vm0, %v476_v42, %v1581_v38 }
  0x97   : > { %v1555_v45 = vunpack.i.l.bf16 %v1554_v28  ;;  %v1556_v41 = vunpack.i.h.bf16 %v1554_v28  ;;  %v709_v19 = vpack.c.bf16 %v693_v49, %v692_v39  ;;  %v389_v49 = vsel %vm357_vm14, %v1841_v6, 0.0 }
  0x99   : > { %1120 = vmatmul.bf16.gmra.mxu3 %v704_v24  ;;  %v673_v17 = vsel %vm663_vm0, %v1762_v63, %v1555_v45  ;;  %v530_v63 = vsel %vm354_vm8, %v1835_v60, 0.0  ;;  %v531_v24 = vsel %vm355_vm10, %v1841_v6, 0.0 }
  0x9a   : > { %v1403_v51 = vpack.c.bf16 %v673_v17, %v1556_v41  ;;  %v705_v5 = vpack.c.bf16 %v530_v63, %v529_v58 }
  0x9b   : > { %v1559_v20 = vpop.permute.xlu1 %1558  ;;  %v1594_v29 = vpop.permute.xlu2 %1593 }
  0x9c   : > { %1038 = vmatmul.bf16.gmra.mxu1 %v706_v33  ;;  %v1561_v10 = vunpack.i.h.bf16 %v1559_v20  ;;  %v1560_v1 = vunpack.i.l.bf16 %v1559_v20  ;;  %v1596_v50 = vunpack.i.h.bf16 %v1594_v29  ;;  %v710_v33 = vpack.c.bf16 %v532_v30, %v531_v24 }
  0x9e   : > { %v682_v54 = vsel %vm663_vm0, %v1660_v11, %v1560_v1  ;;  %v683_v62 = vsel %vm663_vm0, %v1662_v12, %v1561_v10  ;;  %v1569_v59 = vpop.permute.xlu0 %1568  ;;  %v385_v12 = vsel %vm353_vm6, %v1733_v48, 0.0  ;;  %v2162_v1 = vld [vmem:[%s2190_s2] ss:$0 sm:$0xff] }
  0x9f   : > { %v703_v3 = vpack.c.bf16 %v683_v62, %v682_v54  ;;  %v1571_v35 = vunpack.i.h.bf16 %v1569_v59  ;;  %v1570_v9 = vunpack.i.l.bf16 %v1569_v59 }
  0xa1   : > { %v674_v46 = vsel %vm663_vm0, %v385_v12, %v1570_v9  ;;  %v675_v14 = vsel %vm663_vm0, %v386_v44, %v1571_v35 }
  0xa2   : > { %v702_v31 = vpack.c.bf16 %v675_v14, %v674_v46 }
  0xa3   : > { %v1574_v25 = vpop.permute.xlu1 %1573 }
  0xa4   : > { %1086 = vmatmul.bf16.vlgmr.msrb.gmra.mxu2 %v698_v52  ;;  %v1576_v48 = vunpack.i.h.bf16 %v1574_v25  ;;  %v1575_v21 = vunpack.i.l.bf16 %v1574_v25 }
  0xa5   : > { %1409 = vmatmul.msk.bf16.vlgmr.msrb.gmra.mxu0 %vm663_vm0, %v700_v0  ;;  %v1595_v0 = vunpack.i.l.bf16 %v1594_v29 }
  0xa6   : > { %v684_v47 = vsel %vm663_vm0, %v1664_v13, %v1575_v21  ;;  %v685_v26 = vsel %vm663_vm0, %v1666_v15, %v1576_v48  ;;  %v1584_v32 = vpop.permute.xlu0 %1583  ;;  %v387_v13 = vsel %vm355_vm10, %v1790_v27, 0.0  ;;  %v388_v15 = vsel %vm356_vm12, %v1835_v60, 0.0 }
  0xa7   : > { %v694_v11 = vsel %vm663_vm0, %v477_v61, %v1595_v0  ;;  %v708_v34 = vpack.c.bf16 %v685_v26, %v684_v47  ;;  %v1586_v23 = vunpack.i.h.bf16 %v1584_v32  ;;  %v1585_v36 = vunpack.i.l.bf16 %v1584_v32 }
  0xa8   : > { %v1407_v4 = vpack.c.bf16 %v1596_v50, %v694_v11  ;;  %v533_v60 = vsel %vm357_vm14, %v1901_v57, 0.0 }
  0xa9   : > { %1125 = vmatmul.bf16.gmra.mxu3 %v709_v19  ;;  %v676_v37 = vsel %vm663_vm0, %v387_v13, %v1585_v36  ;;  %v677_v38 = vsel %vm663_vm0, %v388_v15, %v1586_v23  ;;  %v715_v43 = vpack.c.bf16 0.0, %v533_v60 }
  0xaa   : > { %v707_v28 = vpack.c.bf16 %v677_v38, %v676_v37 }
  0xac   : > { %1404 = vmatmul.msk.bf16.vlgmr.msrb.gmra.mxu1 %vm2057_vm4, %v1403_v51  ;;  %v1589_v40 = vpop.permute.xlu1 %1588 }
  0xad   : > { %v1591_v8 = vunpack.i.h.bf16 %v1589_v40  ;;  %v1590_v42 = vunpack.i.l.bf16 %v1589_v40 }
  0xae   : > { %v1599_v7 = vpop.permute.xlu0 %1598 }
  0xaf   : > { %v686_v2 = vsel %vm663_vm0, %v1668_v16, %v1590_v42  ;;  %v687_v27 = vsel %vm663_vm0, %v1672_v18, %v1591_v8  ;;  %v1601_v45 = vunpack.i.h.bf16 %v1599_v7  ;;  %v1600_v39 = vunpack.i.l.bf16 %v1599_v7 }
  0xb0   : > { %v713_v22 = vpack.c.bf16 %v687_v27, %v686_v2  ;;  %v390_v16 = vsel %vm358_vm3, %v1888_v55, 0.0 }
  0xb1   : > { %v678_v18 = vsel %vm663_vm0, %v389_v49, %v1600_v39  ;;  %v679_v57 = vsel %vm663_vm0, %v390_v16, %v1601_v45 }
  0xb2   : > { %v712_v52 = vpack.c.bf16 %v679_v57, %v678_v18 }
  0xb4   : > { %1091 = vmatmul.bf16.gmra.mxu2 %v703_v3 }
  0xb5   : > { %1410 = vmatmul.msk.bf16.gmra.mxu0 %vm663_vm0, %v705_v5 }
  0xb9   : > { %1408 = vmatmul.msk.bf16.gmra.mxu3 %vm1406_vm7, %v1407_v4 }
  0xbc   : > { %1062 = vmatmul.bf16.gmra.mxu1 %v702_v31 }
  0xc4   : > { %1096 = vmatmul.bf16.gmra.mxu2 %v708_v34 }
  0xc5   : > { %1411 = vmatmul.msk.bf16.gmra.mxu0 %vm663_vm0, %v710_v33 }
  0xcc   : > { %1067 = vmatmul.bf16.gmra.mxu1 %v707_v28 }
  0xd4   : > { %1101 = vmatmul.bf16.gmra.mxu2 %v713_v22 }
  0xd5   : > { %1412 = vmatmul.msk.bf16.gmra.mxu0 %vm663_vm0, %v715_v43 }
  0xdc   : > { %1072 = vmatmul.bf16.gmra.mxu1 %v712_v52 }
 0x109   : > { %v1034_v41 = vpop.f32.mrf.mxu1 }
 0x10a   : > { %v1035_v14 = vadd.f32 %v2162_v1, %v1034_v41 }
 0x10c   : > { %v1116_v56 = vpop.f32.mrf.mxu3 }
 0x111   : > { %v1036_v19 = vpop.f32.mrf.mxu1 }
 0x112   : > { %v1029_v17 = vpop.f32.mrf.mxu0  ;;  %v1037_v33 = vadd.f32 %v2162_v1, %v1036_v19 }
 0x113   : > { %v1030_v58 = vadd.f32 %v2162_v1, %v1029_v17 }
 0x114   : > { %v1118_v62 = vpop.f32.mrf.mxu3 }
 0x117   : > { %v2155_v20 = vpop.f32.mrf.mxu2 }
 0x119   : > { %v1039_v53 = vpop.f32.mrf.mxu1 }
 0x11a   : > { %v1031_v6 = vpop.f32.mrf.mxu0  ;;  %v1040_v8 = vadd.f32 %v2162_v1, %v1039_v53 }
 0x11b   : > { %v1032_v3 = vadd.f32 %v2162_v1, %v1031_v6  ;;  %v1045_v6 = vadd.f32 %v2162_v1, %v2155_v20 }
 0x11c   : > { %v1121_v9 = vpop.f32.mrf.mxu3 }
 0x11f   : > { %v2157_v51 = vpop.f32.mrf.mxu2 }
 0x121   : > { %v1041_v55 = vpop.f32.mrf.mxu1 }
 0x122   : > { %v1145_v10 = vpop.f32.mrf.mxu0  ;;  %v1042_v49 = vadd.f32 %v2162_v1, %v1041_v55 }
 0x124   : > { %v1123_v24 = vpop.f32.mrf.mxu3 }
 0x127   : > { %v1087_v29 = vpop.f32.mrf.mxu2 }
 0x129   : > { %v1058_v54 = vpop.f32.mrf.mxu1 }
 0x12a   : > { %v1059_v63 = vadd.f32 %v1058_v54, %v1030_v58  ;;  %v1147_v0 = vpop.f32.mrf.mxu0 }
 0x12c   : > { %v1088_v59 = vadd.f32 %v1087_v29, %v1059_v63  ;;  %v1126_v40 = vpop.f32.mrf.mxu3 }
 0x12e   : > { %v1117_v50 = vadd.f32 %v1116_v56, %v1088_v59 }
 0x12f   : > { %v1089_v61 = vpop.f32.mrf.mxu2 }
 0x130   : > { %v1146_v44 = vadd.f32 %v1145_v10, %v1117_v50 }
 0x131   : > { %v1060_v5 = vpop.f32.mrf.mxu1 }
 0x132   : > { %v1061_v35 = vadd.f32 %v1060_v5, %v1032_v3  ;;  %v1150_v12 = vpop.f32.mrf.mxu0  ;;  %v1165_v48 = vmax.f32 %v1146_v44, 0.0 }
 0x134   : > { %v1090_v11 = vadd.f32 %v1089_v61, %v1061_v35  ;;  %v1128_v16 = vpop.f32.mrf.mxu3  ;;  %v1047_v61 = vadd.f32 %v2162_v1, %v2157_v51 }
 0x136   : > { %v1119_v4 = vadd.f32 %v1118_v62, %v1090_v11 }
 0x137   : > { %v1092_v46 = vpop.f32.mrf.mxu2 }
 0x138   : > { %v1148_v25 = vadd.f32 %v1147_v0, %v1119_v4 }
 0x139   : > { %v1063_v31 = vpop.f32.mrf.mxu1 }
 0x13a   : > { %v1166_v21 = vmax.f32 %v1148_v25, 0.0  ;;  %v1064_v47 = vadd.f32 %v1063_v31, %v1035_v14  ;;  %v1152_v34 = vpop.f32.mrf.mxu0 }
 0x13c   : > { %v1472_v26 = vpack.c.bf16 %v1166_v21, %v1165_v48  ;;  %v1093_v30 = vadd.f32 %v1092_v46, %v1064_v47  ;;  %v1131_v63 = vpop.f32.mrf.mxu3 }
 0x13e   : > { %1473 = vst [vmem:[%s2172_s24] sm:$0xff] %v1472_v26   ;;  %v1122_v36 = vadd.f32 %v1121_v9, %v1093_v30 }
 0x13f   : > { %v1094_v32 = vpop.f32.mrf.mxu2 }
 0x140   : > { %v1151_v37 = vadd.f32 %v1150_v12, %v1122_v36 }
 0x141   : > { %v1065_v23 = vpop.f32.mrf.mxu1 }
 0x142   : > { %v1066_v13 = vadd.f32 %v1065_v23, %v1037_v33  ;;  %v1155_v2 = vpop.f32.mrf.mxu0  ;;  %v1167_v60 = vmax.f32 %v1151_v37, 0.0 }
 0x144   : > { %v1095_v15 = vadd.f32 %v1094_v32, %v1066_v13  ;;  %v1133_v9 = vpop.f32.mrf.mxu3 }
 0x146   : > { %v1124_v38 = vadd.f32 %v1123_v24, %v1095_v15 }
 0x147   : > { %v1097_v28 = vpop.f32.mrf.mxu2 }
 0x148   : > { %v1153_v42 = vadd.f32 %v1152_v34, %v1124_v38 }
 0x149   : > { %v1068_v27 = vpop.f32.mrf.mxu1 }
 0x14a   : > { %v1168_v7 = vmax.f32 %v1153_v42, 0.0  ;;  %v1069_v22 = vadd.f32 %v1068_v27, %v1040_v8  ;;  %v1157_v41 = vpop.f32.mrf.mxu0 }
 0x14c   : > { %v1477_v43 = vpack.c.bf16 %v1168_v7, %v1167_v60  ;;  %v1098_v45 = vadd.f32 %v1097_v28, %v1069_v22 }
 0x14e   : > { %1492 = vst [vmem:[%s2172_s24 + $0x8] sm:$0xff] %v1477_v43   ;;  %v1127_v57 = vadd.f32 %v1126_v40, %v1098_v45 }
 0x14f   : > { %v1099_v39 = vpop.f32.mrf.mxu2 }
 0x150   : > { %v1156_v17 = vadd.f32 %v1155_v2, %v1127_v57 }
 0x151   : > { %v1070_v18 = vpop.f32.mrf.mxu1 }
 0x152   : > { %v1071_v52 = vadd.f32 %v1070_v18, %v1042_v49  ;;  %v1169_v58 = vmax.f32 %v1156_v17, 0.0  ;;  %v1160_v0 = vpop.f32.mrf.mxu0 }
 0x154   : > { %v1100_v19 = vadd.f32 %v1099_v39, %v1071_v52 }
 0x156   : > { %v1129_v53 = vadd.f32 %v1128_v16, %v1100_v19 }
 0x157   : > { %v1102_v10 = vpop.f32.mrf.mxu2 }
 0x158   : > { %v1158_v56 = vadd.f32 %v1157_v41, %v1129_v53 }
 0x159   : > { %v1073_v29 = vpop.f32.mrf.mxu1 }
 0x15a   : > { %v1170_v54 = vmax.f32 %v1158_v56, 0.0  ;;  %v1074_v62 = vadd.f32 %v1073_v29, %v1045_v6  ;;  %v1162_v44 = vpop.f32.mrf.mxu0 }
 0x15c   : > { %v1482_v55 = vpack.c.bf16 %v1170_v54, %v1169_v58  ;;  %v1103_v59 = vadd.f32 %v1102_v10, %v1074_v62 }
 0x15e   : > { %1493 = vst [vmem:[%s2172_s24 + $0x10] sm:$0xff] %v1482_v55   ;;  %v1132_v5 = vadd.f32 %v1131_v63, %v1103_v59 }
 0x15f   : > { %v1104_v35 = vpop.f32.mrf.mxu2 }
 0x160   : > { %v1161_v11 = vadd.f32 %v1160_v0, %v1132_v5 }
 0x161   : > { %v1075_v3 = vpop.f32.mrf.mxu1 }
 0x162   : > { %v1076_v50 = vadd.f32 %v1075_v3, %v1047_v61  ;;  %v1171_v46 = vmax.f32 %v1161_v11, 0.0 }
 0x164   : > { %v1105_v20 = vadd.f32 %v1104_v35, %v1076_v50 }
 0x166   : > { %v1134_v12 = vadd.f32 %v1133_v9, %v1105_v20 }
 0x168   : > { %v1163_v4 = vadd.f32 %v1162_v44, %v1134_v12 }
 0x16a   : > { %v1172_v14 = vmax.f32 %v1163_v4, 0.0 }
 0x16c   : > { %v1487_v25 = vpack.c.bf16 %v1172_v14, %v1171_v46 }
 0x16e   : > { %1494 = vst [vmem:[%s2172_s24 + $0x18] sm:$0xff] %v1487_v25  }
 0x16f PF: > { %s13_s12 = sadd.s32 1, %s1609_s12  }
 0x170   : > { %p10_p4 = scmp.ge.s32.totalorder %s13_s12, 6  }
 0x172   :  { %12 = sbr.rel (!%p10_p4) target bundleno = 1 (0x1), region = 62 }

// kernel: perceptual_loss.9
= control target key start
LH: loop header
LB: loop body
LE: loop exit
PB: predicated region body
PF: predicated region fallthrough
CT: control target
= control target key end

     0   :  { %s3932_s12 = smov 0   ;;  %s6056_s0 = inlined_call_operand.vmem [shape: bf16[4,256,64], index: 0, kind: input, shape index: {}]   ;;  %s6057_s1 = inlined_call_operand.vmem [shape: bf16[576,64], index: 1, kind: input, shape index: {}]   ;;  %s6058_s2 = inlined_call_operand.vmem [shape: f32[1,64], index: 2, kind: input, shape index: {}]   ;;  %s6059_s3 = inlined_call_operand.vmem [shape: bf16[4,256,64], index: 3, kind: output, shape index: {}]  }
   0x1 LB: > { %s3241_s13 = sadd.s32 4294967295, %s3907_s12   ;;  %p3245_p0 = scmp.ge.s32.totalorder %s3907_s12, 1  ;;  %s3907_s12 = sphi %s3932_s12, %s13_s12  }
   0x2   : > { %p137_p1 = scmp.lt.s32.totalorder %s3907_s12, 5 }
   0x4   : > { %p138_p2 = pnand %p3245_p0, %p137_p1 }
   0x6   : > { %141 = sbr.rel (%p138_p2) target bundleno = 603 (0x25b), region = 32 }
   0xb   : > { %p161_p3 = scmp.lt.s32.totalorder %s3241_s13, 3  ;;  %s3909_s18 = smov 64   ;;  %v6060_v25 = vmov 0.0   ;;  %v236_v27 = vlaneseq }
   0xd   : > { %s6694_s13 = smov (!%p161_p3, %s3241_s13), 3  ;;  %v4016_v29 = vshrl.u32 %v236_v27, 7 }
   0xe   : > { %s3426_s14 = sshll.u32 %s6694_s13, 7 }
   0xf   : > { %s3948_s17 = scalar_lea.vmem %s6056_s0, %s3426_s14  ;;  %v238_v36 = vadd.s32 8, %v4016_v29  ;;  %v269_v37 = vcvt.s32.f32 %v4016_v29  ;;  %v4052_v51 = vadd.s32 16, %v4016_v29  ;;  %v4055_v52 = vadd.s32 24, %v4016_v29  ;;  %s5734_s27 = scalar_lea.vmem %s6059_s3, %s3426_s14 }
  0x10   : > { %v3534_v0 = vld [vmem:[%s3948_s17 + $0x38] sm:$0xff]   ;;  %v3535_v7 = vld [vmem:[%s3948_s17 + $0x40] sm:$0xff]   ;;  %v3536_v28 = vld [vmem:[%s3948_s17 + $0x48] sm:$0xff]   ;;  %vm846_vm0 = vcmp.lt.s32.totalorder %v4016_v29, 7  ;;  %vm6229_vm3 = vcmp.lt.s32.totalorder %v4016_v29, 1 }
  0x11   : > { %v3530_v1 = vld [vmem:[%s3948_s17 + $0x18] sm:$0xff]   ;;  %v3952_v2 = vunpack.c.l.bf16 %v3534_v0  ;;  %v3954_v3 = vunpack.c.h.bf16 %v3534_v0  ;;  %v3978_v12 = vunpack.c.l.bf16 %v3535_v7  ;;  %v3980_v13 = vunpack.c.h.bf16 %v3535_v7  ;;  %v3539_v14 = vld [vmem:[%s3948_s17 + $0x60] sm:$0xff]   ;;  %v3532_v32 = vld [vmem:[%s3948_s17 + $0x28] sm:$0xff]  }
  0x12   : > { %v3956_v4 = vunpack.c.l.bf16 %v3530_v1  ;;  %v3958_v5 = vunpack.c.h.bf16 %v3530_v1  ;;  %v3538_v6 = vld [vmem:[%s3948_s17 + $0x58] sm:$0xff]   ;;  %v3531_v17 = vld [vmem:[%s3948_s17 + $0x20] sm:$0xff]   ;;  %v3995_v19 = vunpack.c.l.bf16 %v3539_v14  ;;  %v3997_v20 = vunpack.c.h.bf16 %v3539_v14  ;;  %v3540_v33 = vld [vmem:[%s3948_s17 + $0x68] sm:$0xff]  }
  0x13   : > { %6295 = vst [vmem:[#allocation2_spill] sm:$0xff] %v3952_v2  ;;  %v3964_v8 = vpack.i.bf16 %v3954_v3, %v3952_v2  ;;  %v3974_v10 = vunpack.c.l.bf16 %v3538_v6  ;;  %v3976_v11 = vunpack.c.h.bf16 %v3538_v6  ;;  %v3985_v15 = vpack.i.bf16 %v3980_v13, %v3978_v12  ;;  %v3465_v18 = vld [vmem:[%s3948_s17] sm:$0xff]   ;;  %v3537_v44 = vld [vmem:[%s3948_s17 + $0x50] sm:$0xff]   ;;  %v3528_v48 = vld [vmem:[%s3948_s17 + $0x8] sm:$0xff]  }
  0x14   : > { %6296 = vst [vmem:[#allocation3_spill] sm:$0xff] %v3954_v3  ;;  %v3968_v9 = vpack.i.bf16 %v3958_v5, %v3956_v4  ;;  %v3999_v21 = vunpack.c.l.bf16 %v3531_v17  ;;  %v4001_v22 = vunpack.c.h.bf16 %v3531_v17  ;;  %v4003_v23 = vunpack.c.l.bf16 %v3465_v18  ;;  %v3529_v57 = vld [vmem:[%s3948_s17 + $0x10] sm:$0xff]  }
  0x15   : > { %6297 = vst [vmem:[#allocation4_spill] sm:$0xff] %v3956_v4  ;;  %3579 = vrot.lane.b32.xlu0 %v3964_v8, %s3909_s18  ;;  %v3989_v16 = vpack.i.bf16 %v3976_v11, %v3974_v10  ;;  %3599 = vrot.lane.b32.xlu2 %v3985_v15, %s3909_s18  ;;  %v4005_v24 = vunpack.c.h.bf16 %v3465_v18  ;;  %v4013_v26 = vpack.i.bf16 %v3997_v20, %v3995_v19  ;;  %v4028_v34 = vunpack.c.l.bf16 %v3536_v28  ;;  %v3541_v62 = vld [vmem:[%s3948_s17 + $0x70] sm:$0xff]  }
  0x16   : > { %6298 = vst [vmem:[#allocation5_spill] sm:$0xff] %v3958_v5  ;;  %3589 = vrot.lane.b32.xlu1 %v3968_v9, %s3909_s18  ;;  %v4020_v30 = vpack.i.bf16 %v4001_v22, %v3999_v21  ;;  %v4030_v35 = vunpack.c.h.bf16 %v3536_v28  ;;  %v270_v38 = vcvt.s32.f32 %v238_v36  ;;  %v301_v39 = vadd.f32 0.5, %v269_v37 }
  0x17   : > { %6299 = vst [vmem:[#allocation6_spill] sm:$0xff] %v3964_v8  ;;  %v3613_v31 = vpack.i.bf16 %v4005_v24, %v4003_v23  ;;  %v4034_v40 = vunpack.c.l.bf16 %v3532_v32  ;;  %v4036_v41 = vunpack.c.h.bf16 %v3532_v32  ;;  %v4038_v42 = vunpack.c.l.bf16 %v3540_v33 }
  0x18   : > { %6300 = vst [vmem:[#allocation7_spill] sm:$0xff] %v3974_v10  ;;  %v4040_v43 = vunpack.c.h.bf16 %v3540_v33  ;;  %v4048_v45 = vpack.i.bf16 %v4030_v35, %v4028_v34  ;;  %v302_v46 = vadd.f32 0.5, %v270_v38  ;;  %v333_v47 = vmul.f32 0.0625, %v301_v39  ;;  %v3435_v33 = vld [vmem:[%s6057_s1 + $0x38] sm:$0xff] }
  0x19   : > { %6301 = vst [vmem:[#allocation8_spill] sm:$0xff] %v3976_v11  ;;  %v4059_v53 = vpack.i.bf16 %v4036_v41, %v4034_v40  ;;  %v4065_v55 = vunpack.c.l.bf16 %v3537_v44  ;;  %v4067_v56 = vunpack.c.h.bf16 %v3537_v44  ;;  %v4072_v58 = vunpack.c.h.bf16 %v3528_v48  ;;  %3543 = vmatpush.bf16.msra.mxu1 %v3435_v33  ;;  %3544 = vmatpush.bf16.msra.mxu2 %v3435_v33 }
  0x1a   : > { %6302 = vst [vmem:[#allocation9_spill] sm:$0xff] %v3978_v12  ;;  %v334_v49 = vmul.f32 0.0625, %v302_v46  ;;  %v365_v50 = vfloor.f32 %v333_v47  ;;  %v4063_v54 = vpack.i.bf16 %v4040_v43, %v4038_v42  ;;  %v6064_v60 = vcvt.s32.f32 %v4052_v51  ;;  %v3533_v46 = vld [vmem:[%s3948_s17 + $0x30] sm:$0xff]   ;;  %2676 = vmatpush.bf16.msra.mxu0 %v3435_v33  ;;  %3545 = vmatpush.bf16.msra.mxu3 %v3435_v33 }
  0x1b   : > { %6303 = vst [vmem:[#allocation10_spill] sm:$0xff] %v3980_v13  ;;  %v6061_v61 = vcvt.s32.f32 %v4055_v52  ;;  %v4077_v63 = vunpack.c.l.bf16 %v3528_v48  ;;  %v4085_v14 = vpack.i.bf16 %v4067_v56, %v4065_v55  ;;  %v4087_v17 = vunpack.c.l.bf16 %v3529_v57 }
  0x1c   : > { %6304 = vst [vmem:[#allocation11_spill] sm:$0xff] %v3985_v15  ;;  %v366_v59 = vfloor.f32 %v334_v49  ;;  %v397_v0 = vmul.f32 16.0, %v365_v50  ;;  %v303_v6 = vadd.f32 0.5, %v6064_v60  ;;  %v4093_v18 = vunpack.c.l.bf16 %v3541_v62  ;;  %v3430_v15 = vld [vmem:[%s6057_s1 + $0x10] sm:$0xff] }
  0x1d   : > { %6305 = vst [vmem:[#allocation12_spill] sm:$0xff] %v3989_v16  ;;  %3584 = vrot.lane.b32.xlu0 %v3989_v16, %s3909_s18  ;;  %3604 = vrot.lane.b32.xlu2 %v4013_v26, %s3909_s18  ;;  %v304_v7 = vadd.f32 0.5, %v6061_v61  ;;  %v4095_v27 = vunpack.c.h.bf16 %v3541_v62  ;;  %v4099_v28 = vpack.i.bf16 %v4072_v58, %v4077_v63  ;;  %v6063_v36 = vrot.slane %v4003_v23, 1 }
  0x1e   : > { %6306 = vst [vmem:[#allocation13_spill] sm:$0xff] %v3995_v19  ;;  %3594 = vrot.lane.b32.xlu1 %v6060_v25, %s3909_s18  ;;  %v398_v1 = vmul.f32 16.0, %v366_v59  ;;  %v335_v32 = vmul.f32 0.0625, %v303_v6  ;;  %v815_v39 = vrot.slane %v4005_v24, 1  ;;  %v6062_v44 = vrot.slane %v4077_v63, 1  ;;  %v3434_v59 = vld [vmem:[%s6057_s1 + $0x30] sm:$0xff] }
  0x1f   : > { %6307 = vst [vmem:[#allocation14_spill] sm:$0xff] %v3997_v20  ;;  %v4110_v47 = vsub.f32 %v269_v37, %v397_v0  ;;  %v336_v49 = vmul.f32 0.0625, %v304_v7  ;;  %v4117_v62 = vunpack.c.h.bf16 %v3529_v57  ;;  %v461_v61 = vrot.slane %v4003_v23, 7  ;;  %3546 = vmatpush.bf16.msra.mxu1 %v3434_v59  ;;  %3547 = vmatpush.bf16.msra.mxu2 %v3434_v59 }
  0x20   : > { %6308 = vst [vmem:[#allocation15_spill] sm:$0xff] %v3999_v21  ;;  %v4112_v48 = vsub.f32 %v270_v38, %v398_v1  ;;  %v367_v50 = vfloor.f32 %v335_v32  ;;  %v4125_v37 = vpack.i.bf16 %v4095_v27, %v4093_v18  ;;  %v4129_v38 = vunpack.c.l.bf16 %v3533_v46  ;;  %2677 = vmatpush.bf16.msra.mxu0 %v3434_v59  ;;  %3548 = vmatpush.bf16.msra.mxu3 %v3434_v59 }
  0x21   : > { %6309 = vst [vmem:[#allocation16_spill] sm:$0xff] %v4001_v22  ;;  %v4131_v0 = vunpack.c.h.bf16 %v3533_v46  ;;  %v368_v57 = vfloor.f32 %v336_v49  ;;  %v4137_v1 = vsel %vm846_vm0, %v815_v39, %v6062_v44  ;;  %v4143_v7 = vsel %vm846_vm0, %v6063_v36, %v815_v39 }
  0x22   : > { %6310 = vst [vmem:[#allocation17_spill] sm:$0xff] %v4003_v23  ;;  %v4149_v32 = vadd.s32 40, %v4016_v29  ;;  %vm879_vm1 = vcmp.lt.f32.partialorder %v4110_v47, 14.5  ;;  %vm880_vm2 = vcmp.lt.f32.partialorder %v4112_v48, 14.5  ;;  %v399_v33 = vmul.f32 16.0, %v367_v50 }
  0x23   : > { %6311 = vst [vmem:[#allocation18_spill] sm:$0xff] %v4005_v24  ;;  %v400_v46 = vmul.f32 16.0, %v368_v57  ;;  %v817_v49 = vrot.slane %v4072_v58, 1  ;;  %v4165_v57 = vpack.i.bf16 %v4131_v0, %v4129_v38  ;;  %v1199_v59 = vsel %vm879_vm1, %v4143_v7, 0.0 }
  0x24   : > { %6312 = vst [vmem:[#allocation19_spill] sm:$0xff] %v4013_v26  ;;  %v274_v36 = vcvt.s32.f32 %v4149_v32  ;;  %v1200_v32 = vsel %vm880_vm2, %v4137_v1, 0.0  ;;  %v4178_v6 = vpack.i.bf16 %v4117_v62, %v4087_v17  ;;  %v463_v60 = vrot.slane %v4077_v63, 7 }
  0x25   : > { %6313 = vst [vmem:[#allocation20_spill] sm:$0xff] %v4028_v34  ;;  %3609 = vrot.lane.b32.xlu0 %v4020_v30, %s3909_s18  ;;  %3619 = vrot.lane.b32.xlu2 %v4048_v45, %s3909_s18  ;;  %v6339_v26 = vcvt.s32.f32 %v4055_v52  ;;  %vm558_vm4 = vcmp.gt.f32.partialorder %v4110_v47, 0.5  ;;  %vm6173_vm5 = vcmp.gt.f32.partialorder %v4112_v48, 0.5  ;;  %v6347_v23 = vrot.slane %v4072_v58, 7 }
  0x26   : > { %6314 = vst [vmem:[#allocation21_spill] sm:$0xff] %v4030_v35  ;;  %3614 = vrot.lane.b32.xlu1 %v3613_v31, %s3909_s18  ;;  %v3542_v31 = vld [vmem:[%s3948_s17 + $0x78] sm:$0xff]   ;;  %v306_v50 = vadd.f32 0.5, %v274_v36 }
  0x27   : > { %6315 = vst [vmem:[#allocation22_spill] sm:$0xff] %v4034_v40  ;;  %v4120_v25 = vunpack.c.h.bf16 %v3542_v31  ;;  %v4146_v31 = vadd.s32 32, %v4016_v29  ;;  %v4187_v16 = vsub.f32 %v6339_v26, %v400_v46 }
  0x28   : > { %6316 = vst [vmem:[#allocation23_spill] sm:$0xff] %v4036_v41  ;;  %v338_v52 = vmul.f32 0.0625, %v306_v50 }
  0x29   : > { %6317 = vst [vmem:[#allocation24_spill] sm:$0xff] %v4038_v42  ;;  %v273_v39 = vcvt.s32.f32 %v4146_v31  ;;  %v3433_v31 = vld [vmem:[%s6057_s1 + $0x28] sm:$0xff]  ;;  %v6344_v46 = vrot.slane %v4120_v25, 7  ;;  %vm6120_vm7 = vcmp.lt.f32.partialorder %v4187_v16, 14.5  ;;  %vm6212_vm9 = vcmp.gt.f32.partialorder %v4187_v16, 0.5 }
  0x2a   : > { %6318 = vst [vmem:[#allocation25_spill] sm:$0xff] %v4040_v43  ;;  %3549 = vmatpush.bf16.msra.mxu1 %v3433_v31  ;;  %3550 = vmatpush.bf16.msra.mxu2 %v3433_v31  ;;  %v370_v50 = vfloor.f32 %v338_v52 }
  0x2b   : > { %6319 = vst [vmem:[#allocation26_spill] sm:$0xff] %v4048_v45  ;;  %v305_v44 = vadd.f32 0.5, %v273_v39  ;;  %v6341_v45 = vrot.slane %v4087_v17, 1  ;;  %2678 = vmatpush.bf16.msra.mxu0 %v3433_v31  ;;  %3551 = vmatpush.bf16.msra.mxu3 %v3433_v31  ;;  %v4218_v31 = vadd.s32 56, %v4016_v29 }
  0x2c   : > { %6320 = vst [vmem:[#allocation27_spill] sm:$0xff] %v4063_v54 }
  0x2d   : > { %6321 = vst [vmem:[#allocation28_spill] sm:$0xff] %v4065_v55  ;;  %3624 = vrot.lane.b32.xlu0 %v4063_v54, %s3909_s18  ;;  %3634 = vrot.lane.b32.xlu2 %v4099_v28, %s3909_s18  ;;  %v337_v26 = vmul.f32 0.0625, %v305_v44 }
  0x2e   : > { %6322 = vst [vmem:[#allocation29_spill] sm:$0xff] %v4067_v56  ;;  %3629 = vrot.lane.b32.xlu1 %v4059_v53, %s3909_s18 }
  0x2f   : > { %6323 = vst [vmem:[#allocation30_spill] sm:$0xff] %v4072_v58  ;;  %v369_v44 = vfloor.f32 %v337_v26 }
  0x30   : > { %6324 = vst [vmem:[#allocation31_spill] sm:$0xff] %v4077_v63 }
  0x31   : > { %6325 = vst [vmem:[#allocation32_spill] sm:$0xff] %v4085_v14  ;;  %v401_v52 = vmul.f32 16.0, %v369_v44 }
  0x32   : > { %6326 = vst [vmem:[#allocation33_spill] sm:$0xff] %v4087_v17 }
  0x33   : > { %6327 = vst [vmem:[#allocation34_spill] sm:$0xff] %v4093_v18 }
  0x34   : > { %6328 = vst [vmem:[#allocation35_spill] sm:$0xff] %v4095_v27 }
  0x35   : > { %6329 = vst [vmem:[#allocation36_spill] sm:$0xff] %v4112_v48  ;;  %3639 = vrot.lane.b32.xlu0 %v4085_v14, %s3909_s18  ;;  %v3432_v14 = vld [vmem:[%s6057_s1 + $0x20] sm:$0xff]  ;;  %3649 = vrot.lane.b32.xlu2 %v4165_v57, %s3909_s18  ;;  %v4262_v48 = vsel %vm6229_vm3, %v463_v60, %v6347_v23 }
  0x36   : > { %6330 = vst [vmem:[#allocation37_spill] sm:$0xff] %v4117_v62  ;;  %3644 = vrot.lane.b32.xlu1 %v4125_v37, %s3909_s18  ;;  %3552 = vmatpush.bf16.msra.mxu1 %v3432_v14 }
  0x37   : > { %6331 = vst [vmem:[#allocation38_spill] sm:$0xff] %v4120_v25  ;;  %3553 = vmatpush.bf16.msra.mxu2 %v3432_v14  ;;  %2679 = vmatpush.bf16.msra.mxu0 %v3432_v14 }
  0x38   : > { %6332 = vst [vmem:[#allocation39_spill] sm:$0xff] %v4125_v37  ;;  %v6337_v37 = vcvt.s32.f32 %v4052_v51  ;;  %v6343_v51 = vrot.slane %v4005_v24, 7  ;;  %3554 = vmatpush.bf16.msra.mxu3 %v3432_v14 }
  0x39   : > { %6333 = vst [vmem:[#allocation40_spill] sm:$0xff] %v4129_v38 }
  0x3a   : > { %6334 = vst [vmem:[#allocation41_spill] sm:$0xff] %v4131_v0  ;;  %v4183_v54 = vsub.f32 %v6337_v37, %v399_v33  ;;  %v4202_v37 = vsel %vm6229_vm3, %v461_v61, %v6343_v51  ;;  %v3658_v33 = vpack.i.bf16 %v1200_v32, %v1199_v59  ;;  %v6345_v59 = vrot.slane %v4077_v63, 1  ;;  %v3431_v32 = vld [vmem:[%s6057_s1 + $0x18] sm:$0xff] }
  0x3b   : > { %6335 = vst [vmem:[#allocation42_spill] sm:$0xff] %v4137_v1  ;;  %v4196_v1 = vsel %vm846_vm0, %v817_v49, %v6341_v45  ;;  %v4214_v45 = vadd.s32 48, %v4016_v29  ;;  %v820_v63 = vrot.slane %v3956_v4, 1  ;;  %3555 = vmatpush.bf16.msra.mxu1 %v3431_v32  ;;  %3556 = vmatpush.bf16.msra.mxu2 %v3431_v32 }
  0x3c   : > { %6336 = vst [vmem:[#allocation43_spill] sm:$0xff] %v4143_v7  ;;  %v4208_v7 = vsel %vm6229_vm3, %v6344_v46, %v461_v61  ;;  %v4224_v61 = vsel %vm846_vm0, %v6345_v59, %v817_v49  ;;  %vm6122_vm6 = vcmp.lt.f32.partialorder %v4183_v54, 14.5  ;;  %v402_v46 = vmul.f32 16.0, %v370_v50  ;;  %2680 = vmatpush.bf16.msra.mxu0 %v3431_v32  ;;  %3557 = vmatpush.bf16.msra.mxu3 %v3431_v32 }
  0x3d   : > { %6338 = vst [vmem:[#allocation44_spill] sm:$0xff] %v4183_v54  ;;  %v275_v51 = vcvt.s32.f32 %v4214_v45  ;;  %v276_v49 = vcvt.s32.f32 %v4218_v31  ;;  %3654 = vrot.lane.b32.xlu0 %v4178_v6, %s3909_s18  ;;  %v1103_v59 = vsel %vm558_vm4, %v4208_v7, 0.0  ;;  %v1104_v45 = vsel %vm6173_vm5, %v4202_v37, 0.0  ;;  %3664 = vrot.lane.b32.xlu2 %v4099_v28, %s3909_s18 }
  0x3e   : > { %6340 = vst [vmem:[#allocation45_spill] sm:$0xff] %v4187_v16  ;;  %3659 = vrot.lane.b32.xlu1 %v3658_v33, %s3909_s18  ;;  %v1201_v14 = vsel %vm6122_vm6, %v4224_v61, 0.0  ;;  %v1202_v44 = vsel %vm6120_vm7, %v4196_v1, 0.0  ;;  %v819_v50 = vrot.slane %v4117_v62, 1  ;;  %v4250_v31 = vsub.f32 %v273_v39, %v401_v52 }
  0x3f   : > { %6342 = vst [vmem:[#allocation46_spill] sm:$0xff] %v4196_v1  ;;  %v307_v26 = vadd.f32 0.5, %v275_v51  ;;  %v308_v33 = vadd.f32 0.5, %v276_v49  ;;  %v4252_v25 = vsub.f32 %v274_v36, %v402_v46  ;;  %v6348_v36 = vrot.slane %v4005_v24, 7  ;;  %3558 = vmatpush.bf16.msra.mxu1 %v3430_v15  ;;  %3559 = vmatpush.bf16.msra.mxu2 %v3430_v15 }
  0x40   : > { %6346 = vst [vmem:[#allocation47_spill] sm:$0xff] %v4224_v61  ;;  %v3668_v52 = vpack.i.bf16 %v1104_v45, %v1103_v59  ;;  %v3673_v46 = vpack.i.bf16 %v1202_v44, %v1201_v14  ;;  %vm560_vm8 = vcmp.gt.f32.partialorder %v4183_v54, 0.5  ;;  %v4276_v23 = vsel %vm846_vm0, %v819_v50, %v820_v63  ;;  %2681 = vmatpush.bf16.msra.mxu0 %v3430_v15 }
  0x41   : > { %v339_v8 = vmul.f32 0.0625, %v307_v26  ;;  %v4268_v39 = vsel %vm6229_vm3, %v6348_v36, %v463_v60  ;;  %v340_v32 = vmul.f32 0.0625, %v308_v33  ;;  %6349 = vst [vmem:[#allocation48_spill] sm:$0xff] %v4276_v23  ;;  %v6350_v24 = vrot.slane %v4087_v17, 1  ;;  %3560 = vmatpush.bf16.msra.mxu3 %v3430_v15 }
  0x42   : > { %vm6112_vm10 = vcmp.lt.f32.partialorder %v4250_v31, 14.5  ;;  %vm6111_vm11 = vcmp.lt.f32.partialorder %v4252_v25, 14.5  ;;  %v465_v28 = vrot.slane %v4087_v17, 7  ;;  %v466_v59 = vrot.slane %v4117_v62, 7 }
  0x43   : > { %v371_v26 = vfloor.f32 %v339_v8  ;;  %v4282_v60 = vsel %vm846_vm0, %v6350_v24, %v819_v50  ;;  %v3429_v8 = vld [vmem:[%s6057_s1 + $0x8] sm:$0xff]  ;;  %v372_v45 = vfloor.f32 %v340_v32  ;;  %v1105_v24 = vsel %vm560_vm8, %v4268_v39, 0.0 }
  0x44   : > { %6351 = vst [vmem:[#allocation49_spill] sm:$0xff] %v4282_v60  ;;  %v1106_v44 = vsel %vm6212_vm9, %v4262_v48, 0.0  ;;  %v821_v50 = vrot.slane %v3958_v5, 1  ;;  %v1203_v33 = vsel %vm6112_vm10, %v4282_v60, 0.0  ;;  %v1204_v15 = vsel %vm6111_vm11, %v4276_v23, 0.0  ;;  %3561 = vmatpush.bf16.msra.mxu1 %v3429_v8  ;;  %3562 = vmatpush.bf16.msra.mxu2 %v3429_v8 }
  0x45   : > { %v403_v14 = vmul.f32 16.0, %v371_v26  ;;  %3669 = vrot.lane.b32.xlu0 %v3668_v52, %s3909_s18  ;;  %v404_v36 = vmul.f32 16.0, %v372_v45  ;;  %v6088_v52 = vrot.slane %v3999_v21, 1  ;;  %2682 = vmatpush.bf16.msra.mxu0 %v3429_v8  ;;  %v3683_v26 = vpack.i.bf16 %v1106_v44, %v1105_v24 }
  0x46   : > { %3674 = vrot.lane.b32.xlu1 %v3673_v46, %s3909_s18  ;;  %3563 = vmatpush.bf16.msra.mxu3 %v3429_v8  ;;  %v3688_v17 = vpack.i.bf16 %v1204_v15, %v1203_v33  ;;  %v4315_v62 = vsel %vm6229_vm3, %v465_v28, %v466_v59  ;;  %v6355_v45 = vrot.slane %v4072_v58, 7  ;;  %v4331_v8 = vsel %vm846_vm0, %v820_v63, %v821_v50 }
  0x47   : > { %v4307_v46 = vsub.f32 %v275_v51, %v403_v14  ;;  %v4309_v32 = vsub.f32 %v276_v49, %v404_v36  ;;  %3679 = vrot.lane.b32.xlu2 %v4178_v6, %s3909_s18  ;;  %6354 = vst [vmem:[#allocation52_spill] sm:$0xff] %v4315_v62  ;;  %v4327_v49 = vsel %vm846_vm0, %v821_v50, %v6088_v52  ;;  %vm6234_vm12 = vcmp.gt.f32.partialorder %v4250_v31, 0.5 }
  0x48   : > { %v4321_v51 = vsel %vm6229_vm3, %v6355_v45, %v465_v28  ;;  %6357 = vst [vmem:[#allocation54_spill] sm:$0xff] %v4327_v49  ;;  %vm6233_vm13 = vcmp.gt.f32.partialorder %v4252_v25, 0.5  ;;  %v467_v24 = vrot.slane %v3956_v4, 7 }
  0x49   : > { %6352 = vst [vmem:[#allocation50_spill] sm:$0xff] %v4307_v46  ;;  %vm6085_vm14 = vcmp.lt.f32.partialorder %v4307_v46, 14.5  ;;  %vm6086_vm15 = vcmp.lt.f32.partialorder %v4309_v32, 14.5  ;;  %v1107_v6 = vsel %vm6234_vm12, %v4321_v51, 0.0  ;;  %v1108_v63 = vsel %vm6233_vm13, %v4315_v62, 0.0 }
  0x4a   : > { %6353 = vst [vmem:[#allocation51_spill] sm:$0xff] %v4309_v32  ;;  %v1205_v28 = vsel %vm6085_vm14, %v4331_v8, 0.0  ;;  %v1206_v14 = vsel %vm6086_vm15, %v4327_v49, 0.0  ;;  %v3698_v44 = vpack.i.bf16 %v1108_v63, %v1107_v6  ;;  %v4361_v15 = vsel %vm6229_vm3, %v466_v59, %v467_v24 }
  0x4b   : > { %6356 = vst [vmem:[#allocation53_spill] sm:$0xff] %v4321_v51  ;;  %v3703_v50 = vpack.i.bf16 %v1206_v14, %v1205_v28  ;;  %vm564_vm14 = vcmp.gt.f32.partialorder %v4307_v46, 0.5  ;;  %vm565_vm15 = vcmp.gt.f32.partialorder %v4309_v32, 0.5  ;;  %v245_v59 = vadd.s32 64, %v4016_v29 }
  0x4c   : > { %6358 = vst [vmem:[#allocation55_spill] sm:$0xff] %v4331_v8  ;;  %v1109_v36 = vsel %vm564_vm14, %v4361_v15, 0.0  ;;  %v246_v6 = vadd.s32 72, %v4016_v29  ;;  %v253_v63 = vadd.s32 128, %v4016_v29  ;;  %v254_v28 = vadd.s32 136, %v4016_v29 }
  0x4d   : > { %3684 = vrot.lane.b32.xlu0 %v3683_v26, %s3909_s18  ;;  %6360 = vst [vmem:[#allocation57_spill] sm:$0xff] %v4361_v15  ;;  %v277_v14 = vcvt.s32.f32 %v245_v59  ;;  %v261_v62 = vadd.s32 192, %v4016_v29  ;;  %v262_v59 = vadd.s32 200, %v4016_v29 }
  0x4e   : > { %3689 = vrot.lane.b32.xlu1 %v3688_v17, %s3909_s18  ;;  %v6087_v17 = vrot.slane %v3958_v5, 7 }
  0x4f   : > { %v293_v46 = vcvt.s32.f32 %v261_v62  ;;  %v294_v51 = vcvt.s32.f32 %v262_v59  ;;  %v3428_v62 = vld [vmem:[%s6057_s1] sm:$0xff]  ;;  %v4437_v59 = vadd.s32 144, %v4016_v29  ;;  %3694 = vrot.lane.b32.xlu2 %v3968_v9, %s3909_s18 }
  0x50   : > { %v4357_v33 = vsel %vm6229_vm3, %v467_v24, %v6087_v17  ;;  %v278_v24 = vcvt.s32.f32 %v246_v6  ;;  %v309_v17 = vadd.f32 0.5, %v277_v14  ;;  %3564 = vmatpush.bf16.msra.mxu1 %v3428_v62  ;;  %3565 = vmatpush.bf16.msra.mxu2 %v3428_v62 }
  0x51   : > { %6359 = vst [vmem:[#allocation56_spill] sm:$0xff] %v4357_v33  ;;  %v1110_v26 = vsel %vm565_vm15, %v4357_v33, 0.0  ;;  %2683 = vmatpush.bf16.msra.mxu0 %v3428_v62  ;;  %3566 = vmatpush.bf16.msra.mxu3 %v3428_v62  ;;  %v4452_v62 = vadd.s32 152, %v4016_v29 }
  0x52   : > { %v3713_v45 = vpack.i.bf16 %v1110_v26, %v1109_v36  ;;  %v310_v52 = vadd.f32 0.5, %v278_v24  ;;  %v341_v8 = vmul.f32 0.0625, %v309_v17 }
  0x54   : > { %v342_v36 = vmul.f32 0.0625, %v310_v52  ;;  %v373_v60 = vfloor.f32 %v341_v8  ;;  %v6114_v8 = vrot.slane %v3954_v3, 7 }
  0x55   : > { %3699 = vrot.lane.b32.xlu0 %v3698_v44, %s3909_s18  ;;  %v285_v44 = vcvt.s32.f32 %v253_v63 }
  0x56   : > { %3704 = vrot.lane.b32.xlu1 %v3703_v50, %s3909_s18  ;;  %v286_v50 = vcvt.s32.f32 %v254_v28  ;;  %v374_v58 = vfloor.f32 %v342_v36  ;;  %v405_v6 = vmul.f32 16.0, %v373_v60  ;;  %v325_v60 = vadd.f32 0.5, %v293_v46 }
  0x57   : > { %v317_v4 = vadd.f32 0.5, %v285_v44  ;;  %v4431_v36 = vadd.s32 80, %v4016_v29  ;;  %3709 = vrot.lane.b32.xlu2 %v4020_v30, %s3909_s18 }
  0x58   : > { %v318_v49 = vadd.f32 0.5, %v286_v50  ;;  %v406_v63 = vmul.f32 16.0, %v374_v58  ;;  %v4380_v27 = vsub.f32 %v277_v14, %v405_v6  ;;  %v4394_v58 = vsel %vm879_vm1, %v4224_v61, 0.0 }
  0x59   : > { %v349_v26 = vmul.f32 0.0625, %v317_v4  ;;  %6365 = vst [vmem:[#allocation62_spill] sm:$0xff] %v4394_v58  ;;  %v483_v61 = vrot.slane %v3974_v10, 7  ;;  %v6126_v58 = vrot.slane %v3976_v11, 7  ;;  %v6381_v10 = vcvt.s32.f32 %v4437_v59 }
  0x5a   : > { %v350_v23 = vmul.f32 0.0625, %v318_v49  ;;  %6361 = vst [vmem:[#allocation58_spill] sm:$0xff] %v4380_v27  ;;  %v4382_v17 = vsub.f32 %v278_v24, %v406_v63  ;;  %v475_v49 = vrot.slane %v3952_v2, 7  ;;  %vm6159_vm11 = vcmp.gt.f32.partialorder %v4380_v27, 0.5 }
  0x5b   : > { %v381_v1 = vfloor.f32 %v349_v26  ;;  %v4422_v47 = vsel %vm6159_vm11, %v4361_v15, 0.0  ;;  %v326_v24 = vadd.f32 0.5, %v294_v51  ;;  %v4434_v26 = vadd.s32 88, %v4016_v29 }
  0x5c   : > { %v382_v32 = vfloor.f32 %v350_v23  ;;  %6362 = vst [vmem:[#allocation59_spill] sm:$0xff] %v4382_v17  ;;  %v6113_v23 = vrot.slane %v4131_v0, 7  ;;  %vm6150_vm10 = vcmp.gt.f32.partialorder %v4382_v17, 0.5  ;;  %v6121_v15 = vrot.slane %v4067_v56, 7 }
  0x5d   : > { %3714 = vrot.lane.b32.xlu0 %v3713_v45, %s3909_s18  ;;  %v413_v28 = vmul.f32 16.0, %v381_v1  ;;  %v4404_v1 = vsel %vm558_vm4, %v4268_v39, 0.0  ;;  %vm6164_vm7 = vcmp.lt.f32.partialorder %v4380_v27, 14.5 }
  0x5e   : > { %v414_v45 = vmul.f32 16.0, %v382_v32  ;;  %6366 = vst [vmem:[#allocation63_spill] sm:$0xff] %v4404_v1  ;;  %v4410_v32 = vsel %vm6229_vm3, %v475_v49, %v6114_v8  ;;  %v4416_v14 = vsel %vm6229_vm3, %v6113_v23, %v475_v49  ;;  %v469_v49 = vrot.slane %v3999_v21, 7 }
  0x5f   : > { %v4384_v4 = vsub.f32 %v285_v44, %v413_v28  ;;  %6367 = vst [vmem:[#allocation64_spill] sm:$0xff] %v4410_v32  ;;  %v357_v44 = vmul.f32 0.0625, %v325_v60  ;;  %v358_v28 = vmul.f32 0.0625, %v326_v24  ;;  %v823_v24 = vrot.slane %v4001_v22, 1  ;;  %3724 = vrot.lane.b32.xlu2 %v4059_v53, %s3909_s18 }
  0x60   : > { %v4386_v52 = vsub.f32 %v286_v50, %v414_v45  ;;  %6368 = vst [vmem:[#allocation65_spill] sm:$0xff] %v4416_v14  ;;  %v4428_v50 = vsel %vm6150_vm10, %v4357_v33, 0.0  ;;  %v4474_v23 = vsel %vm6229_vm3, %v483_v61, %v6126_v58  ;;  %v6377_v58 = vrot.slane %v3958_v5, 7 }
  0x61   : > { %6363 = vst [vmem:[#allocation60_spill] sm:$0xff] %v4384_v4  ;;  %vm6125_vm1 = vcmp.gt.f32.partialorder %v4384_v4, 0.5  ;;  %v389_v45 = vfloor.f32 %v357_v44  ;;  %v390_v8 = vfloor.f32 %v358_v28  ;;  %v6124_v44 = vrot.slane %v4034_v40, 1 }
  0x62   : > { %6364 = vst [vmem:[#allocation61_spill] sm:$0xff] %v4386_v52  ;;  %vm6123_vm4 = vcmp.gt.f32.partialorder %v4386_v52, 0.5  ;;  %v4442_v6 = vsel %vm6125_vm1, %v4416_v14, 0.0  ;;  %v4467_v28 = vsel %vm6229_vm3, %v6121_v15, %v483_v61  ;;  %v3451_v15 = vld [vmem:[%s6057_s1 + $0xb8] sm:$0xff]  ;;  %v319_v4 = vadd.f32 0.5, %v6381_v10 }
  0x63   : > { %v4447_v63 = vsel %vm6123_vm4, %v4410_v32, 0.0  ;;  %v421_v33 = vmul.f32 16.0, %v389_v45  ;;  %v422_v60 = vmul.f32 16.0, %v390_v8  ;;  %6370 = vst [vmem:[#allocation67_spill] sm:$0xff] %v4467_v28  ;;  %v6132_v45 = vrot.slane %v4001_v22, 7  ;;  %2854 = vmatpush.bf16.msrb.mxu2 %v3451_v15  ;;  %v3459_v15 = vld [vmem:[%s6057_s1 + $0xf8] sm:$0xff] }
  0x64   : > { %6371 = vst [vmem:[#allocation68_spill] sm:$0xff] %v4474_v23  ;;  %vm6160_vm4 = vcmp.lt.f32.partialorder %v4382_v17, 14.5  ;;  %v6380_v17 = vcvt.s32.f32 %v4434_v26  ;;  %2943 = vmatpush.bf16.msrb.mxu3 %v3459_v15  ;;  %v264_v15 = vadd.s32 216, %v4016_v29  ;;  %v6382_v10 = vrot.slane %v3954_v3, 7 }
  0x65   : > { %v4461_v52 = vsub.f32 %v293_v46, %v421_v33  ;;  %v4480_v46 = vsel %vm846_vm0, %v823_v24, %v6124_v44  ;;  %v6373_v33 = vrot.slane %v3999_v21, 1  ;;  %v4492_v61 = vsub.f32 %v294_v51, %v422_v60 }
  0x66   : > { %6372 = vst [vmem:[#allocation69_spill] sm:$0xff] %v4480_v46  ;;  %v4511_v51 = vsel %vm6229_vm3, %v469_v49, %v6132_v45  ;;  %v4518_v21 = vsel %vm6229_vm3, %v6377_v58, %v469_v49  ;;  %v3443_v49 = vld [vmem:[%s6057_s1 + $0x78] sm:$0xff]  ;;  %v312_v5 = vadd.f32 0.5, %v6380_v17  ;;  %v3450_v17 = vld [vmem:[%s6057_s1 + $0xb0] sm:$0xff]  ;;  %v296_v1 = vcvt.s32.f32 %v264_v15 }
  0x67   : > { %6369 = vst [vmem:[#allocation66_spill] sm:$0xff] %v4461_v52  ;;  %v4486_v8 = vsel %vm846_vm0, %v6373_v33, %v823_v24  ;;  %vm6170_vm6 = vcmp.gt.f32.partialorder %v4461_v52, 0.5  ;;  %v1208_v33 = vsel %vm6160_vm4, %v4480_v46, 0.0  ;;  %vm6165_vm1 = vcmp.gt.f32.partialorder %v4492_v61, 0.5  ;;  %2765 = vmatpush.bf16.msrb.mxu1 %v3443_v49  ;;  %2855 = vmatpush.bf16.msrb.mxu2 %v3450_v17 }
  0x68   : > { %6374 = vst [vmem:[#allocation70_spill] sm:$0xff] %v4486_v8  ;;  %v1207_v44 = vsel %vm6164_vm7, %v4486_v8, 0.0  ;;  %v4502_v24 = vsel %vm6170_vm6, %v4467_v28, 0.0  ;;  %v1112_v46 = vsel %vm6150_vm10, %v4511_v51, 0.0  ;;  %v4526_v8 = vsel %vm6165_vm1, %v4474_v23, 0.0  ;;  %3739 = vrot.lane.b32.xlu2 %v4165_v57, %s3909_s18 }
  0x69   : > { %6375 = vst [vmem:[#allocation71_spill] sm:$0xff] %v4492_v61  ;;  %v3718_v60 = vpack.i.bf16 %v1208_v33, %v1207_v44  ;;  %v1111_v58 = vsel %vm6159_vm11, %v4518_v21, 0.0  ;;  %v6379_v33 = vcvt.s32.f32 %v4431_v36  ;;  %v288_v52 = vcvt.s32.f32 %v4452_v62 }
  0x6a   : > { %6376 = vst [vmem:[#allocation72_spill] sm:$0xff] %v4511_v51  ;;  %v3728_v61 = vpack.i.bf16 %v1112_v46, %v1111_v58  ;;  %v344_v28 = vmul.f32 0.0625, %v312_v5  ;;  %v263_v62 = vadd.s32 208, %v4016_v29  ;;  %v351_v58 = vmul.f32 0.0625, %v319_v4 }
  0x6b   : > { %6378 = vst [vmem:[#allocation73_spill] sm:$0xff] %v4518_v21  ;;  %v311_v45 = vadd.f32 0.5, %v6379_v33  ;;  %3719 = vrot.lane.b32.xlu1 %v3718_v60, %s3909_s18  ;;  %v477_v33 = vrot.slane %v3978_v12, 7  ;;  %v320_v46 = vadd.f32 0.5, %v288_v52  ;;  %v6161_v60 = vrot.slane %v3980_v13, 7 }
  0x6c   : > { %3729 = vrot.lane.b32.xlu0 %v3728_v61, %s3909_s18  ;;  %v376_v5 = vfloor.f32 %v344_v28  ;;  %vm2127_vm10 = vcmask 523264   ;;  %v295_v27 = vcvt.s32.f32 %v263_v62  ;;  %v383_v4 = vfloor.f32 %v351_v58  ;;  %v3442_v58 = vld [vmem:[%s6057_s1 + $0x70] sm:$0xff] }
  0x6d   : > { %v343_v23 = vmul.f32 0.0625, %v311_v45  ;;  %v4563_v49 = vsel %vm6229_vm3, %v6382_v10, %v477_v33  ;;  %v352_v61 = vmul.f32 0.0625, %v320_v46  ;;  %v4569_v9 = vsel %vm6229_vm3, %v477_v33, %v6161_v60  ;;  %2766 = vmatpush.bf16.msrb.mxu1 %v3442_v58 }
  0x6e   : > { %v408_v28 = vmul.f32 16.0, %v376_v5  ;;  %v4572_v32 = vadd.s32 96, %v4016_v29  ;;  %v327_v10 = vadd.f32 0.5, %v295_v27  ;;  %v328_v12 = vadd.f32 0.5, %v296_v1  ;;  %v3463_v5 = vld [vmem:[%s6057_s1 + $0x118] sm:$0xff] }
  0x6f   : > { %v4539_v44 = vpop.permute.xlu2 %3599  ;;  %v375_v45 = vfloor.f32 %v343_v23  ;;  %v384_v14 = vfloor.f32 %v352_v61  ;;  %v4575_v17 = vadd.s32 104, %v4016_v29  ;;  %v6383_v46 = vcvt.s32.f32 %v4431_v36  ;;  %3036 = vmatpush.bf16.msrb.mxu0 %v3463_v5 }
  0x70   : > { %v6385_v33 = vcvt.s32.f32 %v4434_v26  ;;  %v415_v15 = vmul.f32 16.0, %v383_v4  ;;  %v485_v61 = vrot.slane %v3995_v19, 7  ;;  %v3449_v4 = vld [vmem:[%s6057_s1 + $0xa8] sm:$0xff]  ;;  %v6432_v57 = vrot.slane %v4040_v43, 7 }
  0x71   : > { %v407_v23 = vmul.f32 16.0, %v375_v45  ;;  %v3458_v45 = vld [vmem:[%s6057_s1 + $0xf0] sm:$0xff]  ;;  %v416_v26 = vmul.f32 16.0, %v384_v14  ;;  %v360_v14 = vmul.f32 0.0625, %v328_v12  ;;  %2856 = vmatpush.bf16.msrb.mxu2 %v3449_v4  ;;  %v6175_v12 = vrot.slane %v3997_v20, 7 }
  0x72   : > { %v4583_v62 = vsub.f32 %v6385_v33, %v408_v28  ;;  %v6387_v33 = vcvt.s32.f32 %v4437_v59  ;;  %2944 = vmatpush.bf16.msrb.mxu3 %v3458_v45  ;;  %v6390_v45 = vrot.slane %v3976_v11, 7  ;;  %v6174_v11 = vrot.slane %v4129_v38, 1 }
  0x73   : > { %v4579_v3 = vsub.f32 %v6383_v46, %v407_v23  ;;  %v359_v46 = vmul.f32 0.0625, %v327_v10  ;;  %v4618_v19 = vsub.f32 %v288_v52, %v416_v26  ;;  %v825_v26 = vrot.slane %v4036_v41, 1 }
  0x74   : > { %6386 = vst [vmem:[#allocation75_spill] sm:$0xff] %v4583_v62  ;;  %vm6189_vm4 = vcmp.gt.f32.partialorder %v4583_v62, 0.5  ;;  %v4606_v60 = vsub.f32 %v6387_v33, %v415_v15  ;;  %v392_v15 = vfloor.f32 %v360_v14  ;;  %v4626_v5 = vsel %vm6229_vm3, %v6390_v45, %v485_v61 }
  0x75   : > { %6384 = vst [vmem:[#allocation74_spill] sm:$0xff] %v4579_v3  ;;  %vm6191_vm11 = vcmp.gt.f32.partialorder %v4579_v3, 0.5  ;;  %v4616_v10 = vsel %vm6189_vm4, %v4511_v51, 0.0  ;;  %v391_v59 = vfloor.f32 %v359_v46  ;;  %vm6171_vm1 = vcmp.gt.f32.partialorder %v4618_v19, 0.5 }
  0x76   : > { %6388 = vst [vmem:[#allocation76_spill] sm:$0xff] %v4606_v60  ;;  %v4611_v23 = vsel %vm6191_vm11, %v4518_v21, 0.0  ;;  %vm6172_vm7 = vcmp.gt.f32.partialorder %v4606_v60, 0.5  ;;  %v705_v4 = vsel %vm6171_vm1, %v4569_v9, 0.0  ;;  %v6392_v46 = vunpack.i.l.bf16 %v4539_v44 }
  0x77   : > { %v4594_v36 = vpop.permute.xlu2 %3604  ;;  %6389 = vst [vmem:[#allocation77_spill] sm:$0xff] %v4618_v19  ;;  %v704_v52 = vsel %vm6172_vm7, %v4563_v49, 0.0  ;;  %v423_v58 = vmul.f32 16.0, %v391_v59  ;;  %v424_v14 = vmul.f32 16.0, %v392_v15  ;;  %v4645_v45 = vsel %vm6229_vm3, %v485_v61, %v6175_v12  ;;  %v3457_v15 = vld [vmem:[%s6057_s1 + $0xe8] sm:$0xff] }
  0x78   : > { %v3606_v28 = vunpack.i.l.bf16 %v4594_v36  ;;  %6391 = vst [vmem:[#allocation78_spill] sm:$0xff] %v4626_v5  ;;  %v4639_v33 = vsel %vm2127_vm10, %v704_v52, %v6392_v46  ;;  %v6394_v59 = vunpack.i.h.bf16 %v4539_v44  ;;  %v6397_v61 = vrot.slane %v4034_v40, 1  ;;  %2945 = vmatpush.bf16.msrb.mxu3 %v3457_v15 }
  0x79   : > { %6393 = vst [vmem:[#allocation79_spill] sm:$0xff] %v4645_v45  ;;  %v4652_v21 = vsub.f32 %v295_v27, %v423_v58  ;;  %v4657_v46 = vsub.f32 %v296_v1, %v424_v14  ;;  %vm6209_vm6 = vcmp.lt.f32.partialorder %v4579_v3, 14.5  ;;  %v3441_v27 = vld [vmem:[%s6057_s1 + $0x68] sm:$0xff]  ;;  %v3448_v1 = vld [vmem:[%s6057_s1 + $0xa0] sm:$0xff]  ;;  %vm6208_vm7 = vcmp.lt.f32.partialorder %v4583_v62, 14.5 }
  0x7a   : > { %v4650_v51 = vsel %vm2127_vm10, %v705_v4, %v6394_v59  ;;  %v4666_v44 = vsel %vm846_vm0, %v6397_v61, %v825_v26  ;;  %v4684_v4 = vsel %vm846_vm0, %v825_v26, %v6174_v11  ;;  %v471_v11 = vrot.slane %v4034_v40, 7  ;;  %2767 = vmatpush.bf16.msrb.mxu1 %v3441_v27  ;;  %2857 = vmatpush.bf16.msrb.mxu2 %v3448_v1 }
  0x7b   : > { %6395 = vst [vmem:[#allocation80_spill] sm:$0xff] %v4652_v21  ;;  %vm6211_vm1 = vcmp.gt.f32.partialorder %v4652_v21, 0.5  ;;  %v1209_v14 = vsel %vm6209_vm6, %v4666_v44, 0.0  ;;  %vm6210_vm5 = vcmp.gt.f32.partialorder %v4657_v46, 0.5  ;;  %v1210_v26 = vsel %vm6208_vm7, %v4684_v4, 0.0 }
  0x7c   : > { %6396 = vst [vmem:[#allocation81_spill] sm:$0xff] %v4657_v46  ;;  %v712_v30 = vsel %vm6211_vm1, %v4626_v5, 0.0  ;;  %v713_v60 = vsel %vm6210_vm5, %v4645_v45, 0.0  ;;  %v3733_v15 = vpack.i.bf16 %v1210_v26, %v1209_v14  ;;  %v6190_v5 = vrot.slane %v4036_v41, 7 }
  0x7d   : > { %6398 = vst [vmem:[#allocation82_spill] sm:$0xff] %v4666_v44  ;;  %v4702_v21 = vsel %vm2127_vm10, %v712_v30, %v3606_v28  ;;  %v6400_v28 = vunpack.i.h.bf16 %v4594_v36  ;;  %v281_v26 = vcvt.s32.f32 %v4572_v32 }
  0x7e   : > { %6399 = vst [vmem:[#allocation83_spill] sm:$0xff] %v4684_v4  ;;  %3734 = vrot.lane.b32.xlu1 %v3733_v15, %s3909_s18  ;;  %v282_v15 = vcvt.s32.f32 %v4575_v17 }
  0x7f   : > { %v4672_v58 = vpop.permute.xlu2 %3619  ;;  %v4716_v14 = vsel %vm2127_vm10, %v713_v60, %v6400_v28  ;;  %v4739_v60 = vsel %vm560_vm8, %v4208_v7, 0.0  ;;  %v3456_v7 = vld [vmem:[%s6057_s1 + $0xe0] sm:$0xff]  ;;  %v4776_v28 = vadd.s32 168, %v4016_v29 }
  0x80   : > { %2946 = vmatpush.bf16.msrb.mxu3 %v3456_v7 }
  0x87   : > { %v3580_v59 = vpop.permute.xlu0 %3579 }
  0x88   : > { %v3590_v61 = vpop.permute.xlu1 %3589  ;;  %v3582_v12 = vunpack.i.h.bf16 %v3580_v59  ;;  %v3581_v52 = vunpack.i.l.bf16 %v3580_v59 }
  0x89   : > { %v3592_v19 = vunpack.i.h.bf16 %v3590_v61  ;;  %v3591_v44 = vunpack.i.l.bf16 %v3590_v61 }
  0x8a   : > { %v2144_v59 = vsel %vm2127_vm10, %v4442_v6, %v3581_v52  ;;  %v2145_v1 = vsel %vm2127_vm10, %v4447_v63, %v3582_v12  ;;  %v6404_v12 = vmov 0  ;;  %v313_v52 = vadd.f32 0.5, %v281_v26 }
  0x8b   : > { %v2136_v4 = vsel %vm2127_vm10, %v4422_v47, %v3591_v44  ;;  %v2137_v27 = vsel %vm2127_vm10, %v4428_v50, %v3592_v19  ;;  %v2296_v40 = vpack.c.bf16 %v2145_v1, %v2144_v59  ;;  %v4723_v19 = vsel %vm6229_vm3, %v471_v11, %v6190_v5  ;;  %v3440_v44 = vld [vmem:[%s6057_s1 + $0x60] sm:$0xff]  ;;  %v3447_v59 = vld [vmem:[%s6057_s1 + $0x98] sm:$0xff] }
  0x8c   : > { %v2276_v61 = vpack.c.bf16 %v2137_v27, %v2136_v4  ;;  %v6401_v50 = vrot.slane %v4001_v22, 7  ;;  %v1114_v63 = vsel %vm6189_vm4, %v4723_v19, 0.0  ;;  %v4760_v4 = vpop.permute.xlu2 %3634  ;;  %vm4763_vm4 = vmneg %vm2127_vm10  ;;  %v4770_v27 = vadd.s32 160, %v4016_v29  ;;  %2768 = vmatpush.bf16.msrb.mxu1 %v3440_v44  ;;  %2858 = vmatpush.bf16.msrb.mxu2 %v3447_v59 }
  0x8d   : > { %2724 = vmatmul.bf16.vlgmr.msra.gmra.mxu2 %v2296_v40  ;;  %v3462_v40 = vld [vmem:[%s6057_s1 + $0x110] sm:$0xff]  ;;  %v345_v62 = vmul.f32 0.0625, %v313_v52  ;;  %v4813_v59 = vadd.s32 224, %v4016_v29 }
  0x8e   : > { %v4731_v6 = vsel %vm6229_vm3, %v6401_v50, %v471_v11  ;;  %2704 = vmatmul.bf16.vlgmr.msra.gmra.mxu1 %v2276_v61  ;;  %v4747_v11 = vsel %vm6212_vm9, %v4202_v37, 0.0  ;;  %v479_v50 = vrot.slane %v4028_v34, 7  ;;  %3037 = vmatpush.bf16.msrb.mxu0 %v3462_v40  ;;  %v289_v7 = vcvt.s32.f32 %v4770_v27 }
  0x8f   : > { %v1113_v36 = vsel %vm6191_vm11, %v4731_v6, 0.0  ;;  %v3585_v1 = vpop.permute.xlu0 %3584  ;;  %vm4785_vm11 = vmpackc.low %vm4763_vm4, %vm4763_vm4  ;;  %v6196_v40 = vcvt.s32.f32 %v4776_v28  ;;  %v6407_v37 = vrot.slane %v4030_v35, 7  ;;  %v377_v52 = vfloor.f32 %v345_v62 }
  0x90   : > { %v3743_v30 = vpack.i.bf16 %v1114_v63, %v1113_v36  ;;  %v3595_v61 = vpop.permute.xlu1 %3594  ;;  %v3587_v17 = vunpack.i.h.bf16 %v3585_v1  ;;  %v3586_v36 = vunpack.i.l.bf16 %v3585_v1  ;;  %v6405_v12 = vsel %vm4785_vm11, 4294967295, %v6404_v12 }
  0x91   : > { %v3597_v5 = vunpack.i.h.bf16 %v3595_v61  ;;  %v3596_v47 = vunpack.i.l.bf16 %v3595_v61  ;;  %6406 = vst [vmem:[#allocation84_spill] sm:$0xff] %v6405_v12  ;;  %v314_v63 = vadd.f32 0.5, %v282_v15  ;;  %v321_v27 = vadd.f32 0.5, %v289_v7 }
  0x92   : > { %3744 = vrot.lane.b32.xlu0 %v3743_v30, %s3909_s18  ;;  %v2152_v61 = vsel %vm2127_vm10, %v4502_v24, %v3586_v36  ;;  %v2153_v44 = vsel %vm2127_vm10, %v4526_v8, %v3587_v17  ;;  %v4799_v30 = vsel %vm6229_vm3, %v479_v50, %v6407_v37  ;;  %v6408_v24 = vrot.slane %v3980_v13, 7 }
  0x93   : > { %v3397_v1 = vpack.c.bf16 %v3597_v5, %v3596_v47  ;;  %v2316_v32 = vpack.c.bf16 %v2153_v44, %v2152_v61  ;;  %v346_v3 = vmul.f32 0.0625, %v314_v63  ;;  %v322_v5 = vadd.f32 0.5, %v6196_v40  ;;  %v3446_v61 = vld [vmem:[%s6057_s1 + $0x90] sm:$0xff] }
  0x94   : > { %v4809_v8 = vsel %vm6229_vm3, %v6408_v24, %v479_v50  ;;  %v353_v17 = vmul.f32 0.0625, %v321_v27  ;;  %v4816_v36 = vadd.s32 232, %v4016_v29  ;;  %v3439_v50 = vld [vmem:[%s6057_s1 + $0x58] sm:$0xff]  ;;  %v409_v24 = vmul.f32 16.0, %v377_v52  ;;  %2859 = vmatpush.bf16.msrb.mxu2 %v3446_v61 }
  0x95   : > { %3398 = vmatmul.msk.bf16.vlgmr.msra.gmra.mxu0 %vm4785_vm11, %v3397_v1  ;;  %2744 = vmatmul.bf16.vlgmr.msra.gmra.mxu3 %v2316_v32  ;;  %v378_v63 = vfloor.f32 %v346_v3  ;;  %v3455_v1 = vld [vmem:[%s6057_s1 + $0xd8] sm:$0xff]  ;;  %v354_v44 = vmul.f32 0.0625, %v322_v5  ;;  %v487_v3 = vrot.slane %v4038_v42, 7 }
  0x96   : > { %v385_v40 = vfloor.f32 %v353_v17  ;;  %v298_v22 = vcvt.s32.f32 %v4816_v36  ;;  %2947 = vmatpush.bf16.msrb.mxu3 %v3455_v1  ;;  %2769 = vmatpush.bf16.msrb.mxu1 %v3439_v50  ;;  %v4831_v5 = vsub.f32 %v281_v26, %v409_v24  ;;  %v3461_v24 = vld [vmem:[%s6057_s1 + $0x108] sm:$0xff] }
  0x97   : > { %v3610_v37 = vpop.permute.xlu0 %3609  ;;  %v410_v47 = vmul.f32 16.0, %v378_v63  ;;  %v386_v42 = vfloor.f32 %v354_v44  ;;  %3038 = vmatpush.bf16.msrb.mxu0 %v3461_v24  ;;  %v6423_v24 = vcvt.s32.f32 %v4813_v59 }
  0x98   : > { %v3615_v27 = vpop.permute.xlu1 %3614  ;;  %v3612_v46 = vunpack.i.h.bf16 %v3610_v37  ;;  %v3611_v45 = vunpack.i.l.bf16 %v3610_v37  ;;  %6409 = vst [vmem:[#allocation85_spill] sm:$0xff] %v4831_v5  ;;  %v417_v32 = vmul.f32 16.0, %v385_v40  ;;  %vm6228_vm4 = vcmp.gt.f32.partialorder %v4831_v5, 0.5 }
  0x99   : > { %v3617_v16 = vunpack.i.h.bf16 %v3615_v27  ;;  %v3616_v54 = vunpack.i.l.bf16 %v3615_v27  ;;  %v4833_v62 = vsub.f32 %v282_v15, %v410_v47  ;;  %v698_v26 = vsel %vm6228_vm4, %v4731_v6, 0.0 }
  0x9a   : > { %v2138_v52 = vsel %vm2127_vm10, %v4611_v23, %v3611_v45  ;;  %v2139_v63 = vsel %vm2127_vm10, %v4616_v10, %v3612_v46  ;;  %v418_v10 = vmul.f32 16.0, %v386_v42  ;;  %v4851_v45 = vsub.f32 %v289_v7, %v417_v32 }
  0x9b   : > { %6410 = vst [vmem:[#allocation86_spill] sm:$0xff] %v4833_v62  ;;  %v2130_v17 = vsel %vm2127_vm10, %v4739_v60, %v3616_v54  ;;  %v2131_v1 = vsel %vm2127_vm10, %v4747_v11, %v3617_v16  ;;  %v2281_v50 = vpack.c.bf16 %v2139_v63, %v2138_v52  ;;  %vm6227_vm7 = vcmp.gt.f32.partialorder %v4833_v62, 0.5 }
  0x9c   : > { %v2261_v61 = vpack.c.bf16 %v2131_v1, %v2130_v17  ;;  %v699_v23 = vsel %vm6227_vm7, %v4723_v19, 0.0  ;;  %v6411_v16 = vpack.c.bf16 %v4650_v51, %v4639_v33  ;;  %v6412_v54 = vcvt.s32.f32 %v4813_v59 }
  0x9d   : > { %v330_v60 = vadd.f32 0.5, %v298_v22  ;;  %v6413_v11 = vrot.slane %v4040_v43, 7  ;;  %v6414_v42 = vrot.slane %v3997_v20, 7  ;;  %v6415_v51 = vcvt.s32.f32 %v4776_v28  ;;  %v3454_v28 = vld [vmem:[%s6057_s1 + $0xd0] sm:$0xff] }
  0x9e   : > { %2709 = vmatmul.bf16.gmra.mxu1 %v2281_v50  ;;  %2729 = vmatmul.bf16.gmra.mxu2 %v6411_v16  ;;  %v329_v46 = vadd.f32 0.5, %v6412_v54  ;;  %vm6261_vm6 = vcmp.gt.f32.partialorder %v4851_v45, 0.5  ;;  %v827_v40 = vrot.slane %v4131_v0, 1  ;;  %v6417_v17 = vunpack.i.l.bf16 %v4672_v58  ;;  %v3438_v50 = vld [vmem:[%s6057_s1 + $0x50] sm:$0xff] }
  0x9f   : > { %v4864_v15 = vsel %vm6229_vm3, %v487_v3, %v6413_v11  ;;  %v4870_v7 = vsel %vm6229_vm3, %v6414_v42, %v487_v3  ;;  %v4874_v33 = vsub.f32 %v6415_v51, %v418_v10  ;;  %v706_v44 = vsel %vm6261_vm6, %v4809_v8, 0.0  ;;  %v4881_v32 = vpop.permute.xlu0 %3624  ;;  %v3445_v10 = vld [vmem:[%s6057_s1 + $0x88] sm:$0xff]  ;;  %2948 = vmatpush.bf16.msrb.mxu3 %v3454_v28  ;;  %2770 = vmatpush.bf16.msrb.mxu1 %v3438_v50 }
  0xa0   : > { %v3630_v47 = vpop.permute.xlu1 %3629  ;;  %v361_v37 = vmul.f32 0.0625, %v329_v46  ;;  %v362_v27 = vmul.f32 0.0625, %v330_v60  ;;  %v6215_v3 = vrot.slane %v3952_v2, 1  ;;  %v4894_v1 = vsel %vm2127_vm10, %v706_v44, %v6417_v17  ;;  %2860 = vmatpush.bf16.msrb.mxu2 %v3445_v10  ;;  %v3453_v44 = vld [vmem:[%s6057_s1 + $0xc8] sm:$0xff] }
  0xa1   : > { %6416 = vst [vmem:[#allocation87_spill] sm:$0xff] %v4874_v33  ;;  %v3632_v52 = vunpack.i.h.bf16 %v3630_v47  ;;  %v3631_v63 = vunpack.i.l.bf16 %v3630_v47  ;;  %vm6259_vm5 = vcmp.gt.f32.partialorder %v4874_v33, 0.5  ;;  %v3627_v54 = vunpack.i.h.bf16 %v4881_v32 }
  0xa2   : > { %v707_v16 = vsel %vm6259_vm5, %v4799_v30, 0.0  ;;  %v3626_v46 = vunpack.i.l.bf16 %v4881_v32  ;;  %v393_v60 = vfloor.f32 %v361_v37  ;;  %v6418_v42 = vunpack.i.h.bf16 %v4672_v58 }
  0xa3   : > { %v2140_v53 = vsel %vm2127_vm10, %v698_v26, %v3631_v63  ;;  %v2141_v11 = vsel %vm2127_vm10, %v699_v23, %v3632_v52  ;;  %v394_v47 = vfloor.f32 %v362_v27  ;;  %v4922_v26 = vsel %vm846_vm0, %v827_v40, %v6215_v3  ;;  %2949 = vmatpush.bf16.msrb.mxu3 %v3453_v44 }
  0xa4   : > { %v2149_v51 = vsel %vm2127_vm10, %v707_v16, %v6418_v42  ;;  %v2286_v17 = vpack.c.bf16 %v2141_v11, %v2140_v53  ;;  %v425_v37 = vmul.f32 16.0, %v393_v60  ;;  %6419 = vst [vmem:[#allocation88_spill] sm:$0xff] %v4922_v26  ;;  %v6420_v23 = vrot.slane %v4129_v38, 1  ;;  %v3436_v42 = vld [vmem:[%s6057_s1 + $0x40] sm:$0xff] }
  0xa5   : > { %v2306_v32 = vpack.c.bf16 %v2149_v51, %v4894_v1  ;;  %2689 = vmatmul.bf16.gmra.mxu0 %v2261_v61  ;;  %v426_v58 = vmul.f32 16.0, %v394_v47  ;;  %vm6214_vm1 = vcmp.lt.f32.partialorder %v4831_v5, 14.5  ;;  %vm6213_vm9 = vcmp.lt.f32.partialorder %v4833_v62, 14.5  ;;  %v3437_v1 = vld [vmem:[%s6057_s1 + $0x48] sm:$0xff] }
  0xa6   : > { %v4928_v27 = vsel %vm846_vm0, %v6420_v23, %v827_v40  ;;  %v6422_v28 = vpack.c.bf16 %v4716_v14, %v4702_v21  ;;  %v4937_v52 = vsub.f32 %v6423_v24, %v425_v37  ;;  %v1212_v40 = vsel %vm6213_vm9, %v4922_v26, 0.0  ;;  %v3444_v21 = vld [vmem:[%s6057_s1 + $0x80] sm:$0xff]  ;;  %2771 = vmatpush.bf16.msrb.mxu1 %v3437_v1  ;;  %v4996_v37 = vpop.permute.xlu2 %3649  ;;  %v6431_v5 = vld [vmem:[#allocation35_spill] sm:$0xff] }
  0xa7   : > { %6421 = vst [vmem:[#allocation89_spill] sm:$0xff] %v4928_v27  ;;  %v1211_v61 = vsel %vm6214_vm1, %v4928_v27, 0.0  ;;  %v473_v63 = vrot.slane %v4129_v38, 7  ;;  %v4954_v14 = vsub.f32 %v298_v22, %v426_v58  ;;  %v690_v50 = vsel %vm6234_vm12, %v4268_v39, 0.0  ;;  %v4980_v11 = vpop.permute.xlu0 %3639  ;;  %2861 = vmatpush.bf16.msrb.mxu2 %v3444_v21 }
  0xa8   : > { %2749 = vmatmul.bf16.gmra.mxu3 %v6422_v28  ;;  %v3748_v59 = vpack.i.bf16 %v1212_v40, %v1211_v61  ;;  %v691_v10 = vsel %vm6233_vm13, %v4262_v48, 0.0  ;;  %vm6232_vm9 = vcmp.gt.f32.partialorder %v4937_v52, 0.5  ;;  %v6424_v16 = vrot.slane %v4131_v0, 7 }
  0xa9   : > { %v6425_v22 = vrot.slane %v4036_v41, 7  ;;  %v6426_v39 = vunpack.i.l.bf16 %v4760_v4  ;;  %vm6230_vm1 = vcmp.gt.f32.partialorder %v4954_v14, 0.5  ;;  %v714_v51 = vsel %vm6232_vm9, %v4870_v7, 0.0  ;;  %v6437_v41 = vld [vmem:[#allocation9_spill] sm:$0xff] }
  0xaa   : > { %v4967_v60 = vsel %vm6229_vm3, %v473_v63, %v6424_v16  ;;  %3749 = vrot.lane.b32.xlu1 %v3748_v59, %s3909_s18  ;;  %v715_v58 = vsel %vm6230_vm1, %v4864_v15, 0.0  ;;  %v2156_v23 = vsel %vm2127_vm10, %v714_v51, %v3626_v46  ;;  %v6427_v24 = vunpack.i.h.bf16 %v4760_v4  ;;  %v5009_v59 = vpop.permute.xlu1 %3644  ;;  %2772 = vmatpush.bf16.msrb.mxu1 %v3436_v42 }
  0xab   : > { %v4973_v36 = vsel %vm6229_vm3, %v6425_v22, %v473_v63  ;;  %v4978_v53 = vsel %vm2127_vm10, %v690_v50, %v6426_v39  ;;  %v1116_v44 = vsel %vm6227_vm7, %v4967_v60, 0.0  ;;  %v2157_v40 = vsel %vm2127_vm10, %v715_v58, %v3627_v54 }
  0xac   : > { %v1115_v47 = vsel %vm6228_vm4, %v4973_v36, 0.0  ;;  %v2133_v61 = vsel %vm2127_vm10, %v691_v10, %v6427_v24  ;;  %v2326_v50 = vpack.c.bf16 %v2157_v40, %v2156_v23  ;;  %v251_v4 = vadd.s32 112, %v4016_v29 }
  0xad   : > { %v3758_v28 = vpack.i.bf16 %v1116_v44, %v1115_v47  ;;  %v2266_v63 = vpack.c.bf16 %v2133_v61, %v4978_v53  ;;  %v252_v54 = vadd.s32 120, %v4016_v29  ;;  %v259_v10 = vadd.s32 176, %v4016_v29 }
  0xae   : > { %v260_v22 = vadd.s32 184, %v4016_v29  ;;  %v481_v39 = vrot.slane %v4065_v55, 7  ;;  %2714 = vmatmul.bf16.gmra.mxu1 %v2286_v17  ;;  %2734 = vmatmul.bf16.gmra.mxu2 %v2306_v32  ;;  %v283_v53 = vcvt.s32.f32 %v251_v4  ;;  %v6428_v42 = vrot.slane %v4067_v56, 7 }
  0xaf   : > { %3759 = vrot.lane.b32.xlu0 %v3758_v28, %s3909_s18  ;;  %v284_v44 = vcvt.s32.f32 %v252_v54  ;;  %v291_v58 = vcvt.s32.f32 %v259_v10  ;;  %v6430_v61 = vrot.slane %v4030_v35, 7  ;;  %v5033_v32 = vpop.permute.xlu0 %3654  ;;  %v267_v40 = vadd.s32 240, %v4016_v29  ;;  %v3452_v54 = vld [vmem:[%s6057_s1 + $0xc0] sm:$0xff] }
  0xb0   : > { %v292_v23 = vcvt.s32.f32 %v260_v22  ;;  %v5025_v28 = vsel %vm6229_vm3, %v481_v39, %v6428_v42  ;;  %v315_v24 = vadd.f32 0.5, %v283_v53  ;;  %v268_v4 = vadd.s32 248, %v4016_v29  ;;  %v3460_v10 = vld [vmem:[%s6057_s1 + $0x100] sm:$0xff]  ;;  %2950 = vmatpush.bf16.msrb.mxu3 %v3452_v54 }
  0xb1   : > { %6429 = vst [vmem:[#allocation90_spill] sm:$0xff] %v5025_v28  ;;  %v5031_v17 = vsel %vm6229_vm3, %v6430_v61, %v481_v39  ;;  %v316_v22 = vadd.f32 0.5, %v284_v44  ;;  %v323_v39 = vadd.f32 0.5, %v291_v58  ;;  %v299_v47 = vcvt.s32.f32 %v267_v40  ;;  %3039 = vmatpush.bf16.msrb.mxu0 %v3460_v10 }
  0xb2   : > { %v324_v42 = vadd.f32 0.5, %v292_v23  ;;  %v347_v51 = vmul.f32 0.0625, %v315_v24  ;;  %v300_v1 = vcvt.s32.f32 %v268_v4  ;;  %v489_v3 = vrot.slane %v4093_v18, 7 }
  0xb3   : > { %v348_v21 = vmul.f32 0.0625, %v316_v22  ;;  %v355_v46 = vmul.f32 0.0625, %v323_v39  ;;  %v331_v38 = vadd.f32 0.5, %v299_v47  ;;  %v6231_v26 = vrot.slane %v6431_v5, 7 }
  0xb4   : > { %v356_v16 = vmul.f32 0.0625, %v324_v42  ;;  %v379_v0 = vfloor.f32 %v347_v51  ;;  %v332_v62 = vadd.f32 0.5, %v300_v1  ;;  %v5053_v40 = vsel %vm6229_vm3, %v6432_v57, %v489_v3 }
  0xb5   : > { %2694 = vmatmul.bf16.gmra.mxu0 %v2266_v63  ;;  %v380_v27 = vfloor.f32 %v348_v21  ;;  %v387_v61 = vfloor.f32 %v355_v46  ;;  %6433 = vst [vmem:[#allocation35_spill] sm:$0xff] %v5053_v40  ;;  %v363_v54 = vmul.f32 0.0625, %v331_v38  ;;  %v5059_v51 = vsel %vm6229_vm3, %v489_v3, %v6231_v26 }
  0xb6   : > { %v388_v24 = vfloor.f32 %v356_v16  ;;  %v411_v4 = vmul.f32 16.0, %v379_v0  ;;  %v364_v10 = vmul.f32 0.0625, %v332_v62  ;;  %6434 = vst [vmem:[#allocation91_spill] sm:$0xff] %v5059_v51  ;;  %v6435_v16 = vld [vmem:[#allocation3_spill] sm:$0xff]  ;;  %v6441_v3 = vrot.slane %v3952_v2, 1 }
  0xb7   : > { %v412_v63 = vmul.f32 16.0, %v380_v27  ;;  %v419_v21 = vmul.f32 16.0, %v387_v61  ;;  %v829_v22 = vrot.slane %v6435_v16, 1  ;;  %v395_v42 = vfloor.f32 %v363_v54  ;;  %v6454_v16 = vld [vmem:[#allocation52_spill] sm:$0xff]  ;;  %v6455_v2 = vld [vmem:[#allocation51_spill] sm:$0xff] }
  0xb8   : > { %2754 = vmatmul.bf16.gmra.mxu3 %v2326_v50  ;;  %v420_v46 = vmul.f32 16.0, %v388_v24  ;;  %v5062_v39 = vsub.f32 %v283_v53, %v411_v4  ;;  %v396_v57 = vfloor.f32 %v364_v10  ;;  %v6236_v50 = vrot.slane %v6437_v41, 1 }
  0xb9   : > { %v5065_v0 = vsub.f32 %v284_v44, %v412_v63  ;;  %v5067_v38 = vsub.f32 %v291_v58, %v419_v21  ;;  %v5075_v27 = vsel %vm846_vm0, %v6441_v3, %v829_v22  ;;  %v427_v53 = vmul.f32 16.0, %v395_v42 }
  0xba   : > { %6436 = vst [vmem:[#allocation92_spill] sm:$0xff] %v5062_v39  ;;  %v5069_v62 = vsub.f32 %v292_v23, %v420_v46  ;;  %vm6247_vm7 = vcmp.gt.f32.partialorder %v5062_v39, 0.5  ;;  %v428_v61 = vmul.f32 16.0, %v396_v57  ;;  %v5082_v44 = vsel %vm846_vm0, %v829_v22, %v6236_v50 }
  0xbb   : > { %6438 = vst [vmem:[#allocation93_spill] sm:$0xff] %v5065_v0  ;;  %vm6246_vm4 = vcmp.gt.f32.partialorder %v5065_v0, 0.5  ;;  %v700_v58 = vsel %vm6247_vm7, %v4973_v36, 0.0  ;;  %vm6273_vm3 = vcmp.gt.f32.partialorder %v5067_v38, 0.5  ;;  %v6444_v24 = vunpack.i.l.bf16 %v4996_v37 }
  0xbc   : > { %6439 = vst [vmem:[#allocation94_spill] sm:$0xff] %v5067_v38  ;;  %vm6235_vm1 = vcmp.gt.f32.partialorder %v5069_v62, 0.5  ;;  %v701_v23 = vsel %vm6246_vm4, %v4967_v60, 0.0  ;;  %v708_v54 = vsel %vm6273_vm3, %v5031_v17, 0.0  ;;  %v6445_v63 = vunpack.i.h.bf16 %v4996_v37 }
  0xbd   : > { %6440 = vst [vmem:[#allocation95_spill] sm:$0xff] %v5069_v62  ;;  %v2142_v4 = vsel %vm2127_vm10, %v700_v58, %v6444_v24  ;;  %v709_v10 = vsel %vm6235_vm1, %v5025_v28, 0.0  ;;  %v6446_v46 = vunpack.i.l.bf16 %v4980_v11  ;;  %v6447_v42 = vunpack.i.h.bf16 %v4980_v11 }
  0xbe   : > { %6442 = vst [vmem:[#allocation96_spill] sm:$0xff] %v5075_v27  ;;  %v2143_v21 = vsel %vm2127_vm10, %v701_v23, %v6445_v63  ;;  %v5111_v3 = vsub.f32 %v299_v47, %v427_v53  ;;  %v5113_v26 = vsub.f32 %v300_v1, %v428_v61  ;;  %vm893_vm9 = vcmp.lt.f32.partialorder %v5062_v39, 14.5  ;;  %v6448_v23 = vld [vmem:[#allocation65_spill] sm:$0xff]  ;;  %v3660_v47 = vpop.permute.xlu1 %3659  ;;  %v6449_v61 = vld [vmem:[#allocation64_spill] sm:$0xff] }
  0xbf   : > { %6443 = vst [vmem:[#allocation97_spill] sm:$0xff] %v5082_v44  ;;  %v2150_v22 = vsel %vm2127_vm10, %v708_v54, %v6446_v46  ;;  %v2151_v57 = vsel %vm2127_vm10, %v709_v10, %v6447_v42  ;;  %v2291_v58 = vpack.c.bf16 %v2143_v21, %v2142_v4  ;;  %vm6248_vm12 = vcmp.lt.f32.partialorder %v5065_v0, 14.5 }
  0xc0   : > { %v2311_v24 = vpack.c.bf16 %v2151_v57, %v2150_v22  ;;  %vm588_vm13 = vcmp.gt.f32.partialorder %v5111_v3, 0.5  ;;  %v1213_v37 = vsel %vm893_vm9, %v5075_v27, 0.0  ;;  %v1117_v11 = vsel %vm6247_vm7, %v6448_v23, 0.0  ;;  %v3670_v22 = vpop.permute.xlu0 %3669 }
  0xc1   : > { %2719 = vmatmul.bf16.gmra.mxu1 %v2291_v58  ;;  %vm589_vm1 = vcmp.gt.f32.partialorder %v5113_v26, 0.5  ;;  %v716_v1 = vsel %vm588_vm13, %v5053_v40, 0.0  ;;  %v1214_v53 = vsel %vm6248_vm12, %v5082_v44, 0.0  ;;  %v1118_v4 = vsel %vm6246_vm4, %v6449_v61, 0.0  ;;  %v6452_v58 = vld [vmem:[#allocation53_spill] sm:$0xff]  ;;  %v3665_v44 = vpop.permute.xlu2 %3664 }
  0xc2   : > { %2739 = vmatmul.bf16.gmra.mxu2 %v2311_v24  ;;  %v717_v54 = vsel %vm589_vm1, %v5059_v51, 0.0  ;;  %v6450_v10 = vunpack.i.l.bf16 %v5009_v59  ;;  %v3763_v21 = vpack.i.bf16 %v1214_v53, %v1213_v37  ;;  %v3773_v46 = vpack.i.bf16 %v1118_v4, %v1117_v11  ;;  %v6453_v24 = vld [vmem:[#allocation50_spill] sm:$0xff] }
  0xc3   : > { %v6451_v42 = vunpack.i.h.bf16 %v5009_v59  ;;  %v692_v50 = vsel %vm564_vm14, %v6452_v58, 0.0  ;;  %v693_v0 = vsel %vm565_vm15, %v6454_v16, 0.0  ;;  %v3662_v39 = vunpack.i.h.bf16 %v3660_v47  ;;  %v6458_v4 = vld [vmem:[#allocation46_spill] sm:$0xff] }
  0xc4   : > { %v2158_v63 = vsel %vm2127_vm10, %v716_v1, %v6450_v10  ;;  %3764 = vrot.lane.b32.xlu1 %v3763_v21, %s3909_s18  ;;  %3774 = vrot.lane.b32.xlu0 %v3773_v46, %s3909_s18  ;;  %v6456_v37 = vunpack.i.l.bf16 %v5033_v32  ;;  %v6457_v11 = vunpack.i.h.bf16 %v5033_v32  ;;  %v3661_v53 = vunpack.i.l.bf16 %v3660_v47 }
  0xc5   : > { %v2159_v57 = vsel %vm2127_vm10, %v717_v54, %v6451_v42  ;;  %v6459_v54 = vld [vmem:[#allocation36_spill] sm:$0xff]  ;;  %v1584_v10 = vsel %vm880_vm2, %v6458_v4, 0.0  ;;  %v3672_v42 = vunpack.i.h.bf16 %v3670_v22  ;;  %v3671_v46 = vunpack.i.l.bf16 %v3670_v22 }
  0xc6   : > { %v2331_v27 = vpack.c.bf16 %v2159_v57, %v2158_v63  ;;  %v2134_v59 = vsel %vm2127_vm10, %v692_v50, %v6456_v37  ;;  %v2135_v1 = vsel %vm2127_vm10, %v693_v0, %v6457_v11  ;;  %vm6460_vm4 = vcmp.gt.f32.partialorder %v6459_v54, 0.5  ;;  %v6461_v50 = vld [vmem:[#allocation17_spill] sm:$0xff]  ;;  %v6462_v0 = vld [vmem:[#allocation18_spill] sm:$0xff] }
  0xc7   : > { %v1360_v63 = vsel %vm6460_vm4, %v4262_v48, 0.0  ;;  %v2271_v21 = vpack.c.bf16 %v2135_v1, %v2134_v59  ;;  %v3667_v57 = vunpack.i.h.bf16 %v3665_v44  ;;  %v3666_v61 = vunpack.i.l.bf16 %v3665_v44  ;;  %v6463_v54 = vld [vmem:[#allocation6_spill] sm:$0xff]  ;;  %v6464_v48 = vld [vmem:[#allocation63_spill] sm:$0xff]  ;;  %v6466_v59 = vld [vmem:[#allocation61_spill] sm:$0xff] }
  0xc8   : > { %2759 = vmatmul.bf16.gmra.mxu3 %v2331_v27  ;;  %v2192_v32 = vsel %vm2127_vm10, %v6461_v50, %v3661_v53  ;;  %v2193_v47 = vsel %vm2127_vm10, %v6462_v0, %v3662_v39  ;;  %v831_v37 = vrot.slane %v3980_v13, 1  ;;  %v832_v11 = vrot.slane %v4028_v34, 1  ;;  %3754 = vrot.lane.b32.xlu2 %v6463_v54, %s3909_s18  ;;  %v6465_v27 = vld [vmem:[#allocation60_spill] sm:$0xff]  ;;  %v6470_v54 = vld [vmem:[#allocation62_spill] sm:$0xff]  ;;  %v6471_v13 = vld [vmem:[#allocation11_spill] sm:$0xff] }
  0xc9   : > { %2699 = vmatmul.bf16.gmra.mxu0 %v2271_v21  ;;  %v2224_v22 = vsel %vm2127_vm10, %v6464_v48, %v3666_v61  ;;  %v2225_v44 = vsel %vm2127_vm10, %v1360_v63, %v3667_v57  ;;  %vm6254_vm2 = vcmp.lt.f32.partialorder %v6465_v27, 14.5  ;;  %vm6253_vm4 = vcmp.lt.f32.partialorder %v6466_v59, 14.5 }
  0xca   : > { %v2259_v1 = vpack.c.bf16 %v2225_v44, %v2224_v22  ;;  %v5178_v39 = vsel %vm846_vm0, %v831_v37, %v832_v11  ;;  %v6467_v53 = vrot.slane %v6437_v41, 1  ;;  %vm6468_vm7 = vcmp.gt.f32.partialorder %v6465_v27, 0.5  ;;  %v6472_v27 = vld [vmem:[#allocation76_spill] sm:$0xff] }
  0xcb   : > { %v1119_v61 = vsel %vm6468_vm7, %v4563_v49, 0.0  ;;  %v1216_v57 = vsel %vm6253_vm4, %v5178_v39, 0.0  ;;  %vm6469_vm12 = vcmp.gt.f32.partialorder %v6466_v59, 0.5  ;;  %v2260_v48 = vpack.c.bf16 %v1584_v10, %v6470_v54  ;;  %v3675_v10 = vpop.permute.xlu1 %3674 }
  0xcc   : > { %v5184_v21 = vsel %vm846_vm0, %v6467_v53, %v831_v37  ;;  %v1120_v0 = vsel %vm6469_vm12, %v4569_v9, 0.0  ;;  %v3402_v44 = vpack.c.bf16 %v3672_v42, %v3671_v46  ;;  %v2258_v53 = vpack.c.bf16 %v2193_v47, %v2192_v32  ;;  %v6473_v46 = vld [vmem:[#allocation77_spill] sm:$0xff] }
  0xcd   : > { %v1215_v63 = vsel %vm6254_vm2, %v5184_v21, 0.0  ;;  %v3788_v22 = vpack.i.bf16 %v1120_v0, %v1119_v61  ;;  %v833_v34 = vrot.slane %v4030_v35, 1  ;;  %v834_v41 = vrot.slane %v4065_v55, 1  ;;  %v6479_v55 = vld [vmem:[#allocation42_spill] sm:$0xff]  ;;  %v6480_v35 = vld [vmem:[#allocation45_spill] sm:$0xff] }
  0xce   : > { %v3778_v37 = vpack.i.bf16 %v1216_v57, %v1215_v63  ;;  %vm897_vm7 = vcmp.lt.f32.partialorder %v6472_v27, 14.5  ;;  %vm898_vm12 = vcmp.lt.f32.partialorder %v6473_v46, 14.5  ;;  %vm6474_vm4 = vcmp.gt.f32.partialorder %v6472_v27, 0.5 }
  0xcf   : > { %3789 = vrot.lane.b32.xlu0 %v3788_v22, %s3909_s18  ;;  %v5210_v42 = vsel %vm846_vm0, %v832_v11, %v833_v34  ;;  %v1121_v32 = vsel %vm6474_vm4, %v4809_v8, 0.0  ;;  %v5218_v47 = vsel %vm846_vm0, %v833_v34, %v834_v41  ;;  %vm6475_vm2 = vcmp.gt.f32.partialorder %v6473_v46, 0.5 }
  0xd0   : > { %3779 = vrot.lane.b32.xlu1 %v3778_v37, %s3909_s18  ;;  %3769 = vrot.lane.b32.xlu2 %v6471_v13, %s3909_s18  ;;  %v3685_v13 = vpop.permute.xlu0 %3684  ;;  %v1217_v61 = vsel %vm897_vm7, %v5210_v42, 0.0  ;;  %v1122_v11 = vsel %vm6475_vm2, %v4799_v30, 0.0  ;;  %v1218_v63 = vsel %vm898_vm12, %v5218_v47, 0.0  ;;  %v3677_v0 = vunpack.i.h.bf16 %v3675_v10 }
  0xd1   : > { %3403 = vmatmul.msk.bf16.vlgmr.msrb.gmra.mxu1 %vm4785_vm11, %v3402_v44  ;;  %v3803_v57 = vpack.i.bf16 %v1122_v11, %v1121_v32  ;;  %v3676_v54 = vunpack.i.l.bf16 %v3675_v10  ;;  %v3793_v37 = vpack.i.bf16 %v1218_v63, %v1217_v61  ;;  %v3686_v22 = vunpack.i.l.bf16 %v3685_v13  ;;  %v6476_v44 = vld [vmem:[#allocation43_spill] sm:$0xff]  ;;  %v6483_v61 = vld [vmem:[#allocation30_spill] sm:$0xff] }
  0xd2   : > { %2862 = vmatmul.bf16.vlgmr.msrb.gmra.mxu2 %v2258_v53  ;;  %v3687_v34 = vunpack.i.h.bf16 %v3685_v13  ;;  %v6477_v53 = vld [vmem:[#allocation44_spill] sm:$0xff]  ;;  %vm6481_vm2 = vcmp.lt.f32.partialorder %v6480_v35, 14.5  ;;  %v6482_v11 = vld [vmem:[#allocation31_spill] sm:$0xff]  ;;  %v2195_v63 = vsel %vm2127_vm10, %v6483_v61, %v3677_v0  ;;  %v835_v13 = vrot.slane %v4067_v56, 1 }
  0xd3   : > { %vm6478_vm4 = vcmp.lt.f32.partialorder %v6477_v53, 14.5  ;;  %v1010_v32 = vsel %vm6481_vm2, %v6479_v55, 0.0  ;;  %v2194_v10 = vsel %vm2127_vm10, %v6482_v11, %v3676_v54  ;;  %vm6264_vm2 = vcmp.lt.f32.partialorder %v4874_v33, 14.5 }
  0xd4   : > { %v1009_v12 = vsel %vm6478_vm4, %v6476_v44, 0.0  ;;  %v3680_v44 = vpop.permute.xlu2 %3679  ;;  %vm899_vm4 = vcmp.lt.f32.partialorder %v4851_v45, 14.5  ;;  %v2163_v55 = vsel %vm2127_vm10, %v1010_v32, %v3687_v34  ;;  %v5252_v54 = vsel %vm846_vm0, %v834_v41, %v835_v13 }
  0xd5   : > { %v1124_v0 = vsel %vm6259_vm5, %v5025_v28, 0.0  ;;  %v1219_v34 = vsel %vm899_vm4, %v5252_v54, 0.0  ;;  %v2263_v11 = vpack.c.bf16 %v2195_v63, %v2194_v10  ;;  %v3682_v41 = vunpack.i.h.bf16 %v3680_v44 }
  0xd6   : > { %v3681_v61 = vunpack.i.l.bf16 %v3680_v44  ;;  %v1361_v56 = vsel %vm560_vm8, %v6452_v58, 0.0  ;;  %vm6486_vm5 = vcmp.gt.f32.partialorder %v6480_v35, 0.5  ;;  %v6487_v44 = vld [vmem:[#allocation49_spill] sm:$0xff]  ;;  %vm6490_vm8 = vcmp.lt.f32.partialorder %v6480_v35, 14.5 }
  0xd7   : > { %3804 = vrot.lane.b32.xlu0 %v3803_v57, %s3909_s18  ;;  %v2162_v57 = vsel %vm2127_vm10, %v1009_v12, %v3686_v22  ;;  %v1123_v12 = vsel %vm6261_vm6, %v5031_v17, 0.0  ;;  %vm6488_vm6 = vcmp.lt.f32.partialorder %v6477_v53, 14.5 }
  0xd8   : > { %3794 = vrot.lane.b32.xlu1 %v3793_v37, %s3909_s18  ;;  %2951 = vmatmul.bf16.vlgmr.msrb.gmra.mxu3 %v2259_v1  ;;  %v6484_v37 = vld [vmem:[#allocation26_spill] sm:$0xff]  ;;  %v6485_v1 = vld [vmem:[#allocation7_spill] sm:$0xff]  ;;  %v3818_v32 = vpack.i.bf16 %v1124_v0, %v1123_v12  ;;  %v2226_v10 = vsel %vm2127_vm10, %v1361_v56, %v3681_v61  ;;  %v3700_v12 = vpop.permute.xlu0 %3699  ;;  %v6492_v56 = vld [vmem:[#allocation8_spill] sm:$0xff] }
  0xd9   : > { %3409 = vmatmul.msk.bf16.vlgmr.msrb.gmra.mxu0 %vm2127_vm10, %v2260_v48  ;;  %3784 = vrot.lane.b32.xlu2 %v6484_v37, %s3909_s18  ;;  %v836_v48 = vrot.slane %v6485_v1, 1  ;;  %v2262_v1 = vpack.c.bf16 %v2163_v55, %v2162_v57  ;;  %v1585_v57 = vsel %vm6488_vm6, %v6487_v44, 0.0  ;;  %v6489_v55 = vld [vmem:[#allocation48_spill] sm:$0xff]  ;;  %v3701_v33 = vunpack.i.l.bf16 %v3700_v12 }
  0xda   : > { %v1586_v58 = vsel %vm6490_vm8, %v6489_v55, 0.0  ;;  %vm6275_vm6 = vcmp.lt.f32.partialorder %v5067_v38, 14.5  ;;  %vm6274_vm8 = vcmp.lt.f32.partialorder %v5069_v62, 14.5  ;;  %v6503_v38 = vld [vmem:[#allocation33_spill] sm:$0xff] }
  0xdb   : > { %v5262_v22 = vsel %vm846_vm0, %v835_v13, %v836_v48  ;;  %v1362_v13 = vsel %vm6486_vm5, %v6454_v16, 0.0  ;;  %v3690_v16 = vpop.permute.xlu1 %3689  ;;  %vm6497_vm5 = vcmp.lt.f32.partialorder %v4250_v31, 14.5 }
  0xdc   : > { %v1220_v37 = vsel %vm6264_vm2, %v5262_v22, 0.0  ;;  %v2227_v63 = vsel %vm2127_vm10, %v1362_v13, %v3682_v41  ;;  %v6493_v41 = vld [vmem:[#allocation13_spill] sm:$0xff]  ;;  %v3691_v53 = vunpack.i.l.bf16 %v3690_v16  ;;  %v3702_v13 = vunpack.i.h.bf16 %v3700_v12  ;;  %v6500_v12 = vld [vmem:[#allocation68_spill] sm:$0xff] }
  0xdd   : > { %v3808_v28 = vpack.i.bf16 %v1220_v37, %v1219_v34  ;;  %v2264_v0 = vpack.c.bf16 %v2227_v63, %v2226_v10  ;;  %v2265_v34 = vpack.c.bf16 %v1586_v58, %v1585_v57  ;;  %v838_v61 = vrot.slane %v6493_v41, 1  ;;  %v6498_v63 = vld [vmem:[#allocation67_spill] sm:$0xff]  ;;  %v3695_v41 = vpop.permute.xlu2 %3694 }
  0xde   : > { %v3692_v37 = vunpack.i.h.bf16 %v3690_v16  ;;  %v1125_v57 = vsel %vm6273_vm3, %v6498_v63, 0.0  ;;  %vm6499_vm2 = vcmp.lt.f32.partialorder %v4252_v25, 14.5  ;;  %vm6509_vm3 = vcmp.lt.f32.partialorder %v4250_v31, 14.5 }
  0xdf   : > { %3819 = vrot.lane.b32.xlu0 %v3818_v32, %s3909_s18  ;;  %v837_v32 = vrot.slane %v6492_v56, 1 }
  0xe0   : > { %3809 = vrot.lane.b32.xlu1 %v3808_v28, %s3909_s18  ;;  %v6491_v28 = vld [vmem:[#allocation32_spill] sm:$0xff] }
  0xe1   : > { %2778 = vmatmul.bf16.gmra.mxu1 %v2262_v1  ;;  %3799 = vrot.lane.b32.xlu2 %v6491_v28, %s3909_s18  ;;  %v5292_v35 = vsel %vm846_vm0, %v837_v32, %v838_v61  ;;  %v5296_v1 = vsel %vm846_vm0, %v836_v48, %v837_v32  ;;  %v1012_v48 = vsel %vm6499_vm2, %v6458_v4, 0.0  ;;  %vm6505_vm2 = vcmp.gt.f32.partialorder %v4250_v31, 0.5 }
  0xe2   : > { %2867 = vmatmul.bf16.gmra.mxu2 %v2263_v11  ;;  %6494 = vst [vmem:[#allocation65_spill] sm:$0xff] %v5292_v35  ;;  %v6496_v11 = vld [vmem:[#allocation47_spill] sm:$0xff]  ;;  %v1221_v58 = vsel %vm6275_vm6, %v5296_v1, 0.0  ;;  %v1222_v16 = vsel %vm6274_vm8, %v5292_v35, 0.0  ;;  %v2165_v56 = vsel %vm2127_vm10, %v1012_v48, %v3702_v13  ;;  %v3697_v35 = vunpack.i.h.bf16 %v3695_v41  ;;  %v6510_v48 = vld [vmem:[#allocation54_spill] sm:$0xff] }
  0xe3   : > { %6495 = vst [vmem:[#allocation53_spill] sm:$0xff] %v5296_v1  ;;  %v1011_v10 = vsel %vm6497_vm5, %v6496_v11, 0.0  ;;  %vm6501_vm5 = vcmp.gt.f32.partialorder %v5069_v62, 0.5  ;;  %v3823_v32 = vpack.i.bf16 %v1222_v16, %v1221_v58  ;;  %v6502_v11 = vld [vmem:[#allocation37_spill] sm:$0xff]  ;;  %v2196_v1 = vsel %vm2127_vm10, %v6503_v38, %v3691_v53  ;;  %v6506_v16 = vld [vmem:[#allocation56_spill] sm:$0xff]  ;;  %v6508_v53 = vld [vmem:[#allocation55_spill] sm:$0xff] }
  0xe4   : > { %v1126_v28 = vsel %vm6501_vm5, %v6500_v12, 0.0  ;;  %v2164_v4 = vsel %vm2127_vm10, %v1011_v10, %v3701_v33  ;;  %v3696_v62 = vunpack.i.l.bf16 %v3695_v41  ;;  %vm6507_vm5 = vcmp.gt.f32.partialorder %v4252_v25, 0.5  ;;  %v3705_v41 = vpop.permute.xlu1 %3704 }
  0xe5   : > { %v2267_v12 = vpack.c.bf16 %v2165_v56, %v2164_v4  ;;  %v1364_v33 = vsel %vm6507_vm5, %v6506_v16, 0.0  ;;  %v1587_v10 = vsel %vm6509_vm3, %v6508_v53, 0.0  ;;  %vm6511_vm8 = vcmp.lt.f32.partialorder %v4252_v25, 14.5  ;;  %v6517_v16 = vld [vmem:[#allocation78_spill] sm:$0xff] }
  0xe6   : > { %v2229_v38 = vsel %vm2127_vm10, %v1364_v33, %v3697_v35  ;;  %v1588_v56 = vsel %vm6511_vm8, %v6510_v48, 0.0  ;;  %v3706_v35 = vunpack.i.l.bf16 %v3705_v41  ;;  %vm6513_vm3 = vcmp.lt.f32.partialorder %v6453_v24, 14.5 }
  0xe7   : > { %v1013_v31 = vsel %vm6513_vm3, %v6487_v44, 0.0  ;;  %vm6519_vm3 = vcmp.lt.f32.partialorder %v6455_v2, 14.5 }
  0xe8   : > { %2956 = vmatmul.bf16.gmra.mxu3 %v2264_v0  ;;  %v3833_v0 = vpack.i.bf16 %v1126_v28, %v1125_v57  ;;  %3824 = vrot.lane.b32.xlu1 %v3823_v32, %s3909_s18  ;;  %v6504_v57 = vld [vmem:[#allocation57_spill] sm:$0xff]  ;;  %v2270_v32 = vpack.c.bf16 %v1588_v56, %v1587_v10  ;;  %v1014_v44 = vsel %vm6519_vm3, %v6489_v55, 0.0  ;;  %v6522_v56 = vld [vmem:[#allocation12_spill] sm:$0xff] }
  0xe9   : > { %3410 = vmatmul.msk.bf16.gmra.mxu0 %vm2127_vm10, %v2265_v34  ;;  %v2197_v34 = vsel %vm2127_vm10, %v6502_v11, %v3692_v37  ;;  %v1363_v37 = vsel %vm6505_vm2, %v6504_v57, 0.0  ;;  %v6512_v11 = vld [vmem:[#allocation24_spill] sm:$0xff]  ;;  %3814 = vrot.lane.b32.xlu2 %v6522_v56, %s3909_s18 }
  0xea   : > { %3834 = vrot.lane.b32.xlu0 %v3833_v0, %s3909_s18  ;;  %v2268_v58 = vpack.c.bf16 %v2197_v34, %v2196_v1  ;;  %v2228_v13 = vsel %vm2127_vm10, %v1363_v37, %v3696_v62  ;;  %v3715_v1 = vpop.permute.xlu0 %3714  ;;  %v839_v0 = vrot.slane %v3997_v20, 1  ;;  %v840_v62 = vrot.slane %v6512_v11, 1  ;;  %v6516_v37 = vld [vmem:[#allocation71_spill] sm:$0xff]  ;;  %v6524_v20 = vld [vmem:[#allocation5_spill] sm:$0xff] }
  0xeb   : > { %v2269_v28 = vpack.c.bf16 %v2229_v38, %v2228_v13  ;;  %v3707_v34 = vunpack.i.h.bf16 %v3705_v41  ;;  %v3717_v4 = vunpack.i.h.bf16 %v3715_v1  ;;  %v3716_v57 = vunpack.i.l.bf16 %v3715_v1  ;;  %v6520_v38 = vld [vmem:[#allocation79_spill] sm:$0xff] }
  0xec   : > { %v5348_v25 = vsel %vm846_vm0, %v839_v0, %v840_v62  ;;  %vm904_vm2 = vcmp.lt.f32.partialorder %v6516_v37, 14.5  ;;  %vm6521_vm6 = vcmp.gt.f32.partialorder %v6516_v37, 0.5 }
  0xed   : > { %6514 = vst [vmem:[#allocation50_spill] sm:$0xff] %v5348_v25  ;;  %v1224_v13 = vsel %vm904_vm2, %v5348_v25, 0.0  ;;  %v1128_v10 = vsel %vm6521_vm6, %v6520_v38, 0.0  ;;  %v2167_v11 = vsel %vm2127_vm10, %v1014_v44, %v3717_v4  ;;  %vm6528_vm6 = vcmp.lt.f32.partialorder %v6453_v24, 14.5  ;;  %v6529_v44 = vld [vmem:[#allocation69_spill] sm:$0xff] }
  0xf1   : > { %2783 = vmatmul.bf16.gmra.mxu1 %v2267_v12  ;;  %v5352_v12 = vsel %vm846_vm0, %v838_v61, %v839_v0  ;;  %v2166_v0 = vsel %vm2127_vm10, %v1013_v31, %v3716_v57 }
  0xf2   : > { %2872 = vmatmul.bf16.gmra.mxu2 %v2268_v58  ;;  %v6515_v58 = vld [vmem:[#allocation66_spill] sm:$0xff]  ;;  %v2272_v56 = vpack.c.bf16 %v2167_v11, %v2166_v0 }
  0xf3   : > { %vm903_vm8 = vcmp.lt.f32.partialorder %v6515_v58, 14.5  ;;  %vm6518_vm5 = vcmp.gt.f32.partialorder %v6515_v58, 0.5  ;;  %v2199_v58 = vsel %vm2127_vm10, %v6524_v20, %v3707_v34  ;;  %v6527_v34 = vld [vmem:[#allocation70_spill] sm:$0xff] }
  0xf4   : > { %v1127_v33 = vsel %vm6518_vm5, %v6517_v16, 0.0  ;;  %v1223_v61 = vsel %vm903_vm8, %v5352_v12, 0.0  ;;  %v1589_v31 = vsel %vm6528_vm6, %v6527_v34, 0.0  ;;  %vm6530_vm5 = vmmov %vm6519_vm3 }
  0xf5   : > { %v3838_v41 = vpack.i.bf16 %v1224_v13, %v1223_v61  ;;  %v3848_v1 = vpack.i.bf16 %v1128_v10, %v1127_v33  ;;  %v6525_v33 = vld [vmem:[#allocation73_spill] sm:$0xff]  ;;  %v6526_v13 = vld [vmem:[#allocation72_spill] sm:$0xff]  ;;  %v1590_v11 = vsel %vm6530_vm5, %v6529_v44, 0.0  ;;  %v3730_v10 = vpop.permute.xlu0 %3729 }
  0xf6   : > { %v1366_v57 = vsel %vm565_vm15, %v6526_v13, 0.0  ;;  %v3731_v0 = vunpack.i.l.bf16 %v3730_v10 }
  0xf7   : > { %3839 = vrot.lane.b32.xlu1 %v3838_v41, %s3909_s18  ;;  %3849 = vrot.lane.b32.xlu0 %v3848_v1, %s3909_s18  ;;  %v2275_v1 = vpack.c.bf16 %v1590_v11, %v1589_v31 }
  0xf8   : > { %2961 = vmatmul.bf16.gmra.mxu3 %v2269_v28  ;;  %v6523_v28 = vld [vmem:[#allocation4_spill] sm:$0xff] }
  0xf9   : > { %3411 = vmatmul.msk.bf16.gmra.mxu0 %vm2127_vm10, %v2270_v32  ;;  %v2198_v55 = vsel %vm2127_vm10, %v6523_v28, %v3706_v35  ;;  %v3710_v32 = vpop.permute.xlu2 %3709  ;;  %v1365_v35 = vsel %vm564_vm14, %v6525_v33, 0.0  ;;  %v841_v28 = vrot.slane %v4040_v43, 1 }
  0xfa   : > { %v3712_v37 = vunpack.i.h.bf16 %v3710_v32  ;;  %v3711_v25 = vunpack.i.l.bf16 %v3710_v32  ;;  %v2273_v61 = vpack.c.bf16 %v2199_v58, %v2198_v55  ;;  %v3720_v58 = vpop.permute.xlu1 %3719  ;;  %v3732_v32 = vunpack.i.h.bf16 %v3730_v10 }
  0xfb   : > { %v3722_v55 = vunpack.i.h.bf16 %v3720_v58  ;;  %v5404_v2 = vsel %vm846_vm0, %v840_v62, %v841_v28 }
  0xfc   : > { %v2230_v4 = vsel %vm2127_vm10, %v1365_v35, %v3711_v25  ;;  %v2231_v20 = vsel %vm2127_vm10, %v1366_v57, %v3712_v37  ;;  %v842_v25 = vrot.slane %v4093_v18, 1  ;;  %v3721_v37 = vunpack.i.l.bf16 %v3720_v58  ;;  %v6534_v35 = vld [vmem:[#allocation59_spill] sm:$0xff]  ;;  %v6536_v57 = vld [vmem:[#allocation81_spill] sm:$0xff] }
  0xfd   : > { %v2274_v41 = vpack.c.bf16 %v2231_v20, %v2230_v4  ;;  %vm6535_vm3 = vcmp.lt.f32.partialorder %v6534_v35, 14.5  ;;  %vm6284_vm6 = vcmp.lt.f32.partialorder %v6536_v57, 14.5  ;;  %v6537_v4 = vld [vmem:[#allocation19_spill] sm:$0xff] }
  0xfe   : > { %v5400_v24 = vsel %vm846_vm0, %v841_v28, %v842_v25  ;;  %v1016_v13 = vsel %vm6535_vm3, %v6510_v48, 0.0  ;;  %3829 = vrot.lane.b32.xlu2 %v6537_v4, %s3909_s18  ;;  %v6541_v4 = vld [vmem:[#allocation16_spill] sm:$0xff] }
  0xff   : > { %v1226_v20 = vsel %vm6284_vm6, %v5400_v24, 0.0  ;;  %v2201_v18 = vsel %vm2127_vm10, %v6541_v4, %v3722_v55  ;;  %vm6547_vm6 = vcmp.lt.f32.partialorder %v6534_v35, 14.5  ;;  %v6551_v4 = vld [vmem:[#allocation74_spill] sm:$0xff] }
 0x101   : > { %2788 = vmatmul.bf16.gmra.mxu1 %v2272_v56  ;;  %v6531_v56 = vld [vmem:[#allocation80_spill] sm:$0xff]  ;;  %v3725_v31 = vpop.permute.xlu2 %3724 }
 0x102   : > { %2877 = vmatmul.bf16.gmra.mxu2 %v2273_v61  ;;  %vm6291_vm14 = vcmp.lt.f32.partialorder %v6531_v56, 14.5  ;;  %v6532_v61 = vld [vmem:[#allocation58_spill] sm:$0xff]  ;;  %vm6538_vm5 = vcmp.gt.f32.partialorder %v6531_v56, 0.5 }
 0x103   : > { %vm6533_vm15 = vcmp.lt.f32.partialorder %v6532_v61, 14.5  ;;  %v1225_v62 = vsel %vm6291_vm14, %v5404_v2, 0.0  ;;  %vm6542_vm3 = vcmp.gt.f32.partialorder %v6532_v61, 0.5  ;;  %vm6567_vm14 = vcmp.lt.f32.partialorder %v6551_v4, 14.5 }
 0x104   : > { %v1015_v33 = vsel %vm6533_vm15, %v6508_v53, 0.0  ;;  %v1129_v53 = vsel %vm6538_vm5, %v4870_v7, 0.0  ;;  %vm6539_vm15 = vcmp.gt.f32.partialorder %v6536_v57, 0.5  ;;  %v3853_v11 = vpack.i.bf16 %v1226_v20, %v1225_v62 }
 0x105   : > { %v1130_v48 = vsel %vm6539_vm15, %v4864_v15, 0.0  ;;  %v2168_v10 = vsel %vm2127_vm10, %v1015_v33, %v3731_v0  ;;  %v3727_v57 = vunpack.i.h.bf16 %v3725_v31  ;;  %v3726_v62 = vunpack.i.l.bf16 %v3725_v31  ;;  %v6544_v33 = vld [vmem:[#allocation82_spill] sm:$0xff]  ;;  %v3735_v31 = vpop.permute.xlu1 %3734 }
 0x106   : > { %v3863_v58 = vpack.i.bf16 %v1130_v48, %v1129_v53  ;;  %3854 = vrot.lane.b32.xlu1 %v3853_v11, %s3909_s18  ;;  %vm6543_vm5 = vcmp.gt.f32.partialorder %v6534_v35, 0.5  ;;  %vm6545_vm15 = vcmp.lt.f32.partialorder %v6532_v61, 14.5  ;;  %v6546_v48 = vld [vmem:[#allocation83_spill] sm:$0xff]  ;;  %v843_v61 = vrot.slane %v6431_v5, 1 }
 0x107   : > { %v3737_v35 = vunpack.i.h.bf16 %v3735_v31 }
 0x108   : > { %2966 = vmatmul.bf16.gmra.mxu3 %v2274_v41  ;;  %v2169_v41 = vsel %vm2127_vm10, %v1016_v13, %v3732_v32  ;;  %3864 = vrot.lane.b32.xlu0 %v3863_v58, %s3909_s18  ;;  %v1367_v32 = vsel %vm6542_vm3, %v4731_v6, 0.0  ;;  %v1591_v13 = vsel %vm6545_vm15, %v6544_v33, 0.0  ;;  %v3899_v6 = vld [vmem:[%s3948_s17 + $0x78] sm:$0xff]   ;;  %vm6292_vm15 = vcmp.lt.f32.partialorder %v4954_v14, 14.5 }
 0x109   : > { %3412 = vmatmul.msk.bf16.gmra.mxu0 %vm2127_vm10, %v2275_v1  ;;  %v6540_v1 = vld [vmem:[#allocation15_spill] sm:$0xff]  ;;  %v2277_v20 = vpack.c.bf16 %v2169_v41, %v2168_v10  ;;  %v2232_v55 = vsel %vm2127_vm10, %v1367_v32, %v3726_v62  ;;  %v5454_v11 = vunpack.c.l.bf16 %v3899_v6  ;;  %v3736_v32 = vunpack.i.l.bf16 %v3735_v31 }
 0x10a   : > { %v2200_v28 = vsel %vm2127_vm10, %v6540_v1, %v3721_v37  ;;  %v1368_v37 = vsel %vm6543_vm5, %v4723_v19, 0.0  ;;  %v3745_v19 = vpop.permute.xlu0 %3744  ;;  %vm907_vm5 = vcmp.lt.f32.partialorder %v4937_v52, 14.5 }
 0x10b   : > { %v5437_v43 = vpop.f32.mrf.mxu1  ;;  %v2278_v53 = vpack.c.bf16 %v2201_v18, %v2200_v28  ;;  %v2233_v0 = vsel %vm2127_vm10, %v1368_v37, %v3727_v57  ;;  %v1592_v18 = vsel %vm6547_vm6, %v6546_v48, 0.0  ;;  %6548 = vst [vmem:[#allocation52_spill] sm:$0xff] %v5454_v11  ;;  %v844_v1 = vrot.slane %v5454_v11, 1 }
 0x10c   : > { %v2279_v57 = vpack.c.bf16 %v2233_v0, %v2232_v55  ;;  %v2280_v41 = vpack.c.bf16 %v1592_v18, %v1591_v13  ;;  %vm6552_vm6 = vcmp.lt.f32.partialorder %v6551_v4, 14.5  ;;  %v3747_v37 = vunpack.i.h.bf16 %v3745_v19  ;;  %v6559_v18 = vld [vmem:[#allocation27_spill] sm:$0xff] }
 0x10d   : > { %v1017_v62 = vsel %vm6552_vm6, %v6527_v34, 0.0  ;;  %v3746_v6 = vunpack.i.l.bf16 %v3745_v19  ;;  %v5472_v55 = vsel %vm846_vm0, %v843_v61, %v844_v1  ;;  %v5476_v0 = vsel %vm846_vm0, %v842_v25, %v843_v61  ;;  %3844 = vrot.lane.b32.xlu2 %v6559_v18, %s3909_s18  ;;  %v3740_v61 = vpop.permute.xlu2 %3739 }
 0x10e   : > { %6555 = vst [vmem:[#allocation36_spill] sm:$0xff] %v5472_v55  ;;  %v1227_v34 = vsel %vm907_vm5, %v5476_v0, 0.0  ;;  %vm6557_vm6 = vcmp.gt.f32.partialorder %v4937_v52, 0.5 }
 0x10f   : > { %6556 = vst [vmem:[#allocation17_spill] sm:$0xff] %v5476_v0  ;;  %v1131_v25 = vsel %vm6557_vm6, %v5053_v40, 0.0  ;;  %v2170_v0 = vsel %vm2127_vm10, %v1017_v62, %v3746_v6  ;;  %v6563_v40 = vld [vmem:[#allocation23_spill] sm:$0xff]  ;;  %vm6564_vm6 = vcmp.gt.f32.partialorder %v6551_v4, 0.5 }
 0x110   : > { %v5456_v58 = vpop.f32.mrf.mxu2  ;;  %v1369_v62 = vsel %vm6564_vm6, %v4973_v36, 0.0 }
 0x111   : > { %2793 = vmatmul.bf16.gmra.mxu1 %v2277_v20  ;;  %6549 = vst [vmem:[#allocation51_spill] sm:$0xff] %v5456_v58  ;;  %v6553_v20 = vld [vmem:[#allocation75_spill] sm:$0xff] }
 0x112   : > { %2882 = vmatmul.bf16.gmra.mxu2 %v2278_v53  ;;  %v5458_v10 = vpop.f32.mrf.mxu0  ;;  %vm6554_vm3 = vcmp.lt.f32.partialorder %v6553_v20, 14.5 }
 0x113   : > { %v5462_v28 = vpop.f32.mrf.mxu1  ;;  %v1018_v53 = vsel %vm6554_vm3, %v6529_v44, 0.0  ;;  %v1228_v44 = vsel %vm6292_vm15, %v5472_v55, 0.0  ;;  %vm6558_vm3 = vcmp.gt.f32.partialorder %v4954_v14, 0.5  ;;  %vm6569_vm15 = vcmp.lt.f32.partialorder %v6553_v20, 14.5 }
 0x114   : > { %6550 = vst [vmem:[#allocation46_spill] sm:$0xff] %v5462_v28  ;;  %v1132_v13 = vsel %vm6558_vm3, %v5059_v51, 0.0  ;;  %v3868_v31 = vpack.i.bf16 %v1228_v44, %v1227_v34  ;;  %v2171_v28 = vsel %vm2127_vm10, %v1018_v53, %v3747_v37  ;;  %v2203_v51 = vsel %vm2127_vm10, %v6563_v40, %v3737_v35  ;;  %v6566_v37 = vld [vmem:[#allocation89_spill] sm:$0xff] }
 0x115   : > { %v3878_v19 = vpack.i.bf16 %v1132_v13, %v1131_v25  ;;  %v3741_v25 = vunpack.i.l.bf16 %v3740_v61  ;;  %v2282_v13 = vpack.c.bf16 %v2171_v28, %v2170_v0  ;;  %vm6565_vm3 = vcmp.gt.f32.partialorder %v6553_v20, 0.5 }
 0x116   : > { %3869 = vrot.lane.b32.xlu1 %v3868_v31, %s3909_s18  ;;  %v1370_v40 = vsel %vm6565_vm3, %v4967_v60, 0.0  ;;  %v1593_v6 = vsel %vm6567_vm14, %v6566_v37, 0.0  ;;  %v6568_v31 = vld [vmem:[#allocation88_spill] sm:$0xff]  ;;  %vm909_vm14 = vcmp.lt.f32.partialorder %v5111_v3, 14.5  ;;  %vm910_vm3 = vcmp.lt.f32.partialorder %v5113_v26, 14.5 }
 0x117   : > { %3879 = vrot.lane.b32.xlu0 %v3878_v19, %s3909_s18  ;;  %v2234_v35 = vsel %vm2127_vm10, %v1369_v62, %v3741_v25 }
 0x118   : > { %2971 = vmatmul.bf16.gmra.mxu3 %v2279_v57  ;;  %v6560_v57 = vld [vmem:[#allocation22_spill] sm:$0xff]  ;;  %v5497_v58 = vpop.f32.mrf.mxu2  ;;  %v5499_v55 = vpop.f32.mrf.mxu3 }
 0x119   : > { %3413 = vmatmul.msk.bf16.gmra.mxu0 %vm2127_vm10, %v2280_v41  ;;  %v2202_v41 = vsel %vm2127_vm10, %v6560_v57, %v3736_v32  ;;  %6561 = vst [vmem:[#allocation18_spill] sm:$0xff] %v5497_v58  ;;  %v3742_v32 = vunpack.i.h.bf16 %v3740_v61  ;;  %v6572_v61 = vld [vmem:[#allocation38_spill] sm:$0xff] }
 0x11a   : > { %6562 = vst [vmem:[#allocation6_spill] sm:$0xff] %v5499_v55  ;;  %v5507_v34 = vpop.f32.mrf.mxu0  ;;  %v2283_v18 = vpack.c.bf16 %v2203_v51, %v2202_v41  ;;  %v1594_v51 = vsel %vm6569_vm15, %v6568_v31, 0.0  ;;  %v6582_v55 = vrot.slane %v6572_v61, 7 }
 0x11b   : > { %v5509_v44 = vpop.f32.mrf.mxu1  ;;  %v2235_v53 = vsel %vm2127_vm10, %v1370_v40, %v3742_v32  ;;  %v2285_v57 = vpack.c.bf16 %v1594_v51, %v1593_v6  ;;  %v845_v32 = vrot.slane %v6572_v61, 1  ;;  %v6577_v6 = vld [vmem:[#allocation86_spill] sm:$0xff] }
 0x11c   : > { %v3750_v28 = vpop.permute.xlu1 %3749  ;;  %v2284_v19 = vpack.c.bf16 %v2235_v53, %v2234_v35  ;;  %v6575_v53 = vld [vmem:[#allocation85_spill] sm:$0xff]  ;;  %vm6578_vm6 = vcmp.lt.f32.partialorder %v6577_v6, 14.5 }
 0x11d   : > { %v3751_v25 = vunpack.i.l.bf16 %v3750_v28  ;;  %v3752_v62 = vunpack.i.h.bf16 %v3750_v28  ;;  %v5536_v20 = vsel %vm846_vm0, %v844_v1, %v845_v32  ;;  %vm6576_vm15 = vcmp.lt.f32.partialorder %v6575_v53, 14.5 }
 0x11e   : > { %v1019_v1 = vsel %vm6576_vm15, %v6544_v33, 0.0  ;;  %v1020_v51 = vsel %vm6578_vm6, %v6546_v48, 0.0  ;;  %vm6589_vm6 = vcmp.gt.f32.partialorder %v6575_v53, 0.5 }
 0x120   : > { %v5527_v0 = vpop.f32.mrf.mxu3 }
 0x121   : > { %2798 = vmatmul.bf16.gmra.mxu1 %v2282_v13  ;;  %v5525_v36 = vpop.f32.mrf.mxu2  ;;  %6571 = vst [vmem:[#allocation61_spill] sm:$0xff] %v5527_v0  ;;  %v3760_v41 = vpop.permute.xlu0 %3759  ;;  %v491_v13 = vrot.slane %v5454_v11, 7  ;;  %v6574_v0 = vrot.slane %v6461_v50, 1  ;;  %v6579_v50 = vld [vmem:[#allocation40_spill] sm:$0xff] }
 0x122   : > { %2887 = vmatmul.bf16.gmra.mxu2 %v2283_v18  ;;  %6570 = vst [vmem:[#allocation63_spill] sm:$0xff] %v5525_v36  ;;  %v5529_v60 = vpop.f32.mrf.mxu0  ;;  %v3762_v18 = vunpack.i.h.bf16 %v3760_v41  ;;  %v3761_v40 = vunpack.i.l.bf16 %v3760_v41  ;;  %v2204_v28 = vsel %vm2127_vm10, %v6579_v50, %v3751_v25  ;;  %v3755_v41 = vpop.permute.xlu2 %3754  ;;  %v6584_v50 = vrot.slane %v6431_v5, 7 }
 0x123   : > { %v5532_v4 = vpop.f32.mrf.mxu1  ;;  %v5543_v35 = vsel %vm846_vm0, %v845_v32, %v6574_v0  ;;  %v1229_v0 = vsel %vm909_vm14, %v5536_v20, 0.0  ;;  %v6581_v32 = vld [vmem:[#allocation39_spill] sm:$0xff]  ;;  %vm6583_vm0 = vcmp.lt.s32.totalorder %v4016_v29, 1 }
 0x124   : > { %6573 = vst [vmem:[#allocation62_spill] sm:$0xff] %v5532_v4  ;;  %3859 = vrot.lane.b32.xlu2 %v6581_v32, %s3909_s18  ;;  %v5570_v25 = vsel %vm6583_vm0, %v491_v13, %v6582_v55  ;;  %vm6585_vm15 = vmmov %vm6583_vm0  ;;  %vm6595_vm0 = vcmp.lt.f32.partialorder %v6577_v6, 14.5 }
 0x125   : > { %v5576_v36 = vsel %vm6585_vm15, %v6584_v50, %v491_v13  ;;  %v1134_v55 = vsel %vm589_vm1, %v5570_v25, 0.0  ;;  %v3757_v50 = vunpack.i.h.bf16 %v3755_v41  ;;  %vm6593_vm1 = vcmp.lt.f32.partialorder %v6575_v53, 14.5  ;;  %v6599_v53 = vld [vmem:[#allocation92_spill] sm:$0xff] }
 0x128   : > { %2976 = vmatmul.bf16.gmra.mxu3 %v2284_v19  ;;  %v1230_v19 = vsel %vm910_vm3, %v5543_v35, 0.0 }
 0x129   : > { %3414 = vmatmul.msk.bf16.gmra.mxu0 %vm2127_vm10, %v2285_v57  ;;  %v6580_v57 = vld [vmem:[#allocation41_spill] sm:$0xff]  ;;  %v3883_v48 = vpack.i.bf16 %v1230_v19, %v1229_v0  ;;  %v5578_v58 = vpop.f32.mrf.mxu2  ;;  %v2173_v0 = vsel %vm2127_vm10, %v1020_v51, %v3762_v18  ;;  %v1133_v19 = vsel %vm588_vm13, %v5576_v36, 0.0  ;;  %v1371_v18 = vsel %vm6589_vm6, %v6448_v23, 0.0  ;;  %v6590_v51 = vld [vmem:[#allocation64_spill] sm:$0xff] }
 0x12a   : > { %v2205_v33 = vsel %vm2127_vm10, %v6580_v57, %v3752_v62  ;;  %6586 = vst [vmem:[#allocation11_spill] sm:$0xff] %v5578_v58  ;;  %v2172_v57 = vsel %vm2127_vm10, %v1019_v1, %v3761_v40  ;;  %v5590_v32 = vpop.f32.mrf.mxu0  ;;  %v3893_v29 = vpack.i.bf16 %v1134_v55, %v1133_v19  ;;  %vm6591_vm13 = vcmp.gt.f32.partialorder %v6577_v6, 0.5  ;;  %v6592_v19 = vld [vmem:[#allocation96_spill] sm:$0xff]  ;;  %v6600_v6 = vld [vmem:[#allocation93_spill] sm:$0xff] }
 0x12b   : > { %v5580_v62 = vpop.f32.mrf.mxu3  ;;  %3884 = vrot.lane.b32.xlu1 %v3883_v48, %s3909_s18  ;;  %v5593_v13 = vpop.f32.mrf.mxu1  ;;  %v2287_v40 = vpack.c.bf16 %v2173_v0, %v2172_v57  ;;  %v2288_v1 = vpack.c.bf16 %v2205_v33, %v2204_v28  ;;  %v1372_v58 = vsel %vm6591_vm13, %v6590_v51, 0.0  ;;  %v6594_v57 = vld [vmem:[#allocation97_spill] sm:$0xff]  ;;  %vm6601_vm15 = vcmp.lt.f32.partialorder %v6600_v6, 14.5 }
 0x12c   : > { %6587 = vst [vmem:[#allocation76_spill] sm:$0xff] %v5580_v62  ;;  %v3756_v62 = vunpack.i.l.bf16 %v3755_v41  ;;  %3894 = vrot.lane.b32.xlu0 %v3893_v29, %s3909_s18  ;;  %v2237_v48 = vsel %vm2127_vm10, %v1372_v58, %v3757_v50  ;;  %v1595_v41 = vsel %vm6593_vm1, %v6592_v19, 0.0  ;;  %v1596_v28 = vsel %vm6595_vm0, %v6594_v57, 0.0  ;;  %vm6608_vm1 = vmmov %vm6601_vm15 }
 0x12d   : > { %6588 = vst [vmem:[#allocation77_spill] sm:$0xff] %v5593_v13  ;;  %vm6606_vm6 = vcmp.gt.f32.partialorder %v6599_v53, 0.5  ;;  %vm6607_vm13 = vcmp.gt.f32.partialorder %v6600_v6, 0.5  ;;  %vm6612_vm0 = vcmp.lt.f32.partialorder %v6466_v59, 14.5 }
 0x12e   : > { %v2236_v4 = vsel %vm2127_vm10, %v1371_v18, %v3756_v62  ;;  %v2290_v62 = vpack.c.bf16 %v1596_v28, %v1595_v41  ;;  %v1021_v18 = vsel %vm893_vm9, %v6566_v37, 0.0  ;;  %v3770_v41 = vpop.permute.xlu2 %3769 }
 0x12f   : > { %v2289_v55 = vpack.c.bf16 %v2237_v48, %v2236_v4  ;;  %v3873_v48 = vpack.i.bf16 %v6572_v61, %v5454_v11  ;;  %v3772_v61 = vunpack.i.h.bf16 %v3770_v41  ;;  %v3771_v11 = vunpack.i.l.bf16 %v3770_v41 }
 0x131   : > { %2803 = vmatmul.bf16.gmra.mxu1 %v2287_v40  ;;  %v5610_v23 = vpop.f32.mrf.mxu2  ;;  %v1022_v40 = vsel %vm6601_vm15, %v6568_v31, 0.0  ;;  %v6604_v31 = vld [vmem:[#allocation2_spill] sm:$0xff]  ;;  %3874 = vrot.lane.b32.xlu2 %v3873_v48, %s3909_s18 }
 0x132   : > { %2892 = vmatmul.bf16.gmra.mxu2 %v2288_v1  ;;  %6596 = vst [vmem:[#allocation43_spill] sm:$0xff] %v5610_v23  ;;  %v5614_v0 = vpop.f32.mrf.mxu0 }
 0x133   : > { %v5612_v33 = vpop.f32.mrf.mxu3  ;;  %v5616_v29 = vpop.f32.mrf.mxu1 }
 0x134   : > { %6597 = vst [vmem:[#allocation44_spill] sm:$0xff] %v5612_v33 }
 0x135   : > { %6598 = vst [vmem:[#allocation42_spill] sm:$0xff] %v5616_v29 }
 0x136   : > { %v3765_v58 = vpop.permute.xlu1 %3764  ;;  %v3775_v50 = vpop.permute.xlu0 %3774 }
 0x137   : > { %v3767_v1 = vunpack.i.h.bf16 %v3765_v58  ;;  %v3766_v51 = vunpack.i.l.bf16 %v3765_v58  ;;  %v3777_v33 = vunpack.i.h.bf16 %v3775_v50  ;;  %v3776_v4 = vunpack.i.l.bf16 %v3775_v50 }
 0x138   : > { %2981 = vmatmul.bf16.gmra.mxu3 %v2289_v55 }
 0x139   : > { %3415 = vmatmul.msk.bf16.gmra.mxu0 %vm2127_vm10, %v2290_v62  ;;  %v5627_v28 = vpop.f32.mrf.mxu2  ;;  %v2174_v37 = vsel %vm2127_vm10, %v1021_v18, %v3776_v4  ;;  %v2175_v29 = vsel %vm2127_vm10, %v1022_v40, %v3777_v33  ;;  %v2206_v55 = vsel %vm2127_vm10, %v6604_v31, %v3766_v51  ;;  %v6605_v62 = vld [vmem:[#allocation3_spill] sm:$0xff]  ;;  %v1373_v18 = vsel %vm6606_vm6, %v4563_v49, 0.0 }
 0x13a   : > { %6602 = vst [vmem:[#allocation45_spill] sm:$0xff] %v5627_v28  ;;  %v2207_v58 = vsel %vm2127_vm10, %v6605_v62, %v3767_v1  ;;  %v5638_v50 = vpop.f32.mrf.mxu0  ;;  %v2292_v13 = vpack.c.bf16 %v2175_v29, %v2174_v37  ;;  %v1374_v33 = vsel %vm6607_vm13, %v4569_v9, 0.0  ;;  %v2238_v1 = vsel %vm2127_vm10, %v1373_v18, %v3771_v11  ;;  %v3785_v18 = vpop.permute.xlu2 %3784 }
 0x13b   : > { %v5629_v23 = vpop.f32.mrf.mxu3  ;;  %v2293_v28 = vpack.c.bf16 %v2207_v58, %v2206_v55  ;;  %v2239_v51 = vsel %vm2127_vm10, %v1374_v33, %v3772_v61  ;;  %v1597_v4 = vsel %vm893_vm9, %v5184_v21, 0.0  ;;  %v1598_v29 = vsel %vm6608_vm1, %v5178_v39, 0.0  ;;  %vm6620_vm1 = vmmov %vm6612_vm0 }
 0x13c   : > { %6603 = vst [vmem:[#allocation31_spill] sm:$0xff] %v5629_v23  ;;  %v2294_v48 = vpack.c.bf16 %v2239_v51, %v2238_v1  ;;  %v2295_v9 = vpack.c.bf16 %v1598_v29, %v1597_v4  ;;  %v6614_v4 = vld [vmem:[#allocation9_spill] sm:$0xff]  ;;  %vm6618_vm6 = vcmp.gt.f32.partialorder %v6466_v59, 0.5 }
 0x13e   : > { %v5646_v40 = vpop.f32.mrf.mxu1 }
 0x141   : > { %2808 = vmatmul.bf16.gmra.mxu1 %v2292_v13  ;;  %v3790_v37 = vpop.permute.xlu0 %3789  ;;  %v6610_v13 = vld [vmem:[#allocation60_spill] sm:$0xff] }
 0x142   : > { %2897 = vmatmul.bf16.gmra.mxu2 %v2293_v28  ;;  %v3780_v41 = vpop.permute.xlu1 %3779  ;;  %v3792_v62 = vunpack.i.h.bf16 %v3790_v37  ;;  %v3791_v58 = vunpack.i.l.bf16 %v3790_v37  ;;  %vm6611_vm9 = vcmp.lt.f32.partialorder %v6610_v13, 14.5  ;;  %v1024_v28 = vsel %vm6612_vm0, %v6594_v57, 0.0 }
 0x143   : > { %v5656_v49 = vpop.f32.mrf.mxu3  ;;  %v3782_v53 = vunpack.i.h.bf16 %v3780_v41  ;;  %v3781_v55 = vunpack.i.l.bf16 %v3780_v41  ;;  %v1023_v6 = vsel %vm6611_vm9, %v6592_v19, 0.0  ;;  %v6616_v41 = vmov 0.0   ;;  %vm6619_vm13 = vmmov %vm6611_vm9 }
 0x144   : > { %6609 = vst [vmem:[#allocation30_spill] sm:$0xff] %v5656_v49  ;;  %v2176_v1 = vsel %vm2127_vm10, %v1023_v6, %v3791_v58  ;;  %v2177_v51 = vsel %vm2127_vm10, %v1024_v28, %v3792_v62  ;;  %3889 = vrot.lane.b32.xlu2 %v6616_v41, %s3909_s18  ;;  %v3787_v57 = vunpack.i.h.bf16 %v3785_v18  ;;  %v3786_v49 = vunpack.i.l.bf16 %v3785_v18 }
 0x145   : > { %v5658_v31 = vpop.f32.mrf.mxu2  ;;  %v2208_v29 = vsel %vm2127_vm10, %v6614_v4, %v3781_v55  ;;  %vm6617_vm15 = vcmp.gt.f32.partialorder %v6610_v13, 0.5  ;;  %v1376_v55 = vsel %vm6618_vm6, %v4799_v30, 0.0  ;;  %v1599_v28 = vsel %vm6619_vm13, %v5210_v42, 0.0  ;;  %v5704_v30 = vld [vmem:[%s6058_s2] ss:$0 sm:$0xff] }
 0x146   : > { %v5660_v11 = vpop.f32.mrf.mxu0  ;;  %v5662_v61 = vpop.f32.mrf.mxu1  ;;  %v1375_v62 = vsel %vm6617_vm15, %v4809_v8, 0.0  ;;  %v2241_v6 = vsel %vm2127_vm10, %v1376_v55, %v3787_v57  ;;  %v1600_v18 = vsel %vm6620_vm1, %v5218_v47, 0.0  ;;  %v1026_v55 = vsel %vm898_vm12, %v5178_v39, 0.0 }
 0x147   : > { %v2240_v58 = vsel %vm2127_vm10, %v1375_v62, %v3786_v49  ;;  %v1025_v62 = vsel %vm897_vm7, %v5184_v21, 0.0  ;;  %v2688_v21 = vadd.f32 %v5704_v30, %v5507_v34  ;;  %vm6624_vm9 = vcmp.gt.f32.partialorder %v6472_v27, 0.5 }
 0x148   : > { %2986 = vmatmul.bf16.gmra.mxu3 %v2294_v48  ;;  %v6615_v48 = vld [vmem:[#allocation10_spill] sm:$0xff]  ;;  %v2299_v49 = vpack.c.bf16 %v2241_v6, %v2240_v58  ;;  %v3800_v6 = vpop.permute.xlu2 %3799  ;;  %vm6626_vm0 = vcmp.gt.f32.partialorder %v6473_v46, 0.5  ;;  %vm3153_vm15 = vcmask 519168   ;;  %v2691_v27 = vadd.f32 %v5704_v30, %v5529_v60 }
 0x149   : > { %3416 = vmatmul.msk.bf16.gmra.mxu0 %vm2127_vm10, %v2295_v9  ;;  %v2209_v9 = vsel %vm2127_vm10, %v6615_v48, %v3782_v53  ;;  %v3805_v4 = vpop.permute.xlu0 %3804  ;;  %v2686_v48 = vadd.f32 %v5704_v30, %v5458_v10 }
 0x14a   : > { %v2298_v23 = vpack.c.bf16 %v2209_v9, %v2208_v29  ;;  %v3806_v41 = vunpack.i.l.bf16 %v3805_v4 }
 0x14b   : > { %v5671_v33 = vpop.f32.mrf.mxu3 }
 0x14c   : > { %6613 = vst [vmem:[#allocation26_spill] sm:$0xff] %v5671_v33  ;;  %v2297_v33 = vpack.c.bf16 %v2177_v51, %v2176_v1  ;;  %v2300_v1 = vpack.c.bf16 %v1600_v18, %v1599_v28  ;;  %v3795_v51 = vpop.permute.xlu1 %3794  ;;  %v2178_v28 = vsel %vm2127_vm10, %v1025_v62, %v3806_v41  ;;  %v1377_v41 = vsel %vm6624_vm9, %v5031_v17, 0.0 }
 0x14d   : > { %v5681_v19 = vpop.f32.mrf.mxu2  ;;  %v3797_v9 = vunpack.i.h.bf16 %v3795_v51 }
 0x14e   : > { %v5683_v37 = vpop.f32.mrf.mxu0  ;;  %v2774_v53 = vpop.f32.mrf.mxu1 }
 0x14f   : > { %v2775_v57 = vadd.f32 %v2774_v53, %v2686_v48  ;;  %v6622_v53 = vld [vmem:[#allocation20_spill] sm:$0xff] }
 0x151   : > { %2813 = vmatmul.bf16.gmra.mxu1 %v2297_v33  ;;  %v3796_v33 = vunpack.i.l.bf16 %v3795_v51 }
 0x152   : > { %2902 = vmatmul.bf16.gmra.mxu2 %v2298_v23  ;;  %v3807_v23 = vunpack.i.h.bf16 %v3805_v4 }
 0x153   : > { %v5699_v8 = vpop.f32.mrf.mxu3 }
 0x154   : > { %6621 = vst [vmem:[#allocation49_spill] sm:$0xff] %v5699_v8  ;;  %v2179_v18 = vsel %vm2127_vm10, %v1026_v55, %v3807_v23  ;;  %v6625_v8 = vld [vmem:[#allocation90_spill] sm:$0xff] }
 0x155   : > { %v2863_v29 = vpop.f32.mrf.mxu2  ;;  %v2302_v23 = vpack.c.bf16 %v2179_v18, %v2178_v28 }
 0x156   : > { %v3041_v13 = vpop.f32.mrf.mxu0  ;;  %v2776_v59 = vpop.f32.mrf.mxu1  ;;  %v2864_v58 = vadd.f32 %v2863_v29, %v2775_v57  ;;  %v3802_v29 = vunpack.i.h.bf16 %v3800_v6  ;;  %v3801_v57 = vunpack.i.l.bf16 %v3800_v6  ;;  %v1601_v6 = vsel %vm897_vm7, %v5252_v54, 0.0 }
 0x158   : > { %2991 = vmatmul.bf16.gmra.mxu3 %v2299_v49  ;;  %v2210_v49 = vsel %vm2127_vm10, %v6622_v53, %v3796_v33  ;;  %v1378_v33 = vsel %vm6626_vm0, %v6625_v8, 0.0  ;;  %v2242_v17 = vsel %vm2127_vm10, %v1377_v41, %v3801_v57  ;;  %v1602_v8 = vsel %vm898_vm12, %v5262_v22, 0.0 }
 0x159   : > { %3417 = vmatmul.msk.bf16.gmra.mxu0 %vm2127_vm10, %v2300_v1  ;;  %v6623_v1 = vld [vmem:[#allocation21_spill] sm:$0xff]  ;;  %vm6631_vm12 = vcmp.gt.f32.partialorder %v4851_v45, 0.5  ;;  %v2696_v45 = vadd.f32 %v5704_v30, %v5614_v0 }
 0x15a   : > { %v2211_v51 = vsel %vm2127_vm10, %v6623_v1, %v3797_v9  ;;  %v2777_v9 = vadd.f32 %v2776_v59, %v2688_v21  ;;  %v3820_v59 = vpop.permute.xlu0 %3819  ;;  %v3810_v1 = vpop.permute.xlu1 %3809 }
 0x15b   : > { %v2952_v10 = vpop.f32.mrf.mxu3  ;;  %v2303_v55 = vpack.c.bf16 %v2211_v51, %v2210_v49  ;;  %v2305_v49 = vpack.c.bf16 %v1602_v8, %v1601_v6  ;;  %v3822_v46 = vunpack.i.h.bf16 %v3820_v59  ;;  %v3812_v57 = vunpack.i.h.bf16 %v3810_v1  ;;  %v6629_v6 = vld [vmem:[#allocation28_spill] sm:$0xff]  ;;  %v6630_v8 = vld [vmem:[#allocation29_spill] sm:$0xff] }
 0x15c   : > { %v2953_v4 = vadd.f32 %v2952_v10, %v2864_v58  ;;  %v3811_v41 = vunpack.i.l.bf16 %v3810_v1 }
 0x15d   : > { %v2865_v48 = vpop.f32.mrf.mxu2 }
 0x15e   : > { %v3043_v39 = vpop.f32.mrf.mxu0  ;;  %v3042_v62 = vadd.f32 %v3041_v13, %v2953_v4  ;;  %v2779_v34 = vpop.f32.mrf.mxu1  ;;  %v2243_v13 = vsel %vm2127_vm10, %v1378_v33, %v3802_v29  ;;  %v2866_v10 = vadd.f32 %v2865_v48, %v2777_v9  ;;  %v3821_v29 = vunpack.i.l.bf16 %v3820_v59 }
 0x15f   : > { %v2304_v53 = vpack.c.bf16 %v2243_v13, %v2242_v17  ;;  %v2780_v33 = vadd.f32 %v2779_v34, %v2691_v27  ;;  %v3815_v17 = vpop.permute.xlu2 %3814  ;;  %v1379_v27 = vsel %vm6631_vm12, %v6498_v63, 0.0 }
 0x160   : > { %v3121_v58 = vpack.c.bf16 %v3042_v62, %v3042_v62  ;;  %v1027_v62 = vsel %vm899_vm4, %v5210_v42, 0.0  ;;  %v2212_v42 = vsel %vm2127_vm10, %v6629_v6, %v3811_v41 }
 0x161   : > { %2818 = vmatmul.bf16.gmra.mxu1 %v2302_v23  ;;  %v6627_v23 = vld [vmem:[#allocation87_spill] sm:$0xff] }
 0x162   : > { %3154 = vst.msk [vmem:[%s5734_s27] sm:$0xf] %vm3153_vm15, %v3121_v58  ;;  %2907 = vmatmul.bf16.gmra.mxu2 %v2303_v55  ;;  %vm6628_vm7 = vcmp.lt.f32.partialorder %v6627_v23, 14.5  ;;  %vm6633_vm6 = vcmp.gt.f32.partialorder %v6627_v23, 0.5 }
 0x163   : > { %v2954_v28 = vpop.f32.mrf.mxu3  ;;  %v1028_v55 = vsel %vm6628_vm7, %v5218_v47, 0.0  ;;  %v2213_v47 = vsel %vm2127_vm10, %v6630_v8, %v3812_v57  ;;  %vm6636_vm13 = vmmov %vm6628_vm7 }
 0x164   : > { %v2955_v18 = vadd.f32 %v2954_v28, %v2866_v10  ;;  %v2181_v58 = vsel %vm2127_vm10, %v1028_v55, %v3822_v46  ;;  %v2693_v10 = vadd.f32 %v5704_v30, %v5590_v32  ;;  %v6634_v55 = vld [vmem:[#allocation53_spill] sm:$0xff] }
 0x165   : > { %v2868_v51 = vpop.f32.mrf.mxu2 }
 0x166   : > { %v3046_v4 = vpop.f32.mrf.mxu0  ;;  %v3044_v21 = vadd.f32 %v3043_v39, %v2955_v18  ;;  %v2781_v48 = vpop.f32.mrf.mxu1  ;;  %v2869_v60 = vadd.f32 %v2868_v51, %v2780_v33  ;;  %v2180_v39 = vsel %vm2127_vm10, %v1027_v62, %v3821_v29  ;;  %v2308_v51 = vpack.c.bf16 %v2213_v47, %v2212_v42  ;;  %v6635_v33 = vld [vmem:[#allocation65_spill] sm:$0xff] }
 0x167   : > { %v2307_v18 = vpack.c.bf16 %v2181_v58, %v2180_v39  ;;  %v2782_v57 = vadd.f32 %v2781_v48, %v2693_v10  ;;  %v3835_v48 = vpop.permute.xlu0 %3834 }
 0x168   : > { %v3122_v9 = vpack.c.bf16 %v3044_v21, %v3044_v21  ;;  %2996 = vmatmul.bf16.gmra.mxu3 %v2304_v53  ;;  %v3817_v53 = vunpack.i.h.bf16 %v3815_v17  ;;  %v6632_v21 = vld [vmem:[#allocation68_spill] sm:$0xff]  ;;  %v3837_v23 = vunpack.i.h.bf16 %v3835_v48  ;;  %v3836_v47 = vunpack.i.l.bf16 %v3835_v48 }
 0x169   : > { %3418 = vmatmul.msk.bf16.gmra.mxu0 %vm2127_vm10, %v2305_v49  ;;  %v3816_v49 = vunpack.i.l.bf16 %v3815_v17  ;;  %v1380_v46 = vsel %vm6633_vm6, %v6632_v21, 0.0 }
 0x16a   : > { %3155 = vst.msk [vmem:[%s5734_s27 + $0x4] sm:$0xf] %vm3153_vm15, %v3122_v9  ;;  %v2245_v62 = vsel %vm2127_vm10, %v1380_v46, %v3817_v53  ;;  %v1604_v9 = vsel %vm6636_vm13, %v6635_v33, 0.0  ;;  %v3830_v46 = vpop.permute.xlu2 %3829 }
 0x16b   : > { %v2957_v13 = vpop.f32.mrf.mxu3  ;;  %v2244_v32 = vsel %vm2127_vm10, %v1379_v27, %v3816_v49  ;;  %v6639_v49 = vld [vmem:[#allocation95_spill] sm:$0xff]  ;;  %v3831_v48 = vunpack.i.l.bf16 %v3830_v46 }
 0x16c   : > { %v2958_v34 = vadd.f32 %v2957_v13, %v2869_v60  ;;  %v2309_v58 = vpack.c.bf16 %v2245_v62, %v2244_v32  ;;  %v3825_v13 = vpop.permute.xlu1 %3824  ;;  %vm6640_vm1 = vcmp.lt.f32.partialorder %v6639_v49, 14.5  ;;  %v6642_v32 = vld [vmem:[#allocation8_spill] sm:$0xff]  ;;  %v2698_v62 = vadd.f32 %v5704_v30, %v5638_v50 }
 0x16d   : > { %v2870_v28 = vpop.f32.mrf.mxu2  ;;  %v3827_v10 = vunpack.i.h.bf16 %v3825_v13  ;;  %vm6644_vm0 = vcmp.gt.f32.partialorder %v6639_v49, 0.5  ;;  %vm6647_vm12 = vmmov %vm6640_vm1 }
 0x16e   : > { %v3048_v59 = vpop.f32.mrf.mxu0  ;;  %v3047_v1 = vadd.f32 %v3046_v4, %v2958_v34  ;;  %v2784_v29 = vpop.f32.mrf.mxu1  ;;  %v1603_v4 = vsel %vm899_vm4, %v6634_v55, 0.0  ;;  %v2871_v63 = vadd.f32 %v2870_v28, %v2782_v57  ;;  %v3826_v28 = vunpack.i.l.bf16 %v3825_v13 }
 0x16f   : > { %v2310_v17 = vpack.c.bf16 %v1604_v9, %v1603_v4  ;;  %v1382_v13 = vsel %vm6644_vm0, %v6520_v38, 0.0  ;;  %vm6663_vm0 = vcmp.gt.f32.partialorder %v6531_v56, 0.5 }
 0x170   : > { %v3123_v41 = vpack.c.bf16 %v3047_v1, %v3047_v1  ;;  %v1030_v1 = vsel %vm6640_vm1, %v5262_v22, 0.0  ;;  %v2215_v22 = vsel %vm2127_vm10, %v6642_v32, %v3827_v10  ;;  %v6648_v32 = vld [vmem:[#allocation66_spill] sm:$0xff]  ;;  %vm6657_vm1 = vcmp.lt.f32.partialorder %v6531_v56, 14.5 }
 0x171   : > { %2823 = vmatmul.bf16.gmra.mxu1 %v2307_v18  ;;  %v6637_v18 = vld [vmem:[#allocation94_spill] sm:$0xff]  ;;  %v2183_v21 = vsel %vm2127_vm10, %v1030_v1, %v3837_v23  ;;  %vm6652_vm6 = vcmp.gt.f32.partialorder %v6648_v32, 0.5 }
 0x172   : > { %3156 = vst.msk [vmem:[%s5734_s27 + $0x8] sm:$0xf] %vm3153_vm15, %v3123_v41  ;;  %2912 = vmatmul.bf16.gmra.mxu2 %v2308_v51  ;;  %vm6638_vm4 = vcmp.lt.f32.partialorder %v6637_v18, 14.5  ;;  %v2785_v51 = vadd.f32 %v2784_v29, %v2696_v45  ;;  %v6641_v41 = vld [vmem:[#allocation7_spill] sm:$0xff]  ;;  %vm6643_vm9 = vcmp.gt.f32.partialorder %v6637_v18, 0.5  ;;  %v2701_v18 = vadd.f32 %v5704_v30, %v5660_v11 }
 0x173   : > { %v2959_v60 = vpop.f32.mrf.mxu3  ;;  %v1029_v53 = vsel %vm6638_vm4, %v5252_v54, 0.0  ;;  %v2214_v54 = vsel %vm2127_vm10, %v6641_v41, %v3826_v28  ;;  %vm6645_vm7 = vmmov %vm6638_vm4  ;;  %vm6656_vm4 = vcmp.gt.f32.partialorder %v4954_v14, 0.5 }
 0x174   : > { %v2960_v39 = vadd.f32 %v2959_v60, %v2871_v63  ;;  %v3832_v60 = vunpack.i.h.bf16 %v3830_v46  ;;  %v3845_v46 = vpop.permute.xlu2 %3844 }
 0x175   : > { %v2873_v6 = vpop.f32.mrf.mxu2 }
 0x176   : > { %v3051_v42 = vpop.f32.mrf.mxu0  ;;  %v3049_v8 = vadd.f32 %v3048_v59, %v2960_v39  ;;  %v2786_v34 = vpop.f32.mrf.mxu1  ;;  %v2874_v0 = vadd.f32 %v2873_v6, %v2785_v51  ;;  %v2182_v59 = vsel %vm2127_vm10, %v1029_v53, %v3836_v47  ;;  %v2247_v23 = vsel %vm2127_vm10, %v1382_v13, %v3832_v60  ;;  %v6646_v47 = vld [vmem:[#allocation50_spill] sm:$0xff] }
 0x177   : > { %v2312_v63 = vpack.c.bf16 %v2183_v21, %v2182_v59  ;;  %v2787_v45 = vadd.f32 %v2786_v34, %v2698_v62  ;;  %v1606_v10 = vsel %vm6647_vm12, %v6646_v47, 0.0  ;;  %v3850_v34 = vpop.permute.xlu0 %3849  ;;  %v3840_v51 = vpop.permute.xlu1 %3839  ;;  %v1032_v62 = vsel %vm904_vm2, %v6635_v33, 0.0  ;;  %vm6669_vm12 = vmmov %vm6657_vm1 }
 0x178   : > { %v3124_v27 = vpack.c.bf16 %v3049_v8, %v3049_v8  ;;  %3001 = vmatmul.bf16.gmra.mxu3 %v2309_v58  ;;  %v2313_v58 = vpack.c.bf16 %v2215_v22, %v2214_v54  ;;  %v3852_v49 = vunpack.i.h.bf16 %v3850_v34  ;;  %v3851_v21 = vunpack.i.l.bf16 %v3850_v34 }
 0x179   : > { %3419 = vmatmul.msk.bf16.gmra.mxu0 %vm2127_vm10, %v2310_v17  ;;  %v1381_v17 = vsel %vm6643_vm9, %v6517_v16, 0.0  ;;  %v3842_v41 = vunpack.i.h.bf16 %v3840_v51  ;;  %v3841_v54 = vunpack.i.l.bf16 %v3840_v51  ;;  %v1031_v22 = vsel %vm903_vm8, %v6634_v55, 0.0 }
 0x17a   : > { %3157 = vst.msk [vmem:[%s5734_s27 + $0xc] sm:$0xf] %vm3153_vm15, %v3124_v27  ;;  %v2246_v50 = vsel %vm2127_vm10, %v1381_v17, %v3831_v48  ;;  %v2185_v60 = vsel %vm2127_vm10, %v1032_v62, %v3852_v49  ;;  %v2703_v13 = vadd.f32 %v5704_v30, %v5683_v37  ;;  %v2706_v49 = vadd.f32 %v5704_v30, %v5437_v43 }
 0x17b   : > { %v2962_v57 = vpop.f32.mrf.mxu3  ;;  %v2314_v53 = vpack.c.bf16 %v2247_v23, %v2246_v50  ;;  %v3847_v50 = vunpack.i.h.bf16 %v3845_v46  ;;  %v3846_v23 = vunpack.i.l.bf16 %v3845_v46  ;;  %v1388_v43 = vsel %vm6656_vm4, %v5570_v25, 0.0  ;;  %v6658_v25 = vld [vmem:[#allocation81_spill] sm:$0xff] }
 0x17c   : > { %v2963_v29 = vadd.f32 %v2962_v57, %v2874_v0  ;;  %vm6659_vm9 = vcmp.lt.f32.partialorder %v6658_v25, 14.5 }
 0x17d   : > { %v2875_v4 = vpop.f32.mrf.mxu2 }
 0x17e   : > { %v3053_v9 = vpop.f32.mrf.mxu0  ;;  %v3052_v39 = vadd.f32 %v3051_v42, %v2963_v29  ;;  %v2789_v6 = vpop.f32.mrf.mxu1  ;;  %v1605_v42 = vsel %vm6645_vm7, %v5352_v12, 0.0  ;;  %v2876_v16 = vadd.f32 %v2875_v4, %v2787_v45  ;;  %v6649_v29 = vld [vmem:[#allocation71_spill] sm:$0xff]  ;;  %vm6665_vm7 = vcmp.gt.f32.partialorder %v6658_v25, 0.5 }
 0x17f   : > { %v2315_v1 = vpack.c.bf16 %v1606_v10, %v1605_v42  ;;  %v2790_v4 = vadd.f32 %v2789_v6, %v2701_v18  ;;  %vm6653_vm13 = vcmp.gt.f32.partialorder %v6649_v29, 0.5  ;;  %v5841_v34 = vpop.permute.xlu2 %3859 }
 0x180   : > { %v3125_v8 = vpack.c.bf16 %v3052_v39, %v3052_v39  ;;  %v6650_v39 = vld [vmem:[#allocation13_spill] sm:$0xff] }
 0x181   : > { %2828 = vmatmul.bf16.gmra.mxu1 %v2312_v63  ;;  %v2216_v55 = vsel %vm2127_vm10, %v6650_v39, %v3841_v54 }
 0x182   : > { %3158 = vst.msk [vmem:[%s5734_s27 + $0x10] sm:$0xf] %vm3153_vm15, %v3125_v8  ;;  %2917 = vmatmul.bf16.gmra.mxu2 %v2313_v58  ;;  %v6651_v58 = vld [vmem:[#allocation14_spill] sm:$0xff] }
 0x183   : > { %v2964_v38 = vpop.f32.mrf.mxu3  ;;  %v2217_v17 = vsel %vm2127_vm10, %v6651_v58, %v3842_v41  ;;  %v5858_v41 = vsel %vm907_vm5, %v5536_v20, 0.0  ;;  %v1033_v20 = vsel %vm6657_vm1, %v5352_v12, 0.0  ;;  %v1034_v58 = vsel %vm6659_vm9, %v6646_v47, 0.0 }
 0x184   : > { %v2965_v28 = vadd.f32 %v2964_v38, %v2876_v16  ;;  %v2318_v10 = vpack.c.bf16 %v2217_v17, %v2216_v55  ;;  %v1383_v16 = vsel %vm6652_vm6, %v4870_v7, 0.0  ;;  %v1384_v38 = vsel %vm6653_vm13, %v4864_v15, 0.0  ;;  %vm6670_vm6 = vmmov %vm6659_vm9 }
 0x185   : > { %v2878_v27 = vpop.f32.mrf.mxu2  ;;  %v2248_v51 = vsel %vm2127_vm10, %v1383_v16, %v3846_v23  ;;  %v1608_v7 = vsel %vm904_vm2, %v5400_v24, 0.0  ;;  %vm6655_vm2 = vcmp.gt.f32.partialorder %v4937_v52, 0.5  ;;  %v6660_v23 = vld [vmem:[#allocation24_spill] sm:$0xff] }
 0x186   : > { %v3056_v0 = vpop.f32.mrf.mxu0  ;;  %v3054_v59 = vadd.f32 %v3053_v9, %v2965_v28  ;;  %v2791_v57 = vpop.f32.mrf.mxu1  ;;  %v2879_v11 = vadd.f32 %v2878_v27, %v2790_v4  ;;  %v2184_v9 = vsel %vm2127_vm10, %v1031_v22, %v3851_v21  ;;  %v2249_v27 = vsel %vm2127_vm10, %v1384_v38, %v3847_v50 }
 0x187   : > { %v2317_v8 = vpack.c.bf16 %v2185_v60, %v2184_v9  ;;  %v2792_v37 = vadd.f32 %v2791_v57, %v2703_v13  ;;  %v2319_v46 = vpack.c.bf16 %v2249_v27, %v2248_v51  ;;  %v1387_v32 = vsel %vm6655_vm2, %v5576_v36, 0.0  ;;  %v6662_v51 = vld [vmem:[#allocation35_spill] sm:$0xff] }
 0x188   : > { %v3126_v63 = vpack.c.bf16 %v3054_v59, %v3054_v59  ;;  %3006 = vmatmul.bf16.gmra.mxu3 %v2314_v53  ;;  %v3855_v59 = vpop.permute.xlu1 %3854  ;;  %v1385_v27 = vsel %vm6663_vm0, %v6662_v51, 0.0 }
 0x189   : > { %3420 = vmatmul.msk.bf16.gmra.mxu0 %vm2127_vm10, %v2315_v1  ;;  %v3865_v1 = vpop.permute.xlu0 %3864  ;;  %v3857_v4 = vunpack.i.h.bf16 %v3855_v59 }
 0x18a   : > { %3159 = vst.msk [vmem:[%s5734_s27 + $0x14] sm:$0xf] %vm3153_vm15, %v3126_v63  ;;  %v3856_v63 = vunpack.i.l.bf16 %v3855_v59  ;;  %v3867_v9 = vunpack.i.h.bf16 %v3865_v1  ;;  %v3866_v60 = vunpack.i.l.bf16 %v3865_v1 }
 0x18b   : > { %v2967_v48 = vpop.f32.mrf.mxu3 }
 0x18c   : > { %v2968_v33 = vadd.f32 %v2967_v48, %v2879_v11  ;;  %v3875_v11 = vpop.permute.xlu2 %3874  ;;  %v2186_v47 = vsel %vm2127_vm10, %v1033_v20, %v3866_v60  ;;  %v2187_v50 = vsel %vm2127_vm10, %v1034_v58, %v3867_v9 }
 0x18d   : > { %v2880_v6 = vpop.f32.mrf.mxu2  ;;  %v3877_v48 = vunpack.i.h.bf16 %v3875_v11  ;;  %v3876_v36 = vunpack.i.l.bf16 %v3875_v11 }
 0x18e   : > { %v3058_v45 = vpop.f32.mrf.mxu0  ;;  %v3057_v42 = vadd.f32 %v3056_v0, %v2968_v33  ;;  %v2794_v28 = vpop.f32.mrf.mxu1  ;;  %v1607_v0 = vsel %vm903_vm8, %v5404_v2, 0.0  ;;  %v2881_v18 = vadd.f32 %v2880_v6, %v2792_v37  ;;  %vm6654_vm8 = vcmp.lt.f32.partialorder %v4954_v14, 14.5  ;;  %v6673_v14 = vld [vmem:[#allocation62_spill] sm:$0xff] }
 0x18f   : > { %v2320_v57 = vpack.c.bf16 %v1608_v7, %v1607_v0  ;;  %v5863_v54 = vsel %vm6654_vm8, %v5543_v35, 0.0  ;;  %v2795_v39 = vadd.f32 %v2794_v28, %v2706_v49  ;;  %v5883_v33 = vsel %vm2127_vm10, %v1387_v32, %v3876_v36  ;;  %v6664_v0 = vld [vmem:[#allocation91_spill] sm:$0xff] }
 0x190   : > { %v3127_v53 = vpack.c.bf16 %v3057_v42, %v3057_v42  ;;  %v2330_v12 = vpack.c.bf16 %v5863_v54, %v5858_v41  ;;  %v5886_v13 = vsel %vm2127_vm10, %v1388_v43, %v3877_v48  ;;  %v2218_v42 = vsel %vm2127_vm10, %v6660_v23, %v3856_v63 }
 0x191   : > { %2833 = vmatmul.bf16.gmra.mxu1 %v2317_v8  ;;  %v5878_v17 = vpop.permute.xlu0 %3879  ;;  %v3862_v28 = vunpack.i.h.bf16 %v5841_v34  ;;  %v3861_v37 = vunpack.i.l.bf16 %v5841_v34  ;;  %v1386_v7 = vsel %vm6665_vm7, %v6664_v0, 0.0  ;;  %v2322_v49 = vpack.c.bf16 %v2187_v50, %v2186_v47 }
 0x192   : > { %3160 = vst.msk [vmem:[%s5734_s27 + $0x18] sm:$0xf] %vm3153_vm15, %v3127_v53  ;;  %2922 = vmatmul.bf16.gmra.mxu2 %v2318_v10  ;;  %v6661_v10 = vld [vmem:[#allocation25_spill] sm:$0xff] }
 0x193   : > { %v2969_v15 = vpop.f32.mrf.mxu3  ;;  %v2219_v16 = vsel %vm2127_vm10, %v6661_v10, %v3857_v4  ;;  %v2250_v4 = vsel %vm2127_vm10, %v1385_v27, %v3861_v37  ;;  %v2251_v63 = vsel %vm2127_vm10, %v1386_v7, %v3862_v28  ;;  %v3882_v10 = vunpack.i.h.bf16 %v5878_v17  ;;  %v6672_v27 = vld [vmem:[#allocation34_spill] sm:$0xff] }
 0x194   : > { %v2970_v21 = vadd.f32 %v2969_v15, %v2881_v18  ;;  %v6666_v18 = vld [vmem:[#allocation46_spill] sm:$0xff]  ;;  %v2324_v36 = vpack.c.bf16 %v2251_v63, %v2250_v4  ;;  %v1035_v37 = vsel %vm907_vm5, %v5404_v2, 0.0  ;;  %v6674_v4 = vld [vmem:[#allocation77_spill] sm:$0xff] }
 0x195   : > { %v2883_v22 = vpop.f32.mrf.mxu2  ;;  %v2708_v15 = vadd.f32 %v5704_v30, %v6666_v18  ;;  %v2716_v63 = vadd.f32 %v5704_v30, %v6674_v4 }
 0x196   : > { %v3061_v29 = vpop.f32.mrf.mxu0  ;;  %v3059_v62 = vadd.f32 %v3058_v45, %v2970_v21  ;;  %v2796_v35 = vpop.f32.mrf.mxu1  ;;  %v2884_v6 = vadd.f32 %v2883_v22, %v2795_v39  ;;  %v2329_v45 = vpack.c.bf16 %v5886_v13, %v5883_v33  ;;  %v2323_v21 = vpack.c.bf16 %v2219_v16, %v2218_v42 }
 0x197   : > { %v2797_v22 = vadd.f32 %v2796_v35, %v2708_v15  ;;  %v3881_v16 = vunpack.i.l.bf16 %v5878_v17 }
 0x198   : > { %v3128_v55 = vpack.c.bf16 %v3059_v62, %v3059_v62  ;;  %3011 = vmatmul.bf16.gmra.mxu3 %v2319_v46  ;;  %v6667_v46 = vld [vmem:[#allocation17_spill] sm:$0xff] }
 0x199   : > { %3421 = vmatmul.msk.bf16.gmra.mxu0 %vm2127_vm10, %v2320_v57  ;;  %v1037_v34 = vsel %vm909_vm14, %v6667_v46, 0.0  ;;  %v6668_v57 = vld [vmem:[#allocation36_spill] sm:$0xff]  ;;  %vm6671_vm14 = vmmov %vm6654_vm8  ;;  %v2188_v17 = vsel %vm2127_vm10, %v1035_v37, %v3881_v16 }
 0x19a   : > { %3161 = vst.msk [vmem:[%s5734_s27 + $0x1c] sm:$0xf] %vm3153_vm15, %v3128_v55  ;;  %v1038_v32 = vsel %vm910_vm3, %v6668_v57, 0.0  ;;  %v1610_v3 = vsel %vm6670_vm6, %v6668_v57, 0.0  ;;  %v3870_v55 = vpop.permute.xlu1 %3869 }
 0x19b   : > { %v2972_v8 = vpop.f32.mrf.mxu3  ;;  %v3872_v23 = vunpack.i.h.bf16 %v3870_v55  ;;  %v3871_v42 = vunpack.i.l.bf16 %v3870_v55  ;;  %v6676_v55 = vld [vmem:[#allocation38_spill] sm:$0xff] }
 0x19c   : > { %v2973_v38 = vadd.f32 %v2972_v8, %v2884_v6  ;;  %v2711_v8 = vadd.f32 %v5704_v30, %v5509_v44  ;;  %v1036_v44 = vsel %vm6671_vm14, %v5400_v24, 0.0  ;;  %v2713_v24 = vadd.f32 %v5704_v30, %v6673_v14 }
 0x19d   : > { %v2885_v53 = vpop.f32.mrf.mxu2  ;;  %v2189_v51 = vsel %vm2127_vm10, %v1036_v44, %v3882_v10  ;;  %v2220_v0 = vsel %vm2127_vm10, %v6672_v27, %v3871_v42  ;;  %v2221_v52 = vsel %vm2127_vm10, %v6431_v5, %v3872_v23 }
 0x19e   : > { %v3063_v1 = vpop.f32.mrf.mxu0  ;;  %v3062_v59 = vadd.f32 %v3061_v29, %v2973_v38  ;;  %v2799_v43 = vpop.f32.mrf.mxu1  ;;  %v1609_v29 = vsel %vm6669_vm12, %v6667_v46, 0.0  ;;  %v2886_v26 = vadd.f32 %v2885_v53, %v2797_v22 }
 0x19f   : > { %v3895_v20 = vpop.permute.xlu0 %3894  ;;  %v2325_v39 = vpack.c.bf16 %v1610_v3, %v1609_v29  ;;  %v2800_v38 = vadd.f32 %v2799_v43, %v2711_v8  ;;  %v3890_v8 = vpop.permute.xlu2 %3889 }
 0x1a0   : > { %v3129_v62 = vpack.c.bf16 %v3062_v59, %v3062_v59  ;;  %v3897_v11 = vunpack.i.h.bf16 %v3895_v20  ;;  %v3896_v9 = vunpack.i.l.bf16 %v3895_v20  ;;  %v2327_v59 = vpack.c.bf16 %v2189_v51, %v2188_v17 }
 0x1a1   : > { %2838 = vmatmul.bf16.gmra.mxu1 %v2322_v49  ;;  %v2328_v49 = vpack.c.bf16 %v2221_v52, %v2220_v0  ;;  %v3892_v42 = vunpack.i.h.bf16 %v3890_v8  ;;  %v3891_v10 = vunpack.i.l.bf16 %v3890_v8  ;;  %v6683_v52 = vld [vmem:[#allocation43_spill] sm:$0xff] }
 0x1a2   : > { %3162 = vst.msk [vmem:[%s5734_s27 + $0x20] sm:$0xf] %vm3153_vm15, %v3129_v62  ;;  %2927 = vmatmul.bf16.gmra.mxu2 %v2323_v21  ;;  %v5925_v60 = vsel %vm2127_vm10, %v1037_v34, %v3896_v9  ;;  %v5928_v48 = vsel %vm2127_vm10, %v1038_v32, %v3897_v11  ;;  %v3885_v43 = vpop.permute.xlu1 %3884 }
 0x1a3   : > { %v2974_v35 = vpop.f32.mrf.mxu3  ;;  %v2332_v25 = vpack.c.bf16 %v5928_v48, %v5925_v60  ;;  %v3887_v3 = vunpack.i.h.bf16 %v3885_v43  ;;  %v3886_v11 = vunpack.i.l.bf16 %v3885_v43  ;;  %v3911_v60 = vmov 0.0|0.0  }
 0x1a4   : > { %v2975_v56 = vadd.f32 %v2974_v35, %v2886_v26 }
 0x1a5   : > { %v2888_v58 = vpop.f32.mrf.mxu2 }
 0x1a6   : > { %v3066_v6 = vpop.f32.mrf.mxu0  ;;  %v3064_v47 = vadd.f32 %v3063_v1, %v2975_v56  ;;  %v2801_v50 = vpop.f32.mrf.mxu1  ;;  %v2889_v53 = vadd.f32 %v2888_v58, %v2800_v38  ;;  %v2223_v58 = vsel %vm2127_vm10, %v6676_v55, %v3887_v3 }
 0x1a7   : > { %v2802_v46 = vadd.f32 %v2801_v50, %v2713_v24 }
 0x1a8   : > { %v3130_v28 = vpack.c.bf16 %v3064_v47, %v3064_v47  ;;  %3016 = vmatmul.bf16.gmra.mxu3 %v2324_v36  ;;  %v6675_v36 = vld [vmem:[#allocation52_spill] sm:$0xff] }
 0x1a9   : > { %3422 = vmatmul.msk.bf16.gmra.mxu0 %vm2127_vm10, %v2325_v39  ;;  %v2222_v39 = vsel %vm2127_vm10, %v6675_v36, %v3886_v11  ;;  %v6680_v11 = vld [vmem:[#allocation18_spill] sm:$0xff] }
 0x1aa   : > { %3163 = vst.msk [vmem:[%s5734_s27 + $0x24] sm:$0xf] %vm3153_vm15, %v3130_v28  ;;  %v3407_v28 = vpack.c.bf16 %v3892_v42, %v3891_v10 }
 0x1ab   : > { %v2977_v1 = vpop.f32.mrf.mxu3 }
 0x1ac   : > { %v2978_v2 = vadd.f32 %v2977_v1, %v2889_v53  ;;  %v2721_v1 = vadd.f32 %v5704_v30, %v5646_v40  ;;  %v2723_v40 = vadd.f32 %v5704_v30, %v5662_v61 }
 0x1ad   : > { %v2890_v7 = vpop.f32.mrf.mxu2 }
 0x1ae   : > { %v3068_v18 = vpop.f32.mrf.mxu0  ;;  %v3067_v15 = vadd.f32 %v3066_v6, %v2978_v2  ;;  %v2804_v21 = vpop.f32.mrf.mxu1  ;;  %v2891_v57 = vadd.f32 %v2890_v7, %v2802_v46 }
 0x1af   : > { %v2805_v9 = vadd.f32 %v2804_v21, %v2716_v63 }
 0x1b0   : > { %v3131_v34 = vpack.c.bf16 %v3067_v15, %v3067_v15 }
 0x1b1   : > { %2843 = vmatmul.bf16.gmra.mxu1 %v2327_v59 }
 0x1b2   : > { %3164 = vst.msk [vmem:[%s5734_s27 + $0x28] sm:$0xf] %vm3153_vm15, %v3131_v34  ;;  %2932 = vmatmul.bf16.gmra.mxu2 %v2328_v49 }
 0x1b3   : > { %v2979_v32 = vpop.f32.mrf.mxu3 }
 0x1b4   : > { %v2980_v5 = vadd.f32 %v2979_v32, %v2891_v57  ;;  %v6679_v32 = vld [vmem:[#allocation51_spill] sm:$0xff] }
 0x1b5   : > { %v2893_v22 = vpop.f32.mrf.mxu2 }
 0x1b6   : > { %v3071_v62 = vpop.f32.mrf.mxu0  ;;  %v3069_v20 = vadd.f32 %v3068_v18, %v2980_v5  ;;  %v2806_v29 = vpop.f32.mrf.mxu1  ;;  %v2894_v35 = vadd.f32 %v2893_v22, %v2805_v9  ;;  %v2726_v5 = vadd.f32 %v5704_v30, %v6679_v32  ;;  %v2728_v9 = vadd.f32 %v5704_v30, %v6680_v11 }
 0x1b8   : > { %v3132_v26 = vpack.c.bf16 %v3069_v20, %v3069_v20  ;;  %3021 = vmatmul.bf16.gmra.mxu3 %v2329_v45  ;;  %v6677_v45 = vld [vmem:[#allocation42_spill] sm:$0xff] }
 0x1b9   : > { %3423 = vmatmul.msk.bf16.gmra.mxu0 %vm2127_vm10, %v2330_v12  ;;  %v2718_v41 = vadd.f32 %v5704_v30, %v6677_v45  ;;  %v2333_v12 = vpack.c.bf16 %v2223_v58, %v2222_v39 }
 0x1ba   : > { %3165 = vst.msk [vmem:[%s5734_s27 + $0x2c] sm:$0xf] %vm3153_vm15, %v3132_v26 }
 0x1bb   : > { %v2982_v56 = vpop.f32.mrf.mxu3  ;;  %v2807_v50 = vadd.f32 %v2806_v29, %v2718_v41 }
 0x1bc   : > { %v2983_v6 = vadd.f32 %v2982_v56, %v2894_v35 }
 0x1bd   : > { %v2895_v33 = vpop.f32.mrf.mxu2 }
 0x1be   : > { %v3073_v13 = vpop.f32.mrf.mxu0  ;;  %v3072_v54 = vadd.f32 %v3071_v62, %v2983_v6  ;;  %v2809_v47 = vpop.f32.mrf.mxu1  ;;  %v2896_v16 = vadd.f32 %v2895_v33, %v2807_v50  ;;  %v6681_v33 = vld [vmem:[#allocation63_spill] sm:$0xff] }
 0x1bf   : > { %v2810_v27 = vadd.f32 %v2809_v47, %v2721_v1 }
 0x1c0   : > { %v3133_v23 = vpack.c.bf16 %v3072_v54, %v3072_v54 }
 0x1c1   : > { %2848 = vmatmul.bf16.gmra.mxu1 %v2332_v25 }
 0x1c2   : > { %3166 = vst.msk [vmem:[%s5734_s27 + $0x30] sm:$0xf] %vm3153_vm15, %v3133_v23  ;;  %2937 = vmatmul.bf16.gmra.mxu2 %v2333_v12 }
 0x1c3   : > { %v2984_v38 = vpop.f32.mrf.mxu3 }
 0x1c4   : > { %v2985_v37 = vadd.f32 %v2984_v38, %v2896_v16  ;;  %v6682_v16 = vld [vmem:[#allocation11_spill] sm:$0xff] }
 0x1c5   : > { %v2898_v44 = vpop.f32.mrf.mxu2  ;;  %v2733_v38 = vadd.f32 %v5704_v30, %v6682_v16 }
 0x1c6   : > { %v3076_v53 = vpop.f32.mrf.mxu0  ;;  %v3074_v17 = vadd.f32 %v3073_v13, %v2985_v37  ;;  %v2811_v51 = vpop.f32.mrf.mxu1  ;;  %v2899_v48 = vadd.f32 %v2898_v44, %v2810_v27  ;;  %v2731_v13 = vadd.f32 %v5704_v30, %v6681_v33 }
 0x1c7   : > { %v2812_v15 = vadd.f32 %v2811_v51, %v2723_v40 }
 0x1c8   : > { %v3134_v0 = vpack.c.bf16 %v3074_v17, %v3074_v17  ;;  %3408 = vmatmul.msk.bf16.gmra.mxu3 %vm4785_vm11, %v3407_v28 }
 0x1c9   : > { %3115 = vmatmul.bf16.gmra.mxu0 %v3911_v60  ;;  %v2736_v60 = vadd.f32 %v5704_v30, %v6683_v52 }
 0x1ca   : > { %3167 = vst.msk [vmem:[%s5734_s27 + $0x34] sm:$0xf] %vm3153_vm15, %v3134_v0 }
 0x1cb   : > { %v2987_v25 = vpop.f32.mrf.mxu3 }
 0x1cc   : > { %v2988_v2 = vadd.f32 %v2987_v25, %v2899_v48 }
 0x1cd   : > { %v2900_v7 = vpop.f32.mrf.mxu2 }
 0x1ce   : > { %v3078_v18 = vpop.f32.mrf.mxu0  ;;  %v3077_v14 = vadd.f32 %v3076_v53, %v2988_v2  ;;  %v2814_v24 = vpop.f32.mrf.mxu1  ;;  %v2901_v49 = vadd.f32 %v2900_v7, %v2812_v15 }
 0x1cf   : > { %v2815_v62 = vadd.f32 %v2814_v24, %v2726_v5 }
 0x1d0   : > { %v3135_v59 = vpack.c.bf16 %v3077_v14, %v3077_v14 }
 0x1d2   : > { %3168 = vst.msk [vmem:[%s5734_s27 + $0x38] sm:$0xf] %vm3153_vm15, %v3135_v59  ;;  %v6684_v59 = vld [vmem:[#allocation45_spill] sm:$0xff] }
 0x1d3   : > { %v2989_v21 = vpop.f32.mrf.mxu3 }
 0x1d4   : > { %v2990_v46 = vadd.f32 %v2989_v21, %v2901_v49  ;;  %v2738_v49 = vadd.f32 %v5704_v30, %v6684_v59 }
 0x1d5   : > { %v2903_v34 = vpop.f32.mrf.mxu2 }
 0x1d6   : > { %v3081_v57 = vpop.f32.mrf.mxu0  ;;  %v3079_v43 = vadd.f32 %v3078_v18, %v2990_v46  ;;  %v2816_v22 = vpop.f32.mrf.mxu1  ;;  %v2904_v4 = vadd.f32 %v2903_v34, %v2815_v62 }
 0x1d7   : > { %v2817_v56 = vadd.f32 %v2816_v22, %v2728_v9 }
 0x1d8   : > { %v3136_v61 = vpack.c.bf16 %v3079_v43, %v3079_v43 }
 0x1da   : > { %3169 = vst.msk [vmem:[%s5734_s27 + $0x3c] sm:$0xf] %vm3153_vm15, %v3136_v61  ;;  %v2741_v61 = vadd.f32 %v5704_v30, %v5658_v31 }
 0x1db   : > { %v2992_v63 = vpop.f32.mrf.mxu3 }
 0x1dc   : > { %v2993_v20 = vadd.f32 %v2992_v63, %v2904_v4 }
 0x1dd   : > { %v2905_v29 = vpop.f32.mrf.mxu2 }
 0x1de   : > { %v3083_v3 = vpop.f32.mrf.mxu0  ;;  %v3082_v26 = vadd.f32 %v3081_v57, %v2993_v20  ;;  %v2819_v35 = vpop.f32.mrf.mxu1  ;;  %v2906_v39 = vadd.f32 %v2905_v29, %v2817_v56  ;;  %v2743_v56 = vadd.f32 %v5704_v30, %v5681_v19 }
 0x1df   : > { %v2820_v54 = vadd.f32 %v2819_v35, %v2731_v13 }
 0x1e0   : > { %v3137_v36 = vpack.c.bf16 %v3082_v26, %v3082_v26 }
 0x1e2   : > { %3170 = vst.msk [vmem:[%s5734_s27 + $0x40] sm:$0xf] %vm3153_vm15, %v3137_v36 }
 0x1e3   : > { %v2994_v55 = vpop.f32.mrf.mxu3 }
 0x1e4   : > { %v2995_v58 = vadd.f32 %v2994_v55, %v2906_v39 }
 0x1e5   : > { %v2908_v6 = vpop.f32.mrf.mxu2 }
 0x1e6   : > { %v3086_v8 = vpop.f32.mrf.mxu0  ;;  %v3084_v45 = vadd.f32 %v3083_v3, %v2995_v58  ;;  %v2821_v41 = vpop.f32.mrf.mxu1  ;;  %v2909_v47 = vadd.f32 %v2908_v6, %v2820_v54 }
 0x1e7   : > { %v2822_v44 = vadd.f32 %v2821_v41, %v2733_v38  ;;  %v6686_v38 = vld [vmem:[#allocation61_spill] sm:$0xff] }
 0x1e8   : > { %v3138_v12 = vpack.c.bf16 %v3084_v45, %v3084_v45  ;;  %v6685_v45 = vld [vmem:[#allocation6_spill] sm:$0xff] }
 0x1e9   : > { %v2746_v41 = vadd.f32 %v5704_v30, %v6685_v45 }
 0x1ea   : > { %3171 = vst.msk [vmem:[%s5734_s27 + $0x44] sm:$0xf] %vm3153_vm15, %v3138_v12 }
 0x1eb   : > { %v2997_v50 = vpop.f32.mrf.mxu3 }
 0x1ec   : > { %v2998_v23 = vadd.f32 %v2997_v50, %v2909_v47 }
 0x1ed   : > { %v2910_v42 = vpop.f32.mrf.mxu2 }
 0x1ee   : > { %v3088_v10 = vpop.f32.mrf.mxu0  ;;  %v3087_v28 = vadd.f32 %v3086_v8, %v2998_v23  ;;  %v2824_v37 = vpop.f32.mrf.mxu1  ;;  %v2911_v1 = vadd.f32 %v2910_v42, %v2822_v44 }
 0x1ef   : > { %v2825_v2 = vadd.f32 %v2824_v37, %v2736_v60  ;;  %v6687_v60 = vld [vmem:[#allocation76_spill] sm:$0xff] }
 0x1f0   : > { %v3139_v53 = vpack.c.bf16 %v3087_v28, %v3087_v28  ;;  %v2748_v28 = vadd.f32 %v5704_v30, %v6686_v38 }
 0x1f2   : > { %3172 = vst.msk [vmem:[%s5734_s27 + $0x48] sm:$0xf] %vm3153_vm15, %v3139_v53 }
 0x1f3   : > { %v2999_v17 = vpop.f32.mrf.mxu3 }
 0x1f4   : > { %v3000_v51 = vadd.f32 %v2999_v17, %v2911_v1 }
 0x1f5   : > { %v2913_v27 = vpop.f32.mrf.mxu2 }
 0x1f6   : > { %v3091_v0 = vpop.f32.mrf.mxu0  ;;  %v3089_v48 = vadd.f32 %v3088_v10, %v3000_v51  ;;  %v2826_v25 = vpop.f32.mrf.mxu1  ;;  %v2914_v18 = vadd.f32 %v2913_v27, %v2825_v2 }
 0x1f7   : > { %v2827_v34 = vadd.f32 %v2826_v25, %v2738_v49  ;;  %v6688_v49 = vld [vmem:[#allocation44_spill] sm:$0xff] }
 0x1f8   : > { %v3140_v7 = vpack.c.bf16 %v3089_v48, %v3089_v48  ;;  %v2751_v48 = vadd.f32 %v5704_v30, %v6687_v60 }
 0x1fa   : > { %3173 = vst.msk [vmem:[%s5734_s27 + $0x4c] sm:$0xf] %vm3153_vm15, %v3140_v7 }
 0x1fb   : > { %v3002_v40 = vpop.f32.mrf.mxu3 }
 0x1fc   : > { %v3003_v14 = vadd.f32 %v3002_v40, %v2914_v18 }
 0x1fd   : > { %v2915_v24 = vpop.f32.mrf.mxu2 }
 0x1fe   : > { %v3093_v15 = vpop.f32.mrf.mxu0  ;;  %v3092_v21 = vadd.f32 %v3091_v0, %v3003_v14  ;;  %v2829_v46 = vpop.f32.mrf.mxu1  ;;  %v2916_v32 = vadd.f32 %v2915_v24, %v2827_v34 }
 0x1ff   : > { %v2830_v20 = vadd.f32 %v2829_v46, %v2741_v61  ;;  %v6689_v61 = vld [vmem:[#allocation31_spill] sm:$0xff] }
 0x200   : > { %v3141_v57 = vpack.c.bf16 %v3092_v21, %v3092_v21  ;;  %v2753_v21 = vadd.f32 %v5704_v30, %v6688_v49 }
 0x202   : > { %3174 = vst.msk [vmem:[%s5734_s27 + $0x50] sm:$0xf] %vm3153_vm15, %v3141_v57 }
 0x203   : > { %v3004_v5 = vpop.f32.mrf.mxu3 }
 0x204   : > { %v3005_v43 = vadd.f32 %v3004_v5, %v2916_v32 }
 0x205   : > { %v2918_v22 = vpop.f32.mrf.mxu2 }
 0x206   : > { %v3096_v62 = vpop.f32.mrf.mxu0  ;;  %v3094_v4 = vadd.f32 %v3093_v15, %v3005_v43  ;;  %v2831_v63 = vpop.f32.mrf.mxu1  ;;  %v2919_v3 = vadd.f32 %v2918_v22, %v2830_v20 }
 0x207   : > { %v2832_v55 = vadd.f32 %v2831_v63, %v2743_v56 }
 0x208   : > { %v3142_v29 = vpack.c.bf16 %v3094_v4, %v3094_v4  ;;  %v2756_v4 = vadd.f32 %v5704_v30, %v6689_v61 }
 0x20a   : > { %3175 = vst.msk [vmem:[%s5734_s27 + $0x54] sm:$0xf] %vm3153_vm15, %v3142_v29 }
 0x20b   : > { %v3007_v11 = vpop.f32.mrf.mxu3 }
 0x20c   : > { %v3008_v9 = vadd.f32 %v3007_v11, %v2919_v3 }
 0x20d   : > { %v2920_v26 = vpop.f32.mrf.mxu2 }
 0x20e   : > { %v3098_v35 = vpop.f32.mrf.mxu0  ;;  %v3097_v36 = vadd.f32 %v3096_v62, %v3008_v9  ;;  %v2834_v39 = vpop.f32.mrf.mxu1  ;;  %v2921_v58 = vadd.f32 %v2920_v26, %v2832_v55 }
 0x20f   : > { %v2835_v47 = vadd.f32 %v2834_v39, %v2746_v41  ;;  %v6690_v39 = vld [vmem:[#allocation30_spill] sm:$0xff] }
 0x210   : > { %v3143_v31 = vpack.c.bf16 %v3097_v36, %v3097_v36  ;;  %v3900_v36 = vld [vmem:[%s6058_s2] ss:$0 sm:$0xff] }
 0x211   : > { %v2758_v55 = vadd.f32 %v3900_v36, %v6690_v39 }
 0x212   : > { %3176 = vst.msk [vmem:[%s5734_s27 + $0x58] sm:$0xf] %vm3153_vm15, %v3143_v31 }
 0x213   : > { %v3009_v6 = vpop.f32.mrf.mxu3 }
 0x214   : > { %v3010_v8 = vadd.f32 %v3009_v6, %v2921_v58 }
 0x215   : > { %v2923_v33 = vpop.f32.mrf.mxu2 }
 0x216   : > { %v3101_v13 = vpop.f32.mrf.mxu0  ;;  %v3099_v54 = vadd.f32 %v3098_v35, %v3010_v8  ;;  %v2836_v12 = vpop.f32.mrf.mxu1  ;;  %v2924_v50 = vadd.f32 %v2923_v33, %v2835_v47 }
 0x217   : > { %v2837_v53 = vadd.f32 %v2836_v12, %v2748_v28  ;;  %v6692_v28 = vld [vmem:[#allocation49_spill] sm:$0xff] }
 0x218   : > { %v3144_v19 = vpack.c.bf16 %v3099_v54, %v3099_v54  ;;  %v6691_v54 = vld [vmem:[#allocation26_spill] sm:$0xff] }
 0x219   : > { %v2761_v12 = vadd.f32 %v3900_v36, %v6691_v54 }
 0x21a   : > { %3177 = vst.msk [vmem:[%s5734_s27 + $0x5c] sm:$0xf] %vm3153_vm15, %v3144_v19 }
 0x21b   : > { %v3012_v23 = vpop.f32.mrf.mxu3 }
 0x21c   : > { %v3013_v42 = vadd.f32 %v3012_v23, %v2924_v50 }
 0x21d   : > { %v2925_v10 = vpop.f32.mrf.mxu2 }
 0x21e   : > { %v3103_v16 = vpop.f32.mrf.mxu0  ;;  %v3102_v37 = vadd.f32 %v3101_v13, %v3013_v42  ;;  %v2839_v44 = vpop.f32.mrf.mxu1  ;;  %v2926_v17 = vadd.f32 %v2925_v10, %v2837_v53 }
 0x21f   : > { %v2840_v7 = vadd.f32 %v2839_v44, %v2751_v48 }
 0x220   : > { %v3145_v1 = vpack.c.bf16 %v3102_v37, %v3102_v37  ;;  %v2763_v37 = vadd.f32 %v3900_v36, %v6692_v28 }
 0x222   : > { %3178 = vst.msk [vmem:[%s5734_s27 + $0x60] sm:$0xf] %vm3153_vm15, %v3145_v1 }
 0x223   : > { %v3014_v51 = vpop.f32.mrf.mxu3 }
 0x224   : > { %v3015_v27 = vadd.f32 %v3014_v51, %v2926_v17 }
 0x225   : > { %v2928_v0 = vpop.f32.mrf.mxu2 }
 0x226   : > { %v3106_v52 = vpop.f32.mrf.mxu0  ;;  %v3104_v25 = vadd.f32 %v3103_v16, %v3015_v27  ;;  %v2841_v2 = vpop.f32.mrf.mxu1  ;;  %v2929_v40 = vadd.f32 %v2928_v0, %v2840_v7 }
 0x227   : > { %v2842_v57 = vadd.f32 %v2841_v2, %v2753_v21 }
 0x228   : > { %v3146_v18 = vpack.c.bf16 %v3104_v25, %v3104_v25 }
 0x22a   : > { %3179 = vst.msk [vmem:[%s5734_s27 + $0x64] sm:$0xf] %vm3153_vm15, %v3146_v18 }
 0x22b   : > { %v3017_v14 = vpop.f32.mrf.mxu3 }
 0x22c   : > { %v3018_v24 = vadd.f32 %v3017_v14, %v2929_v40 }
 0x22d   : > { %v2930_v15 = vpop.f32.mrf.mxu2 }
 0x22e   : > { %v3108_v59 = vpop.f32.mrf.mxu0  ;;  %v3107_v46 = vadd.f32 %v3106_v52, %v3018_v24  ;;  %v2844_v34 = vpop.f32.mrf.mxu1  ;;  %v2931_v5 = vadd.f32 %v2930_v15, %v2842_v57 }
 0x22f   : > { %v2845_v29 = vadd.f32 %v2844_v34, %v2756_v4 }
 0x230   : > { %v3147_v32 = vpack.c.bf16 %v3107_v46, %v3107_v46 }
 0x232   : > { %3180 = vst.msk [vmem:[%s5734_s27 + $0x68] sm:$0xf] %vm3153_vm15, %v3147_v32 }
 0x233   : > { %v3019_v43 = vpop.f32.mrf.mxu3 }
 0x234   : > { %v3020_v22 = vadd.f32 %v3019_v43, %v2931_v5 }
 0x235   : > { %v2933_v62 = vpop.f32.mrf.mxu2 }
 0x236   : > { %v3109_v63 = vadd.f32 %v3108_v59, %v3020_v22  ;;  %v3111_v20 = vpop.f32.mrf.mxu0  ;;  %v2846_v11 = vpop.f32.mrf.mxu1  ;;  %v2934_v9 = vadd.f32 %v2933_v62, %v2845_v29 }
 0x237   : > { %v2847_v31 = vadd.f32 %v2846_v11, %v2758_v55 }
 0x238   : > { %v3148_v3 = vpack.c.bf16 %v3109_v63, %v3109_v63 }
 0x23a   : > { %3181 = vst.msk [vmem:[%s5734_s27 + $0x6c] sm:$0xf] %vm3153_vm15, %v3148_v3 }
 0x23b   : > { %v3022_v26 = vpop.f32.mrf.mxu3 }
 0x23c   : > { %v3023_v35 = vadd.f32 %v3022_v26, %v2934_v9 }
 0x23d   : > { %v2935_v56 = vpop.f32.mrf.mxu2 }
 0x23e   : > { %v3112_v30 = vadd.f32 %v3111_v20, %v3023_v35  ;;  %v3113_v6 = vpop.f32.mrf.mxu0  ;;  %v2936_v8 = vadd.f32 %v2935_v56, %v2847_v31  ;;  %v2849_v33 = vpop.f32.mrf.mxu1 }
 0x23f   : > { %v2850_v19 = vadd.f32 %v2849_v33, %v2761_v12 }
 0x240   : > { %v3149_v58 = vpack.c.bf16 %v3112_v30, %v3112_v30 }
 0x242   : > { %3182 = vst.msk [vmem:[%s5734_s27 + $0x70] sm:$0xf] %vm3153_vm15, %v3149_v58 }
 0x243   : > { %v3024_v13 = vpop.f32.mrf.mxu3 }
 0x244   : > { %v3025_v45 = vadd.f32 %v3024_v13, %v2936_v8 }
 0x245   : > { %v2938_v41 = vpop.f32.mrf.mxu2 }
 0x246   : > { %v3114_v47 = vadd.f32 %v3113_v6, %v3025_v45  ;;  %v2939_v23 = vadd.f32 %v2938_v41, %v2850_v19  ;;  %v3116_v42 = vpop.f32.mrf.mxu0  ;;  %v2851_v38 = vpop.f32.mrf.mxu1 }
 0x247   : > { %v2852_v1 = vadd.f32 %v2851_v38, %v2763_v37 }
 0x248   : > { %v3150_v50 = vpack.c.bf16 %v3114_v47, %v3114_v47 }
 0x24a   : > { %3183 = vst.msk [vmem:[%s5734_s27 + $0x74] sm:$0xf] %vm3153_vm15, %v3150_v50 }
 0x24b   : > { %v3027_v10 = vpop.f32.mrf.mxu3 }
 0x24c   : > { %v3028_v16 = vadd.f32 %v3027_v10, %v2939_v23 }
 0x24d   : > { %v2940_v53 = vpop.f32.mrf.mxu2 }
 0x24e   : > { %v3117_v44 = vadd.f32 %v3116_v42, %v3028_v16  ;;  %v2941_v51 = vadd.f32 %v2940_v53, %v2852_v1  ;;  %v3118_v52 = vpop.f32.mrf.mxu0 }
 0x250   : > { %v3151_v17 = vpack.c.bf16 %v3117_v44, %v3117_v44 }
 0x252   : > { %3184 = vst.msk [vmem:[%s5734_s27 + $0x78] sm:$0xf] %vm3153_vm15, %v3151_v17 }
 0x253   : > { %v3029_v27 = vpop.f32.mrf.mxu3 }
 0x254   : > { %v3030_v0 = vadd.f32 %v3029_v27, %v2941_v51 }
 0x256   : > { %v3119_v60 = vadd.f32 %v3118_v52, %v3030_v0 }
 0x258   : > { %v3152_v48 = vpack.c.bf16 %v3119_v60, %v3119_v60 }
 0x25a   : > { %3185 = vst.msk [vmem:[%s5734_s27 + $0x7c] sm:$0xf] %vm3153_vm15, %v3152_v48 }
 0x25b PF: > { %s13_s12 = sadd.s32 1, %s3907_s12  }
 0x25c   : > { %p10_p4 = scmp.ge.s32.totalorder %s13_s12, 6  }
 0x25e   :  { %12 = sbr.rel (!%p10_p4) target bundleno = 1 (0x1), region = 62 }

// kernel: perceptual_loss.8
= control target key start
LH: loop header
LB: loop body
LE: loop exit
PB: predicated region body
PF: predicated region fallthrough
CT: control target
= control target key end

     0   :  { %s4056_s12 = smov 0   ;;  %s6436_s0 = inlined_call_operand.vmem [shape: bf16[4,256,3], index: 0, kind: input, shape index: {}]   ;;  %s6437_s1 = inlined_call_operand.vmem [shape: bf16[27,64], index: 1, kind: input, shape index: {}]   ;;  %s6438_s2 = inlined_call_operand.vmem [shape: f32[1,64], index: 2, kind: input, shape index: {}]   ;;  %s6439_s3 = inlined_call_operand.vmem [shape: bf16[4,256,64], index: 3, kind: output, shape index: {}]  }
   0x1 LB: > { %s3235_s13 = sadd.s32 4294967295, %s4024_s12   ;;  %p3239_p0 = scmp.ge.s32.totalorder %s4024_s12, 1  ;;  %s4024_s12 = sphi %s4056_s12, %s13_s12  }
   0x2   : > { %p137_p1 = scmp.lt.s32.totalorder %s4024_s12, 5 }
   0x4   : > { %p138_p2 = pnand %p3239_p0, %p137_p1 }
   0x6   : > { %141 = sbr.rel (%p138_p2) target bundleno = 645 (0x285), region = 32 }
   0xb   : > { %p161_p3 = scmp.lt.s32.totalorder %s3235_s13, 3  ;;  %v236_v0 = vlaneseq  ;;  %v6440_v2 = vmov 0.0   ;;  %s4027_s14 = smov 3  }
   0xc   : > { %3378 = vrot.lane.b32.xlu0 %v6440_v2, %s4027_s14  ;;  %s4028_s19 = smov 6   ;;  %s4029_s20 = smov 9  }
   0xd   : > { %s7179_s13 = smov (!%p161_p3, %s3235_s13), 3  ;;  %v4066_v1 = vshrl.u32 %v236_v0, 7  ;;  %s4030_s21 = smov 12  }
   0xe   : > { %s3270_s15 = sshll.u32 %s7179_s13, 7  ;;  %s4031_s22 = smov 15  }
   0xf   : > { %6717 = vst [vmem:[#allocation2_spill] sm:$0xff] %v4066_v1  ;;  %v4072_v3 = vadd.s32 32, %v4066_v1  ;;  %v4075_v4 = vadd.s32 40, %v4066_v1  ;;  %v4078_v5 = vadd.s32 16, %v4066_v1  ;;  %s4085_s18 = scalar_lea.vmem %s6436_s0, %s3270_s15  ;;  %v4093_v11 = vadd.s32 24, %v4066_v1  ;;  %s4032_s23 = smov 18  }
  0x10   : > { %v3340_v6 = vld [vmem:[%s4085_s18 + $0x18] sm:$0xff]   ;;  %v3338_v7 = vld [vmem:[%s4085_s18 + $0x8] sm:$0xff]   ;;  %v3275_v8 = vld [vmem:[%s4085_s18] sm:$0xff]   ;;  %vm6586_vm0 = vcmp.lt.s32.totalorder %v4066_v1, 7  ;;  %s4033_s24 = smov 21   ;;  %s4034_s25 = smov 24  }
  0x11   : > { %v6443_v9 = vcvt.s32.f32 %v4072_v3  ;;  %v6442_v10 = vcvt.s32.f32 %v4075_v4  ;;  %v6444_v12 = vcvt.s32.f32 %v4078_v5  ;;  %v4096_v13 = vunpack.c.l.bf16 %v3340_v6  ;;  %v3341_v17 = vld [vmem:[%s4085_s18 + $0x20] sm:$0xff]   ;;  %v3339_v18 = vld [vmem:[%s4085_s18 + $0x10] sm:$0xff]   ;;  %v3342_v19 = vld [vmem:[%s4085_s18 + $0x28] sm:$0xff]   ;;  %s6336_s9 = scalar_lea.vmem %s6439_s3, %s3270_s15 }
  0x12   : > { %v4098_v14 = vunpack.c.h.bf16 %v3340_v6  ;;  %v4100_v15 = vunpack.c.l.bf16 %v3338_v7  ;;  %v4102_v16 = vunpack.c.h.bf16 %v3338_v7  ;;  %v4107_v20 = vunpack.c.l.bf16 %v3275_v8  ;;  %v3344_v24 = vld [vmem:[%s4085_s18 + $0x38] sm:$0xff]   ;;  %v3343_v25 = vld [vmem:[%s4085_s18 + $0x30] sm:$0xff]   ;;  %v3345_v30 = vld [vmem:[%s4085_s18 + $0x40] sm:$0xff]  }
  0x13   : > { %v4109_v21 = vunpack.c.h.bf16 %v3275_v8  ;;  %v4111_v22 = vunpack.c.l.bf16 %v3341_v17  ;;  %v4113_v23 = vunpack.c.h.bf16 %v3341_v17  ;;  %v4125_v28 = vunpack.c.l.bf16 %v3339_v18  ;;  %v3347_v34 = vld [vmem:[%s4085_s18 + $0x50] sm:$0xff]   ;;  %v3346_v35 = vld [vmem:[%s4085_s18 + $0x48] sm:$0xff]   ;;  %v3348_v41 = vld [vmem:[%s4085_s18 + $0x58] sm:$0xff]  }
  0x14   : > { %6718 = vst [vmem:[#allocation3_spill] sm:$0xff] %v4100_v15  ;;  %v4119_v26 = vpack.i.bf16 %v4098_v14, %v4096_v13  ;;  %v4123_v27 = vpack.i.bf16 %v4102_v16, %v4100_v15  ;;  %v4127_v29 = vunpack.c.h.bf16 %v3339_v18  ;;  %v4134_v32 = vunpack.c.l.bf16 %v3342_v19  ;;  %v3350_v46 = vld [vmem:[%s4085_s18 + $0x68] sm:$0xff]   ;;  %v3349_v51 = vld [vmem:[%s4085_s18 + $0x60] sm:$0xff]   ;;  %v3351_v56 = vld [vmem:[%s4085_s18 + $0x70] sm:$0xff]  }
  0x15   : > { %6719 = vst [vmem:[#allocation4_spill] sm:$0xff] %v4102_v16  ;;  %v4132_v31 = vpack.i.bf16 %v4109_v21, %v4107_v20  ;;  %v4136_v33 = vunpack.c.h.bf16 %v3342_v19  ;;  %v6447_v36 = vcvt.s32.f32 %v4093_v11  ;;  %v4147_v37 = vpack.i.bf16 %v4113_v23, %v4111_v22 }
  0x16   : > { %6720 = vst [vmem:[#allocation5_spill] sm:$0xff] %v4107_v20  ;;  %3398 = vrot.lane.b32.xlu2 %v4119_v26, %s4027_s14  ;;  %3388 = vrot.lane.b32.xlu1 %v4123_v27, %s4027_s14  ;;  %v4149_v38 = vunpack.c.l.bf16 %v3344_v24  ;;  %v4151_v39 = vunpack.c.h.bf16 %v3344_v24  ;;  %v4153_v40 = vunpack.c.l.bf16 %v3343_v25  ;;  %v4160_v42 = vpack.i.bf16 %v4127_v29, %v4125_v28 }
  0x17   : > { %6721 = vst [vmem:[#allocation6_spill] sm:$0xff] %v4109_v21  ;;  %3383 = vrot.lane.b32.xlu0 %v4132_v31, %s4027_s14  ;;  %v4162_v43 = vunpack.c.h.bf16 %v3343_v25  ;;  %v4164_v44 = vunpack.c.l.bf16 %v3345_v30  ;;  %v4166_v45 = vunpack.c.h.bf16 %v3345_v30  ;;  %v4171_v47 = vpack.i.bf16 %v4136_v33, %v4134_v32 }
  0x18   : > { %6722 = vst [vmem:[#allocation7_spill] sm:$0xff] %v4119_v26  ;;  %v4173_v48 = vunpack.c.l.bf16 %v3347_v34  ;;  %v4175_v49 = vunpack.c.h.bf16 %v3347_v34  ;;  %v4177_v50 = vunpack.c.l.bf16 %v3346_v35  ;;  %v4182_v52 = vpack.i.bf16 %v4151_v39, %v4149_v38 }
  0x19   : > { %6723 = vst [vmem:[#allocation8_spill] sm:$0xff] %v4123_v27  ;;  %v4186_v53 = vpack.i.bf16 %v4162_v43, %v4153_v40  ;;  %v4188_v54 = vunpack.c.h.bf16 %v3346_v35  ;;  %v4190_v55 = vunpack.c.l.bf16 %v3348_v41  ;;  %v4195_v57 = vpack.i.bf16 %v4166_v45, %v4164_v44 }
  0x1a   : > { %6724 = vst [vmem:[#allocation9_spill] sm:$0xff] %v4125_v28  ;;  %v4197_v58 = vunpack.c.h.bf16 %v3348_v41  ;;  %v4199_v59 = vunpack.c.l.bf16 %v3350_v46  ;;  %v4201_v60 = vunpack.c.h.bf16 %v3350_v46  ;;  %v4205_v61 = vpack.i.bf16 %v4175_v49, %v4173_v48 }
  0x1b   : > { %6725 = vst [vmem:[#allocation10_spill] sm:$0xff] %v4132_v31  ;;  %v4209_v62 = vpack.i.bf16 %v4188_v54, %v4177_v50  ;;  %v4211_v63 = vunpack.c.l.bf16 %v3349_v51  ;;  %v4213_v0 = vunpack.c.h.bf16 %v3349_v51  ;;  %v4223_v8 = vunpack.c.l.bf16 %v3351_v56 }
  0x1c   : > { %6726 = vst [vmem:[#allocation11_spill] sm:$0xff] %v4134_v32  ;;  %v4217_v6 = vpack.i.bf16 %v4197_v58, %v4190_v55  ;;  %v4221_v7 = vpack.i.bf16 %v4201_v60, %v4199_v59  ;;  %v4225_v17 = vunpack.c.h.bf16 %v3351_v56  ;;  %v305_v18 = vadd.f32 0.5, %v6443_v9 }
  0x1d   : > { %6727 = vst [vmem:[#allocation12_spill] sm:$0xff] %v4147_v37  ;;  %v306_v19 = vadd.f32 0.5, %v6442_v10  ;;  %v816_v24 = vrot.slane %v4100_v15, 1  ;;  %v4238_v25 = vpack.i.bf16 %v4213_v0, %v4211_v63  ;;  %v817_v30 = vrot.slane %v4102_v16, 1 }
  0x1e   : > { %6728 = vst [vmem:[#allocation13_spill] sm:$0xff] %v4160_v42  ;;  %3403 = vrot.lane.b32.xlu2 %v4147_v37, %s4027_s14  ;;  %3393 = vrot.lane.b32.xlu1 %v4160_v42, %s4027_s14  ;;  %v818_v34 = vrot.slane %v4125_v28, 1  ;;  %v337_v35 = vmul.f32 0.0625, %v305_v18  ;;  %v303_v46 = vadd.f32 0.5, %v6444_v12  ;;  %v304_v51 = vadd.f32 0.5, %v6447_v36 }
  0x1f   : > { %6729 = vst [vmem:[#allocation14_spill] sm:$0xff] %v4171_v47  ;;  %3408 = vrot.lane.b32.xlu0 %v4171_v47, %s4027_s14  ;;  %v338_v41 = vmul.f32 0.0625, %v306_v19  ;;  %v4251_v56 = vpack.i.bf16 %v4225_v17, %v4223_v8  ;;  %v4259_v10 = vsel %vm6586_vm0, %v816_v24, %v817_v30  ;;  %v815_v18 = vrot.slane %v4109_v21, 1 }
  0x20   : > { %6730 = vst [vmem:[#allocation15_spill] sm:$0xff] %v4182_v52  ;;  %v4255_v2 = vsel %vm6586_vm0, %v817_v30, %v818_v34  ;;  %v369_v19 = vfloor.f32 %v337_v35  ;;  %v335_v12 = vmul.f32 0.0625, %v303_v46  ;;  %v336_v47 = vmul.f32 0.0625, %v304_v51 }
  0x21   : > { %6731 = vst [vmem:[#allocation16_spill] sm:$0xff] %v4186_v53  ;;  %v370_v9 = vfloor.f32 %v338_v41  ;;  %v4265_v37 = vsel %vm6586_vm0, %v815_v18, %v816_v24  ;;  %v243_v42 = vadd.s32 48, %v4066_v1  ;;  %v244_v27 = vadd.s32 56, %v4066_v1 }
  0x22   : > { %6732 = vst [vmem:[#allocation17_spill] sm:$0xff] %v4190_v55  ;;  %v401_v26 = vmul.f32 16.0, %v369_v19  ;;  %v367_v30 = vfloor.f32 %v335_v12  ;;  %v368_v28 = vfloor.f32 %v336_v47  ;;  %v819_v35 = vrot.slane %v4127_v29, 1 }
  0x23   : > { %6733 = vst [vmem:[#allocation18_spill] sm:$0xff] %v4195_v57  ;;  %v402_v31 = vmul.f32 16.0, %v370_v9  ;;  %v275_v16 = vcvt.s32.f32 %v243_v42  ;;  %v276_v15 = vcvt.s32.f32 %v244_v27  ;;  %v6464_v41 = vrot.slane %v4096_v13, 1 }
  0x24   : > { %6734 = vst [vmem:[#allocation19_spill] sm:$0xff] %v4197_v58  ;;  %v6748_v46 = vcvt.s32.f32 %v4072_v3  ;;  %v6750_v24 = vcvt.s32.f32 %v4075_v4  ;;  %v399_v21 = vmul.f32 16.0, %v367_v30  ;;  %v6752_v9 = vrot.slane %v4107_v20, 1 }
  0x25   : > { %6735 = vst [vmem:[#allocation20_spill] sm:$0xff] %v4199_v59  ;;  %v307_v3 = vadd.f32 0.5, %v275_v16  ;;  %v4293_v4 = vsel %vm6586_vm0, %v819_v35, %v6464_v41  ;;  %v6755_v27 = vcvt.s32.f32 %v4078_v5  ;;  %v4321_v5 = vsel %vm6586_vm0, %v818_v34, %v819_v35 }
  0x26   : > { %6736 = vst [vmem:[#allocation21_spill] sm:$0xff] %v4205_v61  ;;  %v4273_v51 = vsub.f32 %v6748_v46, %v401_v26  ;;  %v4277_v36 = vsub.f32 %v6750_v24, %v402_v31  ;;  %3418 = vrot.lane.b32.xlu2 %v4182_v52, %s4027_s14  ;;  %3413 = vrot.lane.b32.xlu1 %v4186_v53, %s4027_s14  ;;  %v308_v26 = vadd.f32 0.5, %v276_v15  ;;  %v6757_v31 = vcvt.s32.f32 %v4093_v11 }
  0x27   : > { %6737 = vst [vmem:[#allocation22_spill] sm:$0xff] %v4209_v62  ;;  %v4287_v12 = vsel %vm6586_vm0, %v6752_v9, %v815_v18  ;;  %3423 = vrot.lane.b32.xlu0 %v4195_v57, %s4027_s14  ;;  %v339_v19 = vmul.f32 0.0625, %v307_v3  ;;  %v247_v11 = vadd.s32 80, %v4066_v1  ;;  %v248_v34 = vadd.s32 88, %v4066_v1 }
  0x28   : > { %6738 = vst [vmem:[#allocation23_spill] sm:$0xff] %v4211_v63  ;;  %vm6611_vm1 = vcmp.lt.f32.partialorder %v4273_v51, 14.5  ;;  %vm6608_vm2 = vcmp.lt.f32.partialorder %v4277_v36, 14.5  ;;  %v340_v30 = vmul.f32 0.0625, %v308_v26  ;;  %v822_v3 = vrot.slane %v4111_v22, 1 }
  0x29   : > { %6739 = vst [vmem:[#allocation24_spill] sm:$0xff] %v4217_v6  ;;  %v4310_v47 = vsel %vm6611_vm1, %v4259_v10, 0.0  ;;  %v4315_v18 = vsel %vm6608_vm2, %v4255_v2, 0.0  ;;  %v371_v46 = vfloor.f32 %v339_v19  ;;  %v279_v35 = vcvt.s32.f32 %v247_v11 }
  0x2a   : > { %6740 = vst [vmem:[#allocation25_spill] sm:$0xff] %v4221_v7  ;;  %v372_v24 = vfloor.f32 %v340_v30  ;;  %v280_v41 = vcvt.s32.f32 %v248_v34  ;;  %v245_v19 = vadd.s32 64, %v4066_v1  ;;  %v246_v30 = vadd.s32 72, %v4066_v1 }
  0x2b   : > { %6741 = vst [vmem:[#allocation26_spill] sm:$0xff] %v4223_v8  ;;  %v403_v26 = vmul.f32 16.0, %v371_v46  ;;  %v821_v34 = vrot.slane %v4098_v14, 1 }
  0x2c   : > { %6742 = vst [vmem:[#allocation27_spill] sm:$0xff] %v4225_v17  ;;  %v400_v17 = vmul.f32 16.0, %v368_v28  ;;  %v4301_v28 = vsub.f32 %v6755_v27, %v399_v21  ;;  %v404_v27 = vmul.f32 16.0, %v372_v24  ;;  %v824_v21 = vrot.slane %v4134_v32, 1 }
  0x2d   : > { %6743 = vst [vmem:[#allocation28_spill] sm:$0xff] %v4238_v25  ;;  %v4348_v46 = vsub.f32 %v275_v16, %v403_v26  ;;  %v278_v16 = vcvt.s32.f32 %v246_v30 }
  0x2e   : > { %6744 = vst [vmem:[#allocation29_spill] sm:$0xff] %v4251_v56  ;;  %v4305_v42 = vsub.f32 %v6757_v31, %v400_v17  ;;  %vm6599_vm3 = vcmp.lt.f32.partialorder %v4301_v28, 14.5  ;;  %v823_v31 = vrot.slane %v4113_v23, 1  ;;  %3433 = vrot.lane.b32.xlu2 %v4205_v61, %s4027_s14  ;;  %3428 = vrot.lane.b32.xlu1 %v4209_v62, %s4027_s14  ;;  %v4350_v24 = vsub.f32 %v276_v15, %v404_v27 }
  0x2f   : > { %6745 = vst [vmem:[#allocation30_spill] sm:$0xff] %v4255_v2  ;;  %v4329_v17 = vsel %vm6599_vm3, %v4287_v12, 0.0  ;;  %v311_v2 = vadd.f32 0.5, %v279_v35  ;;  %3438 = vrot.lane.b32.xlu0 %v4217_v6, %s4027_s14  ;;  %v277_v61 = vcvt.s32.f32 %v245_v19  ;;  %vm6596_vm5 = vcmp.lt.f32.partialorder %v4348_v46, 14.5 }
  0x30   : > { %6746 = vst [vmem:[#allocation31_spill] sm:$0xff] %v4259_v10  ;;  %vm6597_vm4 = vcmp.lt.f32.partialorder %v4305_v42, 14.5  ;;  %v312_v10 = vadd.f32 0.5, %v280_v41  ;;  %vm6595_vm6 = vcmp.lt.f32.partialorder %v4350_v24, 14.5  ;;  %v4363_v15 = vsel %vm6586_vm0, %v822_v3, %v823_v31 }
  0x31   : > { %6747 = vst [vmem:[#allocation32_spill] sm:$0xff] %v4265_v37  ;;  %v4334_v9 = vsel %vm6597_vm4, %v4265_v37, 0.0  ;;  %v343_v37 = vmul.f32 0.0625, %v311_v2  ;;  %v4368_v26 = vsel %vm6596_vm5, %v4321_v5, 0.0  ;;  %v4373_v2 = vsel %vm6595_vm6, %v4293_v4, 0.0 }
  0x32   : > { %6749 = vst [vmem:[#allocation33_spill] sm:$0xff] %v4273_v51  ;;  %v344_v27 = vmul.f32 0.0625, %v312_v10  ;;  %v309_v6 = vadd.f32 0.5, %v277_v61  ;;  %v310_v57 = vadd.f32 0.5, %v278_v16  ;;  %v250_v62 = vadd.s32 104, %v4066_v1 }
  0x33   : > { %6751 = vst [vmem:[#allocation34_spill] sm:$0xff] %v4277_v36  ;;  %v375_v19 = vfloor.f32 %v343_v37  ;;  %v825_v10 = vrot.slane %v4136_v33, 1  ;;  %v6492_v37 = vrot.slane %v4153_v40, 1 }
  0x34   : > { %6753 = vst [vmem:[#allocation35_spill] sm:$0xff] %v4287_v12  ;;  %v4357_v12 = vsel %vm6586_vm0, %v823_v31, %v824_v21  ;;  %v4379_v31 = vsel %vm6586_vm0, %v821_v34, %v822_v3  ;;  %v376_v30 = vfloor.f32 %v344_v27  ;;  %v341_v53 = vmul.f32 0.0625, %v309_v6 }
  0x35   : > { %6754 = vst [vmem:[#allocation36_spill] sm:$0xff] %v4293_v4  ;;  %v407_v52 = vmul.f32 16.0, %v375_v19  ;;  %v342_v4 = vmul.f32 0.0625, %v310_v57  ;;  %v6766_v6 = vrot.slane %v4096_v13, 1  ;;  %v253_v19 = vadd.s32 128, %v4066_v1 }
  0x36   : > { %6756 = vst [vmem:[#allocation37_spill] sm:$0xff] %v4301_v28  ;;  %v408_v32 = vmul.f32 16.0, %v376_v30  ;;  %3448 = vrot.lane.b32.xlu2 %v4221_v7, %s4027_s14  ;;  %3443 = vrot.lane.b32.xlu1 %v4238_v25, %s4027_s14  ;;  %v373_v3 = vfloor.f32 %v341_v53 }
  0x37   : > { %6758 = vst [vmem:[#allocation38_spill] sm:$0xff] %v4305_v42  ;;  %v4385_v11 = vsub.f32 %v279_v35, %v407_v52  ;;  %v374_v27 = vfloor.f32 %v342_v4  ;;  %v4395_v57 = vsel %vm6586_vm0, %v6766_v6, %v821_v34  ;;  %v4401_v52 = vsel %vm6586_vm0, %v825_v10, %v6492_v37  ;;  %3453 = vrot.lane.b32.xlu0 %v4251_v56, %s4027_s14 }
  0x38   : > { %6759 = vst [vmem:[#allocation39_spill] sm:$0xff] %v4321_v5  ;;  %v249_v5 = vadd.s32 96, %v4066_v1  ;;  %v4410_v34 = vsel %vm6586_vm0, %v824_v21, %v825_v10  ;;  %v254_v37 = vadd.s32 136, %v4066_v1 }
  0x39   : > { %6760 = vst [vmem:[#allocation40_spill] sm:$0xff] %v4348_v46  ;;  %v282_v46 = vcvt.s32.f32 %v250_v62  ;;  %v4405_v62 = vsub.f32 %v280_v41, %v408_v32  ;;  %vm6606_vm7 = vcmp.lt.f32.partialorder %v4385_v11, 14.5  ;;  %v406_v35 = vmul.f32 16.0, %v374_v27 }
  0x3a   : > { %6761 = vst [vmem:[#allocation41_spill] sm:$0xff] %v4350_v24  ;;  %v281_v24 = vcvt.s32.f32 %v249_v5  ;;  %v405_v5 = vmul.f32 16.0, %v373_v3  ;;  %v1017_v32 = vsel %vm6606_vm7, %v4363_v15, 0.0  ;;  %v285_v27 = vcvt.s32.f32 %v253_v19 }
  0x3b   : > { %6762 = vst [vmem:[#allocation42_spill] sm:$0xff] %v4357_v12  ;;  %v314_v4 = vadd.f32 0.5, %v282_v46  ;;  %vm6603_vm8 = vcmp.lt.f32.partialorder %v4405_v62, 14.5  ;;  %v4420_v3 = vsub.f32 %v278_v16, %v406_v35  ;;  %v286_v7 = vcvt.s32.f32 %v254_v37 }
  0x3c   : > { %6763 = vst [vmem:[#allocation43_spill] sm:$0xff] %v4363_v15  ;;  %v313_v53 = vadd.f32 0.5, %v281_v24  ;;  %v4418_v41 = vsub.f32 %v277_v61, %v405_v5  ;;  %v1018_v21 = vsel %vm6603_vm8, %v4357_v12, 0.0  ;;  %v6771_v37 = vmov 0.0  }
  0x3d   : > { %6764 = vst [vmem:[#allocation44_spill] sm:$0xff] %v4379_v31  ;;  %v346_v6 = vmul.f32 0.0625, %v314_v4  ;;  %vm6574_vm10 = vcmp.lt.f32.partialorder %v4420_v3, 14.5  ;;  %v828_v4 = vrot.slane %v4149_v38, 1  ;;  %v6772_v19 = vpack.i.bf16 %v4334_v9, %v4329_v17 }
  0x3e   : > { %6765 = vst [vmem:[#allocation45_spill] sm:$0xff] %v4385_v11  ;;  %v345_v30 = vmul.f32 0.0625, %v313_v53  ;;  %vm6575_vm9 = vcmp.lt.f32.partialorder %v4418_v41, 14.5  ;;  %v317_v53 = vadd.f32 0.5, %v285_v27  ;;  %v1016_v16 = vsel %vm6574_vm10, %v4379_v31, 0.0  ;;  %3458 = vrot.lane.b32.xlu1 %v6771_v37, %s4028_s19 }
  0x3f   : > { %6767 = vst [vmem:[#allocation46_spill] sm:$0xff] %v4395_v57  ;;  %v378_v56 = vfloor.f32 %v346_v6  ;;  %v1015_v61 = vsel %vm6575_vm9, %v4395_v57, 0.0  ;;  %3463 = vrot.lane.b32.xlu2 %v6772_v19, %s4028_s19  ;;  %v318_v6 = vadd.f32 0.5, %v286_v7  ;;  %v829_v15 = vrot.slane %v4151_v39, 1 }
  0x40   : > { %6768 = vst [vmem:[#allocation47_spill] sm:$0xff] %v4401_v52  ;;  %v377_v10 = vfloor.f32 %v345_v30  ;;  %v3482_v30 = vpack.i.bf16 %v1018_v21, %v1017_v32  ;;  %v349_v12 = vmul.f32 0.0625, %v317_v53  ;;  %v6773_v31 = vpack.i.bf16 %v4315_v18, %v4310_v47 }
  0x41   : > { %6769 = vst [vmem:[#allocation48_spill] sm:$0xff] %v4405_v62  ;;  %v410_v35 = vmul.f32 16.0, %v378_v56  ;;  %v830_v37 = vrot.slane %v4164_v44, 1  ;;  %v251_v57 = vadd.s32 112, %v4066_v1  ;;  %v3477_v17 = vpack.i.bf16 %v1016_v16, %v1015_v61 }
  0x42   : > { %6770 = vst [vmem:[#allocation49_spill] sm:$0xff] %v4410_v34  ;;  %v409_v5 = vmul.f32 16.0, %v377_v10  ;;  %3468 = vrot.lane.b32.xlu0 %v6773_v31, %s4028_s19  ;;  %v350_v9 = vmul.f32 0.0625, %v318_v6  ;;  %v381_v32 = vfloor.f32 %v349_v12  ;;  %v252_v21 = vadd.s32 120, %v4066_v1 }
  0x43   : > { %v4447_v10 = vsub.f32 %v282_v46, %v410_v35  ;;  %v4456_v47 = vsel %vm6586_vm0, %v828_v4, %v829_v15  ;;  %v283_v18 = vcvt.s32.f32 %v251_v57  ;;  %v4466_v53 = vsel %vm6586_vm0, %v829_v15, %v830_v37 }
  0x44   : > { %v4445_v56 = vsub.f32 %v281_v24, %v409_v5  ;;  %6776 = vst [vmem:[#allocation52_spill] sm:$0xff] %v4456_v47  ;;  %v382_v12 = vfloor.f32 %v350_v9  ;;  %v413_v31 = vmul.f32 16.0, %v381_v32  ;;  %v284_v61 = vcvt.s32.f32 %v252_v21 }
  0x45   : > { %6775 = vst [vmem:[#allocation51_spill] sm:$0xff] %v4447_v10  ;;  %vm6517_vm12 = vcmp.lt.f32.partialorder %v4447_v10, 14.5  ;;  %v315_v16 = vadd.f32 0.5, %v283_v18  ;;  %v827_v5 = vrot.slane %v4162_v43, 1  ;;  %v255_v19 = vadd.s32 144, %v4066_v1 }
  0x46   : > { %6774 = vst [vmem:[#allocation50_spill] sm:$0xff] %v4445_v56  ;;  %vm6519_vm11 = vcmp.lt.f32.partialorder %v4445_v56, 14.5  ;;  %v1020_v24 = vsel %vm6517_vm12, %v4401_v52, 0.0  ;;  %v414_v35 = vmul.f32 16.0, %v382_v12  ;;  %v4469_v57 = vsub.f32 %v285_v27, %v413_v31 }
  0x47   : > { %v1019_v46 = vsel %vm6519_vm11, %v4410_v34, 0.0  ;;  %6777 = vst [vmem:[#allocation53_spill] sm:$0xff] %v4466_v53  ;;  %v256_v6 = vadd.s32 152, %v4066_v1  ;;  %v316_v25 = vadd.f32 0.5, %v284_v61  ;;  %v347_v52 = vmul.f32 0.0625, %v315_v16  ;;  %3478 = vrot.lane.b32.xlu2 %v3477_v17, %s4028_s19 }
  0x48   : > { %6778 = vst [vmem:[#allocation54_spill] sm:$0xff] %v4469_v57  ;;  %v3487_v34 = vpack.i.bf16 %v1020_v24, %v1019_v46  ;;  %v4475_v9 = vsel %vm6586_vm0, %v827_v5, %v828_v4  ;;  %v6780_v15 = vpack.i.bf16 %v4373_v2, %v4368_v26  ;;  %v4482_v27 = vsub.f32 %v286_v7, %v414_v35 }
  0x49   : > { %6779 = vst [vmem:[#allocation55_spill] sm:$0xff] %v4475_v9  ;;  %vm6594_vm13 = vcmp.lt.f32.partialorder %v4469_v57, 14.5  ;;  %v287_v32 = vcvt.s32.f32 %v255_v19  ;;  %v288_v21 = vcvt.s32.f32 %v256_v6  ;;  %v348_v46 = vmul.f32 0.0625, %v316_v25 }
  0x4a   : > { %3473 = vrot.lane.b32.xlu1 %v6780_v15, %s4028_s19  ;;  %6781 = vst [vmem:[#allocation56_spill] sm:$0xff] %v4482_v27  ;;  %3483 = vrot.lane.b32.xlu0 %v3482_v30, %s4028_s19  ;;  %v1023_v4 = vsel %vm6594_vm13, %v4456_v47, 0.0  ;;  %v379_v24 = vfloor.f32 %v347_v52  ;;  %v831_v12 = vrot.slane %v4166_v45, 1  ;;  %vm6587_vm14 = vcmp.lt.f32.partialorder %v4482_v27, 14.5 }
  0x4b   : > { %v6782_v26 = vrot.slane %v4153_v40, 1  ;;  %v319_v2 = vadd.f32 0.5, %v287_v32  ;;  %v320_v17 = vadd.f32 0.5, %v288_v21  ;;  %v1024_v30 = vsel %vm6587_vm14, %v4466_v53, 0.0 }
  0x4c   : > { %v380_v31 = vfloor.f32 %v348_v46  ;;  %v411_v16 = vmul.f32 16.0, %v379_v24  ;;  %v832_v25 = vrot.slane %v4177_v50, 1  ;;  %v3497_v52 = vpack.i.bf16 %v1024_v30, %v1023_v4 }
  0x4d   : > { %v4495_v7 = vsel %vm6586_vm0, %v6782_v26, %v827_v5  ;;  %v351_v35 = vmul.f32 0.0625, %v319_v2  ;;  %v352_v19 = vmul.f32 0.0625, %v320_v17  ;;  %v4503_v6 = vsel %vm6586_vm0, %v830_v37, %v831_v12 }
  0x4e   : > { %6783 = vst [vmem:[#allocation57_spill] sm:$0xff] %v4495_v7  ;;  %v412_v15 = vmul.f32 16.0, %v380_v31  ;;  %v4505_v5 = vsub.f32 %v283_v18, %v411_v16  ;;  %v259_v26 = vadd.s32 176, %v4066_v1  ;;  %v260_v47 = vadd.s32 184, %v4066_v1 }
  0x4f   : > { %6784 = vst [vmem:[#allocation58_spill] sm:$0xff] %v4503_v6  ;;  %v383_v27 = vfloor.f32 %v351_v35  ;;  %v384_v53 = vfloor.f32 %v352_v19  ;;  %v834_v46 = vrot.slane %v4173_v48, 1  ;;  %v835_v24 = vrot.slane %v4175_v49, 1 }
  0x50   : > { %6785 = vst [vmem:[#allocation59_spill] sm:$0xff] %v4505_v5  ;;  %v4511_v4 = vsub.f32 %v284_v61, %v412_v15  ;;  %vm6518_vm15 = vcmp.lt.f32.partialorder %v4505_v5, 14.5  ;;  %v291_v2 = vcvt.s32.f32 %v259_v26  ;;  %v292_v37 = vcvt.s32.f32 %v260_v47 }
  0x51   : > { %v1021_v18 = vsel %vm6518_vm15, %v4495_v7, 0.0  ;;  %v415_v17 = vmul.f32 16.0, %v383_v27  ;;  %v416_v30 = vmul.f32 16.0, %v384_v53  ;;  %v4520_v31 = vsel %vm6586_vm0, %v831_v12, %v832_v25 }
  0x52   : > { %6786 = vst [vmem:[#allocation60_spill] sm:$0xff] %v4511_v4  ;;  %3488 = vrot.lane.b32.xlu1 %v3487_v34, %s4028_s19  ;;  %3498 = vrot.lane.b32.xlu0 %v3497_v52, %s4028_s19  ;;  %vm6543_vm12 = vcmp.lt.f32.partialorder %v4511_v4, 14.5  ;;  %v323_v61 = vadd.f32 0.5, %v291_v2  ;;  %v324_v16 = vadd.f32 0.5, %v292_v37  ;;  %v836_v47 = vrot.slane %v4190_v55, 1 }
  0x53   : > { %6787 = vst [vmem:[#allocation61_spill] sm:$0xff] %v4520_v31  ;;  %v1022_v34 = vsel %vm6543_vm12, %v4475_v9, 0.0  ;;  %v4528_v35 = vsub.f32 %v287_v32, %v415_v17  ;;  %v4530_v27 = vsub.f32 %v288_v21, %v416_v30  ;;  %v4534_v53 = vsel %vm6586_vm0, %v834_v46, %v835_v24 }
  0x54   : > { %6790 = vst [vmem:[#allocation64_spill] sm:$0xff] %v4534_v53  ;;  %v3492_v12 = vpack.i.bf16 %v1022_v34, %v1021_v18  ;;  %v355_v52 = vmul.f32 0.0625, %v323_v61  ;;  %v356_v19 = vmul.f32 0.0625, %v324_v16  ;;  %v257_v15 = vadd.s32 160, %v4066_v1 }
  0x55   : > { %6788 = vst [vmem:[#allocation62_spill] sm:$0xff] %v4528_v35  ;;  %vm6530_vm15 = vcmp.lt.f32.partialorder %v4528_v35, 14.5  ;;  %vm6529_vm11 = vcmp.lt.f32.partialorder %v4530_v27, 14.5  ;;  %v258_v26 = vadd.s32 168, %v4066_v1  ;;  %v833_v32 = vrot.slane %v4188_v54, 1 }
  0x56   : > { %6789 = vst [vmem:[#allocation63_spill] sm:$0xff] %v4530_v27  ;;  %3493 = vrot.lane.b32.xlu2 %v3492_v12, %s4028_s19  ;;  %v1025_v21 = vsel %vm6530_vm15, %v4503_v6, 0.0  ;;  %v1026_v18 = vsel %vm6529_vm11, %v4520_v31, 0.0  ;;  %v387_v17 = vfloor.f32 %v355_v52  ;;  %v388_v30 = vfloor.f32 %v356_v19 }
  0x57   : > { %v3502_v61 = vpack.i.bf16 %v1026_v18, %v1025_v21  ;;  %v4550_v16 = vsel %vm6586_vm0, %v835_v24, %v836_v47  ;;  %v289_v34 = vcvt.s32.f32 %v257_v15  ;;  %v290_v9 = vcvt.s32.f32 %v258_v26 }
  0x58   : > { %6791 = vst [vmem:[#allocation65_spill] sm:$0xff] %v4550_v16  ;;  %v419_v7 = vmul.f32 16.0, %v387_v17  ;;  %v420_v55 = vmul.f32 16.0, %v388_v30  ;;  %v4554_v12 = vsel %vm6586_vm0, %v833_v32, %v834_v46  ;;  %v261_v6 = vadd.s32 192, %v4066_v1 }
  0x59   : > { %6792 = vst [vmem:[#allocation66_spill] sm:$0xff] %v4554_v12  ;;  %v321_v31 = vadd.f32 0.5, %v289_v34  ;;  %v322_v52 = vadd.f32 0.5, %v290_v9  ;;  %v262_v19 = vadd.s32 200, %v4066_v1  ;;  %v837_v21 = vrot.slane %v4197_v58, 1 }
  0x5a   : > { %3503 = vrot.lane.b32.xlu1 %v3502_v61, %s4028_s19  ;;  %v4560_v24 = vsub.f32 %v291_v2, %v419_v7  ;;  %v4562_v15 = vsub.f32 %v292_v37, %v420_v55  ;;  %v4566_v26 = vsel %vm6586_vm0, %v832_v25, %v833_v32  ;;  %v293_v46 = vcvt.s32.f32 %v261_v6 }
  0x5b   : > { %6795 = vst [vmem:[#allocation69_spill] sm:$0xff] %v4566_v26  ;;  %v353_v18 = vmul.f32 0.0625, %v321_v31  ;;  %v354_v17 = vmul.f32 0.0625, %v322_v52  ;;  %v294_v30 = vcvt.s32.f32 %v262_v19  ;;  %v4573_v7 = vsel %vm6586_vm0, %v836_v47, %v837_v21 }
  0x5c   : > { %6793 = vst [vmem:[#allocation67_spill] sm:$0xff] %v4560_v24  ;;  %vm6545_vm11 = vcmp.lt.f32.partialorder %v4560_v24, 14.5  ;;  %vm6544_vm15 = vcmp.lt.f32.partialorder %v4562_v15, 14.5  ;;  %v325_v27 = vadd.f32 0.5, %v293_v46  ;;  %v265_v52 = vadd.s32 224, %v4066_v1 }
  0x5d   : > { %6794 = vst [vmem:[#allocation68_spill] sm:$0xff] %v4562_v15  ;;  %v1029_v55 = vsel %vm6545_vm11, %v4534_v53, 0.0  ;;  %v1030_v25 = vsel %vm6544_vm15, %v4550_v16, 0.0  ;;  %v385_v6 = vfloor.f32 %v353_v18  ;;  %v386_v2 = vfloor.f32 %v354_v17 }
  0x5e   : > { %6796 = vst [vmem:[#allocation70_spill] sm:$0xff] %v4573_v7  ;;  %v3512_v37 = vpack.i.bf16 %v1030_v25, %v1029_v55  ;;  %v326_v31 = vadd.f32 0.5, %v294_v30  ;;  %v357_v32 = vmul.f32 0.0625, %v325_v27  ;;  %v266_v47 = vadd.s32 232, %v4066_v1 }
  0x5f   : > { %v417_v19 = vmul.f32 16.0, %v385_v6  ;;  %v418_v61 = vmul.f32 16.0, %v386_v2  ;;  %v840_v58 = vrot.slane %v4199_v59, 1  ;;  %v297_v35 = vcvt.s32.f32 %v265_v52 }
  0x60   : > { %3513 = vrot.lane.b32.xlu0 %v3512_v37, %s4028_s19  ;;  %v358_v53 = vmul.f32 0.0625, %v326_v31  ;;  %v389_v24 = vfloor.f32 %v357_v32  ;;  %v841_v16 = vrot.slane %v4201_v60, 1  ;;  %v6799_v27 = vrot.slane %v4211_v63, 1 }
  0x61   : > { %v4586_v18 = vsub.f32 %v289_v34, %v417_v19  ;;  %v4588_v17 = vsub.f32 %v290_v9, %v418_v61  ;;  %v298_v25 = vcvt.s32.f32 %v266_v47  ;;  %v329_v59 = vadd.f32 0.5, %v297_v35 }
  0x62   : > { %v4594_v55 = vsel %vm6586_vm0, %v837_v21, %v6799_v27  ;;  %v390_v6 = vfloor.f32 %v358_v53  ;;  %v421_v2 = vmul.f32 16.0, %v389_v24  ;;  %v842_v37 = vrot.slane %v4223_v8, 1 }
  0x63   : > { %6797 = vst [vmem:[#allocation71_spill] sm:$0xff] %v4586_v18  ;;  %vm6573_vm12 = vcmp.lt.f32.partialorder %v4586_v18, 14.5  ;;  %vm6548_vm15 = vcmp.lt.f32.partialorder %v4588_v17, 14.5  ;;  %v330_v34 = vadd.f32 0.5, %v298_v25  ;;  %v4601_v9 = vsel %vm6586_vm0, %v840_v58, %v841_v16 }
  0x64   : > { %6798 = vst [vmem:[#allocation72_spill] sm:$0xff] %v4588_v17  ;;  %v1027_v21 = vsel %vm6573_vm12, %v4566_v26, 0.0  ;;  %v1028_v53 = vsel %vm6548_vm15, %v4554_v12, 0.0  ;;  %v422_v24 = vmul.f32 16.0, %v390_v6  ;;  %v4609_v61 = vsub.f32 %v293_v46, %v421_v2 }
  0x65   : > { %6800 = vst [vmem:[#allocation73_spill] sm:$0xff] %v4594_v55  ;;  %v3507_v31 = vpack.i.bf16 %v1028_v53, %v1027_v21  ;;  %v361_v32 = vmul.f32 0.0625, %v329_v59  ;;  %v362_v52 = vmul.f32 0.0625, %v330_v34  ;;  %v263_v19 = vadd.s32 208, %v4066_v1  ;;  %v4622_v34 = vld [vmem:[%s4085_s18 + $0x78] sm:$0xff]  }
  0x66   : > { %6801 = vst [vmem:[#allocation74_spill] sm:$0xff] %v4601_v9  ;;  %v4612_v47 = vsub.f32 %v294_v30, %v422_v24  ;;  %vm6561_vm11 = vcmp.lt.f32.partialorder %v4609_v61, 14.5  ;;  %v264_v27 = vadd.s32 216, %v4066_v1  ;;  %v839_v26 = vrot.slane %v4213_v0, 1 }
  0x67   : > { %6802 = vst [vmem:[#allocation75_spill] sm:$0xff] %v4609_v61  ;;  %3508 = vrot.lane.b32.xlu2 %v3507_v31, %s4028_s19  ;;  %v1031_v46 = vsel %vm6561_vm11, %v4573_v7, 0.0  ;;  %v393_v6 = vfloor.f32 %v361_v32  ;;  %v394_v2 = vfloor.f32 %v362_v52  ;;  %v295_v59 = vcvt.s32.f32 %v263_v19 }
  0x68   : > { %6803 = vst [vmem:[#allocation76_spill] sm:$0xff] %v4612_v47  ;;  %vm6560_vm15 = vcmp.lt.f32.partialorder %v4612_v47, 14.5  ;;  %v4627_v30 = vsel %vm6586_vm0, %v841_v16, %v842_v37  ;;  %v296_v21 = vcvt.s32.f32 %v264_v27  ;;  %v4631_v53 = vsel %vm6586_vm0, %v839_v26, %v840_v58 }
  0x69   : > { %6804 = vst [vmem:[#allocation77_spill] sm:$0xff] %v4627_v30  ;;  %v1032_v24 = vsel %vm6560_vm15, %v4594_v55, 0.0  ;;  %v425_v31 = vmul.f32 16.0, %v393_v6  ;;  %v426_v32 = vmul.f32 16.0, %v394_v2  ;;  %v327_v52 = vadd.f32 0.5, %v295_v59 }
  0x6a   : > { %6805 = vst [vmem:[#allocation78_spill] sm:$0xff] %v4631_v53  ;;  %v3517_v19 = vpack.i.bf16 %v1032_v24, %v1031_v46  ;;  %v328_v12 = vadd.f32 0.5, %v296_v21  ;;  %v4637_v7 = vunpack.c.l.bf16 %v4622_v34  ;;  %v267_v16 = vadd.s32 240, %v4066_v1  ;;  %v6810_v24 = vld [vmem:[#allocation27_spill] sm:$0xff] }
  0x6b   : > { %v4640_v8 = vsub.f32 %v297_v35, %v425_v31  ;;  %v4642_v27 = vsub.f32 %v298_v25, %v426_v32  ;;  %v359_v58 = vmul.f32 0.0625, %v327_v52  ;;  %v268_v61 = vadd.s32 248, %v4066_v1 }
  0x6c   : > { %3518 = vrot.lane.b32.xlu1 %v3517_v19, %s4028_s19  ;;  %v360_v55 = vmul.f32 0.0625, %v328_v12  ;;  %v6808_v6 = vrot.slane %v4211_v63, 1  ;;  %v299_v2 = vcvt.s32.f32 %v267_v16  ;;  %v843_v47 = vrot.slane %v6810_v24, 1 }
  0x6d   : > { %6806 = vst [vmem:[#allocation79_spill] sm:$0xff] %v4640_v8  ;;  %vm6572_vm15 = vcmp.lt.f32.partialorder %v4640_v8, 14.5  ;;  %vm6571_vm11 = vcmp.lt.f32.partialorder %v4642_v27, 14.5  ;;  %v391_v35 = vfloor.f32 %v359_v58  ;;  %v300_v25 = vcvt.s32.f32 %v268_v61  ;;  %v6812_v58 = vld [vmem:[#allocation6_spill] sm:$0xff] }
  0x6e   : > { %6807 = vst [vmem:[#allocation80_spill] sm:$0xff] %v4642_v27  ;;  %v4650_v46 = vsel %vm6586_vm0, %v6808_v6, %v839_v26  ;;  %v1035_v31 = vsel %vm6572_vm15, %v4601_v9, 0.0  ;;  %v1036_v12 = vsel %vm6571_vm11, %v4627_v30, 0.0  ;;  %v392_v32 = vfloor.f32 %v360_v55  ;;  %v6813_v55 = vld [vmem:[#allocation3_spill] sm:$0xff] }
  0x6f   : > { %6809 = vst [vmem:[#allocation81_spill] sm:$0xff] %v4650_v46  ;;  %v331_v26 = vadd.f32 0.5, %v299_v2  ;;  %v3527_v52 = vpack.i.bf16 %v1036_v12, %v1035_v31  ;;  %v423_v19 = vmul.f32 16.0, %v391_v35  ;;  %v332_v16 = vadd.f32 0.5, %v300_v25  ;;  %v6814_v31 = vld [vmem:[#allocation4_spill] sm:$0xff] }
  0x70   : > { %v424_v24 = vmul.f32 16.0, %v392_v32  ;;  %v4664_v61 = vsel %vm6586_vm0, %v842_v37, %v843_v47  ;;  %v6576_v8 = vrot.slane %v6812_v58, 7  ;;  %v463_v27 = vrot.slane %v6813_v55, 7 }
  0x71   : > { %v363_v63 = vmul.f32 0.0625, %v331_v26  ;;  %6811 = vst [vmem:[#allocation82_spill] sm:$0xff] %v4664_v61  ;;  %3528 = vrot.lane.b32.xlu0 %v3527_v52, %s4028_s19  ;;  %v4668_v9 = vsub.f32 %v295_v59, %v423_v19  ;;  %v364_v30 = vmul.f32 0.0625, %v332_v16  ;;  %v464_v35 = vrot.slane %v6814_v31, 7 }
  0x72   : > { %v4672_v12 = vsub.f32 %v296_v21, %v424_v24  ;;  %vm493_vm11 = vcmp.lt.s32.totalorder %v4066_v1, 1  ;;  %vm6662_vm15 = vcmp.gt.f32.partialorder %v4301_v28, 0.5  ;;  %v4687_v21 = vpop.permute.xlu2 %3398  ;;  %vm6661_vm9 = vcmp.gt.f32.partialorder %v4305_v42, 0.5 }
  0x73   : > { %v395_v6 = vfloor.f32 %v363_v63  ;;  %vm6582_vm12 = vcmp.lt.f32.partialorder %v4668_v9, 14.5  ;;  %v396_v37 = vfloor.f32 %v364_v30  ;;  %v4679_v32 = vsel %vm493_vm11, %v463_v27, %v464_v35 }
  0x74   : > { %6815 = vst [vmem:[#allocation6_spill] sm:$0xff] %v4679_v32  ;;  %v4685_v59 = vsel %vm493_vm11, %v6576_v8, %v463_v27  ;;  %vm6581_vm10 = vcmp.lt.f32.partialorder %v4672_v12, 14.5  ;;  %v1033_v63 = vsel %vm6582_vm12, %v4650_v46, 0.0  ;;  %v1106_v52 = vsel %vm6661_vm9, %v4679_v32, 0.0 }
  0x75   : > { %6816 = vst [vmem:[#allocation3_spill] sm:$0xff] %v4685_v59  ;;  %v427_v24 = vmul.f32 16.0, %v395_v6  ;;  %v1034_v30 = vsel %vm6581_vm10, %v4631_v53, 0.0  ;;  %v428_v26 = vmul.f32 16.0, %v396_v37  ;;  %v1105_v27 = vsel %vm6662_vm15, %v4685_v59, 0.0 }
  0x76   : > { %v3522_v19 = vpack.i.bf16 %v1034_v30, %v1033_v63  ;;  %v3542_v55 = vpack.i.bf16 %v1106_v52, %v1105_v27  ;;  %v4706_v6 = vunpack.c.h.bf16 %v4622_v34  ;;  %v6819_v8 = vrot.slane %v4637_v7, 1 }
  0x77   : > { %v4703_v16 = vsub.f32 %v299_v2, %v427_v24  ;;  %v4708_v31 = vsub.f32 %v300_v25, %v428_v26  ;;  %v238_v53 = vadd.s32 8, %v4066_v1  ;;  %v269_v46 = vcvt.s32.f32 %v4066_v1  ;;  %v6821_v2 = vld [vmem:[#allocation9_spill] sm:$0xff] }
  0x78   : > { %v4714_v37 = vsel %vm6586_vm0, %v843_v47, %v6819_v8  ;;  %3523 = vrot.lane.b32.xlu2 %v3522_v19, %s4028_s19  ;;  %v465_v63 = vrot.slane %v6821_v2, 7  ;;  %v466_v34 = vrot.slane %v4127_v29, 7  ;;  %v461_v30 = vrot.slane %v4107_v20, 7 }
  0x79   : > { %6817 = vst [vmem:[#allocation4_spill] sm:$0xff] %v4703_v16  ;;  %vm6583_vm10 = vcmp.lt.f32.partialorder %v4703_v16, 14.5  ;;  %vm6584_vm12 = vcmp.lt.f32.partialorder %v4708_v31, 14.5  ;;  %3543 = vrot.lane.b32.xlu0 %v3542_v55, %s4029_s20  ;;  %v270_v8 = vcvt.s32.f32 %v238_v53  ;;  %v301_v47 = vadd.f32 0.5, %v269_v46 }
  0x7a   : > { %6818 = vst [vmem:[#allocation83_spill] sm:$0xff] %v4708_v31  ;;  %v1037_v25 = vsel %vm6583_vm10, %v4664_v61, 0.0  ;;  %v1038_v24 = vsel %vm6584_vm12, %v4714_v37, 0.0  ;;  %v4734_v29 = vsel %vm493_vm11, %v465_v63, %v466_v34  ;;  %v4736_v2 = vpop.permute.xlu2 %3403  ;;  %v4740_v53 = vsel %vm493_vm11, %v464_v35, %v465_v63 }
  0x7b   : > { %6820 = vst [vmem:[#allocation84_spill] sm:$0xff] %v4714_v37  ;;  %v3532_v27 = vpack.i.bf16 %v1038_v24, %v1037_v25  ;;  %v302_v52 = vadd.f32 0.5, %v270_v8  ;;  %v333_v19 = vmul.f32 0.0625, %v301_v47  ;;  %vm6613_vm10 = vcmp.gt.f32.partialorder %v4273_v51, 0.5 }
  0x7c   : > { %6822 = vst [vmem:[#allocation9_spill] sm:$0xff] %v4734_v29  ;;  %vm6612_vm12 = vcmp.gt.f32.partialorder %v4277_v36, 0.5  ;;  %v1107_v25 = vsel %vm6613_vm10, %v4740_v53, 0.0  ;;  %v6824_v24 = vrot.slane %v4706_v6, 7  ;;  %v468_v63 = vrot.slane %v4098_v14, 7 }
  0x7d   : > { %6823 = vst [vmem:[#allocation85_spill] sm:$0xff] %v4740_v53  ;;  %3533 = vrot.lane.b32.xlu1 %v3532_v27, %s4028_s19  ;;  %v334_v55 = vmul.f32 0.0625, %v302_v52  ;;  %v365_v26 = vfloor.f32 %v333_v19  ;;  %v1108_v47 = vsel %vm6612_vm12, %v4734_v29, 0.0  ;;  %v469_v27 = vrot.slane %v4111_v22, 7 }
  0x7e   : > { %v4755_v35 = vsel %vm493_vm11, %v6824_v24, %v461_v30  ;;  %v470_v52 = vrot.slane %v4113_v23, 7  ;;  %vm566_vm0 = vcmp.gt.f32.partialorder %v4418_v41, 0.5  ;;  %vm567_vm14 = vcmp.gt.f32.partialorder %v4420_v3, 0.5 }
  0x7f   : > { %v366_v19 = vfloor.f32 %v334_v55  ;;  %v397_v20 = vmul.f32 16.0, %v365_v26  ;;  %v3547_v37 = vpack.i.bf16 %v1108_v47, %v1107_v25  ;;  %v4768_v24 = vsel %vm493_vm11, %v468_v63, %v469_v27 }
  0x80   : > { %v4764_v61 = vsel %vm493_vm11, %v469_v27, %v470_v52  ;;  %6826 = vst [vmem:[#allocation87_spill] sm:$0xff] %v4768_v24  ;;  %v467_v14 = vrot.slane %v4096_v13, 7  ;;  %v1111_v23 = vsel %vm566_vm0, %v4768_v24, 0.0  ;;  %v6828_v55 = vrot.slane %v6812_v58, 7 }
  0x81   : > { %6825 = vst [vmem:[#allocation86_spill] sm:$0xff] %v4764_v61  ;;  %v398_v22 = vmul.f32 16.0, %v366_v19  ;;  %v4771_v36 = vsub.f32 %v269_v46, %v397_v20  ;;  %v1112_v26 = vsel %vm567_vm14, %v4764_v61, 0.0  ;;  %v6831_v20 = vld [vmem:[#allocation40_spill] sm:$0xff]  ;;  %v4793_v46 = vpop.permute.xlu0 %3378  ;;  %vm6614_vm3 = vcmp.gt.f32.partialorder %v4405_v62, 0.5 }
  0x82   : > { %v4783_v25 = vsel %vm493_vm11, %v461_v30, %v6828_v55  ;;  %v3557_v47 = vpack.i.bf16 %v1112_v26, %v1111_v23  ;;  %v4790_v13 = vsel %vm493_vm11, %v466_v34, %v467_v14  ;;  %vm6695_vm6 = vcmp.gt.f32.partialorder %v6831_v20, 0.5  ;;  %v4795_v19 = vpop.permute.xlu2 %3418  ;;  %v6834_v30 = vld [vmem:[#allocation41_spill] sm:$0xff]  ;;  %v6835_v23 = vld [vmem:[#allocation11_spill] sm:$0xff] }
  0x83   : > { %6827 = vst [vmem:[#allocation88_spill] sm:$0xff] %v4771_v36  ;;  %v4785_v27 = vsub.f32 %v270_v8, %v398_v22  ;;  %vm6598_vm13 = vcmp.gt.f32.partialorder %v4771_v36, 0.5  ;;  %v4803_v8 = vsel %vm493_vm11, %v467_v14, %v468_v63  ;;  %vm6688_vm5 = vcmp.gt.f32.partialorder %v6834_v30, 0.5 }
  0x84   : > { %6830 = vst [vmem:[#allocation90_spill] sm:$0xff] %v4790_v13  ;;  %v1103_v58 = vsel %vm6598_vm13, %v4755_v35, 0.0  ;;  %3558 = vrot.lane.b32.xlu0 %v3557_v47, %s4029_s20  ;;  %v1109_v22 = vsel %vm6695_vm6, %v4790_v13, 0.0  ;;  %v471_v26 = vrot.slane %v6835_v23, 7  ;;  %v472_v55 = vrot.slane %v4136_v33, 7 }
  0x85   : > { %6829 = vst [vmem:[#allocation89_spill] sm:$0xff] %v4785_v27  ;;  %vm6602_vm4 = vcmp.gt.f32.partialorder %v4785_v27, 0.5  ;;  %3548 = vrot.lane.b32.xlu1 %v3547_v37, %s4029_s20  ;;  %v1110_v14 = vsel %vm6688_vm5, %v4803_v8, 0.0  ;;  %vm6643_vm13 = vcmp.gt.f32.partialorder %v4385_v11, 0.5  ;;  %v474_v23 = vrot.slane %v4162_v43, 7 }
  0x86   : > { %6832 = vst [vmem:[#allocation91_spill] sm:$0xff] %v4795_v19  ;;  %v1104_v34 = vsel %vm6602_vm4, %v4783_v25, 0.0  ;;  %v4823_v37 = vsel %vm493_vm11, %v471_v26, %v472_v55  ;;  %v4827_v47 = vsel %vm493_vm11, %v470_v52, %v471_v26  ;;  %v475_v33 = vrot.slane %v4149_v38, 7 }
  0x87   : > { %6833 = vst [vmem:[#allocation92_spill] sm:$0xff] %v4803_v8  ;;  %v3537_v63 = vpack.i.bf16 %v1104_v34, %v1103_v58  ;;  %v1113_v58 = vsel %vm6643_vm13, %v4827_v47, 0.0  ;;  %v1114_v34 = vsel %vm6614_vm3, %v4823_v37, 0.0  ;;  %v476_v27 = vrot.slane %v4151_v39, 7 }
  0x88   : > { %6836 = vst [vmem:[#allocation11_spill] sm:$0xff] %v4823_v37  ;;  %vm572_vm4 = vcmp.gt.f32.partialorder %v4505_v5, 0.5  ;;  %v3562_v52 = vpack.i.bf16 %v1114_v34, %v1113_v58  ;;  %v4842_v43 = vsel %vm493_vm11, %v474_v23, %v475_v33  ;;  %vm573_vm8 = vcmp.gt.f32.partialorder %v4511_v4, 0.5  ;;  %v4853_v39 = vpop.permute.xlu1 %3388 }
  0x89   : > { %6837 = vst [vmem:[#allocation93_spill] sm:$0xff] %v4827_v47  ;;  %3538 = vrot.lane.b32.xlu2 %v3537_v63, %s4029_s20  ;;  %v473_v38 = vrot.slane %v4153_v40, 7  ;;  %v4848_v26 = vsel %vm493_vm11, %v475_v33, %v476_v27  ;;  %v1117_v63 = vsel %vm572_vm4, %v4842_v43, 0.0  ;;  %v3552_v36 = vpack.i.bf16 %v1110_v14, %v1109_v22  ;;  %v4859_v34 = vpop.permute.xlu0 %3383 }
  0x8a   : > { %6838 = vst [vmem:[#allocation94_spill] sm:$0xff] %v4842_v43  ;;  %v1118_v58 = vsel %vm573_vm8, %v4848_v26, 0.0  ;;  %vm6678_vm7 = vcmp.gt.f32.partialorder %v4445_v56, 0.5  ;;  %vm6677_vm2 = vcmp.gt.f32.partialorder %v4447_v10, 0.5  ;;  %v4871_v22 = vpop.permute.xlu2 %3433  ;;  %v477_v14 = vrot.slane %v4164_v44, 7  ;;  %v6850_v43 = vld [vmem:[#allocation63_spill] sm:$0xff] }
  0x8b   : > { %6839 = vst [vmem:[#allocation95_spill] sm:$0xff] %v4848_v26  ;;  %v3572_v40 = vpack.i.bf16 %v1118_v58, %v1117_v63  ;;  %v4864_v33 = vsel %vm493_vm11, %v473_v38, %v474_v23  ;;  %v4868_v19 = vsel %vm493_vm11, %v472_v55, %v473_v38  ;;  %v478_v26 = vrot.slane %v4166_v45, 7 }
  0x8c   : > { %6840 = vst [vmem:[#allocation96_spill] sm:$0xff] %v4864_v33  ;;  %vm6625_vm1 = vcmp.gt.f32.partialorder %v4469_v57, 0.5  ;;  %v480_v23 = vrot.slane %v4188_v54, 7  ;;  %v1115_v55 = vsel %vm6678_vm7, %v4868_v19, 0.0  ;;  %v1116_v38 = vsel %vm6677_vm2, %v4864_v33, 0.0 }
  0x8d   : > { %3563 = vrot.lane.b32.xlu1 %v3562_v52, %s4029_s20  ;;  %6841 = vst [vmem:[#allocation97_spill] sm:$0xff] %v4868_v19  ;;  %3573 = vrot.lane.b32.xlu0 %v3572_v40, %s4029_s20  ;;  %v6842_v52 = vld [vmem:[#allocation56_spill] sm:$0xff]  ;;  %v4887_v44 = vsel %vm493_vm11, %v476_v27, %v477_v14  ;;  %v481_v45 = vrot.slane %v4173_v48, 7  ;;  %v4893_v63 = vsel %vm493_vm11, %v477_v14, %v478_v26  ;;  %v482_v58 = vrot.slane %v4175_v49, 7 }
  0x8e   : > { %vm6622_vm12 = vcmp.gt.f32.partialorder %v6842_v52, 0.5  ;;  %6843 = vst [vmem:[#allocation98_spill] sm:$0xff] %v4887_v44  ;;  %v1119_v54 = vsel %vm6625_vm1, %v4887_v44, 0.0  ;;  %vm6631_vm10 = vcmp.gt.f32.partialorder %v4586_v18, 0.5  ;;  %vm6630_vm3 = vcmp.gt.f32.partialorder %v4588_v17, 0.5  ;;  %v6851_v17 = vld [vmem:[#allocation17_spill] sm:$0xff] }
  0x8f   : > { %6844 = vst [vmem:[#allocation99_spill] sm:$0xff] %v4893_v63  ;;  %v1120_v27 = vsel %vm6622_vm12, %v4893_v63, 0.0  ;;  %v4905_v48 = vsel %vm493_vm11, %v480_v23, %v481_v45  ;;  %v4911_v14 = vsel %vm493_vm11, %v481_v45, %v482_v58  ;;  %v3567_v57 = vpack.i.bf16 %v1116_v38, %v1115_v55  ;;  %v6853_v38 = vld [vmem:[#allocation19_spill] sm:$0xff] }
  0x90   : > { %6845 = vst [vmem:[#allocation100_spill] sm:$0xff] %v4905_v48  ;;  %v3577_v40 = vpack.i.bf16 %v1120_v27, %v1119_v54  ;;  %v1123_v49 = vsel %vm6631_vm10, %v4905_v48, 0.0  ;;  %v4916_v44 = vpop.permute.xlu1 %3393  ;;  %v1124_v63 = vsel %vm6630_vm3, %v4911_v14, 0.0  ;;  %v6849_v27 = vld [vmem:[#allocation62_spill] sm:$0xff]  ;;  %vm6635_vm1 = vcmp.gt.f32.partialorder %v6850_v43, 0.5 }
  0x91   : > { %3553 = vrot.lane.b32.xlu2 %v3552_v36, %s4029_s20  ;;  %v479_v36 = vrot.slane %v4177_v50, 7  ;;  %6846 = vst [vmem:[#allocation101_spill] sm:$0xff] %v4911_v14  ;;  %v4921_v52 = vpop.permute.xlu0 %3408  ;;  %v3587_v50 = vpack.i.bf16 %v1124_v63, %v1123_v49  ;;  %vm6634_vm12 = vcmp.gt.f32.partialorder %v6849_v27, 0.5  ;;  %v483_v18 = vrot.slane %v6851_v17, 7 }
  0x92   : > { %v4936_v55 = vpop.permute.xlu2 %3448  ;;  %v484_v63 = vrot.slane %v6853_v38, 7  ;;  %vm6652_vm10 = vcmp.gt.f32.partialorder %v4562_v15, 0.5  ;;  %v6868_v15 = vld [vmem:[#allocation80_spill] sm:$0xff] }
  0x93   : > { %v4926_v45 = vsel %vm493_vm11, %v479_v36, %v480_v23  ;;  %v4930_v54 = vsel %vm493_vm11, %v478_v26, %v479_v36  ;;  %6852 = vst [vmem:[#allocation17_spill] sm:$0xff] %v4936_v55  ;;  %v4950_v17 = vsel %vm493_vm11, %v482_v58, %v483_v18  ;;  %v486_v36 = vrot.slane %v4213_v0, 7  ;;  %v6858_v0 = vld [vmem:[#allocation23_spill] sm:$0xff] }
  0x94   : > { %6847 = vst [vmem:[#allocation102_spill] sm:$0xff] %v4926_v45  ;;  %v1121_v26 = vsel %vm6634_vm12, %v4930_v54, 0.0  ;;  %v1122_v23 = vsel %vm6635_vm1, %v4926_v45, 0.0  ;;  %v4955_v49 = vsel %vm493_vm11, %v483_v18, %v484_v63  ;;  %v488_v55 = vrot.slane %v4201_v60, 7 }
  0x95   : > { %3578 = vrot.lane.b32.xlu1 %v3577_v40, %s4029_s20  ;;  %6848 = vst [vmem:[#allocation103_spill] sm:$0xff] %v4930_v54  ;;  %3588 = vrot.lane.b32.xlu0 %v3587_v50, %s4029_s20  ;;  %v6854_v40 = vld [vmem:[#allocation67_spill] sm:$0xff]  ;;  %v6857_v50 = vld [vmem:[#allocation20_spill] sm:$0xff]  ;;  %v1126_v27 = vsel %vm6652_vm10, %v4955_v49, 0.0  ;;  %vm6646_vm12 = vcmp.gt.f32.partialorder %v4668_v9, 0.5  ;;  %vm6649_vm1 = vcmp.gt.f32.partialorder %v4672_v12, 0.5 }
  0x96   : > { %vm6655_vm3 = vcmp.gt.f32.partialorder %v6854_v40, 0.5  ;;  %6855 = vst [vmem:[#allocation19_spill] sm:$0xff] %v4950_v17  ;;  %v487_v38 = vrot.slane %v6857_v50, 7  ;;  %v485_v58 = vrot.slane %v6858_v0, 7 }
  0x97   : > { %6856 = vst [vmem:[#allocation104_spill] sm:$0xff] %v4955_v49  ;;  %v3582_v49 = vpack.i.bf16 %v1122_v23, %v1121_v26  ;;  %v708_v23 = vsel %vm6655_vm3, %v4905_v48, 0.0  ;;  %v6867_v48 = vld [vmem:[#allocation79_spill] sm:$0xff] }
  0x98   : > { %v4968_v18 = vpop.permute.xlu1 %3413  ;;  %v4976_v60 = vsel %vm493_vm11, %v486_v36, %v487_v38  ;;  %v4994_v26 = vsel %vm493_vm11, %v484_v63, %v485_v58  ;;  %v688_v63 = vsel %vm6662_vm15, %v4755_v35, 0.0  ;;  %vm589_vm15 = vcmp.gt.f32.partialorder %v4708_v31, 0.5 }
  0x99   : > { %3568 = vrot.lane.b32.xlu2 %v3567_v57, %s4029_s20  ;;  %v1125_v57 = vsel %vm6655_vm3, %v4950_v17, 0.0  ;;  %v4972_v17 = vsel %vm493_vm11, %v487_v38, %v488_v55  ;;  %6860 = vst [vmem:[#allocation23_spill] sm:$0xff] %v4976_v60  ;;  %v4978_v50 = vpop.permute.xlu0 %3423  ;;  %v1129_v45 = vsel %vm6646_vm12, %v4976_v60, 0.0  ;;  %v4990_v38 = vsel %vm493_vm11, %v485_v58, %v486_v36  ;;  %v6864_v60 = vld [vmem:[#allocation76_spill] sm:$0xff] }
  0x9a   : > { %v3592_v43 = vpack.i.bf16 %v1126_v27, %v1125_v57  ;;  %6859 = vst [vmem:[#allocation20_spill] sm:$0xff] %v4972_v17  ;;  %v1130_v0 = vsel %vm6649_vm1, %v4972_v17, 0.0  ;;  %v6861_v27 = vld [vmem:[#allocation75_spill] sm:$0xff]  ;;  %vm583_vm12 = vcmp.gt.f32.partialorder %v6864_v60, 0.5  ;;  %v709_v17 = vsel %vm6652_vm10, %v4911_v14, 0.0  ;;  %v5020_v14 = vpop.permute.xlu2 %3463 }
  0x9b   : > { %vm582_vm13 = vcmp.gt.f32.partialorder %v6861_v27, 0.5  ;;  %v3602_v57 = vpack.i.bf16 %v1130_v0, %v1129_v45  ;;  %6862 = vst [vmem:[#allocation105_spill] sm:$0xff] %v4990_v38  ;;  %v3435_v45 = vunpack.i.l.bf16 %v4871_v22  ;;  %v689_v36 = vsel %vm6661_vm9, %v4783_v25, 0.0 }
  0x9c   : > { %6863 = vst [vmem:[#allocation106_spill] sm:$0xff] %v4994_v26  ;;  %vm2639_vm1 = vcmask 23552   ;;  %v1127_v25 = vsel %vm582_vm13, %v4994_v26, 0.0  ;;  %v1128_v35 = vsel %vm583_vm12, %v4990_v38, 0.0  ;;  %vm586_vm10 = vcmp.gt.f32.partialorder %v6867_v48, 0.5 }
  0x9d   : > { %3593 = vrot.lane.b32.xlu1 %v3592_v43, %s4029_s20  ;;  %v3436_v43 = vunpack.i.h.bf16 %v4871_v22  ;;  %3603 = vrot.lane.b32.xlu0 %v3602_v57, %s4029_s20  ;;  %v5017_v0 = vsel %vm2639_vm1, %v708_v23, %v3435_v45  ;;  %v3386_v22 = vunpack.i.h.bf16 %v4859_v34  ;;  %v6865_v57 = vld [vmem:[#allocation26_spill] sm:$0xff]  ;;  %v6866_v23 = vld [vmem:[#allocation27_spill] sm:$0xff]  ;;  %vm587_vm3 = vcmp.gt.f32.partialorder %v6868_v15, 0.5 }
  0x9e   : > { %v490_v45 = vrot.slane %v6866_v23, 7  ;;  %vm588_vm9 = vcmp.gt.f32.partialorder %v4703_v16, 0.5 }
  0x9f   : > { %v5014_v58 = vsel %vm2639_vm1, %v709_v17, %v3436_v43  ;;  %v489_v17 = vrot.slane %v6865_v57, 7  ;;  %v2643_v43 = vsel %vm2639_vm1, %v689_v36, %v3386_v22  ;;  %v3597_v57 = vpack.i.bf16 %v1128_v35, %v1127_v25 }
  0xa0   : > { %v5034_v40 = vpop.permute.xlu1 %3428 }
  0xa1   : > { %3583 = vrot.lane.b32.xlu2 %v3582_v49, %s4029_s20  ;;  %v3385_v49 = vunpack.i.l.bf16 %v4859_v34  ;;  %v5039_v60 = vsel %vm493_vm11, %v488_v55, %v489_v17  ;;  %v491_v34 = vrot.slane %v4637_v7, 7  ;;  %v5042_v42 = vpop.permute.xlu0 %3438  ;;  %v5046_v36 = vsel %vm493_vm11, %v489_v17, %v490_v45  ;;  %v6874_v17 = vld [vmem:[#allocation10_spill] sm:$0xff] }
  0xa2   : > { %6869 = vst [vmem:[#allocation26_spill] sm:$0xff] %v5039_v60  ;;  %v1131_v22 = vsel %vm586_vm10, %v5039_v60, 0.0  ;;  %v1132_v55 = vsel %vm587_vm3, %v5046_v36, 0.0 }
  0xa3   : > { %v2642_v27 = vsel %vm2639_vm1, %v688_v63, %v3385_v49  ;;  %6870 = vst [vmem:[#allocation27_spill] sm:$0xff] %v5046_v36  ;;  %v6871_v63 = vrot.slane %v4706_v6, 7  ;;  %v5063_v25 = vsel %vm493_vm11, %v490_v45, %v491_v34  ;;  %v3607_v35 = vpack.i.bf16 %v1132_v55, %v1131_v22 }
  0xa4   : > { %6873 = vst [vmem:[#allocation108_spill] sm:$0xff] %v5063_v25  ;;  %v1133_v23 = vsel %vm588_vm9, %v5063_v25, 0.0  ;;  %v693_v22 = vsel %vm6688_vm5, %v4734_v29, 0.0  ;;  %v3396_v55 = vunpack.i.h.bf16 %v4916_v44  ;;  %v3410_v25 = vunpack.i.l.bf16 %v4921_v52  ;;  %v3479_v29 = vpop.permute.xlu2 %3478 }
  0xa5   : > { %v5059_v49 = vsel %vm493_vm11, %v491_v34, %v6871_v63  ;;  %3618 = vrot.lane.b32.xlu0 %v6874_v17, %s4030_s21  ;;  %3608 = vrot.lane.b32.xlu1 %v3607_v35, %s4029_s20  ;;  %v692_v34 = vsel %vm6695_vm6, %v4740_v53, 0.0  ;;  %v3395_v63 = vunpack.i.l.bf16 %v4916_v44  ;;  %v699_v35 = vsel %vm6677_vm2, %v4823_v37, 0.0 }
  0xa6   : > { %6872 = vst [vmem:[#allocation107_spill] sm:$0xff] %v5059_v49  ;;  %v1134_v45 = vsel %vm589_vm15, %v5059_v49, 0.0  ;;  %v5091_v17 = vsel %vm2639_vm1, %v693_v22, %v3396_v55  ;;  %v3411_v49 = vunpack.i.h.bf16 %v4921_v52  ;;  %v700_v22 = vsel %vm572_vm4, %v4868_v19, 0.0 }
  0xa7   : > { %v3612_v1 = vpack.i.bf16 %v1134_v45, %v1133_v23  ;;  %v5098_v44 = vsel %vm2639_vm1, %v692_v34, %v3395_v63  ;;  %v701_v52 = vsel %vm573_vm8, %v4864_v33, 0.0  ;;  %v3401_v23 = vunpack.i.h.bf16 %v4687_v21  ;;  %v6876_v33 = vld [vmem:[#allocation8_spill] sm:$0xff] }
  0xa8   : > { %v5095_v53 = vpop.permute.xlu1 %3443  ;;  %v3416_v45 = vunpack.i.h.bf16 %v4968_v18  ;;  %v3415_v34 = vunpack.i.l.bf16 %v4968_v18  ;;  %vm2672_vm11 = vcmask 48128   ;;  %v3466_v55 = vunpack.i.h.bf16 %v5020_v14 }
  0xa9   : > { %3598 = vrot.lane.b32.xlu2 %v3597_v57, %s4029_s20  ;;  %v698_v57 = vsel %vm6678_vm7, %v4827_v47, 0.0  ;;  %v3454_v56 = vpop.permute.xlu0 %3453  ;;  %v5101_v47 = vsel %vm2639_vm1, %v699_v35, %v3411_v49  ;;  %v3400_v49 = vunpack.i.l.bf16 %v4687_v21  ;;  %v695_v63 = vsel %vm567_vm14, %v4803_v8, 0.0 }
  0xaa   : > { %v5104_v37 = vsel %vm2639_vm1, %v698_v57, %v3410_v25  ;;  %v694_v25 = vsel %vm566_vm0, %v4790_v13, 0.0  ;;  %v6875_v57 = vld [vmem:[#allocation7_spill] sm:$0xff]  ;;  %v2655_v35 = vsel %vm2639_vm1, %v701_v52, %v3416_v45  ;;  %v2654_v18 = vsel %vm2639_vm1, %v700_v22, %v3415_v34 }
  0xab   : > { %v3465_v21 = vunpack.i.l.bf16 %v5020_v14  ;;  %v5132_v19 = vsel %vm2672_vm11, %v2643_v43, %v3466_v55  ;;  %v3406_v13 = vunpack.i.h.bf16 %v4736_v2  ;;  %v2649_v52 = vsel %vm2639_vm1, %v695_v63, %v3401_v23 }
  0xac   : > { %vm6877_vm2 = vcmp.gt.f32.partialorder %v4385_v11, 0.5  ;;  %vm6878_vm7 = vcmp.gt.f32.partialorder %v4405_v62, 0.5  ;;  %v3405_v43 = vunpack.i.l.bf16 %v4736_v2  ;;  %v3481_v45 = vunpack.i.h.bf16 %v3479_v29 }
  0xad   : > { %3633 = vrot.lane.b32.xlu0 %v6875_v57, %s4030_s21  ;;  %3623 = vrot.lane.b32.xlu1 %v6876_v33, %s4030_s21  ;;  %v5136_v8 = vsel %vm2672_vm11, %v2642_v27, %v3465_v21  ;;  %v2648_v57 = vsel %vm2639_vm1, %v694_v25, %v3400_v49  ;;  %v696_v14 = vsel %vm6877_vm2, %v4768_v24, 0.0  ;;  %v3480_v34 = vunpack.i.l.bf16 %v3479_v29 }
  0xae   : > { %v3381_v27 = vunpack.i.h.bf16 %v4793_v46  ;;  %v3380_v49 = vunpack.i.l.bf16 %v4793_v46  ;;  %v3390_v63 = vunpack.i.l.bf16 %v4853_v39  ;;  %v5152_v21 = vsel %vm2672_vm11, %v2649_v52, %v3481_v45  ;;  %v6880_v52 = vld [vmem:[#allocation34_spill] sm:$0xff] }
  0xaf   : > { %v5155_v33 = vsel %vm2672_vm11, %v2648_v57, %v3480_v34  ;;  %v3391_v2 = vunpack.i.h.bf16 %v4853_v39  ;;  %vm6879_vm2 = vcmp.gt.f32.partialorder %v4273_v51, 0.5  ;;  %v716_v46 = vsel %vm588_vm9, %v5039_v60, 0.0  ;;  %v6882_v57 = vld [vmem:[#allocation16_spill] sm:$0xff] }
  0xb0   : > { %v3459_v22 = vpop.permute.xlu1 %3458  ;;  %v3494_v25 = vpop.permute.xlu2 %3493  ;;  %v690_v29 = vsel %vm6879_vm2, %v4685_v59, 0.0  ;;  %v3456_v39 = vunpack.i.h.bf16 %v3454_v56  ;;  %v3455_v45 = vunpack.i.l.bf16 %v3454_v56  ;;  %v2641_v24 = vsel %vm2639_vm1, 0.0, %v3381_v27  ;;  %v6883_v59 = vld [vmem:[#allocation13_spill] sm:$0xff] }
  0xb1   : > { %3613 = vrot.lane.b32.xlu2 %v3612_v1, %s4029_s20  ;;  %v697_v1 = vsel %vm6878_vm7, %v4764_v61, 0.0  ;;  %vm6881_vm7 = vcmp.gt.f32.partialorder %v6880_v52, 0.5  ;;  %v3496_v34 = vunpack.i.h.bf16 %v3494_v25  ;;  %v2650_v61 = vsel %vm2639_vm1, %v696_v14, %v3405_v43 }
  0xb2   : > { %v2651_v23 = vsel %vm2639_vm1, %v697_v1, %v3406_v13  ;;  %v717_v13 = vsel %vm589_vm15, %v5046_v36, 0.0  ;;  %v691_v1 = vsel %vm6881_vm7, %v4679_v32, 0.0  ;;  %v2640_v60 = vsel %vm2639_vm1, 0.0, %v3380_v49  ;;  %v6884_v36 = vld [vmem:[#allocation12_spill] sm:$0xff] }
  0xb3   : > { %v3495_v31 = vunpack.i.l.bf16 %v3494_v25  ;;  %v2644_v32 = vsel %vm2639_vm1, %v690_v29, %v3390_v63  ;;  %v5184_v56 = vsel %vm2639_vm1, %v716_v46, %v3455_v45  ;;  %v5187_v14 = vsel %vm2672_vm11, %v2655_v35, %v3496_v34  ;;  %v6891_v45 = vld [vmem:[#allocation72_spill] sm:$0xff]  ;;  %v6896_v34 = vld [vmem:[#allocation54_spill] sm:$0xff] }
  0xb4   : > { %v3469_v55 = vpop.permute.xlu0 %3468  ;;  %6885 = vst [vmem:[#allocation10_spill] sm:$0xff] %v5187_v14  ;;  %v2645_v43 = vsel %vm2639_vm1, %v691_v1, %v3391_v2  ;;  %v3461_v49 = vunpack.i.h.bf16 %v3459_v22  ;;  %vm6892_vm15 = vcmp.gt.f32.partialorder %v6891_v45, 0.5  ;;  %vm6897_vm2 = vcmp.gt.f32.partialorder %v6896_v34, 0.5 }
  0xb5   : > { %3648 = vrot.lane.b32.xlu0 %v6882_v57, %s4030_s21  ;;  %3638 = vrot.lane.b32.xlu1 %v6884_v36, %s4030_s21  ;;  %v5181_v57 = vsel %vm2639_vm1, %v717_v13, %v3456_v39  ;;  %v5191_v27 = vsel %vm2672_vm11, %v2654_v18, %v3495_v31  ;;  %v3471_v25 = vunpack.i.h.bf16 %v3469_v55  ;;  %v3470_v16 = vunpack.i.l.bf16 %v3469_v55  ;;  %v6890_v39 = vld [vmem:[#allocation102_spill] sm:$0xff] }
  0xb6   : > { %6886 = vst [vmem:[#allocation109_spill] sm:$0xff] %v5191_v27  ;;  %v5194_v29 = vsel %vm2672_vm11, %v2641_v24, %v3461_v49  ;;  %v3430_v55 = vunpack.i.l.bf16 %v5034_v40  ;;  %v6898_v49 = vld [vmem:[#allocation14_spill] sm:$0xff]  ;;  %vm6926_vm5 = vcmp.lt.f32.partialorder %v4273_v51, 14.5  ;;  %vm6948_vm6 = vcmp.lt.f32.partialorder %v6834_v30, 14.5 }
  0xb7   : > { %v5200_v35 = vsel %vm2672_vm11, %v2645_v43, %v3471_v25  ;;  %v5203_v2 = vsel %vm2672_vm11, %v2644_v32, %v3470_v16  ;;  %v707_v32 = vsel %vm6892_vm15, %v6890_v39, 0.0  ;;  %v6893_v16 = vld [vmem:[#allocation22_spill] sm:$0xff]  ;;  %v6899_v25 = vld [vmem:[#allocation15_spill] sm:$0xff] }
  0xb8   : > { %6887 = vst [vmem:[#allocation110_spill] sm:$0xff] %v5200_v35  ;;  %v6902_v39 = vld [vmem:[#allocation95_spill] sm:$0xff] }
  0xb9   : > { %3628 = vrot.lane.b32.xlu2 %v6883_v59, %s4030_s21  ;;  %v3460_v59 = vunpack.i.l.bf16 %v3459_v22  ;;  %v3431_v22 = vunpack.i.h.bf16 %v5034_v40 }
  0xbb   : > { %v5197_v46 = vsel %vm2672_vm11, %v2640_v60, %v3460_v59  ;;  %v6888_v59 = vld [vmem:[#allocation71_spill] sm:$0xff]  ;;  %v2661_v14 = vsel %vm2639_vm1, %v707_v32, %v3431_v22  ;;  %v6909_v32 = vld [vmem:[#allocation28_spill] sm:$0xff] }
  0xbc   : > { %v3474_v36 = vpop.permute.xlu1 %3473  ;;  %v3484_v63 = vpop.permute.xlu0 %3483  ;;  %vm6889_vm9 = vcmp.gt.f32.partialorder %v6888_v59, 0.5 }
  0xbd   : > { %v3476_v13 = vunpack.i.h.bf16 %v3474_v36  ;;  %v3475_v31 = vunpack.i.l.bf16 %v3474_v36  ;;  %v3486_v18 = vunpack.i.h.bf16 %v3484_v63  ;;  %v3485_v1 = vunpack.i.l.bf16 %v3484_v63  ;;  %3663 = vrot.lane.b32.xlu0 %v6893_v16, %s4030_s21  ;;  %3653 = vrot.lane.b32.xlu1 %v6899_v25, %s4030_s21  ;;  %v6901_v16 = vld [vmem:[#allocation91_spill] sm:$0xff] }
  0xbe   : > { %v706_v60 = vsel %vm6889_vm9, %v4930_v54, 0.0  ;;  %v6903_v54 = vld [vmem:[#allocation56_spill] sm:$0xff] }
  0xbf   : > { %v5209_v24 = vsel %vm2672_vm11, %v5091_v17, %v3476_v13  ;;  %v5221_v36 = vsel %vm2672_vm11, %v5098_v44, %v3475_v31  ;;  %v5224_v40 = vsel %vm2672_vm11, %v2651_v23, %v3486_v18  ;;  %v6895_v17 = vld [vmem:[#allocation94_spill] sm:$0xff]  ;;  %v5234_v13 = vsel %vm2672_vm11, %v2650_v61, %v3485_v1 }
  0xc0   : > { %6894 = vst [vmem:[#allocation111_spill] sm:$0xff] %v5224_v40  ;;  %v702_v43 = vsel %vm6897_vm2, %v6895_v17, 0.0  ;;  %v3421_v44 = vunpack.i.h.bf16 %v6901_v16  ;;  %v3420_v31 = vunpack.i.l.bf16 %v6901_v16  ;;  %vm6904_vm7 = vcmp.gt.f32.partialorder %v6903_v54, 0.5 }
  0xc1   : > { %3643 = vrot.lane.b32.xlu2 %v6898_v49, %s4030_s21  ;;  %v3509_v63 = vpop.permute.xlu2 %3508  ;;  %6900 = vst [vmem:[#allocation112_spill] sm:$0xff] %v5234_v13  ;;  %v703_v17 = vsel %vm6904_vm7, %v6902_v39, 0.0  ;;  %v2660_v49 = vsel %vm2639_vm1, %v706_v60, %v3430_v55  ;;  %v3426_v60 = vunpack.i.h.bf16 %v4978_v50 }
  0xc2   : > { %v3511_v23 = vunpack.i.h.bf16 %v3509_v63  ;;  %v3510_v18 = vunpack.i.l.bf16 %v3509_v63  ;;  %v2657_v35 = vsel %vm2639_vm1, %v703_v17, %v3421_v44  ;;  %v2656_v39 = vsel %vm2639_vm1, %v702_v43, %v3420_v31  ;;  %v6910_v17 = vld [vmem:[#allocation99_spill] sm:$0xff] }
  0xc3   : > { %v6911_v43 = vld [vmem:[#allocation63_spill] sm:$0xff] }
  0xc4   : > { %v3489_v27 = vpop.permute.xlu1 %3488  ;;  %v5244_v25 = vsel %vm2672_vm11, %v2661_v14, %v3511_v23  ;;  %v5247_v61 = vsel %vm2672_vm11, %v2660_v49, %v3510_v18  ;;  %v3499_v16 = vpop.permute.xlu0 %3498  ;;  %vm6912_vm9 = vcmp.gt.f32.partialorder %v6911_v43, 0.5  ;;  %v6915_v49 = vld [vmem:[#allocation98_spill] sm:$0xff]  ;;  %v5282_v23 = vpack.i.bf16 %v4706_v6, %v4637_v7 }
  0xc5   : > { %6905 = vst [vmem:[#allocation91_spill] sm:$0xff] %v5244_v25  ;;  %v3491_v1 = vunpack.i.h.bf16 %v3489_v27  ;;  %v3490_v40 = vunpack.i.l.bf16 %v3489_v27  ;;  %v3501_v13 = vunpack.i.h.bf16 %v3499_v16  ;;  %v3500_v63 = vunpack.i.l.bf16 %v3499_v16  ;;  %3678 = vrot.lane.b32.xlu0 %v6909_v32, %s4030_s21 }
  0xc6   : > { %6906 = vst [vmem:[#allocation113_spill] sm:$0xff] %v5247_v61  ;;  %v3446_v16 = vunpack.i.h.bf16 %v5095_v53 }
  0xc7   : > { %v5253_v22 = vsel %vm2672_vm11, %v5104_v37, %v3490_v40  ;;  %v5257_v14 = vsel %vm2672_vm11, %v5101_v47, %v3491_v1  ;;  %v5260_v55 = vsel %vm2672_vm11, %v2657_v35, %v3501_v13  ;;  %v5263_v27 = vsel %vm2672_vm11, %v2656_v39, %v3500_v63  ;;  %v6913_v47 = vld [vmem:[#allocation18_spill] sm:$0xff]  ;;  %v6914_v35 = vld [vmem:[#allocation21_spill] sm:$0xff]  ;;  %6918 = vst [vmem:[#allocation63_spill] sm:$0xff] %v5282_v23  ;;  %v6919_v63 = vld [vmem:[#allocation88_spill] sm:$0xff] }
  0xc8   : > { %6907 = vst [vmem:[#allocation114_spill] sm:$0xff] %v5260_v55  ;;  %v705_v37 = vsel %vm6912_vm9, %v6910_v17, 0.0  ;;  %v3425_v40 = vunpack.i.l.bf16 %v4978_v50  ;;  %3668 = vrot.lane.b32.xlu1 %v6914_v35, %s4030_s21  ;;  %v6916_v39 = vld [vmem:[#allocation62_spill] sm:$0xff]  ;;  %vm6694_vm2 = vcmp.lt.f32.partialorder %v6919_v63, 14.5  ;;  %vm6921_vm9 = vcmp.gt.f32.partialorder %v4672_v12, 0.5 }
  0xc9   : > { %6908 = vst [vmem:[#allocation115_spill] sm:$0xff] %v5263_v27  ;;  %3658 = vrot.lane.b32.xlu2 %v6913_v47, %s4030_s21  ;;  %vm6917_vm15 = vcmp.gt.f32.partialorder %v6916_v39, 0.5  ;;  %v2659_v31 = vsel %vm2639_vm1, %v705_v37, %v3426_v60  ;;  %v6920_v47 = vld [vmem:[#allocation89_spill] sm:$0xff]  ;;  %v713_v60 = vsel %vm6921_vm9, %v4990_v38, 0.0  ;;  %vm6928_vm9 = vcmp.lt.f32.partialorder %v6880_v52, 14.5  ;;  %v6929_v38 = vld [vmem:[#allocation35_spill] sm:$0xff] }
  0xca   : > { %v704_v13 = vsel %vm6917_vm15, %v6915_v49, 0.0  ;;  %vm6693_vm7 = vcmp.lt.f32.partialorder %v6920_v47, 14.5  ;;  %vm6922_vm15 = vcmp.gt.f32.partialorder %v4668_v9, 0.5 }
  0xcb   : > { %v2658_v50 = vsel %vm2639_vm1, %v704_v13, %v3425_v40  ;;  %v712_v37 = vsel %vm6922_vm15, %v4994_v26, 0.0  ;;  %v3445_v40 = vunpack.i.l.bf16 %v5095_v53  ;;  %v6923_v13 = vld [vmem:[#allocation24_spill] sm:$0xff]  ;;  %v1199_v53 = vsel %vm6694_vm2, %v6929_v38, 0.0 }
  0xcc   : > { %v3504_v44 = vpop.permute.xlu1 %3503  ;;  %v6930_v26 = vld [vmem:[#allocation32_spill] sm:$0xff]  ;;  %vm6939_vm15 = vcmp.lt.f32.partialorder %v4405_v62, 14.5  ;;  %vm6946_vm2 = vcmp.lt.f32.partialorder %v6831_v20, 14.5 }
  0xcd   : > { %v3506_v18 = vunpack.i.h.bf16 %v3504_v44  ;;  %v3505_v1 = vunpack.i.l.bf16 %v3504_v44  ;;  %3693 = vrot.lane.b32.xlu0 %v5282_v23, %s4030_s21  ;;  %v6924_v44 = vld [vmem:[#allocation25_spill] sm:$0xff]  ;;  %v1200_v23 = vsel %vm6693_vm7, %v6930_v26, 0.0  ;;  %v2666_v17 = vsel %vm2639_vm1, %v712_v37, %v3445_v40  ;;  %v6945_v37 = vld [vmem:[#allocation46_spill] sm:$0xff] }
  0xce   : > { %v1205_v40 = vsel %vm6946_vm2, %v6945_v37, 0.0  ;;  %vm6958_vm2 = vcmp.lt.f32.partialorder %v6903_v54, 14.5 }
  0xcf   : > { %v5289_v32 = vsel %vm2672_vm11, %v2658_v50, %v3505_v1  ;;  %v5292_v35 = vsel %vm2672_vm11, %v2659_v31, %v3506_v18  ;;  %v6925_v31 = vld [vmem:[#allocation39_spill] sm:$0xff]  ;;  %v6927_v1 = vld [vmem:[#allocation36_spill] sm:$0xff] }
  0xd0   : > { %3683 = vrot.lane.b32.xlu1 %v6924_v44, %s4030_s21  ;;  %v1203_v18 = vsel %vm6926_vm5, %v6925_v31, 0.0  ;;  %v1204_v50 = vsel %vm6928_vm9, %v6927_v1, 0.0  ;;  %v3697_v1 = vpack.i.bf16 %v1200_v23, %v1199_v53  ;;  %vm6937_vm5 = vcmp.lt.f32.partialorder %v4385_v11, 14.5  ;;  %v6942_v23 = vld [vmem:[#allocation30_spill] sm:$0xff]  ;;  %v6950_v53 = vld [vmem:[#allocation75_spill] sm:$0xff] }
  0xd1   : > { %3673 = vrot.lane.b32.xlu2 %v6923_v13, %s4030_s21  ;;  %v2667_v13 = vsel %vm2639_vm1, %v713_v60, %v3446_v16  ;;  %v3707_v49 = vpack.i.bf16 %v1204_v50, %v1203_v18  ;;  %vm6941_vm9 = vcmp.lt.f32.partialorder %v4301_v28, 14.5  ;;  %v6943_v60 = vld [vmem:[#allocation38_spill] sm:$0xff]  ;;  %v3440_v18 = vunpack.i.l.bf16 %v5042_v42  ;;  %v6949_v50 = vld [vmem:[#allocation19_spill] sm:$0xff] }
  0xd2   : > { %v3524_v25 = vpop.permute.xlu2 %3523  ;;  %v3514_v44 = vpop.permute.xlu0 %3513  ;;  %vm6944_vm7 = vcmp.lt.f32.partialorder %v6943_v60, 14.5 }
  0xd3   : > { %v3526_v61 = vunpack.i.h.bf16 %v3524_v25  ;;  %v3525_v55 = vunpack.i.l.bf16 %v3524_v25  ;;  %v3516_v27 = vunpack.i.h.bf16 %v3514_v44  ;;  %v3515_v31 = vunpack.i.l.bf16 %v3514_v44  ;;  %v6935_v25 = vld [vmem:[#allocation29_spill] sm:$0xff] }
  0xd5   : > { %v5322_v52 = vsel %vm2672_vm11, %v2667_v13, %v3526_v61  ;;  %v5325_v38 = vsel %vm2672_vm11, %v2666_v17, %v3525_v55  ;;  %v5329_v26 = vsel %vm2672_vm11, %v5014_v58, %v3516_v27  ;;  %v5333_v16 = vsel %vm2672_vm11, %v5017_v0, %v3515_v31  ;;  %3708 = vrot.lane.b32.xlu0 %v3707_v49, %s4031_s22  ;;  %v6936_v61 = vld [vmem:[#allocation49_spill] sm:$0xff]  ;;  %v6938_v17 = vld [vmem:[#allocation47_spill] sm:$0xff]  ;;  %v6947_v13 = vld [vmem:[#allocation44_spill] sm:$0xff] }
  0xd6   : > { %6931 = vst [vmem:[#allocation62_spill] sm:$0xff] %v5322_v52  ;;  %v1209_v55 = vsel %vm6937_vm5, %v6936_v61, 0.0  ;;  %v1210_v58 = vsel %vm6939_vm15, %v6938_v17, 0.0  ;;  %v6940_v27 = vld [vmem:[#allocation31_spill] sm:$0xff]  ;;  %v1202_v49 = vsel %vm6944_vm7, %v6942_v23, 0.0  ;;  %v1206_v44 = vsel %vm6948_vm6, %v6947_v13, 0.0 }
  0xd7   : > { %6932 = vst [vmem:[#allocation88_spill] sm:$0xff] %v5325_v38  ;;  %v1201_v0 = vsel %vm6941_vm9, %v6940_v27, 0.0  ;;  %v3441_v31 = vunpack.i.h.bf16 %v5042_v42  ;;  %v6951_v17 = vld [vmem:[#allocation104_spill] sm:$0xff]  ;;  %v3712_v52 = vpack.i.bf16 %v1206_v44, %v1205_v40  ;;  %v6953_v38 = vld [vmem:[#allocation23_spill] sm:$0xff]  ;;  %vm6956_vm6 = vcmp.lt.f32.partialorder %v6896_v34, 14.5  ;;  %v6959_v44 = vld [vmem:[#allocation17_spill] sm:$0xff] }
  0xd8   : > { %6933 = vst [vmem:[#allocation89_spill] sm:$0xff] %v5329_v26  ;;  %3698 = vrot.lane.b32.xlu1 %v3697_v1, %s4031_s22  ;;  %v3722_v1 = vpack.i.bf16 %v1210_v58, %v1209_v55  ;;  %v6952_v61 = vld [vmem:[#allocation76_spill] sm:$0xff]  ;;  %v711_v23 = vsel %vm583_vm12, %v6951_v17, 0.0  ;;  %v3702_v27 = vpack.i.bf16 %v1202_v49, %v1201_v0  ;;  %v714_v13 = vsel %vm586_vm10, %v6953_v38, 0.0  ;;  %v6955_v17 = vld [vmem:[#allocation58_spill] sm:$0xff]  ;;  %v6957_v49 = vld [vmem:[#allocation61_spill] sm:$0xff] }
  0xd9   : > { %6934 = vst [vmem:[#allocation35_spill] sm:$0xff] %v5333_v16  ;;  %3688 = vrot.lane.b32.xlu2 %v6935_v25, %s4030_s21  ;;  %v710_v25 = vsel %vm582_vm13, %v6949_v50, 0.0  ;;  %v6954_v26 = vld [vmem:[#allocation20_spill] sm:$0xff]  ;;  %v2665_v16 = vsel %vm2639_vm1, %v711_v23, %v3441_v31  ;;  %v1215_v0 = vsel %vm6956_vm6, %v6955_v17, 0.0  ;;  %v1216_v40 = vsel %vm6958_vm2, %v6957_v49, 0.0  ;;  %v6964_v49 = vld [vmem:[#allocation57_spill] sm:$0xff] }
  0xda   : > { %v715_v42 = vsel %vm587_vm3, %v6954_v26, 0.0  ;;  %v2664_v50 = vsel %vm2639_vm1, %v710_v25, %v3440_v18  ;;  %v3451_v38 = vunpack.i.h.bf16 %v6959_v44  ;;  %v3450_v26 = vunpack.i.l.bf16 %v6959_v44  ;;  %v6962_v18 = vld [vmem:[#allocation42_spill] sm:$0xff]  ;;  %v6967_v17 = vld [vmem:[#allocation55_spill] sm:$0xff] }
  0xdb   : > { %vm6961_vm7 = vcmp.lt.f32.partialorder %v4418_v41, 14.5  ;;  %vm6963_vm5 = vcmp.lt.f32.partialorder %v4420_v3, 14.5  ;;  %v6965_v44 = vld [vmem:[#allocation50_spill] sm:$0xff]  ;;  %vm6968_vm9 = vcmp.lt.f32.partialorder %v4447_v10, 14.5  ;;  %vm2705_vm6 = vcmask 72704  }
  0xdc   : > { %vm6966_vm15 = vcmp.lt.f32.partialorder %v6965_v44, 14.5  ;;  %v2669_v62 = vsel %vm2639_vm1, %v715_v42, %v3451_v38  ;;  %v6969_v38 = vld [vmem:[#allocation70_spill] sm:$0xff]  ;;  %v6972_v42 = vld [vmem:[#allocation73_spill] sm:$0xff] }
  0xdd   : > { %3723 = vrot.lane.b32.xlu0 %v3722_v1, %s4031_s22  ;;  %v1208_v1 = vsel %vm6963_vm5, %v6962_v18, 0.0  ;;  %v2668_v18 = vsel %vm2639_vm1, %v714_v13, %v3450_v26  ;;  %v6970_v26 = vld [vmem:[#allocation67_spill] sm:$0xff]  ;;  %vm6978_vm5 = vcmp.lt.f32.partialorder %v4511_v4, 14.5 }
  0xde   : > { %v3519_v37 = vpop.permute.xlu1 %3518  ;;  %vm6971_vm1 = vcmp.lt.f32.partialorder %v6970_v26, 14.5 }
  0xdf   : > { %v3521_v55 = vunpack.i.h.bf16 %v3519_v37  ;;  %v3520_v58 = vunpack.i.l.bf16 %v3519_v37  ;;  %v6960_v37 = vld [vmem:[#allocation43_spill] sm:$0xff]  ;;  %v1221_v13 = vsel %vm6971_vm1, %v6969_v38, 0.0  ;;  %vm6984_vm1 = vcmp.lt.f32.partialorder %v6888_v59, 14.5 }
  0xe0   : > { %3713 = vrot.lane.b32.xlu1 %v3712_v52, %s4031_s22  ;;  %v1207_v31 = vsel %vm6961_vm7, %v6960_v37, 0.0  ;;  %v1212_v52 = vsel %vm6968_vm9, %v6967_v17, 0.0  ;;  %vm6976_vm7 = vcmp.lt.f32.partialorder %v4505_v5, 14.5  ;;  %vm6982_vm9 = vcmp.lt.f32.partialorder %v6911_v43, 14.5 }
  0xe1   : > { %3703 = vrot.lane.b32.xlu2 %v3702_v27, %s4031_s22  ;;  %v5385_v25 = vsel %vm2672_vm11, %v2664_v50, %v3520_v58  ;;  %v5388_v23 = vsel %vm2672_vm11, %v2665_v16, %v3521_v55  ;;  %v1211_v27 = vsel %vm6966_vm15, %v6964_v49, 0.0  ;;  %v3737_v16 = vpack.i.bf16 %v1216_v40, %v1215_v0 }
  0xe2   : > { %v3717_v11 = vpack.i.bf16 %v1208_v1, %v1207_v31  ;;  %v3727_v30 = vpack.i.bf16 %v1212_v52, %v1211_v27  ;;  %v6973_v31 = vld [vmem:[#allocation68_spill] sm:$0xff]  ;;  %vm6980_vm15 = vcmp.lt.f32.partialorder %v6916_v39, 14.5  ;;  %v6981_v1 = vld [vmem:[#allocation66_spill] sm:$0xff] }
  0xe3   : > { %v3539_v50 = vpop.permute.xlu2 %3538  ;;  %v3529_v55 = vpop.permute.xlu0 %3528  ;;  %vm6974_vm2 = vcmp.lt.f32.partialorder %v6973_v31, 14.5  ;;  %v1218_v27 = vsel %vm6982_vm9, %v6981_v1, 0.0  ;;  %vm6994_vm9 = vcmp.lt.f32.partialorder %v6952_v61, 14.5 }
  0xe4   : > { %v3541_v58 = vunpack.i.h.bf16 %v3539_v50  ;;  %v3540_v54 = vunpack.i.l.bf16 %v3539_v50  ;;  %v3531_v34 = vunpack.i.h.bf16 %v3529_v55  ;;  %v3530_v37 = vunpack.i.l.bf16 %v3529_v55 }
  0xe5   : > { %3738 = vrot.lane.b32.xlu0 %v3737_v16, %s4031_s22 }
  0xe6   : > { %v5406_v49 = vsel %vm2705_vm6, %v5194_v29, %v3541_v58  ;;  %v5410_v17 = vsel %vm2705_vm6, %v5197_v46, %v3540_v54  ;;  %v5413_v0 = vsel %vm2672_vm11, %v2669_v62, %v3531_v34  ;;  %v5416_v40 = vsel %vm2672_vm11, %v2668_v18, %v3530_v37  ;;  %v6975_v54 = vld [vmem:[#allocation52_spill] sm:$0xff]  ;;  %v6977_v46 = vld [vmem:[#allocation53_spill] sm:$0xff] }
  0xe7   : > { %v1222_v29 = vsel %vm6974_vm2, %v6972_v42, 0.0  ;;  %v1213_v62 = vsel %vm6976_vm7, %v6975_v54, 0.0  ;;  %v1214_v34 = vsel %vm6978_vm5, %v6977_v46, 0.0  ;;  %v6979_v37 = vld [vmem:[#allocation69_spill] sm:$0xff]  ;;  %vm6986_vm2 = vcmp.lt.f32.partialorder %v6891_v45, 14.5 }
  0xe8   : > { %3728 = vrot.lane.b32.xlu1 %v3727_v30, %s4031_s22  ;;  %v1217_v18 = vsel %vm6980_vm15, %v6979_v37, 0.0  ;;  %v3732_v31 = vpack.i.bf16 %v1214_v34, %v1213_v62  ;;  %vm6988_vm7 = vcmp.lt.f32.partialorder %v6867_v48, 14.5  ;;  %vm6990_vm5 = vcmp.lt.f32.partialorder %v6868_v15, 14.5 }
  0xe9   : > { %3718 = vrot.lane.b32.xlu2 %v3717_v11, %s4031_s22  ;;  %v3752_v11 = vpack.i.bf16 %v1222_v29, %v1221_v13  ;;  %v3742_v26 = vpack.i.bf16 %v1218_v27, %v1217_v18  ;;  %v6985_v18 = vld [vmem:[#allocation65_spill] sm:$0xff]  ;;  %v6987_v27 = vld [vmem:[#allocation82_spill] sm:$0xff]  ;;  %vm6992_vm15 = vcmp.lt.f32.partialorder %v6950_v53, 14.5 }
  0xeb   : > { %v3554_v52 = vpop.permute.xlu2 %3553  ;;  %v3544_v50 = vpop.permute.xlu0 %3543 }
  0xec   : > { %v3556_v30 = vunpack.i.h.bf16 %v3554_v52  ;;  %v3555_v16 = vunpack.i.l.bf16 %v3554_v52  ;;  %v3546_v55 = vunpack.i.h.bf16 %v3544_v50  ;;  %v3545_v58 = vunpack.i.l.bf16 %v3544_v50  ;;  %v6989_v52 = vld [vmem:[#allocation84_spill] sm:$0xff]  ;;  %v6991_v50 = vld [vmem:[#allocation81_spill] sm:$0xff] }
  0xed   : > { %3753 = vrot.lane.b32.xlu0 %v3752_v11, %s4031_s22  ;;  %v1228_v11 = vsel %vm6990_vm5, %v6989_v52, 0.0  ;;  %v6995_v52 = vrot.slane %v4637_v7, 1  ;;  %vm7008_vm5 = vcmp.gt.f32.partialorder %v4301_v28, 0.5 }
  0xee   : > { %v5441_v46 = vsel %vm2705_vm6, %v5209_v24, %v3556_v30  ;;  %v5445_v54 = vsel %vm2705_vm6, %v5221_v36, %v3555_v16  ;;  %v5449_v42 = vsel %vm2705_vm6, %v5136_v8, %v3545_v58  ;;  %v5453_v13 = vsel %vm2705_vm6, %v5132_v19, %v3546_v55  ;;  %v6983_v24 = vld [vmem:[#allocation64_spill] sm:$0xff]  ;;  %v6993_v16 = vld [vmem:[#allocation78_spill] sm:$0xff] }
  0xef   : > { %v3534_v29 = vpop.permute.xlu1 %3533  ;;  %v1219_v36 = vsel %vm6984_vm1, %v6983_v24, 0.0  ;;  %v1220_v8 = vsel %vm6986_vm2, %v6985_v18, 0.0  ;;  %v1227_v19 = vsel %vm6988_vm7, %v6987_v27, 0.0  ;;  %v1223_v30 = vsel %vm6992_vm15, %v6991_v50, 0.0 }
  0xf0   : > { %v3536_v62 = vunpack.i.h.bf16 %v3534_v29  ;;  %v3535_v34 = vunpack.i.l.bf16 %v3534_v29  ;;  %3743 = vrot.lane.b32.xlu1 %v3742_v26, %s4031_s22  ;;  %v1224_v55 = vsel %vm6994_vm9, %v6993_v16, 0.0  ;;  %v845_v29 = vrot.slane %v4706_v6, 1  ;;  %v6996_v6 = vld [vmem:[#allocation2_spill] sm:$0xff] }
  0xf1   : > { %3733 = vrot.lane.b32.xlu2 %v3732_v31, %s4031_s22  ;;  %v3767_v48 = vpack.i.bf16 %v1228_v11, %v1227_v19  ;;  %vm7004_vm2 = vcmp.lt.f32.partialorder %v4668_v9, 14.5  ;;  %vm7006_vm7 = vcmp.lt.f32.partialorder %v4672_v12, 14.5  ;;  %vm7010_vm15 = vcmp.gt.f32.partialorder %v6943_v60, 0.5 }
  0xf2   : > { %v5472_v31 = vsel %vm2672_vm11, %v5184_v56, %v3535_v34  ;;  %v5476_v26 = vsel %vm2672_vm11, %v5181_v57, %v3536_v62  ;;  %v3747_v56 = vpack.i.bf16 %v1220_v8, %v1219_v36  ;;  %v3757_v34 = vpack.i.bf16 %v1224_v55, %v1223_v30  ;;  %v6999_v36 = vld [vmem:[#allocation5_spill] sm:$0xff] }
  0xf3   : > { %v3569_v58 = vpop.permute.xlu2 %3568  ;;  %vm6997_vm11 = vcmp.lt.s32.totalorder %v6996_v6, 7  ;;  %v7000_v8 = vrot.slane %v6999_v36, 1  ;;  %v7009_v55 = vld [vmem:[#allocation9_spill] sm:$0xff] }
  0xf4   : > { %v3571_v38 = vunpack.i.h.bf16 %v3569_v58  ;;  %v3570_v15 = vunpack.i.l.bf16 %v3569_v58  ;;  %v5497_v58 = vsel %vm6997_vm11, %v6995_v52, %v845_v29  ;;  %vm7001_vm1 = vmmov %vm6997_vm11 }
  0xf5   : > { %6998 = vst [vmem:[#allocation32_spill] sm:$0xff] %v5497_v58  ;;  %3768 = vrot.lane.b32.xlu0 %v3767_v48, %s4031_s22 }
  0xf6   : > { %v5487_v57 = vsel %vm2705_vm6, %v5257_v14, %v3571_v38  ;;  %v5491_v62 = vsel %vm2705_vm6, %v5253_v22, %v3570_v15  ;;  %v3559_v50 = vpop.permute.xlu0 %3558  ;;  %v5503_v14 = vsel %vm7001_vm1, %v845_v29, %v7000_v8  ;;  %v7003_v15 = vld [vmem:[#allocation74_spill] sm:$0xff]  ;;  %v7005_v38 = vld [vmem:[#allocation77_spill] sm:$0xff]  ;;  %vm7019_vm1 = vcmp.gt.f32.partialorder %v6919_v63, 0.5 }
  0xf7   : > { %v3549_v45 = vpop.permute.xlu1 %3548  ;;  %v3561_v59 = vunpack.i.h.bf16 %v3559_v50  ;;  %v3560_v16 = vunpack.i.l.bf16 %v3559_v50  ;;  %7002 = vst [vmem:[#allocation75_spill] sm:$0xff] %v5503_v14  ;;  %v1225_v22 = vsel %vm7004_vm2, %v7003_v15, 0.0  ;;  %v1226_v7 = vsel %vm7006_vm7, %v7005_v38, 0.0  ;;  %v7007_v50 = vld [vmem:[#allocation85_spill] sm:$0xff] }
  0xf8   : > { %v3551_v19 = vunpack.i.h.bf16 %v3549_v45  ;;  %v3550_v11 = vunpack.i.l.bf16 %v3549_v45  ;;  %3758 = vrot.lane.b32.xlu1 %v3757_v34, %s4031_s22  ;;  %v1361_v30 = vsel %vm7008_vm5, %v7007_v50, 0.0  ;;  %v1362_v45 = vsel %vm7010_vm15, %v7009_v55, 0.0 }
  0xf9   : > { %3748 = vrot.lane.b32.xlu2 %v3747_v56, %s4031_s22  ;;  %v5516_v52 = vsel %vm2705_vm6, %v5155_v33, %v3560_v16  ;;  %v5520_v48 = vsel %vm2705_vm6, %v5152_v21, %v3561_v59  ;;  %v7011_v56 = vld [vmem:[#allocation110_spill] sm:$0xff]  ;;  %v7012_v16 = vld [vmem:[#allocation4_spill] sm:$0xff]  ;;  %v7014_v59 = vld [vmem:[#allocation83_spill] sm:$0xff]  ;;  %v3782_v50 = vpack.i.bf16 %v1362_v45, %v1361_v30  ;;  %v3762_v55 = vpack.i.bf16 %v1226_v7, %v1225_v22 }
  0xfa   : > { %v5530_v29 = vsel %vm2705_vm6, %v5203_v2, %v3550_v11  ;;  %v5534_v33 = vsel %vm2705_vm6, %v7011_v56, %v3551_v19  ;;  %vm7013_vm9 = vcmp.lt.f32.partialorder %v7012_v16, 14.5  ;;  %vm7015_vm11 = vcmp.lt.f32.partialorder %v7014_v59, 14.5  ;;  %v7016_v59 = vld [vmem:[#allocation93_spill] sm:$0xff]  ;;  %v7017_v22 = vld [vmem:[#allocation11_spill] sm:$0xff]  ;;  %v7020_v45 = vld [vmem:[#allocation6_spill] sm:$0xff] }
  0xfb   : > { %v1229_v21 = vsel %vm7013_vm9, %v5497_v58, 0.0  ;;  %v1230_v34 = vsel %vm7015_vm11, %v5503_v14, 0.0  ;;  %v3584_v6 = vpop.permute.xlu2 %3583  ;;  %v1367_v30 = vsel %vm566_vm0, %v7016_v59, 0.0  ;;  %v1368_v7 = vsel %vm567_vm14, %v7017_v22, 0.0  ;;  %v7028_v59 = vld [vmem:[#allocation111_spill] sm:$0xff] }
  0xfc   : > { %v3586_v36 = vunpack.i.h.bf16 %v3584_v6  ;;  %v3585_v8 = vunpack.i.l.bf16 %v3584_v6  ;;  %v3772_v60 = vpack.i.bf16 %v1230_v34, %v1229_v21  ;;  %vm7021_vm2 = vcmp.gt.f32.partialorder %v6920_v47, 0.5  ;;  %v7022_v6 = vld [vmem:[#allocation90_spill] sm:$0xff] }
  0xfd   : > { %3783 = vrot.lane.b32.xlu0 %v3782_v50, %s4032_s23  ;;  %v1360_v21 = vsel %vm7021_vm2, %v7020_v45, 0.0  ;;  %vm7023_vm0 = vcmp.gt.f32.partialorder %v4273_v51, 0.5  ;;  %v7025_v50 = vld [vmem:[#allocation34_spill] sm:$0xff]  ;;  %v3797_v58 = vpack.i.bf16 %v1368_v7, %v1367_v30  ;;  %v7029_v51 = vld [vmem:[#allocation109_spill] sm:$0xff]  ;;  %vm7035_vm7 = vcmp.gt.f32.partialorder %v6831_v20, 0.5 }
  0xfe   : > { %v5544_v2 = vsel %vm2705_vm6, %v5292_v35, %v3586_v36  ;;  %v5548_v19 = vsel %vm2705_vm6, %v5289_v32, %v3585_v8  ;;  %v7018_v32 = vld [vmem:[#allocation3_spill] sm:$0xff]  ;;  %v1363_v36 = vsel %vm7023_vm0, %v7022_v6, 0.0  ;;  %v7024_v8 = vld [vmem:[#allocation92_spill] sm:$0xff]  ;;  %vm7026_vm14 = vcmp.gt.f32.partialorder %v7025_v50, 0.5  ;;  %v7030_v50 = vld [vmem:[#allocation10_spill] sm:$0xff] }
  0xff   : > { %v3564_v11 = vpop.permute.xlu1 %3563  ;;  %v1359_v35 = vsel %vm7019_vm1, %v7018_v32, 0.0  ;;  %v3574_v34 = vpop.permute.xlu0 %3573  ;;  %vm2738_vm15 = vcmask 97280   ;;  %vm7053_vm9 = vcmp.gt.f32.partialorder %v6965_v44, 0.5  ;;  %vm7055_vm11 = vcmp.gt.f32.partialorder %v4447_v10, 0.5 }
 0x100   : > { %v3566_v56 = vunpack.i.h.bf16 %v3564_v11  ;;  %v3565_v16 = vunpack.i.l.bf16 %v3564_v11  ;;  %3773 = vrot.lane.b32.xlu1 %v3772_v60, %s4031_s22  ;;  %v1364_v11 = vsel %vm7026_vm14, %v7024_v8, 0.0  ;;  %v3576_v32 = vunpack.i.h.bf16 %v3574_v34 }
 0x101   : > { %3763 = vrot.lane.b32.xlu2 %v3762_v55, %s4031_s22  ;;  %v7027_v55 = vld [vmem:[#allocation112_spill] sm:$0xff]  ;;  %v3575_v14 = vunpack.i.l.bf16 %v3574_v34  ;;  %vm7067_vm0 = vcmp.lt.f32.partialorder %v6950_v53, 14.5  ;;  %vm7068_vm14 = vcmp.lt.f32.partialorder %v6952_v61, 14.5 }
 0x102   : > { %v5573_v60 = vsel %vm2705_vm6, %v7027_v55, %v3565_v16  ;;  %v5577_v22 = vsel %vm2705_vm6, %v7028_v59, %v3566_v56  ;;  %v5585_v8 = vsel %vm2705_vm6, %v7030_v50, %v3576_v32  ;;  %v3777_v16 = vpack.i.bf16 %v1360_v21, %v1359_v35  ;;  %v7033_v59 = vld [vmem:[#allocation99_spill] sm:$0xff] }
 0x103   : > { %v3599_v45 = vpop.permute.xlu2 %3598  ;;  %v5581_v6 = vsel %vm2705_vm6, %v7029_v51, %v3575_v14  ;;  %v3787_v55 = vpack.i.bf16 %v1364_v11, %v1363_v36  ;;  %v7032_v14 = vld [vmem:[#allocation98_spill] sm:$0xff]  ;;  %v1374_v35 = vsel %vm573_vm8, %v7033_v59, 0.0  ;;  %v7039_v36 = vld [vmem:[#allocation97_spill] sm:$0xff] }
 0x104   : > { %v3601_v28 = vunpack.i.h.bf16 %v3599_v45  ;;  %v3600_v27 = vunpack.i.l.bf16 %v3599_v45  ;;  %v1373_v50 = vsel %vm572_vm4, %v7032_v14, 0.0  ;;  %v7040_v11 = vld [vmem:[#allocation45_spill] sm:$0xff]  ;;  %v7042_v45 = vld [vmem:[#allocation96_spill] sm:$0xff]  ;;  %v7046_v59 = vld [vmem:[#allocation114_spill] sm:$0xff] }
 0x105   : > { %3798 = vrot.lane.b32.xlu0 %v3797_v58, %s4032_s23  ;;  %vm7041_vm4 = vcmp.gt.f32.partialorder %v7040_v11, 0.5  ;;  %v7047_v11 = vld [vmem:[#allocation113_spill] sm:$0xff] }
 0x106   : > { %v5589_v56 = vsel %vm2705_vm6, %v5388_v23, %v3601_v28  ;;  %v5593_v34 = vsel %vm2705_vm6, %v5385_v25, %v3600_v27  ;;  %v7034_v28 = vld [vmem:[#allocation87_spill] sm:$0xff]  ;;  %v7036_v23 = vld [vmem:[#allocation86_spill] sm:$0xff]  ;;  %v7037_v27 = vld [vmem:[#allocation41_spill] sm:$0xff]  ;;  %v1369_v32 = vsel %vm7041_vm4, %v7039_v36, 0.0  ;;  %vm7081_vm4 = vcmp.gt.f32.partialorder %v4672_v12, 0.5 }
 0x107   : > { %7031 = vst [vmem:[#allocation76_spill] sm:$0xff] %v5589_v56  ;;  %v3579_v30 = vpop.permute.xlu1 %3578  ;;  %v1365_v25 = vsel %vm7035_vm7, %v7034_v28, 0.0  ;;  %vm7038_vm5 = vcmp.gt.f32.partialorder %v7037_v27, 0.5  ;;  %v3589_v21 = vpop.permute.xlu0 %3588  ;;  %v3812_v27 = vpack.i.bf16 %v1374_v35, %v1373_v50  ;;  %v7052_v35 = vld [vmem:[#allocation94_spill] sm:$0xff] }
 0x108   : > { %v3581_v7 = vunpack.i.h.bf16 %v3579_v30  ;;  %v3580_v51 = vunpack.i.l.bf16 %v3579_v30  ;;  %3788 = vrot.lane.b32.xlu1 %v3787_v55, %s4032_s23  ;;  %v1366_v58 = vsel %vm7038_vm5, %v7036_v23, 0.0  ;;  %v7043_v30 = vld [vmem:[#allocation48_spill] sm:$0xff]  ;;  %v3591_v4 = vunpack.i.h.bf16 %v3589_v21 }
 0x109   : > { %3778 = vrot.lane.b32.xlu2 %v3777_v16, %s4032_s23  ;;  %vm7044_vm8 = vcmp.gt.f32.partialorder %v7043_v30, 0.5  ;;  %v7045_v16 = vld [vmem:[#allocation115_spill] sm:$0xff]  ;;  %v3590_v5 = vunpack.i.l.bf16 %v3589_v21  ;;  %vm7079_vm5 = vcmp.gt.f32.partialorder %v4668_v9, 0.5 }
 0x10a   : > { %v1370_v14 = vsel %vm7044_vm8, %v7042_v45, 0.0  ;;  %v5618_v55 = vsel %vm2705_vm6, %v7045_v16, %v3580_v51  ;;  %v5622_v28 = vsel %vm2705_vm6, %v7046_v59, %v3581_v7  ;;  %v7048_v30 = vld [vmem:[#allocation91_spill] sm:$0xff]  ;;  %v3792_v51 = vpack.i.bf16 %v1366_v58, %v1365_v25  ;;  %v7057_v58 = vld [vmem:[#allocation54_spill] sm:$0xff] }
 0x10b   : > { %v3614_v23 = vpop.permute.xlu2 %3613  ;;  %v5626_v36 = vsel %vm2705_vm6, %v7047_v11, %v3590_v5  ;;  %v5630_v45 = vsel %vm2705_vm6, %v7048_v30, %v3591_v4  ;;  %v3802_v16 = vpack.i.bf16 %v1370_v14, %v1369_v32  ;;  %v1371_v25 = vsel %vm7053_vm9, %v7052_v35, 0.0  ;;  %v7059_v11 = vld [vmem:[#allocation102_spill] sm:$0xff]  ;;  %v7060_v32 = vld [vmem:[#allocation56_spill] sm:$0xff]  ;;  %v7062_v59 = vld [vmem:[#allocation35_spill] sm:$0xff] }
 0x10c   : > { %v3616_v20 = vunpack.i.h.bf16 %v3614_v23  ;;  %v3615_v56 = vunpack.i.l.bf16 %v3614_v23  ;;  %7049 = vst [vmem:[#allocation17_spill] sm:$0xff] %v5630_v45  ;;  %vm7058_vm1 = vcmp.gt.f32.partialorder %v7057_v58, 0.5  ;;  %vm7061_vm2 = vcmp.gt.f32.partialorder %v7060_v32, 0.5 }
 0x10d   : > { %3813 = vrot.lane.b32.xlu0 %v3812_v27, %s4032_s23  ;;  %v1376_v30 = vsel %vm7061_vm2, %v7059_v11, 0.0  ;;  %vm7077_vm7 = vcmp.lt.f32.partialorder %v7060_v32, 14.5  ;;  %vm7084_vm8 = vcmp.lt.f32.partialorder %v4418_v41, 14.5  ;;  %vm7086_vm9 = vcmp.lt.f32.partialorder %v4420_v3, 14.5 }
 0x10e   : > { %v5634_v7 = vsel %vm2705_vm6, %v5476_v26, %v3616_v20  ;;  %v5638_v21 = vsel %vm2705_vm6, %v5472_v31, %v3615_v56  ;;  %v7054_v20 = vld [vmem:[#allocation95_spill] sm:$0xff]  ;;  %vm7091_vm2 = vcmp.gt.f32.partialorder %v6916_v39, 0.5 }
 0x10f   : > { %7050 = vst [vmem:[#allocation69_spill] sm:$0xff] %v5634_v7  ;;  %v3594_v50 = vpop.permute.xlu1 %3593  ;;  %v1372_v26 = vsel %vm7055_vm11, %v7054_v20, 0.0  ;;  %v3604_v31 = vpop.permute.xlu0 %3603  ;;  %v7056_v56 = vld [vmem:[#allocation103_spill] sm:$0xff]  ;;  %v7064_v7 = vld [vmem:[#allocation88_spill] sm:$0xff]  ;;  %vm7087_vm11 = vcmp.lt.f32.partialorder %v6916_v39, 14.5 }
 0x110   : > { %7051 = vst [vmem:[#allocation66_spill] sm:$0xff] %v5638_v21  ;;  %3803 = vrot.lane.b32.xlu1 %v3802_v16, %s4032_s23  ;;  %v3596_v5 = vunpack.i.h.bf16 %v3594_v50  ;;  %v3595_v4 = vunpack.i.l.bf16 %v3594_v50  ;;  %v1375_v27 = vsel %vm7058_vm1, %v7056_v56, 0.0  ;;  %v3606_v50 = vunpack.i.h.bf16 %v3604_v31  ;;  %v7065_v21 = vld [vmem:[#allocation62_spill] sm:$0xff] }
 0x111   : > { %3793 = vrot.lane.b32.xlu2 %v3792_v51, %s4032_s23  ;;  %v7063_v51 = vld [vmem:[#allocation89_spill] sm:$0xff]  ;;  %v3605_v35 = vunpack.i.l.bf16 %v3604_v31  ;;  %v3807_v44 = vpack.i.bf16 %v1372_v26, %v1371_v25  ;;  %v3817_v45 = vpack.i.bf16 %v1376_v30, %v1375_v27  ;;  %v7066_v25 = vld [vmem:[#allocation22_spill] sm:$0xff]  ;;  %vm7088_vm1 = vcmp.lt.f32.partialorder %v6911_v43, 14.5 }
 0x112   : > { %v5657_v23 = vsel %vm2705_vm6, %v7062_v59, %v3595_v4  ;;  %v5661_v16 = vsel %vm2705_vm6, %v7063_v51, %v3596_v5  ;;  %v5669_v11 = vsel %vm2705_vm6, %v7065_v21, %v3606_v50  ;;  %v1608_v21 = vsel %vm7068_vm14, %v7005_v38, 0.0 }
 0x113   : > { %v3629_v14 = vpop.permute.xlu2 %3628  ;;  %v5665_v56 = vsel %vm2705_vm6, %v7064_v7, %v3605_v35  ;;  %v1607_v7 = vsel %vm7067_vm0, %v7003_v15, 0.0  ;;  %vm7093_vm0 = vcmp.gt.f32.partialorder %v6911_v43, 0.5  ;;  %vm7096_vm14 = vcmp.lt.f32.partialorder %v4668_v9, 14.5 }
 0x114   : > { %v3631_v20 = vunpack.i.h.bf16 %v3629_v14  ;;  %v3630_v10 = vunpack.i.l.bf16 %v3629_v14  ;;  %v3842_v59 = vpack.i.bf16 %v1608_v21, %v1607_v7  ;;  %v7073_v7 = vld [vmem:[#allocation30_spill] sm:$0xff]  ;;  %v1600_v21 = vsel %vm7077_vm7, %v6981_v1, 0.0 }
 0x115   : > { %3828 = vrot.lane.b32.xlu0 %v7066_v25, %s4033_s24 }
 0x116   : > { %v5673_v4 = vsel %vm2738_vm15, %v5534_v33, %v3631_v20  ;;  %v5677_v5 = vsel %vm2738_vm15, %v5530_v29, %v3630_v10  ;;  %v7069_v33 = vld [vmem:[#allocation23_spill] sm:$0xff]  ;;  %v7070_v29 = vld [vmem:[#allocation20_spill] sm:$0xff] }
 0x117   : > { %v1383_v10 = vsel %vm582_vm13, %v7069_v33, 0.0  ;;  %v1384_v26 = vsel %vm583_vm12, %v7070_v29, 0.0  ;;  %v3619_v31 = vpop.permute.xlu0 %3618  ;;  %v3609_v30 = vpop.permute.xlu1 %3608  ;;  %vm7072_vm12 = vcmp.lt.f32.partialorder %v6919_v63, 14.5  ;;  %vm7074_vm13 = vcmp.lt.f32.partialorder %v6920_v47, 14.5 }
 0x118   : > { %3818 = vrot.lane.b32.xlu1 %v3817_v45, %s4032_s23  ;;  %v3621_v15 = vunpack.i.h.bf16 %v3619_v31  ;;  %v3620_v14 = vunpack.i.l.bf16 %v3619_v31  ;;  %v3611_v50 = vunpack.i.h.bf16 %v3609_v30  ;;  %v3822_v35 = vpack.i.bf16 %v1384_v26, %v1383_v10 }
 0x119   : > { %3808 = vrot.lane.b32.xlu2 %v3807_v44, %s4032_s23  ;;  %v3610_v44 = vunpack.i.l.bf16 %v3609_v30 }
 0x11a   : > { %v5697_v45 = vsel %vm2738_vm15, %v5410_v17, %v3620_v14  ;;  %v5701_v53 = vsel %vm2738_vm15, %v5406_v49, %v3621_v15  ;;  %v5717_v17 = vsel %vm2705_vm6, %v5413_v0, %v3611_v50  ;;  %v7071_v49 = vld [vmem:[#allocation31_spill] sm:$0xff]  ;;  %v7083_v50 = vld [vmem:[#allocation49_spill] sm:$0xff] }
 0x11b   : > { %v3644_v27 = vpop.permute.xlu2 %3643  ;;  %v5713_v25 = vsel %vm2705_vm6, %v5416_v40, %v3610_v44  ;;  %v7075_v40 = vld [vmem:[#allocation25_spill] sm:$0xff]  ;;  %vm7076_vm6 = vcmp.lt.f32.partialorder %v7057_v58, 14.5  ;;  %v7085_v44 = vld [vmem:[#allocation47_spill] sm:$0xff] }
 0x11c   : > { %v3646_v51 = vunpack.i.h.bf16 %v3644_v27  ;;  %v3645_v38 = vunpack.i.l.bf16 %v3644_v27  ;;  %v1599_v0 = vsel %vm7076_vm6, %v6979_v37, 0.0 }
 0x11d   : > { %3843 = vrot.lane.b32.xlu0 %v3842_v59, %s4034_s25  ;;  %v3837_v14 = vpack.i.bf16 %v1600_v21, %v1599_v0 }
 0x11e   : > { %v5705_v61 = vsel %vm2738_vm15, %v5577_v22, %v3646_v51  ;;  %v5709_v20 = vsel %vm2738_vm15, %v5573_v60, %v3645_v38  ;;  %v1583_v22 = vsel %vm7072_vm12, %v7071_v49, 0.0  ;;  %v1584_v60 = vsel %vm7074_vm13, %v7073_v7, 0.0 }
 0x11f   : > { %v3634_v33 = vpop.permute.xlu0 %3633  ;;  %v3624_v10 = vpop.permute.xlu1 %3623  ;;  %v3857_v47 = vpack.i.bf16 %v1584_v60, %v1583_v22  ;;  %vm7098_vm12 = vcmp.lt.f32.partialorder %v4672_v12, 14.5  ;;  %vm2771_vm13 = vcmask 121856  }
 0x120   : > { %3833 = vrot.lane.b32.xlu1 %v7075_v40, %s4033_s24  ;;  %v3636_v29 = vunpack.i.h.bf16 %v3634_v33  ;;  %v3635_v26 = vunpack.i.l.bf16 %v3634_v33  ;;  %v3626_v30 = vunpack.i.h.bf16 %v3624_v10  ;;  %v3625_v15 = vunpack.i.l.bf16 %v3624_v10 }
 0x121   : > { %3823 = vrot.lane.b32.xlu2 %v3822_v35, %s4032_s23  ;;  %v1592_v35 = vsel %vm7086_vm9, %v7085_v44, 0.0 }
 0x122   : > { %v5737_v59 = vsel %vm2738_vm15, %v5445_v54, %v3635_v26  ;;  %v5741_v37 = vsel %vm2738_vm15, %v5441_v46, %v3636_v29  ;;  %v5753_v32 = vsel %vm2738_vm15, %v5449_v42, %v3625_v15  ;;  %v5757_v54 = vsel %vm2738_vm15, %v5453_v13, %v3626_v30  ;;  %v7078_v46 = vld [vmem:[#allocation26_spill] sm:$0xff] }
 0x123   : > { %v3659_v63 = vpop.permute.xlu2 %3658  ;;  %v1385_v51 = vsel %vm7079_vm5, %v7078_v46, 0.0  ;;  %v1591_v13 = vsel %vm7084_vm8, %v7083_v50, 0.0 }
 0x124   : > { %v3661_v31 = vunpack.i.h.bf16 %v3659_v63  ;;  %v3660_v27 = vunpack.i.l.bf16 %v3659_v63  ;;  %v3862_v29 = vpack.i.bf16 %v1592_v35, %v1591_v13  ;;  %v7095_v35 = vld [vmem:[#allocation82_spill] sm:$0xff] }
 0x125   : > { %3858 = vrot.lane.b32.xlu0 %v3857_v47, %s4034_s25 }
 0x126   : > { %v5745_v1 = vsel %vm2738_vm15, %v5622_v28, %v3661_v31  ;;  %v5749_v58 = vsel %vm2738_vm15, %v5618_v55, %v3660_v27  ;;  %v7080_v28 = vld [vmem:[#allocation27_spill] sm:$0xff]  ;;  %v7082_v55 = vld [vmem:[#allocation8_spill] sm:$0xff]  ;;  %v7092_v31 = vld [vmem:[#allocation101_spill] sm:$0xff] }
 0x127   : > { %v1386_v38 = vsel %vm7081_vm4, %v7080_v28, 0.0  ;;  %v3649_v42 = vpop.permute.xlu0 %3648  ;;  %v3639_v22 = vpop.permute.xlu1 %3638  ;;  %v1378_v27 = vsel %vm7093_vm0, %v7092_v31, 0.0  ;;  %v7102_v31 = vld [vmem:[#allocation19_spill] sm:$0xff] }
 0x128   : > { %3848 = vrot.lane.b32.xlu1 %v7082_v55, %s4033_s24  ;;  %v3651_v7 = vunpack.i.h.bf16 %v3649_v42  ;;  %v3650_v60 = vunpack.i.l.bf16 %v3649_v42  ;;  %v3872_v40 = vpack.i.bf16 %v1386_v38, %v1385_v51  ;;  %v3641_v33 = vunpack.i.h.bf16 %v3639_v22 }
 0x129   : > { %3838 = vrot.lane.b32.xlu2 %v3837_v14, %s4034_s25  ;;  %v3640_v63 = vunpack.i.l.bf16 %v3639_v22 }
 0x12a   : > { %v5777_v10 = vsel %vm2738_vm15, %v5491_v62, %v3650_v60  ;;  %v5781_v41 = vsel %vm2738_vm15, %v5487_v57, %v3651_v7  ;;  %v5797_v62 = vsel %vm2738_vm15, %v5520_v48, %v3641_v33  ;;  %v1601_v57 = vsel %vm7087_vm11, %v6983_v24, 0.0 }
 0x12b   : > { %v3674_v49 = vpop.permute.xlu2 %3673  ;;  %v5793_v47 = vsel %vm2738_vm15, %v5516_v52, %v3640_v63  ;;  %v7090_v52 = vld [vmem:[#allocation100_spill] sm:$0xff] }
 0x12c   : > { %v3676_v0 = vunpack.i.h.bf16 %v3674_v49  ;;  %v3675_v21 = vunpack.i.l.bf16 %v3674_v49  ;;  %v1377_v48 = vsel %vm7091_vm2, %v7090_v52, 0.0  ;;  %v7097_v49 = vld [vmem:[#allocation84_spill] sm:$0xff]  ;;  %v7100_v52 = vld [vmem:[#allocation17_spill] sm:$0xff] }
 0x12d   : > { %3873 = vrot.lane.b32.xlu0 %v3872_v40, %s4032_s23  ;;  %v3867_v42 = vpack.i.bf16 %v1378_v27, %v1377_v48  ;;  %v7101_v48 = vld [vmem:[#allocation16_spill] sm:$0xff]  ;;  %v7103_v27 = vld [vmem:[#allocation71_spill] sm:$0xff] }
 0x12e   : > { %v5785_v3 = vsel %vm2738_vm15, %v5661_v16, %v3676_v0  ;;  %v5789_v26 = vsel %vm2738_vm15, %v5657_v23, %v3675_v21  ;;  %v1602_v16 = vsel %vm7088_vm1, %v6985_v18, 0.0  ;;  %v7089_v23 = vld [vmem:[#allocation14_spill] sm:$0xff]  ;;  %vm7104_vm6 = vcmp.gt.f32.partialorder %v7103_v27, 0.5 }
 0x12f   : > { %v3664_v30 = vpop.permute.xlu0 %3663  ;;  %v3654_v24 = vpop.permute.xlu1 %3653  ;;  %v3887_v51 = vpack.i.bf16 %v1602_v16, %v1601_v57 }
 0x130   : > { %3863 = vrot.lane.b32.xlu1 %v3862_v29, %s4034_s25  ;;  %v3666_v14 = vunpack.i.h.bf16 %v3664_v30  ;;  %v3665_v46 = vunpack.i.l.bf16 %v3664_v30  ;;  %v3656_v38 = vunpack.i.h.bf16 %v3654_v24  ;;  %v3655_v55 = vunpack.i.l.bf16 %v3654_v24  ;;  %v7099_v29 = vld [vmem:[#allocation76_spill] sm:$0xff]  ;;  %v7108_v24 = vld [vmem:[#allocation29_spill] sm:$0xff] }
 0x131   : > { %3853 = vrot.lane.b32.xlu2 %v7089_v23, %s4033_s24  ;;  %v7105_v30 = vld [vmem:[#allocation104_spill] sm:$0xff] }
 0x132   : > { %v5817_v50 = vsel %vm2738_vm15, %v5548_v19, %v3665_v46  ;;  %v5821_v39 = vsel %vm2738_vm15, %v5544_v2, %v3666_v14  ;;  %v5833_v44 = vsel %vm2738_vm15, %v5581_v6, %v3655_v55  ;;  %v5837_v19 = vsel %vm2738_vm15, %v5585_v8, %v3656_v38  ;;  %v7094_v2 = vld [vmem:[#allocation21_spill] sm:$0xff]  ;;  %v7109_v14 = vld [vmem:[#allocation39_spill] sm:$0xff] }
 0x133   : > { %v3689_v15 = vpop.permute.xlu2 %3688  ;;  %v1610_v6 = vsel %vm7098_vm12, %v7097_v49, 0.0  ;;  %v7110_v46 = vld [vmem:[#allocation37_spill] sm:$0xff] }
 0x134   : > { %v3691_v18 = vunpack.i.h.bf16 %v3689_v15  ;;  %v3690_v28 = vunpack.i.l.bf16 %v3689_v15  ;;  %v7106_v15 = vld [vmem:[#allocation72_spill] sm:$0xff]  ;;  %vm7111_vm5 = vcmp.lt.f32.partialorder %v7110_v46, 14.5 }
 0x135   : > { %3888 = vrot.lane.b32.xlu0 %v3887_v51, %s4034_s25  ;;  %vm7107_vm7 = vcmp.gt.f32.partialorder %v7106_v15, 0.5  ;;  %v1585_v51 = vsel %vm7111_vm5, %v7109_v14, 0.0  ;;  %v7127_v14 = vld [vmem:[#allocation80_spill] sm:$0xff] }
 0x136   : > { %v5825_v43 = vsel %vm2738_vm15, %v5717_v17, %v3691_v18  ;;  %v5829_v13 = vsel %vm2738_vm15, %v5713_v25, %v3690_v28  ;;  %v1609_v25 = vsel %vm7096_vm14, %v7095_v35, 0.0  ;;  %v7112_v18 = vld [vmem:[#allocation36_spill] sm:$0xff]  ;;  %v7113_v28 = vld [vmem:[#allocation38_spill] sm:$0xff]  ;;  %vm7144_vm2 = vcmp.lt.f32.partialorder %v7127_v14, 14.5 }
 0x137   : > { %v3679_v17 = vpop.permute.xlu0 %3678  ;;  %v3892_v57 = vpack.i.bf16 %v1610_v6, %v1609_v25  ;;  %vm7114_vm4 = vcmp.lt.f32.partialorder %v7113_v28, 14.5 }
 0x138   : > { %3878 = vrot.lane.b32.xlu1 %v7094_v2, %s4033_s24  ;;  %v3681_v7 = vunpack.i.h.bf16 %v3679_v17  ;;  %v3680_v60 = vunpack.i.l.bf16 %v3679_v17  ;;  %v1586_v38 = vsel %vm7114_vm4, %v7112_v18, 0.0 }
 0x139   : > { %3868 = vrot.lane.b32.xlu2 %v3867_v42, %s4032_s23 }
 0x13a   : > { %v3669_v8 = vpop.permute.xlu1 %3668  ;;  %v5851_v63 = vsel %vm2738_vm15, %v5593_v34, %v3680_v60  ;;  %v5855_v9 = vsel %vm2738_vm15, %v7099_v29, %v3681_v7  ;;  %v7116_v60 = vld [vmem:[#allocation69_spill] sm:$0xff] }
 0x13b   : > { %v3704_v22 = vpop.permute.xlu2 %3703  ;;  %v3671_v21 = vunpack.i.h.bf16 %v3669_v8  ;;  %v3670_v33 = vunpack.i.l.bf16 %v3669_v8  ;;  %v7115_v8 = vld [vmem:[#allocation66_spill] sm:$0xff] }
 0x13c   : > { %v3706_v40 = vunpack.i.h.bf16 %v3704_v22  ;;  %v3705_v0 = vunpack.i.l.bf16 %v3704_v22 }
 0x13d   : > { %v5867_v23 = vsel %vm2738_vm15, %v5626_v36, %v3670_v33  ;;  %v5871_v34 = vsel %vm2738_vm15, %v7100_v52, %v3671_v21  ;;  %3903 = vrot.lane.b32.xlu0 %v7101_v48, %s4033_s24  ;;  %v7117_v52 = vld [vmem:[#allocation13_spill] sm:$0xff] }
 0x13e   : > { %v5859_v12 = vsel %vm2771_vm13, %v5753_v32, %v3705_v0  ;;  %v5863_v16 = vsel %vm2771_vm13, %v5757_v54, %v3706_v40  ;;  %v1379_v32 = vsel %vm7104_vm6, %v7102_v31, 0.0  ;;  %v1380_v54 = vsel %vm7107_vm7, %v7105_v30, 0.0  ;;  %v7119_v48 = vld [vmem:[#allocation45_spill] sm:$0xff]  ;;  %v7121_v31 = vld [vmem:[#allocation55_spill] sm:$0xff] }
 0x13f   : > { %v3694_v36 = vpop.permute.xlu0 %3693  ;;  %v3917_v35 = vpack.i.bf16 %v1380_v54, %v1379_v32  ;;  %v3907_v0 = vpack.i.bf16 %v1586_v38, %v1585_v51  ;;  %vm7120_vm8 = vcmp.lt.f32.partialorder %v7119_v48, 14.5  ;;  %v7122_v32 = vld [vmem:[#allocation48_spill] sm:$0xff]  ;;  %vm2804_vm7 = vcmask 146432  }
 0x140   : > { %3893 = vrot.lane.b32.xlu1 %v3892_v57, %s4034_s25  ;;  %v3696_v2 = vunpack.i.h.bf16 %v3694_v36  ;;  %v3695_v17 = vunpack.i.l.bf16 %v3694_v36  ;;  %vm7123_vm9 = vcmp.lt.f32.partialorder %v7122_v32, 14.5  ;;  %v7124_v54 = vld [vmem:[#allocation108_spill] sm:$0xff]  ;;  %v7126_v36 = vld [vmem:[#allocation107_spill] sm:$0xff] }
 0x141   : > { %3883 = vrot.lane.b32.xlu2 %v7108_v24, %s4033_s24  ;;  %v7125_v24 = vld [vmem:[#allocation79_spill] sm:$0xff]  ;;  %v1388_v46 = vsel %vm587_vm3, %v7126_v36, 0.0  ;;  %vm7130_vm3 = vcmp.lt.f32.partialorder %v7103_v27, 14.5 }
 0x142   : > { %v3684_v42 = vpop.permute.xlu1 %3683  ;;  %v5892_v7 = vsel %vm2738_vm15, %v7115_v8, %v3695_v17  ;;  %v5896_v40 = vsel %vm2738_vm15, %v7116_v60, %v3696_v2  ;;  %vm7142_vm1 = vcmp.lt.f32.partialorder %v7125_v24, 14.5 }
 0x143   : > { %v3719_v55 = vpop.permute.xlu2 %3718  ;;  %v3686_v6 = vunpack.i.h.bf16 %v3684_v42  ;;  %v3685_v22 = vunpack.i.l.bf16 %v3684_v42 }
 0x144   : > { %v3721_v25 = vunpack.i.h.bf16 %v3719_v55  ;;  %v3720_v49 = vunpack.i.l.bf16 %v3719_v55 }
 0x145   : > { %v5908_v29 = vsel %vm2738_vm15, %v5665_v56, %v3685_v22  ;;  %v5912_v57 = vsel %vm2738_vm15, %v5669_v11, %v3686_v6  ;;  %3918 = vrot.lane.b32.xlu0 %v3917_v35, %s4032_s23  ;;  %v1594_v56 = vsel %vm7123_vm9, %v7121_v31, 0.0  ;;  %v1387_v11 = vsel %vm586_vm10, %v7124_v54, 0.0 }
 0x146   : > { %v5900_v21 = vsel %vm2771_vm13, %v5797_v62, %v3721_v25  ;;  %v5904_v33 = vsel %vm2771_vm13, %v5793_v47, %v3720_v49  ;;  %v7118_v62 = vld [vmem:[#allocation57_spill] sm:$0xff]  ;;  %v3922_v6 = vpack.i.bf16 %v1388_v46, %v1387_v11  ;;  %vm7132_vm10 = vcmp.lt.f32.partialorder %v7106_v15, 14.5 }
 0x147   : > { %v1593_v47 = vsel %vm7120_vm8, %v7118_v62, 0.0  ;;  %v3709_v30 = vpop.permute.xlu0 %3708  ;;  %vm2987_vm9 = vcmask 1044480  }
 0x148   : > { %3908 = vrot.lane.b32.xlu1 %v3907_v0, %s4034_s25  ;;  %v3711_v18 = vunpack.i.h.bf16 %v3709_v30  ;;  %v3710_v28 = vunpack.i.l.bf16 %v3709_v30  ;;  %v3912_v35 = vpack.i.bf16 %v1594_v56, %v1593_v47  ;;  %v7129_v0 = vld [vmem:[#allocation70_spill] sm:$0xff] }
 0x149   : > { %3898 = vrot.lane.b32.xlu2 %v7117_v52, %s4033_s24  ;;  %v7131_v52 = vld [vmem:[#allocation73_spill] sm:$0xff] }
 0x14a   : > { %v3699_v38 = vpop.permute.xlu1 %3698  ;;  %v5932_v25 = vsel %vm2771_vm13, %v5677_v5, %v3710_v28  ;;  %v5936_v49 = vsel %vm2771_vm13, %v5673_v4, %v3711_v18  ;;  %v7128_v4 = vld [vmem:[#allocation63_spill] sm:$0xff]  ;;  %v7135_v18 = vld [vmem:[#allocation50_spill] sm:$0xff] }
 0x14b   : > { %v3734_v51 = vpop.permute.xlu2 %3733  ;;  %v3701_v2 = vunpack.i.h.bf16 %v3699_v38  ;;  %v3700_v17 = vunpack.i.l.bf16 %v3699_v38  ;;  %vm7136_vm15 = vcmp.lt.f32.partialorder %v7135_v18, 14.5  ;;  %v7137_v38 = vld [vmem:[#allocation53_spill] sm:$0xff] }
 0x14c   : > { %v3736_v55 = vunpack.i.h.bf16 %v3734_v51  ;;  %v3735_v42 = vunpack.i.l.bf16 %v3734_v51  ;;  %v7133_v51 = vld [vmem:[#allocation7_spill] sm:$0xff] }
 0x14d   : > { %v5948_v60 = vsel %vm2771_vm13, %v5697_v45, %v3700_v17  ;;  %v5952_v5 = vsel %vm2771_vm13, %v5701_v53, %v3701_v2  ;;  %3933 = vrot.lane.b32.xlu0 %v7128_v4, %s4033_s24  ;;  %v1604_v45 = vsel %vm7132_vm10, %v7131_v52, 0.0  ;;  %vm2988_vm10 = vcmask 1045504  }
 0x14e   : > { %v5940_v22 = vsel %vm2771_vm13, %v5837_v19, %v3736_v55  ;;  %v5944_v8 = vsel %vm2771_vm13, %v5833_v44, %v3735_v42  ;;  %v1603_v44 = vsel %vm7130_vm3, %v7129_v0, 0.0  ;;  %v7143_v42 = vld [vmem:[#allocation75_spill] sm:$0xff] }
 0x14f   : > { %v3724_v19 = vpop.permute.xlu0 %3723  ;;  %v3937_v11 = vpack.i.bf16 %v1604_v45, %v1603_v44  ;;  %v1612_v2 = vsel %vm7144_vm2, %v7143_v42, 0.0  ;;  %vm2837_vm2 = vcmask 171008  }
 0x150   : > { %3923 = vrot.lane.b32.xlu1 %v3922_v6, %s4032_s23  ;;  %v3726_v48 = vunpack.i.h.bf16 %v3724_v19  ;;  %v3725_v53 = vunpack.i.l.bf16 %v3724_v19 }
 0x151   : > { %3913 = vrot.lane.b32.xlu2 %v3912_v35, %s4034_s25 }
 0x152   : > { %v3714_v47 = vpop.permute.xlu1 %3713  ;;  %v5966_v54 = vsel %vm2771_vm13, %v5709_v20, %v3725_v53  ;;  %v5970_v27 = vsel %vm2771_vm13, %v5705_v61, %v3726_v48  ;;  %v7134_v61 = vld [vmem:[#allocation52_spill] sm:$0xff]  ;;  %v7145_v53 = vld [vmem:[#allocation15_spill] sm:$0xff] }
 0x153   : > { %v3749_v62 = vpop.permute.xlu2 %3748  ;;  %v3716_v56 = vunpack.i.h.bf16 %v3714_v47  ;;  %v3715_v30 = vunpack.i.l.bf16 %v3714_v47  ;;  %v1595_v28 = vsel %vm7136_vm15, %v7134_v61, 0.0  ;;  %v7147_v47 = vld [vmem:[#allocation33_spill] sm:$0xff]  ;;  %v7156_v61 = vld [vmem:[#allocation68_spill] sm:$0xff] }
 0x154   : > { %v3751_v31 = vunpack.i.h.bf16 %v3749_v62  ;;  %v3750_v32 = vunpack.i.l.bf16 %v3749_v62  ;;  %vm7148_vm0 = vcmp.lt.f32.partialorder %v7147_v47, 14.5  ;;  %vm7157_vm6 = vcmp.gt.f32.partialorder %v7156_v61, 0.5 }
 0x155   : > { %v2778_v46 = vsel %vm2771_vm13, %v5737_v59, %v3715_v30  ;;  %v2779_v20 = vsel %vm2771_vm13, %v5741_v37, %v3716_v56  ;;  %3948 = vrot.lane.b32.xlu0 %v7133_v51, %s4033_s24  ;;  %v7141_v59 = vld [vmem:[#allocation32_spill] sm:$0xff]  ;;  %v7152_v30 = vld [vmem:[#allocation106_spill] sm:$0xff]  ;;  %v7155_v51 = vld [vmem:[#allocation105_spill] sm:$0xff]  ;;  %vm7162_vm4 = vcmp.lt.f32.partialorder %v7156_v61, 14.5 }
 0x156   : > { %v5974_v15 = vsel %vm2771_vm13, %v5871_v34, %v3751_v31  ;;  %v5978_v36 = vsel %vm2771_vm13, %v5867_v23, %v3750_v32  ;;  %v7138_v34 = vld [vmem:[#allocation51_spill] sm:$0xff]  ;;  %v7140_v23 = vld [vmem:[#allocation24_spill] sm:$0xff]  ;;  %v1611_v37 = vsel %vm7142_vm1, %v7141_v59, 0.0  ;;  %v7150_v32 = vld [vmem:[#allocation34_spill] sm:$0xff]  ;;  %v1382_v18 = vsel %vm7157_vm6, %v7155_v51, 0.0 }
 0x157   : > { %vm7139_vm11 = vcmp.lt.f32.partialorder %v7138_v34, 14.5  ;;  %v6001_v17 = vpop.permute.xlu0 %3738  ;;  %v3942_v45 = vpack.i.bf16 %v1612_v2, %v1611_v37  ;;  %v7149_v31 = vld [vmem:[#allocation44_spill] sm:$0xff]  ;;  %vm7151_vm14 = vcmp.lt.f32.partialorder %v7150_v32, 14.5  ;;  %v7161_v32 = vld [vmem:[#allocation78_spill] sm:$0xff]  ;;  %vm2870_vm1 = vcmask 195584  }
 0x158   : > { %v1596_v55 = vsel %vm7139_vm11, %v7137_v38, 0.0  ;;  %3938 = vrot.lane.b32.xlu1 %v3937_v11, %s4034_s25  ;;  %v7153_v11 = vld [vmem:[#allocation67_spill] sm:$0xff] }
 0x159   : > { %3928 = vrot.lane.b32.xlu2 %v7140_v23, %s4033_s24  ;;  %v3962_v4 = vpack.i.bf16 %v1596_v55, %v1595_v28  ;;  %vm7154_vm12 = vcmp.gt.f32.partialorder %v7153_v11, 0.5  ;;  %vm7160_vm5 = vcmp.lt.f32.partialorder %v7153_v11, 14.5  ;;  %v7167_v11 = vld [vmem:[#allocation42_spill] sm:$0xff] }
 0x15a   : > { %v3729_v6 = vpop.permute.xlu1 %3728 }
 0x15b   : > { %v3764_v35 = vpop.permute.xlu2 %3763  ;;  %v3731_v44 = vunpack.i.h.bf16 %v3729_v6  ;;  %v3730_v52 = vunpack.i.l.bf16 %v3729_v6 }
 0x15c   : > { %v3766_v19 = vunpack.i.h.bf16 %v3764_v35  ;;  %v3765_v0 = vunpack.i.l.bf16 %v3764_v35 }
 0x15d   : > { %v6013_v14 = vsel %vm2771_vm13, %v5777_v10, %v3730_v52  ;;  %v6017_v48 = vsel %vm2771_vm13, %v5781_v41, %v3731_v44  ;;  %3963 = vrot.lane.b32.xlu0 %v3962_v4, %s4034_s25  ;;  %v1588_v10 = vsel %vm7151_vm14, %v7149_v31, 0.0  ;;  %v1381_v41 = vsel %vm7154_vm12, %v7152_v30, 0.0 }
 0x15e   : > { %v6005_v62 = vsel %vm2771_vm13, %v5912_v57, %v3766_v19  ;;  %v6009_v24 = vsel %vm2771_vm13, %v5908_v29, %v3765_v0  ;;  %v7146_v57 = vld [vmem:[#allocation46_spill] sm:$0xff]  ;;  %v3967_v35 = vpack.i.bf16 %v1382_v18, %v1381_v41  ;;  %v7158_v19 = vld [vmem:[#allocation28_spill] sm:$0xff]  ;;  %v7168_v41 = vld [vmem:[#allocation41_spill] sm:$0xff]  ;;  %v4035_v18 = vmov 65535  }
 0x15f   : > { %v1587_v29 = vsel %vm7148_vm0, %v7146_v57, 0.0  ;;  %v3754_v56 = vpop.permute.xlu0 %3753  ;;  %v7159_v57 = vld [vmem:[#allocation81_spill] sm:$0xff]  ;;  %vm7169_vm3 = vcmp.lt.f32.partialorder %v7168_v41, 14.5  ;;  %vm2938_vm0 = vcmask 220160  }
 0x160   : > { %3953 = vrot.lane.b32.xlu1 %v7145_v53, %s4033_s24  ;;  %v3756_v38 = vunpack.i.h.bf16 %v3754_v56  ;;  %v3755_v34 = vunpack.i.l.bf16 %v3754_v56  ;;  %v3957_v37 = vpack.i.bf16 %v1588_v10, %v1587_v29  ;;  %v1605_v47 = vsel %vm7160_vm5, %v7159_v57, 0.0  ;;  %v7164_v56 = vld [vmem:[#allocation40_spill] sm:$0xff] }
 0x161   : > { %3943 = vrot.lane.b32.xlu2 %v3942_v45, %s4034_s25  ;;  %v1606_v10 = vsel %vm7162_vm4, %v7161_v32, 0.0  ;;  %vm7165_vm8 = vcmp.lt.f32.partialorder %v7164_v56, 14.5  ;;  %v1590_v51 = vsel %vm7169_vm3, %v7167_v11, 0.0  ;;  %v7172_v56 = vld [vmem:[#allocation59_spill] sm:$0xff] }
 0x162   : > { %v3744_v55 = vpop.permute.xlu1 %3743  ;;  %v6039_v42 = vsel %vm2771_vm13, %v5789_v26, %v3755_v34  ;;  %v6043_v2 = vsel %vm2771_vm13, %v5785_v3, %v3756_v38  ;;  %v2989_v38 = vsel %vm2987_vm9, 4294967295, %v4035_v18  ;;  %vm7173_vm15 = vcmp.lt.f32.partialorder %v7172_v56, 14.5 }
 0x163   : > { %v6035_v28 = vpop.permute.xlu2 %3778  ;;  %v3746_v23 = vunpack.i.h.bf16 %v3744_v55  ;;  %v3745_v59 = vunpack.i.l.bf16 %v3744_v55  ;;  %v2990_v34 = vsel %vm2988_vm10, %v2989_v38, 0 }
 0x165   : > { %v6047_v6 = vsel %vm2771_vm13, %v5817_v50, %v3745_v59  ;;  %v6051_v4 = vsel %vm2771_vm13, %v5821_v39, %v3746_v23  ;;  %3978 = vrot.lane.b32.xlu0 %v7158_v19, %s4033_s24 }
 0x167   : > { %v3769_v26 = vpop.permute.xlu0 %3768 }
 0x168   : > { %3968 = vrot.lane.b32.xlu1 %v3967_v35, %s4032_s23  ;;  %v3771_v0 = vunpack.i.h.bf16 %v3769_v26  ;;  %v3770_v44 = vunpack.i.l.bf16 %v3769_v26 }
 0x169   : > { %3958 = vrot.lane.b32.xlu2 %v3957_v37, %s4034_s25  ;;  %v3987_v37 = vpack.i.bf16 %v1606_v10, %v1605_v47 }
 0x16a   : > { %v6057_v52 = vpop.permute.xlu1 %3758  ;;  %v6061_v39 = vsel %vm2771_vm13, %v5829_v13, %v3770_v44  ;;  %v6065_v53 = vsel %vm2771_vm13, %v5825_v43, %v3771_v0  ;;  %v7163_v13 = vld [vmem:[#allocation43_spill] sm:$0xff] }
 0x16b   : > { %v3794_v3 = vpop.permute.xlu2 %3793  ;;  %v1589_v30 = vsel %vm7165_vm8, %v7163_v13, 0.0  ;;  %v3250_v43 = vld [vmem:[%s6437_s1 + $0x8] sm:$0xf] }
 0x16c   : > { %v3796_v50 = vunpack.i.h.bf16 %v3794_v3  ;;  %v3795_v45 = vunpack.i.l.bf16 %v3794_v3  ;;  %v4007_v3 = vpack.i.bf16 %v1590_v51, %v1589_v30 }
 0x16e   : > { %v6071_v29 = vsel %vm2804_vm7, %v2778_v46, %v3795_v45  ;;  %v6074_v31 = vsel %vm2804_vm7, %v2779_v20, %v3796_v50  ;;  %v3273_v46 = vld [vmem:[%s6437_s1 + $0x8] sm:$0x30]  ;;  %v7166_v20 = vmov 0.0  }
 0x16f   : > { %3993 = vrot.lane.b32.xlu0 %v7166_v20, %s4034_s25  ;;  %v3251_v61 = vor.u32 %v3273_v46, %v3250_v43  ;;  %v3784_v55 = vpop.permute.xlu0 %3783  ;;  %v7175_v43 = vld [vmem:[#allocation60_spill] sm:$0xff] }
 0x170   : > { %3983 = vrot.lane.b32.xlu1 %v7166_v20, %s4033_s24  ;;  %v3786_v35 = vunpack.i.h.bf16 %v3784_v55  ;;  %v3785_v19 = vunpack.i.l.bf16 %v3784_v55  ;;  %vm7176_vm11 = vcmp.lt.f32.partialorder %v7175_v43, 14.5 }
 0x171   : > { %3973 = vrot.lane.b32.xlu2 %v7166_v20, %s4032_s23  ;;  %v2992_v23 = vand.u32 %v3251_v61, %v2990_v34  ;;  %v7177_v34 = vld [vmem:[#allocation18_spill] sm:$0xff] }
 0x172   : > { %v3774_v26 = vpop.permute.xlu1 %3773  ;;  %v6099_v57 = vsel %vm2804_vm7, %v5859_v12, %v3785_v19  ;;  %v6103_v32 = vsel %vm2804_vm7, %v5863_v16, %v3786_v35  ;;  %v3272_v16 = vld [vmem:[%s6437_s1] sm:$0xff] }
 0x173   : > { %v3809_v59 = vpop.permute.xlu2 %3808  ;;  %v3776_v50 = vunpack.i.h.bf16 %v3774_v26  ;;  %v3775_v45 = vunpack.i.l.bf16 %v3774_v26  ;;  %3354 = vmatpush.bf16.msra.mxu2 %v2992_v23  ;;  %3355 = vmatpush.bf16.msra.mxu3 %v2992_v23  ;;  %v3740_v26 = vunpack.i.l.bf16 %v6001_v17 }
 0x174   : > { %v3811_v0 = vunpack.i.h.bf16 %v3809_v59  ;;  %v3810_v44 = vunpack.i.l.bf16 %v3809_v59  ;;  %3000 = vmatpush.bf16.msra.mxu0 %v2992_v23  ;;  %3353 = vmatpush.bf16.msra.mxu1 %v2992_v23 }
 0x175   : > { %v6115_v13 = vsel %vm2771_vm13, %v5892_v7, %v3775_v45  ;;  %v6119_v12 = vsel %vm2771_vm13, %v5896_v40, %v3776_v50  ;;  %v7171_v7 = vld [vmem:[#allocation58_spill] sm:$0xff]  ;;  %v7174_v40 = vld [vmem:[#allocation61_spill] sm:$0xff] }
 0x176   : > { %v6107_v47 = vsel %vm2804_vm7, %v6013_v14, %v3810_v44  ;;  %v6111_v10 = vsel %vm2804_vm7, %v6017_v48, %v3811_v0  ;;  %v7170_v14 = vld [vmem:[#allocation12_spill] sm:$0xff]  ;;  %v1597_v30 = vsel %vm7173_vm15, %v7171_v7, 0.0  ;;  %v1598_v46 = vsel %vm7176_vm11, %v7174_v40, 0.0 }
 0x177   : > { %4008 = vrot.lane.b32.xlu0 %v4007_v3, %s4034_s25  ;;  %3357 = vmatpush.bf16.msra.mxu2 %v3272_v16  ;;  %v6128_v48 = vpop.permute.xlu0 %3798  ;;  %v4012_v61 = vpack.i.bf16 %v1598_v46, %v1597_v30  ;;  %v3761_v40 = vunpack.i.h.bf16 %v6057_v52 }
 0x178   : > { %3998 = vrot.lane.b32.xlu1 %v7170_v14, %s4033_s24  ;;  %3358 = vmatpush.bf16.msra.mxu3 %v3272_v16 }
 0x179   : > { %3988 = vrot.lane.b32.xlu2 %v3987_v37, %s4034_s25  ;;  %3001 = vmatpush.bf16.msra.mxu0 %v3272_v16 }
 0x17a   : > { %v3789_v11 = vpop.permute.xlu1 %3788  ;;  %3356 = vmatpush.bf16.msra.mxu1 %v3272_v16 }
 0x17b   : > { %v3824_v20 = vpop.permute.xlu2 %3823  ;;  %v3791_v41 = vunpack.i.h.bf16 %v3789_v11  ;;  %v3790_v51 = vunpack.i.l.bf16 %v3789_v11  ;;  %v3760_v11 = vunpack.i.l.bf16 %v6057_v52  ;;  %v2797_v52 = vsel %vm2771_vm13, %v5855_v9, %v3761_v40 }
 0x17d   : > { %v6138_v18 = vsel %vm2804_vm7, %v5932_v25, %v3790_v51  ;;  %v6142_v38 = vsel %vm2804_vm7, %v5936_v49, %v3791_v41  ;;  %v3741_v49 = vunpack.i.h.bf16 %v6001_v17  ;;  %v3825_v51 = vunpack.i.l.bf16 %v3824_v20 }
 0x17f   : > { %v3814_v55 = vpop.permute.xlu0 %3813 }
 0x180   : > { %4013 = vrot.lane.b32.xlu1 %v4012_v61, %s4034_s25  ;;  %v3816_v59 = vunpack.i.h.bf16 %v3814_v55  ;;  %v3815_v37 = vunpack.i.l.bf16 %v3814_v55 }
 0x181   : > { %4003 = vrot.lane.b32.xlu2 %v7177_v34, %s4033_s24 }
 0x182   : > { %v6147_v35 = vpop.permute.xlu1 %3803  ;;  %v6151_v19 = vsel %vm2804_vm7, %v5944_v8, %v3815_v37  ;;  %v6155_v25 = vsel %vm2804_vm7, %v5940_v22, %v3816_v59  ;;  %v2788_v8 = vsel %vm2771_vm13, %v5749_v58, %v3740_v26  ;;  %v2789_v22 = vsel %vm2771_vm13, %v5745_v1, %v3741_v49 }
 0x183   : > { %v3839_v23 = vpop.permute.xlu2 %3838  ;;  %v3826_v1 = vunpack.i.h.bf16 %v3824_v20  ;;  %v2796_v49 = vsel %vm2771_vm13, %v5851_v63, %v3760_v11  ;;  %v3781_v63 = vunpack.i.h.bf16 %v6035_v28  ;;  %vm3147_vm13 = vcmask 519168  }
 0x184   : > { %v3841_v16 = vunpack.i.h.bf16 %v3839_v23  ;;  %v3840_v14 = vunpack.i.l.bf16 %v3839_v23 }
 0x185   : > { %v2830_v20 = vsel %vm2804_vm7, %v2797_v52, %v3826_v1  ;;  %v2806_v11 = vsel %vm2804_vm7, %v5952_v5, %v3781_v63 }
 0x187   : > { %v3829_v3 = vpop.permute.xlu0 %3828 }
 0x188   : > { %v3831_v44 = vunpack.i.h.bf16 %v3829_v3  ;;  %v3830_v50 = vunpack.i.l.bf16 %v3829_v3 }
 0x18a   : > { %v3819_v45 = vpop.permute.xlu1 %3818 }
 0x18b   : > { %v6159_v0 = vpop.permute.xlu2 %3853  ;;  %v3821_v7 = vunpack.i.h.bf16 %v3819_v45  ;;  %v3820_v56 = vunpack.i.l.bf16 %v3819_v45 }
 0x18d   : > { %v2821_v17 = vsel %vm2804_vm7, %v2788_v8, %v3820_v56  ;;  %v2822_v30 = vsel %vm2804_vm7, %v2789_v22, %v3821_v7  ;;  %v3780_v56 = vunpack.i.l.bf16 %v6035_v28 }
 0x18e   : > { %v2854_v43 = vsel %vm2837_vm2, %v2821_v17, %v3830_v50  ;;  %v2855_v46 = vsel %vm2837_vm2, %v2822_v30, %v3831_v44  ;;  %v2829_v44 = vsel %vm2804_vm7, %v2796_v49, %v3825_v51  ;;  %v3801_v51 = vunpack.i.h.bf16 %v6128_v48 }
 0x18f   : > { %v2887_v41 = vsel %vm2870_vm1, %v2854_v43, %v3840_v14  ;;  %v2888_v58 = vsel %vm2870_vm1, %v2855_v46, %v3841_v16  ;;  %v3844_v34 = vpop.permute.xlu0 %3843  ;;  %v2805_v46 = vsel %vm2804_vm7, %v5948_v60, %v3780_v56  ;;  %v3855_v60 = vunpack.i.l.bf16 %v6159_v0 }
 0x190   : > { %v2911_v61 = vpack.c.bf16 %v2888_v58, %v2887_v41  ;;  %v3846_v23 = vunpack.i.h.bf16 %v3844_v34  ;;  %v3845_v59 = vunpack.i.l.bf16 %v3844_v34  ;;  %v2814_v52 = vsel %vm2804_vm7, %v5900_v21, %v3801_v51 }
 0x192   : > { %v3834_v37 = vpop.permute.xlu1 %3833  ;;  %3260 = vmatmul.msk.bf16.vlgmr.msra.gmra.mxu2 %vm2938_vm0, %v2911_v61  ;;  %v3800_v61 = vunpack.i.l.bf16 %v6128_v48 }
 0x193   : > { %v6173_v55 = vpop.permute.xlu2 %3868  ;;  %v3836_v26 = vunpack.i.h.bf16 %v3834_v37  ;;  %v3835_v3 = vunpack.i.l.bf16 %v3834_v37 }
 0x194   : > { %v2813_v49 = vsel %vm2804_vm7, %v5904_v33, %v3800_v61 }
 0x195   : > { %v2862_v50 = vsel %vm2837_vm2, %v2829_v44, %v3835_v3  ;;  %v2863_v45 = vsel %vm2837_vm2, %v2830_v20, %v3836_v26  ;;  %v2846_v48 = vsel %vm2837_vm2, %v2813_v49, %v3855_v60 }
 0x196   : > { %v2895_v16 = vsel %vm2870_vm1, %v2862_v50, %v3845_v59  ;;  %v2896_v14 = vsel %vm2870_vm1, %v2863_v45, %v3846_v23  ;;  %v3856_v23 = vunpack.i.h.bf16 %v6159_v0  ;;  %v3871_v45 = vunpack.i.h.bf16 %v6173_v55 }
 0x197   : > { %v2915_v7 = vpack.c.bf16 %v2896_v14, %v2895_v16  ;;  %v3859_v9 = vpop.permute.xlu0 %3858  ;;  %v3870_v16 = vunpack.i.l.bf16 %v6173_v55 }
 0x198   : > { %v3861_v22 = vunpack.i.h.bf16 %v3859_v9  ;;  %v3860_v17 = vunpack.i.l.bf16 %v3859_v9  ;;  %v2847_v44 = vsel %vm2837_vm2, %v2814_v52, %v3856_v23 }
 0x199   : > { %3264 = vmatmul.msk.bf16.vlgmr.msra.gmra.mxu3 %vm2938_vm0, %v2915_v7 }
 0x19a   : > { %v3849_v30 = vpop.permute.xlu1 %3848 }
 0x19b   : > { %v6189_v8 = vpop.permute.xlu2 %3883  ;;  %v3851_v40 = vunpack.i.h.bf16 %v3849_v30  ;;  %v3850_v43 = vunpack.i.l.bf16 %v3849_v30 }
 0x19d   : > { %v2838_v41 = vsel %vm2837_vm2, %v2805_v46, %v3850_v43  ;;  %v2839_v28 = vsel %vm2837_vm2, %v2806_v11, %v3851_v40 }
 0x19e   : > { %v2871_v58 = vsel %vm2870_vm1, %v2838_v41, %v3860_v17  ;;  %v2872_v1 = vsel %vm2870_vm1, %v2839_v28, %v3861_v22  ;;  %v2823_v22 = vsel %vm2804_vm7, %v6047_v6, %v3870_v16  ;;  %v2824_v17 = vsel %vm2804_vm7, %v6051_v4, %v3871_v45 }
 0x19f   : > { %v2903_v34 = vpack.c.bf16 %v2872_v1, %v2871_v58  ;;  %v3874_v5 = vpop.permute.xlu0 %3873  ;;  %v3806_v41 = vunpack.i.h.bf16 %v6147_v35  ;;  %v3805_v28 = vunpack.i.l.bf16 %v6147_v35  ;;  %v3886_v6 = vunpack.i.h.bf16 %v6189_v8 }
 0x1a0   : > { %v3876_v30 = vunpack.i.h.bf16 %v3874_v5  ;;  %v3875_v40 = vunpack.i.l.bf16 %v3874_v5  ;;  %v3885_v1 = vunpack.i.l.bf16 %v6189_v8 }
 0x1a1   : > { %3252 = vmatmul.msk.bf16.vlgmr.msra.gmra.mxu0 %vm2938_vm0, %v2903_v34  ;;  %v2815_v49 = vsel %vm2804_vm7, %v5966_v54, %v3805_v28  ;;  %v2816_v8 = vsel %vm2804_vm7, %v5970_v27, %v3806_v41 }
 0x1a2   : > { %v3864_v37 = vpop.permute.xlu1 %3863  ;;  %v2831_v4 = vsel %vm2804_vm7, %v6009_v24, %v3875_v40  ;;  %v2832_v51 = vsel %vm2804_vm7, %v6005_v62, %v3876_v30 }
 0x1a3   : > { %v6204_v59 = vpop.permute.xlu2 %3898  ;;  %v3866_v26 = vunpack.i.h.bf16 %v3864_v37  ;;  %v3865_v3 = vunpack.i.l.bf16 %v3864_v37 }
 0x1a4   : > { %v3901_v45 = vunpack.i.h.bf16 %v6204_v59  ;;  %v3900_v16 = vunpack.i.l.bf16 %v6204_v59 }
 0x1a5   : > { %v2879_v0 = vsel %vm2870_vm1, %v2846_v48, %v3865_v3  ;;  %v2880_v20 = vsel %vm2870_vm1, %v2847_v44, %v3866_v26  ;;  %v2864_v3 = vsel %vm2837_vm2, %v2831_v4, %v3885_v1  ;;  %v2865_v48 = vsel %vm2837_vm2, %v2832_v51, %v3886_v6 }
 0x1a6   : > { %v2907_v50 = vpack.c.bf16 %v2880_v20, %v2879_v0 }
 0x1a7   : > { %v3889_v33 = vpop.permute.xlu0 %3888 }
 0x1a8   : > { %3256 = vmatmul.msk.bf16.vlgmr.msra.gmra.mxu1 %vm2938_vm0, %v2907_v50  ;;  %v3891_v21 = vunpack.i.h.bf16 %v3889_v33  ;;  %v3890_v7 = vunpack.i.l.bf16 %v3889_v33 }
 0x1aa   : > { %v3879_v63 = vpop.permute.xlu1 %3878 }
 0x1ab   : > { %v3914_v14 = vpop.permute.xlu2 %3913  ;;  %v3881_v56 = vunpack.i.h.bf16 %v3879_v63  ;;  %v3880_v9 = vunpack.i.l.bf16 %v3879_v63  ;;  %v2840_v63 = vsel %vm2837_vm2, %v6099_v57, %v3900_v16 }
 0x1ac   : > { %v3916_v61 = vunpack.i.h.bf16 %v3914_v14  ;;  %v3915_v34 = vunpack.i.l.bf16 %v3914_v14 }
 0x1ad   : > { %v2856_v43 = vsel %vm2837_vm2, %v2823_v22, %v3880_v9  ;;  %v2857_v55 = vsel %vm2837_vm2, %v2824_v17, %v3881_v56  ;;  %v2841_v56 = vsel %vm2837_vm2, %v6103_v32, %v3901_v45 }
 0x1ae   : > { %v2889_v46 = vsel %vm2870_vm1, %v2856_v43, %v3890_v7  ;;  %v2890_v11 = vsel %vm2870_vm1, %v2857_v55, %v3891_v21 }
 0x1af   : > { %v2912_v58 = vpack.c.bf16 %v2890_v11, %v2889_v46  ;;  %v3904_v23 = vpop.permute.xlu0 %3903 }
 0x1b0   : > { %v3906_v5 = vunpack.i.h.bf16 %v3904_v23  ;;  %v3905_v35 = vunpack.i.l.bf16 %v3904_v23 }
 0x1b1   : > { %3261 = vmatmul.msk.bf16.gmra.mxu2 %vm2938_vm0, %v2912_v58 }
 0x1b2   : > { %v3894_v37 = vpop.permute.xlu1 %3893  ;;  %v2848_v62 = vsel %vm2837_vm2, %v2815_v49, %v3905_v35  ;;  %v2849_v26 = vsel %vm2837_vm2, %v2816_v8, %v3906_v5 }
 0x1b3   : > { %v6234_v60 = vpop.permute.xlu2 %3928  ;;  %v3896_v24 = vunpack.i.h.bf16 %v3894_v37  ;;  %v3895_v52 = vunpack.i.l.bf16 %v3894_v37  ;;  %v2881_v20 = vsel %vm2870_vm1, %v2848_v62, %v3915_v34  ;;  %v2882_v54 = vsel %vm2870_vm1, %v2849_v26, %v3916_v61 }
 0x1b4   : > { %v2908_v27 = vpack.c.bf16 %v2882_v54, %v2881_v20  ;;  %v3931_v23 = vunpack.i.h.bf16 %v6234_v60  ;;  %v3930_v5 = vunpack.i.l.bf16 %v6234_v60 }
 0x1b5   : > { %v2897_v44 = vsel %vm2870_vm1, %v2864_v3, %v3895_v52  ;;  %v2898_v0 = vsel %vm2870_vm1, %v2865_v48, %v3896_v24 }
 0x1b6   : > { %v2916_v50 = vpack.c.bf16 %v2898_v0, %v2897_v44 }
 0x1b7   : > { %v3919_v33 = vpop.permute.xlu0 %3918 }
 0x1b8   : > { %3265 = vmatmul.msk.bf16.gmra.mxu3 %vm2938_vm0, %v2916_v50  ;;  %3257 = vmatmul.msk.bf16.gmra.mxu1 %vm2938_vm0, %v2908_v27  ;;  %v3921_v57 = vunpack.i.h.bf16 %v3919_v33  ;;  %v3920_v58 = vunpack.i.l.bf16 %v3919_v33 }
 0x1ba   : > { %v3909_v14 = vpop.permute.xlu1 %3908 }
 0x1bb   : > { %v3911_v21 = vunpack.i.h.bf16 %v3909_v14  ;;  %v3910_v7 = vunpack.i.l.bf16 %v3909_v14  ;;  %v3944_v9 = vpop.permute.xlu2 %3943 }
 0x1bc   : > { %v3946_v46 = vunpack.i.h.bf16 %v3944_v9  ;;  %v3945_v11 = vunpack.i.l.bf16 %v3944_v9 }
 0x1bd   : > { %v2873_v22 = vsel %vm2870_vm1, %v2840_v63, %v3910_v7  ;;  %v2874_v17 = vsel %vm2870_vm1, %v2841_v56, %v3911_v21 }
 0x1be   : > { %v2904_v59 = vpack.c.bf16 %v2874_v17, %v2873_v22 }
 0x1bf   : > { %v3934_v30 = vpop.permute.xlu0 %3933 }
 0x1c0   : > { %3253 = vmatmul.msk.bf16.gmra.mxu0 %vm2938_vm0, %v2904_v59  ;;  %v3936_v40 = vunpack.i.h.bf16 %v3934_v30  ;;  %v3935_v43 = vunpack.i.l.bf16 %v3934_v30 }
 0x1c2   : > { %v3924_v55 = vpop.permute.xlu1 %3923 }
 0x1c3   : > { %v3926_v41 = vunpack.i.h.bf16 %v3924_v55  ;;  %v3925_v28 = vunpack.i.l.bf16 %v3924_v55  ;;  %v3959_v1 = vpop.permute.xlu2 %3958 }
 0x1c4   : > { %v3961_v49 = vunpack.i.h.bf16 %v3959_v1  ;;  %v3960_v8 = vunpack.i.l.bf16 %v3959_v1 }
 0x1c5   : > { %v2833_v32 = vsel %vm2804_vm7, %v6061_v39, %v3925_v28  ;;  %v2834_v6 = vsel %vm2804_vm7, %v6065_v53, %v3926_v41  ;;  %v2825_v39 = vsel %vm2804_vm7, %v5978_v36, %v3920_v58  ;;  %v2826_v53 = vsel %vm2804_vm7, %v5974_v15, %v3921_v57 }
 0x1c6   : > { %v2866_v4 = vsel %vm2837_vm2, %v2833_v32, %v3935_v43  ;;  %v2867_v51 = vsel %vm2837_vm2, %v2834_v6, %v3936_v40  ;;  %v2858_v36 = vsel %vm2837_vm2, %v2825_v39, %v3930_v5  ;;  %v2859_v15 = vsel %vm2837_vm2, %v2826_v53, %v3931_v23 }
 0x1c7   : > { %v2899_v61 = vsel %vm2870_vm1, %v2866_v4, %v3945_v11  ;;  %v2900_v34 = vsel %vm2870_vm1, %v2867_v51, %v3946_v46  ;;  %v3949_v37 = vpop.permute.xlu0 %3948 }
 0x1c8   : > { %v2917_v35 = vpack.c.bf16 %v2900_v34, %v2899_v61  ;;  %v3951_v24 = vunpack.i.h.bf16 %v3949_v37  ;;  %v3950_v52 = vunpack.i.l.bf16 %v3949_v37 }
 0x1ca   : > { %v3939_v62 = vpop.permute.xlu1 %3938  ;;  %3266 = vmatmul.msk.bf16.gmra.mxu3 %vm2938_vm0, %v2917_v35  ;;  %v2842_v60 = vsel %vm2837_vm2, %v6138_v18, %v3950_v52  ;;  %v2843_v48 = vsel %vm2837_vm2, %v6142_v38, %v3951_v24 }
 0x1cb   : > { %v3941_v26 = vunpack.i.h.bf16 %v3939_v62  ;;  %v3940_v3 = vunpack.i.l.bf16 %v3939_v62  ;;  %v2875_v54 = vsel %vm2870_vm1, %v2842_v60, %v3960_v8  ;;  %v2876_v50 = vsel %vm2870_vm1, %v2843_v48, %v3961_v49  ;;  %v3974_v45 = vpop.permute.xlu2 %3973 }
 0x1cc   : > { %v2905_v27 = vpack.c.bf16 %v2876_v50, %v2875_v54  ;;  %v3976_v6 = vunpack.i.h.bf16 %v3974_v45  ;;  %v3975_v1 = vunpack.i.l.bf16 %v3974_v45 }
 0x1cd   : > { %v2891_v44 = vsel %vm2870_vm1, %v2858_v36, %v3940_v3  ;;  %v2892_v0 = vsel %vm2870_vm1, %v2859_v15, %v3941_v26 }
 0x1ce   : > { %v2913_v20 = vpack.c.bf16 %v2892_v0, %v2891_v44  ;;  %v2836_v35 = vsel %vm2804_vm7, %v6119_v12, %v3976_v6 }
 0x1cf   : > { %v3964_v18 = vpop.permute.xlu0 %3963 }
 0x1d0   : > { %3262 = vmatmul.msk.bf16.gmra.mxu2 %vm2938_vm0, %v2913_v20  ;;  %3254 = vmatmul.msk.bf16.gmra.mxu0 %vm2938_vm0, %v2905_v27  ;;  %v3966_v16 = vunpack.i.h.bf16 %v3964_v18  ;;  %v3965_v33 = vunpack.i.l.bf16 %v3964_v18 }
 0x1d2   : > { %v3954_v38 = vpop.permute.xlu1 %3953 }
 0x1d3   : > { %v3956_v14 = vunpack.i.h.bf16 %v3954_v38  ;;  %v3955_v21 = vunpack.i.l.bf16 %v3954_v38  ;;  %v3989_v59 = vpop.permute.xlu2 %3988 }
 0x1d4   : > { %v3991_v55 = vunpack.i.h.bf16 %v3989_v59  ;;  %v3990_v46 = vunpack.i.l.bf16 %v3989_v59 }
 0x1d5   : > { %v2850_v7 = vsel %vm2837_vm2, %v6107_v47, %v3955_v21  ;;  %v2851_v63 = vsel %vm2837_vm2, %v6111_v10, %v3956_v14 }
 0x1d6   : > { %v2883_v56 = vsel %vm2870_vm1, %v2850_v7, %v3965_v33  ;;  %v2884_v9 = vsel %vm2870_vm1, %v2851_v63, %v3966_v16  ;;  %v6328_v16 = vld [vmem:[%s6438_s2] ss:$0 sm:$0xff] }
 0x1d7   : > { %v2909_v22 = vpack.c.bf16 %v2884_v9, %v2883_v56  ;;  %v3979_v17 = vpop.permute.xlu0 %3978 }
 0x1d8   : > { %v3981_v40 = vunpack.i.h.bf16 %v3979_v17  ;;  %v3980_v43 = vunpack.i.l.bf16 %v3979_v17 }
 0x1d9   : > { %3258 = vmatmul.msk.bf16.gmra.mxu1 %vm2938_vm0, %v2909_v22 }
 0x1da   : > { %v3969_v30 = vpop.permute.xlu1 %3968 }
 0x1db   : > { %v3971_v11 = vunpack.i.h.bf16 %v3969_v30  ;;  %v3970_v41 = vunpack.i.l.bf16 %v3969_v30  ;;  %v4004_v60 = vpop.permute.xlu2 %4003 }
 0x1dc   : > { %v4006_v0 = vunpack.i.h.bf16 %v4004_v60  ;;  %v4005_v20 = vunpack.i.l.bf16 %v4004_v60 }
 0x1dd   : > { %v2827_v47 = vsel %vm2804_vm7, %v6039_v42, %v3970_v41  ;;  %v2828_v10 = vsel %vm2804_vm7, %v6043_v2, %v3971_v11  ;;  %v2835_v2 = vsel %vm2804_vm7, %v6115_v13, %v3975_v1 }
 0x1de   : > { %v2860_v28 = vsel %vm2837_vm2, %v2827_v47, %v3980_v43  ;;  %v2861_v57 = vsel %vm2837_vm2, %v2828_v10, %v3981_v40  ;;  %v2852_v45 = vsel %vm2837_vm2, %v6151_v19, %v4005_v20 }
 0x1df   : > { %v2893_v58 = vsel %vm2870_vm1, %v2860_v28, %v3990_v46  ;;  %v2894_v32 = vsel %vm2870_vm1, %v2861_v57, %v3991_v55 }
 0x1e0   : > { %v2914_v4 = vpack.c.bf16 %v2894_v32, %v2893_v58 }
 0x1e1   : > { %v3994_v51 = vpop.permute.xlu0 %3993 }
 0x1e2   : > { %v3984_v61 = vpop.permute.xlu1 %3983  ;;  %3263 = vmatmul.msk.bf16.gmra.mxu2 %vm2938_vm0, %v2914_v4  ;;  %v3996_v34 = vunpack.i.h.bf16 %v3994_v51  ;;  %v3995_v42 = vunpack.i.l.bf16 %v3994_v51 }
 0x1e3   : > { %v3986_v23 = vunpack.i.h.bf16 %v3984_v61  ;;  %v3985_v5 = vunpack.i.l.bf16 %v3984_v61 }
 0x1e5   : > { %v2868_v39 = vsel %vm2837_vm2, %v2835_v2, %v3985_v5  ;;  %v2869_v53 = vsel %vm2837_vm2, %v2836_v35, %v3986_v23 }
 0x1e6   : > { %v2901_v37 = vsel %vm2870_vm1, %v2868_v39, %v3995_v42  ;;  %v2902_v49 = vsel %vm2870_vm1, %v2869_v53, %v3996_v34 }
 0x1e7   : > { %v2918_v8 = vpack.c.bf16 %v2902_v49, %v2901_v37 }
 0x1e9   : > { %3267 = vmatmul.msk.bf16.gmra.mxu3 %vm2938_vm0, %v2918_v8  ;;  %v4009_v24 = vpop.permute.xlu0 %4008 }
 0x1ea   : > { %v3999_v52 = vpop.permute.xlu1 %3998  ;;  %v4011_v62 = vunpack.i.h.bf16 %v4009_v24  ;;  %v4010_v26 = vunpack.i.l.bf16 %v4009_v24 }
 0x1eb   : > { %v4001_v3 = vunpack.i.h.bf16 %v3999_v52  ;;  %v4000_v13 = vunpack.i.l.bf16 %v3999_v52 }
 0x1ed   : > { %v2844_v12 = vsel %vm2837_vm2, %v6071_v29, %v4000_v13  ;;  %v2845_v48 = vsel %vm2837_vm2, %v6074_v31, %v4001_v3  ;;  %v2853_v29 = vsel %vm2837_vm2, %v6155_v25, %v4006_v0 }
 0x1ee   : > { %v2877_v36 = vsel %vm2870_vm1, %v2844_v12, %v4010_v26  ;;  %v2878_v15 = vsel %vm2870_vm1, %v2845_v48, %v4011_v62 }
 0x1ef   : > { %v2906_v44 = vpack.c.bf16 %v2878_v15, %v2877_v36 }
 0x1f1   : > { %3255 = vmatmul.msk.bf16.gmra.mxu0 %vm2938_vm0, %v2906_v44 }
 0x1f2   : > { %v4014_v54 = vpop.permute.xlu1 %4013 }
 0x1f3   : > { %v4016_v50 = vunpack.i.h.bf16 %v4014_v54  ;;  %v4015_v27 = vunpack.i.l.bf16 %v4014_v54 }
 0x1f5   : > { %v2885_v31 = vsel %vm2870_vm1, %v2852_v45, %v4015_v27  ;;  %v2886_v18 = vsel %vm2870_vm1, %v2853_v29, %v4016_v50 }
 0x1f6   : > { %v2910_v38 = vpack.c.bf16 %v2886_v18, %v2885_v31 }
 0x1f8   : > { %3259 = vmatmul.msk.bf16.gmra.mxu1 %vm2938_vm0, %v2910_v38 }
 0x215   : > { %v3043_v33 = vpop.f32.mrf.mxu2 }
 0x216   : > { %v3044_v14 = vadd.f32 %v6328_v16, %v3043_v33 }
 0x218   : > { %v3099_v21 = vmax.f32 %v3044_v14, 0.0 }
 0x21a   : > { %v3131_v19 = vpack.c.bf16 %v3099_v21, %v3099_v21 }
 0x21c   : > { %3164 = vst.msk [vmem:[%s6336_s9 + $0x40] sm:$0xf] %vm3147_vm13, %v3131_v19  ;;  %v3063_v25 = vpop.f32.mrf.mxu3 }
 0x21d   : > { %v3064_v7 = vadd.f32 %v6328_v16, %v3063_v25  ;;  %v3045_v63 = vpop.f32.mrf.mxu2 }
 0x21e   : > { %v3046_v56 = vadd.f32 %v6328_v16, %v3045_v63  ;;  %v3003_v9 = vpop.f32.mrf.mxu0 }
 0x21f   : > { %v3107_v22 = vmax.f32 %v3064_v7, 0.0  ;;  %v3004_v17 = vadd.f32 %v6328_v16, %v3003_v9 }
 0x220   : > { %v3100_v59 = vmax.f32 %v3046_v56, 0.0 }
 0x221   : > { %v3139_v30 = vpack.c.bf16 %v3107_v22, %v3107_v22  ;;  %v3083_v40 = vmax.f32 %v3004_v17, 0.0 }
 0x222   : > { %v3132_v43 = vpack.c.bf16 %v3100_v59, %v3100_v59 }
 0x223   : > { %3172 = vst.msk [vmem:[%s6336_s9 + $0x60] sm:$0xf] %vm3147_vm13, %v3139_v30  ;;  %v3115_v55 = vpack.c.bf16 %v3083_v40, %v3083_v40 }
 0x224   : > { %3165 = vst.msk [vmem:[%s6336_s9 + $0x44] sm:$0xf] %vm3147_vm13, %v3132_v43  ;;  %v3065_v46 = vpop.f32.mrf.mxu3 }
 0x225   : > { %3148 = vst.msk [vmem:[%s6336_s9] sm:$0xf] %vm3147_vm13, %v3115_v55  ;;  %v3066_v11 = vadd.f32 %v6328_v16, %v3065_v46  ;;  %v3023_v41 = vpop.f32.mrf.mxu1 }
 0x226   : > { %v3024_v47 = vadd.f32 %v6328_v16, %v3023_v41  ;;  %v3005_v10 = vpop.f32.mrf.mxu0 }
 0x227   : > { %v3108_v28 = vmax.f32 %v3066_v11, 0.0  ;;  %v3006_v57 = vadd.f32 %v6328_v16, %v3005_v10 }
 0x228   : > { %v3091_v58 = vmax.f32 %v3024_v47, 0.0 }
 0x229   : > { %v3140_v32 = vpack.c.bf16 %v3108_v28, %v3108_v28  ;;  %v3084_v6 = vmax.f32 %v3006_v57, 0.0 }
 0x22a   : > { %v3123_v1 = vpack.c.bf16 %v3091_v58, %v3091_v58 }
 0x22b   : > { %3173 = vst.msk [vmem:[%s6336_s9 + $0x64] sm:$0xf] %vm3147_vm13, %v3140_v32  ;;  %v3116_v4 = vpack.c.bf16 %v3084_v6, %v3084_v6 }
 0x22c   : > { %3156 = vst.msk [vmem:[%s6336_s9 + $0x20] sm:$0xf] %vm3147_vm13, %v3123_v1 }
 0x22d   : > { %3149 = vst.msk [vmem:[%s6336_s9 + $0x4] sm:$0xf] %vm3147_vm13, %v3116_v4  ;;  %v3025_v51 = vpop.f32.mrf.mxu1 }
 0x22e   : > { %v3026_v61 = vadd.f32 %v6328_v16, %v3025_v51 }
 0x230   : > { %v3092_v34 = vmax.f32 %v3026_v61, 0.0 }
 0x232   : > { %v3124_v42 = vpack.c.bf16 %v3092_v34, %v3092_v34 }
 0x234   : > { %3157 = vst.msk [vmem:[%s6336_s9 + $0x24] sm:$0xf] %vm3147_vm13, %v3124_v42  ;;  %v3048_v23 = vpop.f32.mrf.mxu2 }
 0x235   : > { %v3049_v5 = vadd.f32 %v6328_v16, %v3048_v23  ;;  %v3028_v2 = vpop.f32.mrf.mxu1 }
 0x236   : > { %v3029_v35 = vadd.f32 %v6328_v16, %v3028_v2 }
 0x237   : > { %v3101_v39 = vmax.f32 %v3049_v5, 0.0 }
 0x238   : > { %v3093_v53 = vmax.f32 %v3029_v35, 0.0 }
 0x239   : > { %v3133_v37 = vpack.c.bf16 %v3101_v39, %v3101_v39 }
 0x23a   : > { %v3125_v49 = vpack.c.bf16 %v3093_v53, %v3093_v53 }
 0x23b   : > { %3166 = vst.msk [vmem:[%s6336_s9 + $0x48] sm:$0xf] %vm3147_vm13, %v3133_v37  ;;  %v3068_v8 = vpop.f32.mrf.mxu3 }
 0x23c   : > { %3158 = vst.msk [vmem:[%s6336_s9 + $0x28] sm:$0xf] %vm3147_vm13, %v3125_v49  ;;  %v3069_v24 = vadd.f32 %v6328_v16, %v3068_v8  ;;  %v3050_v52 = vpop.f32.mrf.mxu2 }
 0x23d   : > { %v3051_v62 = vadd.f32 %v6328_v16, %v3050_v52  ;;  %v3008_v26 = vpop.f32.mrf.mxu0  ;;  %v3030_v3 = vpop.f32.mrf.mxu1 }
 0x23e   : > { %v3109_v13 = vmax.f32 %v3069_v24, 0.0  ;;  %v3009_v60 = vadd.f32 %v6328_v16, %v3008_v26  ;;  %v3031_v12 = vadd.f32 %v6328_v16, %v3030_v3 }
 0x23f   : > { %v3102_v48 = vmax.f32 %v3051_v62, 0.0 }
 0x240   : > { %v3141_v36 = vpack.c.bf16 %v3109_v13, %v3109_v13  ;;  %v3085_v15 = vmax.f32 %v3009_v60, 0.0  ;;  %v3094_v44 = vmax.f32 %v3031_v12, 0.0 }
 0x241   : > { %v3134_v0 = vpack.c.bf16 %v3102_v48, %v3102_v48 }
 0x242   : > { %3174 = vst.msk [vmem:[%s6336_s9 + $0x68] sm:$0xf] %vm3147_vm13, %v3141_v36  ;;  %v3117_v20 = vpack.c.bf16 %v3085_v15, %v3085_v15  ;;  %v3126_v54 = vpack.c.bf16 %v3094_v44, %v3094_v44 }
 0x243   : > { %3167 = vst.msk [vmem:[%s6336_s9 + $0x4c] sm:$0xf] %vm3147_vm13, %v3134_v0  ;;  %v3070_v50 = vpop.f32.mrf.mxu3 }
 0x244   : > { %3150 = vst.msk [vmem:[%s6336_s9 + $0x8] sm:$0xf] %vm3147_vm13, %v3117_v20  ;;  %v3071_v27 = vadd.f32 %v6328_v16, %v3070_v50 }
 0x245   : > { %3159 = vst.msk [vmem:[%s6336_s9 + $0x2c] sm:$0xf] %vm3147_vm13, %v3126_v54  ;;  %v3010_v45 = vpop.f32.mrf.mxu0 }
 0x246   : > { %v3110_v29 = vmax.f32 %v3071_v27, 0.0  ;;  %v3011_v31 = vadd.f32 %v6328_v16, %v3010_v45 }
 0x248   : > { %v3142_v18 = vpack.c.bf16 %v3110_v29, %v3110_v29  ;;  %v3086_v38 = vmax.f32 %v3011_v31, 0.0 }
 0x24a   : > { %3175 = vst.msk [vmem:[%s6336_s9 + $0x6c] sm:$0xf] %vm3147_vm13, %v3142_v18  ;;  %v3118_v33 = vpack.c.bf16 %v3086_v38, %v3086_v38 }
 0x24c   : > { %3151 = vst.msk [vmem:[%s6336_s9 + $0xc] sm:$0xf] %vm3147_vm13, %v3118_v33 }
 0x24d   : > { %v3073_v14 = vpop.f32.mrf.mxu3  ;;  %v3013_v19 = vpop.f32.mrf.mxu0 }
 0x24e   : > { %v3074_v21 = vadd.f32 %v6328_v16, %v3073_v14  ;;  %v3014_v25 = vadd.f32 %v6328_v16, %v3013_v19 }
 0x250   : > { %v3111_v7 = vmax.f32 %v3074_v21, 0.0  ;;  %v3087_v63 = vmax.f32 %v3014_v25, 0.0 }
 0x252   : > { %v3143_v56 = vpack.c.bf16 %v3111_v7, %v3111_v7  ;;  %v3119_v9 = vpack.c.bf16 %v3087_v63, %v3087_v63 }
 0x253   : > { %v3053_v22 = vpop.f32.mrf.mxu2 }
 0x254   : > { %3176 = vst.msk [vmem:[%s6336_s9 + $0x70] sm:$0xf] %vm3147_vm13, %v3143_v56  ;;  %v3054_v17 = vadd.f32 %v6328_v16, %v3053_v22 }
 0x255   : > { %3152 = vst.msk [vmem:[%s6336_s9 + $0x10] sm:$0xf] %vm3147_vm13, %v3119_v9  ;;  %v3075_v59 = vpop.f32.mrf.mxu3  ;;  %v3015_v43 = vpop.f32.mrf.mxu0 }
 0x256   : > { %v3103_v30 = vmax.f32 %v3054_v17, 0.0  ;;  %v3076_v40 = vadd.f32 %v6328_v16, %v3075_v59  ;;  %v3033_v55 = vpop.f32.mrf.mxu1  ;;  %v3016_v46 = vadd.f32 %v6328_v16, %v3015_v43 }
 0x257   : > { %v3034_v11 = vadd.f32 %v6328_v16, %v3033_v55 }
 0x258   : > { %v3135_v41 = vpack.c.bf16 %v3103_v30, %v3103_v30  ;;  %v3112_v47 = vmax.f32 %v3076_v40, 0.0  ;;  %v3088_v10 = vmax.f32 %v3016_v46, 0.0 }
 0x259   : > { %v3095_v28 = vmax.f32 %v3034_v11, 0.0 }
 0x25a   : > { %3168 = vst.msk [vmem:[%s6336_s9 + $0x50] sm:$0xf] %vm3147_vm13, %v3135_v41  ;;  %v3144_v57 = vpack.c.bf16 %v3112_v47, %v3112_v47  ;;  %v3120_v58 = vpack.c.bf16 %v3088_v10, %v3088_v10 }
 0x25b   : > { %v3127_v32 = vpack.c.bf16 %v3095_v28, %v3095_v28  ;;  %v3055_v6 = vpop.f32.mrf.mxu2 }
 0x25c   : > { %3177 = vst.msk [vmem:[%s6336_s9 + $0x74] sm:$0xf] %vm3147_vm13, %v3144_v57  ;;  %v3056_v1 = vadd.f32 %v6328_v16, %v3055_v6 }
 0x25d   : > { %3153 = vst.msk [vmem:[%s6336_s9 + $0x14] sm:$0xf] %vm3147_vm13, %v3120_v58 }
 0x25e   : > { %3160 = vst.msk [vmem:[%s6336_s9 + $0x30] sm:$0xf] %vm3147_vm13, %v3127_v32  ;;  %v3104_v4 = vmax.f32 %v3056_v1, 0.0  ;;  %v3035_v51 = vpop.f32.mrf.mxu1 }
 0x25f   : > { %v3036_v61 = vadd.f32 %v6328_v16, %v3035_v51 }
 0x260   : > { %v3136_v34 = vpack.c.bf16 %v3104_v4, %v3104_v4 }
 0x261   : > { %v3096_v42 = vmax.f32 %v3036_v61, 0.0 }
 0x262   : > { %3169 = vst.msk [vmem:[%s6336_s9 + $0x54] sm:$0xf] %vm3147_vm13, %v3136_v34 }
 0x263   : > { %v3128_v23 = vpack.c.bf16 %v3096_v42, %v3096_v42 }
 0x265   : > { %3161 = vst.msk [vmem:[%s6336_s9 + $0x34] sm:$0xf] %vm3147_vm13, %v3128_v23  ;;  %v3058_v5 = vpop.f32.mrf.mxu2 }
 0x266   : > { %v3059_v2 = vadd.f32 %v6328_v16, %v3058_v5 }
 0x268   : > { %v3105_v35 = vmax.f32 %v3059_v2, 0.0 }
 0x26a   : > { %v3137_v39 = vpack.c.bf16 %v3105_v35, %v3105_v35 }
 0x26c   : > { %3170 = vst.msk [vmem:[%s6336_s9 + $0x58] sm:$0xf] %vm3147_vm13, %v3137_v39  ;;  %v3078_v53 = vpop.f32.mrf.mxu3 }
 0x26d   : > { %v3079_v37 = vadd.f32 %v6328_v16, %v3078_v53  ;;  %v3060_v49 = vpop.f32.mrf.mxu2 }
 0x26e   : > { %v3061_v8 = vadd.f32 %v6328_v16, %v3060_v49  ;;  %v3018_v24 = vpop.f32.mrf.mxu0 }
 0x26f   : > { %v3113_v52 = vmax.f32 %v3079_v37, 0.0  ;;  %v3019_v62 = vadd.f32 %v6328_v16, %v3018_v24 }
 0x270   : > { %v3106_v26 = vmax.f32 %v3061_v8, 0.0 }
 0x271   : > { %v3145_v3 = vpack.c.bf16 %v3113_v52, %v3113_v52  ;;  %v3089_v13 = vmax.f32 %v3019_v62, 0.0 }
 0x272   : > { %v3138_v60 = vpack.c.bf16 %v3106_v26, %v3106_v26 }
 0x273   : > { %3178 = vst.msk [vmem:[%s6336_s9 + $0x78] sm:$0xf] %vm3147_vm13, %v3145_v3  ;;  %v3121_v12 = vpack.c.bf16 %v3089_v13, %v3089_v13 }
 0x274   : > { %3171 = vst.msk [vmem:[%s6336_s9 + $0x5c] sm:$0xf] %vm3147_vm13, %v3138_v60  ;;  %v3080_v48 = vpop.f32.mrf.mxu3 }
 0x275   : > { %3154 = vst.msk [vmem:[%s6336_s9 + $0x18] sm:$0xf] %vm3147_vm13, %v3121_v12  ;;  %v3081_v36 = vadd.f32 %v6328_v16, %v3080_v48  ;;  %v3038_v15 = vpop.f32.mrf.mxu1 }
 0x276   : > { %v3039_v44 = vadd.f32 %v6328_v16, %v3038_v15  ;;  %v3020_v0 = vpop.f32.mrf.mxu0 }
 0x277   : > { %v3114_v20 = vmax.f32 %v3081_v36, 0.0  ;;  %v3021_v54 = vadd.f32 %v6328_v16, %v3020_v0 }
 0x278   : > { %v3097_v50 = vmax.f32 %v3039_v44, 0.0 }
 0x279   : > { %v3146_v27 = vpack.c.bf16 %v3114_v20, %v3114_v20  ;;  %v3090_v45 = vmax.f32 %v3021_v54, 0.0 }
 0x27a   : > { %v3129_v29 = vpack.c.bf16 %v3097_v50, %v3097_v50 }
 0x27b   : > { %3179 = vst.msk [vmem:[%s6336_s9 + $0x7c] sm:$0xf] %vm3147_vm13, %v3146_v27  ;;  %v3122_v31 = vpack.c.bf16 %v3090_v45, %v3090_v45 }
 0x27c   : > { %3162 = vst.msk [vmem:[%s6336_s9 + $0x38] sm:$0xf] %vm3147_vm13, %v3129_v29 }
 0x27d   : > { %3155 = vst.msk [vmem:[%s6336_s9 + $0x1c] sm:$0xf] %vm3147_vm13, %v3122_v31  ;;  %v3040_v18 = vpop.f32.mrf.mxu1 }
 0x27e   : > { %v3041_v38 = vadd.f32 %v6328_v16, %v3040_v18 }
 0x280   : > { %v3098_v33 = vmax.f32 %v3041_v38, 0.0 }
 0x282   : > { %v3130_v14 = vpack.c.bf16 %v3098_v33, %v3098_v33 }
 0x284   : > { %3163 = vst.msk [vmem:[%s6336_s9 + $0x3c] sm:$0xf] %vm3147_vm13, %v3130_v14 }
 0x285 PF: > { %s13_s12 = sadd.s32 1, %s4024_s12  }
 0x286   : > { %p10_p4 = scmp.ge.s32.totalorder %s13_s12, 6  }
 0x288   :  { %12 = sbr.rel (!%p10_p4) target bundleno = 1 (0x1), region = 62 }

// kernel: perceptual_loss.11
= control target key start
LH: loop header
LB: loop body
LE: loop exit
PB: predicated region body
PF: predicated region fallthrough
CT: control target
= control target key end

     0   :  { %s2026_s12 = smov 0   ;;  %s2698_s0 = inlined_call_operand.vmem [shape: bf16[4,64,128], index: 0, kind: input, shape index: {}]   ;;  %s2699_s1 = inlined_call_operand.vmem [shape: bf16[1152,128], index: 1, kind: input, shape index: {}]   ;;  %s2700_s2 = inlined_call_operand.vmem [shape: f32[1,128], index: 2, kind: input, shape index: {}]   ;;  %s2701_s3 = inlined_call_operand.vmem [shape: bf16[4,64,128], index: 3, kind: output, shape index: {}]  }
   0x1 LB: > { %s1482_s13 = sadd.s32 4294967295, %s2002_s12   ;;  %p1486_p0 = scmp.ge.s32.totalorder %s2002_s12, 1  ;;  %s2002_s12 = sphi %s2026_s12, %s13_s12  }
   0x2   : > { %p137_p1 = scmp.lt.s32.totalorder %s2002_s12, 5 }
   0x4   : > { %p138_p2 = pnand %p1486_p0, %p137_p1 }
   0x5   : > { %p161_p3 = scmp.lt.s32.totalorder (!%p138_p2), %s1482_s13, 3 }
   0x6   : > { %141 = sbr.rel (%p138_p2) target bundleno = 332 (0x14c), region = 32 }
   0xb   : > { %v1862_v0 = vld [vmem:[%s2699_s1 + $0x38] sm:$0xff]  ;;  %v187_v1 = vlaneseq  ;;  %v1861_v3 = vld [vmem:[%s2699_s1 + $0x30] sm:$0xff]  ;;  %s2721_s13 = smov (!%p161_p3, %s1482_s13), 3  ;;  %v1860_v11 = vld [vmem:[%s2699_s1 + $0x28] sm:$0xff]  ;;  %vm2005_vm9 = vmmov 1  }
   0xc   : > { %v1878_v2 = vld [vmem:[%s2699_s1 + $0xb8] sm:$0xff]  ;;  %1969 = vmatpush.bf16.msra.mxu1 %v1862_v0  ;;  %1150 = vmatpush.bf16.msra.mxu0 %v1862_v0  ;;  %v1877_v5 = vld [vmem:[%s2699_s1 + $0xb0] sm:$0xff]  ;;  %s1853_s26 = sshll.u32 %s2721_s13, 5  ;;  %v1876_v14 = vld [vmem:[%s2699_s1 + $0xa8] sm:$0xff] }
   0xd   : > { %v2045_v4 = vshrl.u32 %v187_v1, 7  ;;  %1208 = vmatpush.bf16.msra.mxu2 %v1878_v2  ;;  %v1886_v6 = vld [vmem:[%s2699_s1 + $0xf8] sm:$0xff]  ;;  %v1885_v9 = vld [vmem:[%s2699_s1 + $0xf0] sm:$0xff]  ;;  %s165_s6 = scalar_lea.vmem %s2698_s0, %s1853_s26  ;;  %v1884_v18 = vld [vmem:[%s2699_s1 + $0xe8] sm:$0xff]  ;;  %s2682_s21 = scalar_lea.vmem %s2701_s3, %s1853_s26 }
   0xe   : > { %1237 = vmatpush.bf16.msra.mxu3 %v1886_v6  ;;  %v1859_v20 = vld [vmem:[%s2699_s1 + $0x20] sm:$0xff]  ;;  %v2094_v25 = vld [vmem:[%s165_s6 + $0x8] sm:$0xff]   ;;  %v2096_v26 = vld [vmem:[%s165_s6 + $0x10] sm:$0xff]  }
   0xf   : > { %v2054_v7 = vadd.s32 32, %v2045_v4  ;;  %v2057_v8 = vadd.s32 40, %v2045_v4  ;;  %v2064_v10 = vadd.s32 8, %v2045_v4  ;;  %v196_v19 = vcvt.s32.f32 %v2045_v4  ;;  %v1875_v24 = vld [vmem:[%s2699_s1 + $0xa0] sm:$0xff]  ;;  %v2103_v32 = vld [vmem:[%s165_s6 + $0x18] sm:$0xff]   ;;  %v1857_v51 = vld [vmem:[%s2699_s1 + $0x10] sm:$0xff] }
  0x10   : > { %1970 = vmatpush.bf16.msra.mxu1 %v1861_v3  ;;  %1151 = vmatpush.bf16.msra.mxu0 %v1861_v3  ;;  %v1883_v30 = vld [vmem:[%s2699_s1 + $0xe0] sm:$0xff]  ;;  %v2106_v34 = vadd.s32 48, %v2045_v4  ;;  %v1858_v35 = vld [vmem:[%s2699_s1 + $0x18] sm:$0xff]  ;;  %v2112_v36 = vunpack.c.l.bf16 %v2094_v25  ;;  %v2115_v38 = vadd.s32 56, %v2045_v4  ;;  %v2121_v40 = vunpack.c.h.bf16 %v2094_v25  ;;  %v1873_v54 = vld [vmem:[%s2699_s1 + $0x90] sm:$0xff] }
  0x11   : > { %v200_v12 = vcvt.s32.f32 %v2054_v7  ;;  %v201_v13 = vcvt.s32.f32 %v2057_v8  ;;  %1209 = vmatpush.bf16.msra.mxu2 %v1877_v5  ;;  %v197_v15 = vcvt.s32.f32 %v2064_v10  ;;  %v2101_v31 = vld [vmem:[%s165_s6] sm:$0xff]   ;;  %v204_v33 = vadd.f32 0.5, %v196_v19  ;;  %v1874_v39 = vld [vmem:[%s2699_s1 + $0x98] sm:$0xff]  ;;  %v1881_v2 = vld [vmem:[%s2699_s1 + $0xd0] sm:$0xff] }
  0x12   : > { %1238 = vmatpush.bf16.msra.mxu3 %v1885_v9  ;;  %v2124_v41 = vunpack.c.l.bf16 %v2096_v26  ;;  %v2127_v44 = vunpack.c.l.bf16 %v2101_v31  ;;  %v2130_v45 = vunpack.c.h.bf16 %v2103_v32  ;;  %v1882_v48 = vld [vmem:[%s2699_s1 + $0xd8] sm:$0xff]  ;;  %v202_v50 = vcvt.s32.f32 %v2106_v34  ;;  %v1856_v5 = vld [vmem:[%s2699_s1 + $0x8] sm:$0xff] }
  0x13   : > { %v208_v16 = vadd.f32 0.5, %v200_v12  ;;  %v209_v17 = vadd.f32 0.5, %v201_v13  ;;  %v205_v23 = vadd.f32 0.5, %v197_v15  ;;  %v212_v42 = vmul.f32 0.125, %v204_v33  ;;  %v1872_v9 = vld [vmem:[%s2699_s1 + $0x88] sm:$0xff]  ;;  %v1894_v33 = vld [vmem:[%s2699_s1 + $0x138] sm:$0xff] }
  0x14   : > { %1971 = vmatpush.bf16.msra.mxu1 %v1860_v11  ;;  %1152 = vmatpush.bf16.msra.mxu0 %v1860_v11  ;;  %v246_v52 = vrot.slane %v2112_v36, 7  ;;  %vm252_vm0 = vcmp.lt.s32.totalorder %v2045_v4, 1  ;;  %v203_v53 = vcvt.s32.f32 %v2115_v38  ;;  %v247_v55 = vrot.slane %v2121_v40, 7  ;;  %v1916_v38 = vld [vmem:[%s2699_s1 + $0x1e8] sm:$0xff] }
  0x15   : > { %v216_v21 = vmul.f32 0.125, %v208_v16  ;;  %v217_v22 = vmul.f32 0.125, %v209_v17  ;;  %1210 = vmatpush.bf16.msra.mxu2 %v1876_v14  ;;  %v213_v28 = vmul.f32 0.125, %v205_v23  ;;  %v220_v49 = vfloor.f32 %v212_v42 }
  0x16   : > { %1239 = vmatpush.bf16.msra.mxu3 %v1884_v18  ;;  %v248_v56 = vrot.slane %v2124_v41, 7  ;;  %v2148_v57 = vunpack.c.h.bf16 %v2101_v31  ;;  %v244_v60 = vrot.slane %v2127_v44, 7  ;;  %v251_v61 = vrot.slane %v2130_v45, 7  ;;  %v1880_v18 = vld [vmem:[%s2699_s1 + $0xc8] sm:$0xff] }
  0x17   : > { %v224_v27 = vfloor.f32 %v216_v21  ;;  %v225_v29 = vfloor.f32 %v217_v22  ;;  %v221_v37 = vfloor.f32 %v213_v28  ;;  %v228_v58 = vmul.f32 8.0, %v220_v49  ;;  %v1871_v28 = vld [vmem:[%s2699_s1 + $0x80] sm:$0xff] }
  0x18   : > { %1972 = vmatpush.bf16.msra.mxu1 %v1859_v20  ;;  %1153 = vmatpush.bf16.msra.mxu0 %v1859_v20  ;;  %v2155_v62 = vadd.s32 16, %v2045_v4  ;;  %v210_v3 = vadd.f32 0.5, %v202_v50  ;;  %vm341_vm1 = vcmp.lt.s32.totalorder %v2045_v4, 7  ;;  %v211_v6 = vadd.f32 0.5, %v203_v53  ;;  %v1855_v20 = vld [vmem:[%s2699_s1] sm:$0xff] }
  0x19   : > { %1211 = vmatpush.bf16.msra.mxu2 %v1875_v24  ;;  %v232_v43 = vmul.f32 8.0, %v224_v27  ;;  %v233_v46 = vmul.f32 8.0, %v225_v29  ;;  %v229_v47 = vmul.f32 8.0, %v221_v37  ;;  %v2165_v1 = vsub.f32 %v196_v19, %v228_v58  ;;  %v1870_v27 = vld [vmem:[%s2699_s1 + $0x78] sm:$0xff]  ;;  %v1879_v58 = vld [vmem:[%s2699_s1 + $0xc0] sm:$0xff] }
  0x1a   : > { %1240 = vmatpush.bf16.msra.mxu3 %v1883_v30  ;;  %v2179_v7 = vadd.s32 24, %v2045_v4  ;;  %v198_v8 = vcvt.s32.f32 %v2155_v62  ;;  %v333_v10 = vrot.slane %v2127_v44, 1  ;;  %v334_v11 = vrot.slane %v2148_v57, 1  ;;  %v1867_v49 = vld [vmem:[%s2699_s1 + $0x60] sm:$0xff] }
  0x1b   : > { %v2150_v59 = vsub.f32 %v200_v12, %v232_v43  ;;  %v2159_v63 = vsub.f32 %v201_v13, %v233_v46  ;;  %v2163_v0 = vsub.f32 %v197_v15, %v229_v47  ;;  %vm350_vm2 = vcmp.lt.f32.partialorder %v2165_v1, 6.5 }
  0x1c   : > { %1973 = vmatpush.bf16.msra.mxu1 %v1858_v35  ;;  %1154 = vmatpush.bf16.msra.mxu0 %v1858_v35  ;;  %v2193_v12 = vsel %vm252_vm0, %v247_v55, %v248_v56  ;;  %v2199_v13 = vsel %vm252_vm0, %v246_v52, %v247_v55  ;;  %v199_v15 = vcvt.s32.f32 %v2179_v7  ;;  %v206_v16 = vadd.f32 0.5, %v198_v8  ;;  %v1910_v35 = vld [vmem:[%s2699_s1 + $0x1b8] sm:$0xff] }
  0x1d   : > { %1212 = vmatpush.bf16.msra.mxu2 %v1874_v39  ;;  %vm351_vm3 = vcmp.lt.f32.partialorder %v2163_v0, 6.5  ;;  %vm273_vm5 = vcmp.gt.f32.partialorder %v2150_v59, 0.5  ;;  %vm274_vm6 = vcmp.gt.f32.partialorder %v2159_v63, 0.5  ;;  %v2218_v17 = vsel %vm252_vm0, %v251_v61, %v244_v60 }
  0x1e   : > { %1241 = vmatpush.bf16.msra.mxu3 %v1882_v48  ;;  %vm2203_vm4 = vmpackc.low %vm351_vm3, %vm350_vm2  ;;  %v218_v19 = vmul.f32 0.125, %v210_v3  ;;  %v219_v21 = vmul.f32 0.125, %v211_v6  ;;  %v207_v22 = vadd.f32 0.5, %v199_v15  ;;  %v245_v23 = vrot.slane %v2148_v57, 7  ;;  %v1869_v3 = vld [vmem:[%s2699_s1 + $0x70] sm:$0xff] }
  0x1f   : > { %v335_v24 = vrot.slane %v2112_v36, 1  ;;  %vm270_vm7 = vcmp.gt.f32.partialorder %v2163_v0, 0.5  ;;  %v2241_v29 = vsel %vm341_vm1, %v333_v10, %v334_v11  ;;  %v214_v30 = vmul.f32 0.125, %v206_v16  ;;  %vm2259_vm8 = vmpackc.low %vm274_vm6, %vm273_vm5  ;;  %v1892_v0 = vld [vmem:[%s2699_s1 + $0x128] sm:$0xff] }
  0x20   : > { %1974 = vmatpush.bf16.msra.mxu1 %v1857_v51  ;;  %1155 = vmatpush.bf16.msra.mxu0 %v1857_v51  ;;  %v215_v37 = vmul.f32 0.125, %v207_v22  ;;  %v2265_v43 = vpack.c.bf16 %v2193_v12, %v2199_v13  ;;  %v2004_v46 = vmov 0.0   ;;  %vm2274_vm10 = vmpackc.low %vm270_vm7, %vm2005_vm9  ;;  %v227_v55 = vfloor.f32 %v219_v21 }
  0x21   : > { %1213 = vmatpush.bf16.msra.mxu2 %v1873_v54  ;;  %v2253_v39 = vsel %vm341_vm1, %v334_v11, %v335_v24  ;;  %v1780_v47 = vpack.c.bf16 %v2218_v17, %v2004_v46  ;;  %v1792_v51 = vpack.c.bf16 %v2241_v29, %v2004_v46  ;;  %v226_v54 = vfloor.f32 %v218_v19  ;;  %vm1791_vm11 = vmpackc.low %vm351_vm3, %vm2005_vm9  ;;  %v1909_v11 = vld [vmem:[%s2699_s1 + $0x1b0] sm:$0xff] }
  0x22   : > { %1242 = vmatpush.bf16.msra.mxu3 %v1881_v2  ;;  %v1816_v48 = vpack.c.bf16 %v2253_v39, %v2241_v29  ;;  %v2289_v2 = vsel %vm252_vm0, %v244_v60, %v245_v23  ;;  %v223_v6 = vfloor.f32 %v215_v37  ;;  %vm269_vm12 = vcmp.gt.f32.partialorder %v2165_v1, 0.5  ;;  %v1893_v60 = vld [vmem:[%s2699_s1 + $0x130] sm:$0xff]  ;;  %v1908_v1 = vld [vmem:[%s2699_s1 + $0x1a8] sm:$0xff] }
  0x23   : > { %v2313_v16 = vunpack.c.h.bf16 %v2096_v26  ;;  %v2318_v19 = vunpack.c.l.bf16 %v2103_v32  ;;  %v235_v21 = vmul.f32 8.0, %v227_v55  ;;  %vm2324_vm13 = vmpackc.low %vm270_vm7, %vm269_vm12  ;;  %v336_v34 = vrot.slane %v2121_v40, 1  ;;  %v1890_v55 = vld [vmem:[%s2699_s1 + $0x118] sm:$0xff] }
  0x24   : > { %1975 = vmatpush.bf16.msra.mxu1 %v1856_v5  ;;  %1156 = vmatpush.bf16.msra.mxu0 %v1856_v5  ;;  %v222_v5 = vfloor.f32 %v214_v30  ;;  %v1917_v30 = vld [vmem:[%s2699_s1 + $0x1f0] sm:$0xff]  ;;  %vm354_vm12 = vcmp.lt.f32.partialorder %v2150_v59, 6.5  ;;  %v568_v14 = vpack.c.bf16 0.0, %v2130_v45 }
  0x25   : > { %1214 = vmatpush.bf16.msra.mxu2 %v1872_v9  ;;  %v1918_v9 = vld [vmem:[%s2699_s1 + $0x1f8] sm:$0xff]  ;;  %v2349_v37 = vsub.f32 %v203_v53, %v235_v21  ;;  %v1907_v53 = vld [vmem:[%s2699_s1 + $0x1a0] sm:$0xff]  ;;  %v1888_v21 = vld [vmem:[%s2699_s1 + $0x108] sm:$0xff] }
  0x26   : > { %1243 = vmatpush.bf16.msra.mxu3 %v1880_v18  ;;  %v1804_v18 = vpack.c.bf16 %v2289_v2, %v2218_v17  ;;  %v1868_v17 = vld [vmem:[%s2699_s1 + $0x68] sm:$0xff] }
  0x27   : > { %vm276_vm15 = vcmp.gt.f32.partialorder %v2349_v37, 0.5 }
  0x28   : > { %1976 = vmatpush.bf16.msra.mxu1 %v1855_v20  ;;  %1157 = vmatpush.bf16.msra.mxu0 %v1855_v20  ;;  %v234_v20 = vmul.f32 8.0, %v226_v54 }
  0x29   : > { %1215 = vmatpush.bf16.msra.mxu2 %v1871_v28  ;;  %v231_v28 = vmul.f32 8.0, %v223_v6 }
  0x2a   : > { %1244 = vmatpush.bf16.msra.mxu3 %v1879_v58 }
  0x2b   : > { %1787 = vmatmul.msk.bf16.vlgmr.msra.gmra.mxu1 %vm2259_vm8, %v2265_v43  ;;  %1781 = vmatmul.msk.bf16.vlgmr.msra.gmra.mxu0 %vm2274_vm10, %v1780_v47  ;;  %v250_v47 = vrot.slane %v2318_v19, 7  ;;  %v239_v54 = vsub.f32 %v199_v15, %v231_v28  ;;  %v2396_v15 = vsel %vm341_vm1, %v335_v24, %v336_v34  ;;  %v338_v28 = vrot.slane %v2313_v16, 1 }
  0x2c   : > { %1179 = vmatpush.bf16.msrb.mxu1 %v1870_v27  ;;  %1266 = vmatpush.bf16.msrb.mxu0 %v1894_v33  ;;  %v230_v27 = vmul.f32 8.0, %v222_v5  ;;  %v249_v33 = vrot.slane %v2313_v16, 7  ;;  %v1865_v5 = vld [vmem:[%s2699_s1 + $0x50] sm:$0xff] }
  0x2d   : > { %1324 = vmatpush.bf16.msrb.mxu2 %v1910_v35  ;;  %1805 = vmatmul.msk.bf16.vlgmr.msra.gmra.mxu3 %vm2324_vm13, %v1804_v18  ;;  %v2345_v35 = vsub.f32 %v202_v50, %v234_v20  ;;  %v1891_v50 = vld [vmem:[%s2699_s1 + $0x120] sm:$0xff]  ;;  %vm272_vm3 = vcmp.gt.f32.partialorder %v239_v54, 0.5  ;;  %vm353_vm6 = vcmp.lt.f32.partialorder %v239_v54, 6.5  ;;  %v2450_v18 = vpack.c.bf16 %v2124_v41, %v2121_v40  ;;  %v1905_v20 = vld [vmem:[%s2699_s1 + $0x190] sm:$0xff]  ;;  %v1914_v40 = vld [vmem:[%s2699_s1 + $0x1d8] sm:$0xff] }
  0x2e   : > { %1793 = vmatmul.msk.bf16.vlgmr.msra.gmra.mxu2 %vm1791_vm11, %v1792_v51  ;;  %1353 = vmatpush.bf16.msrb.mxu3 %v1918_v9  ;;  %v238_v51 = vsub.f32 %v198_v8, %v230_v27  ;;  %v2373_v62 = vsel %vm252_vm0, %v248_v56, %v249_v33  ;;  %v2379_v7 = vsel %vm252_vm0, %v249_v33, %v250_v47  ;;  %v1866_v56 = vld [vmem:[%s2699_s1 + $0x58] sm:$0xff]  ;;  %v337_v27 = vrot.slane %v2124_v41, 1 }
  0x2f   : > { %vm275_vm14 = vcmp.gt.f32.partialorder %v2345_v35, 0.5  ;;  %v258_v8 = vsel %vm252_vm0, %v245_v23, %v246_v52  ;;  %v2409_v23 = vpack.c.bf16 %v2379_v7, %v2373_v62 }
  0x30   : > { %1180 = vmatpush.bf16.msrb.mxu1 %v1869_v3  ;;  %1267 = vmatpush.bf16.msrb.mxu0 %v1893_v60  ;;  %vm271_vm2 = vcmp.gt.f32.partialorder %v238_v51, 0.5  ;;  %vm352_vm5 = vcmp.lt.f32.partialorder %v238_v51, 6.5  ;;  %vm2403_vm7 = vmpackc.low %vm276_vm15, %vm275_vm14  ;;  %v2412_v24 = vpack.c.bf16 %v258_v8, %v2289_v2  ;;  %v2420_v3 = vpack.c.bf16 %v2396_v15, %v2253_v39  ;;  %v1889_v2 = vld [vmem:[%s2699_s1 + $0x110] sm:$0xff]  ;;  %v1906_v60 = vld [vmem:[%s2699_s1 + $0x198] sm:$0xff] }
  0x31   : > { %1325 = vmatpush.bf16.msrb.mxu2 %v1909_v11  ;;  %vm2414_vm10 = vmpackc.low %vm272_vm3, %vm271_vm2  ;;  %v1807_v9 = vpack.c.bf16 %v2199_v13, %v258_v8  ;;  %v1915_v11 = vld [vmem:[%s2699_s1 + $0x1e0] sm:$0xff]  ;;  %v1864_v13 = vld [vmem:[%s2699_s1 + $0x48] sm:$0xff]  ;;  %v2482_v41 = vsel %vm341_vm1, %v337_v27, %v338_v28  ;;  %v2486_v33 = vsel %vm341_vm1, %v336_v34, %v337_v27  ;;  %vm355_vm15 = vcmp.lt.f32.partialorder %v2159_v63, 6.5 }
  0x32   : > { %1354 = vmatpush.bf16.msrb.mxu3 %v1917_v30  ;;  %vm2425_vm11 = vmpackc.low %vm353_vm6, %vm352_vm5  ;;  %v1902_v30 = vld [vmem:[%s2699_s1 + $0x178] sm:$0xff]  ;;  %v535_v51 = vpack.c.bf16 %v2127_v44, %v2004_v46  ;;  %v2497_v54 = vpack.c.bf16 %v2482_v41, %v2486_v33  ;;  %v1925_v34 = vld [vmem:[%s2699_s1 + $0x230] sm:$0xff]  ;;  %v2526_v8 = vpack.c.bf16 %v2318_v19, %v2313_v16  ;;  %vm356_vm3 = vcmp.lt.f32.partialorder %v2345_v35, 6.5 }
  0x33   : > { %vm2502_vm2 = vmpackc.low %vm355_vm15, %vm354_vm12  ;;  %v1900_v63 = vld [vmem:[%s2699_s1 + $0x168] sm:$0xff]  ;;  %v1923_v16 = vld [vmem:[%s2699_s1 + $0x220] sm:$0xff]  ;;  %vm357_vm5 = vcmp.lt.f32.partialorder %v2349_v37, 6.5 }
  0x34   : > { %1181 = vmatpush.bf16.msrb.mxu1 %v1868_v17  ;;  %1268 = vmatpush.bf16.msrb.mxu0 %v1892_v0  ;;  %v1863_v17 = vld [vmem:[%s2699_s1 + $0x40] sm:$0xff]  ;;  %v1904_v46 = vld [vmem:[%s2699_s1 + $0x188] sm:$0xff]  ;;  %vm2574_vm6 = vmpackc.low %vm357_vm5, %vm356_vm3 }
  0x35   : > { %1326 = vmatpush.bf16.msrb.mxu2 %v1908_v1  ;;  %v1887_v0 = vld [vmem:[%s2699_s1 + $0x100] sm:$0xff]  ;;  %v1926_v1 = vld [vmem:[%s2699_s1 + $0x238] sm:$0xff] }
  0x36   : > { %1355 = vmatpush.bf16.msrb.mxu3 %v1916_v38  ;;  %v1810_v38 = vpack.c.bf16 %v2373_v62, %v2193_v12  ;;  %v1912_v12 = vld [vmem:[%s2699_s1 + $0x1c8] sm:$0xff]  ;;  %v1899_v62 = vld [vmem:[%s2699_s1 + $0x160] sm:$0xff] }
  0x38   : > { %1182 = vmatpush.bf16.msrb.mxu1 %v1867_v49  ;;  %1269 = vmatpush.bf16.msrb.mxu0 %v1891_v50  ;;  %v1901_v49 = vld [vmem:[%s2699_s1 + $0x170] sm:$0xff] }
  0x39   : > { %1327 = vmatpush.bf16.msrb.mxu2 %v1907_v53  ;;  %v1913_v50 = vld [vmem:[%s2699_s1 + $0x1d0] sm:$0xff]  ;;  %v1924_v53 = vld [vmem:[%s2699_s1 + $0x228] sm:$0xff] }
  0x3a   : > { %1356 = vmatpush.bf16.msrb.mxu3 %v1915_v11  ;;  %v541_v11 = vpack.c.bf16 %v2112_v36, %v2148_v57  ;;  %v1896_v57 = vld [vmem:[%s2699_s1 + $0x148] sm:$0xff] }
  0x3b   : > { %1790 = vmatmul.msk.bf16.gmra.mxu1 %vm2403_vm7, %v2409_v23  ;;  %1784 = vmatmul.msk.bf16.gmra.mxu0 %vm2414_vm10, %v2412_v24 }
  0x3c   : > { %1183 = vmatpush.bf16.msrb.mxu1 %v1866_v56  ;;  %1270 = vmatpush.bf16.msrb.mxu0 %v1890_v55  ;;  %v339_v56 = vrot.slane %v2318_v19, 1  ;;  %v340_v55 = vrot.slane %v2130_v45, 1  ;;  %v1922_v19 = vld [vmem:[%s2699_s1 + $0x218] sm:$0xff] }
  0x3d   : > { %1328 = vmatpush.bf16.msrb.mxu2 %v1906_v60  ;;  %1808 = vmatmul.msk.bf16.gmra.mxu3 %vm2414_vm10, %v1807_v9  ;;  %v1897_v60 = vld [vmem:[%s2699_s1 + $0x150] sm:$0xff] }
  0x3e   : > { %1796 = vmatmul.msk.bf16.gmra.mxu2 %vm2425_vm11, %v2420_v3  ;;  %1357 = vmatpush.bf16.msrb.mxu3 %v1914_v40  ;;  %v2555_v9 = vsel %vm341_vm1, %v338_v28, %v339_v56  ;;  %v349_v29 = vsel %vm341_vm1, %v340_v55, %v333_v10 }
  0x3f   : > { %v1822_v39 = vpack.c.bf16 %v2555_v9, %v2482_v41 }
  0x40   : > { %1184 = vmatpush.bf16.msrb.mxu1 %v1865_v5  ;;  %1271 = vmatpush.bf16.msrb.mxu0 %v1889_v2  ;;  %v1898_v5 = vld [vmem:[%s2699_s1 + $0x158] sm:$0xff]  ;;  %v2551_v2 = vsel %vm341_vm1, %v339_v56, %v340_v55 }
  0x41   : > { %1329 = vmatpush.bf16.msrb.mxu2 %v1905_v20  ;;  %v253_v20 = vsel %vm252_vm0, %v250_v47, %v251_v61  ;;  %v1911_v61 = vld [vmem:[%s2699_s1 + $0x1c0] sm:$0xff]  ;;  %vm1836_vm0 = vmpackc.low %vm2005_vm9, %vm275_vm14  ;;  %v1825_v22 = vpack.c.bf16 %v349_v29, %v2551_v2 }
  0x42   : > { %1358 = vmatpush.bf16.msrb.mxu3 %v1913_v50  ;;  %v1813_v36 = vpack.c.bf16 %v253_v20, %v2379_v7  ;;  %v1895_v47 = vld [vmem:[%s2699_s1 + $0x140] sm:$0xff]  ;;  %v1920_v7 = vld [vmem:[%s2699_s1 + $0x208] sm:$0xff] }
  0x44   : > { %1185 = vmatpush.bf16.msrb.mxu1 %v1864_v13  ;;  %1272 = vmatpush.bf16.msrb.mxu0 %v1888_v21  ;;  %v1801_v13 = vpack.c.bf16 %v2551_v2, %v2555_v9  ;;  %v1919_v21 = vld [vmem:[%s2699_s1 + $0x200] sm:$0xff] }
  0x45   : > { %1330 = vmatpush.bf16.msrb.mxu2 %v1904_v46 }
  0x46   : > { %1359 = vmatpush.bf16.msrb.mxu3 %v1912_v12 }
  0x48   : > { %1186 = vmatpush.bf16.msrb.mxu1 %v1863_v17  ;;  %1273 = vmatpush.bf16.msrb.mxu0 %v1887_v0 }
  0x4a   : > { %1360 = vmatpush.bf16.msrb.mxu3 %v1911_v61 }
  0x4b   : > { %1187 = vmatmul.bf16.vlgmr.msrb.gmra.mxu1 %v535_v51  ;;  %1274 = vmatmul.bf16.vlgmr.msrb.gmra.mxu0 %v2101_v31  ;;  %v1903_v31 = vld [vmem:[%s2699_s1 + $0x180] sm:$0xff] }
  0x4c   : > { %1295 = vmatpush.bf16.msra.mxu1 %v1902_v30  ;;  %1382 = vmatpush.bf16.msra.mxu0 %v1926_v1 }
  0x4d   : > { %1811 = vmatmul.msk.bf16.gmra.mxu3 %vm2259_vm8, %v1810_v38  ;;  %1331 = vmatpush.bf16.msrb.mxu2 %v1903_v31 }
  0x4e   : > { %1799 = vmatmul.msk.bf16.gmra.mxu2 %vm2502_vm2, %v2497_v54 }
  0x50   : > { %1296 = vmatpush.bf16.msra.mxu1 %v1901_v49  ;;  %1383 = vmatpush.bf16.msra.mxu0 %v1925_v34 }
  0x51   : > { %1977 = vmatpush.bf16.msra.mxu2 %v1926_v1 }
  0x54   : > { %1297 = vmatpush.bf16.msra.mxu1 %v1900_v63  ;;  %1384 = vmatpush.bf16.msra.mxu0 %v1924_v53 }
  0x55   : > { %1978 = vmatpush.bf16.msra.mxu2 %v1925_v34 }
  0x58   : > { %1298 = vmatpush.bf16.msra.mxu1 %v1899_v62  ;;  %1385 = vmatpush.bf16.msra.mxu0 %v1923_v16 }
  0x59   : > { %1979 = vmatpush.bf16.msra.mxu2 %v1924_v53 }
  0x5b   : > { %1192 = vmatmul.bf16.gmra.mxu1 %v541_v11  ;;  %1279 = vmatmul.bf16.gmra.mxu0 %v2094_v25  ;;  %v1921_v25 = vld [vmem:[%s2699_s1 + $0x210] sm:$0xff] }
  0x5c   : > { %1299 = vmatpush.bf16.msra.mxu1 %v1898_v5  ;;  %1386 = vmatpush.bf16.msra.mxu0 %v1922_v19 }
  0x5d   : > { %1980 = vmatpush.bf16.msra.mxu2 %v1923_v16  ;;  %1814 = vmatmul.msk.bf16.gmra.mxu3 %vm2403_vm7, %v1813_v36 }
  0x5e   : > { %1802 = vmatmul.msk.bf16.gmra.mxu2 %vm2574_vm6, %v1801_v13 }
  0x60   : > { %1300 = vmatpush.bf16.msra.mxu1 %v1897_v60  ;;  %1387 = vmatpush.bf16.msra.mxu0 %v1921_v25 }
  0x61   : > { %1981 = vmatpush.bf16.msra.mxu2 %v1922_v19 }
  0x64   : > { %1301 = vmatpush.bf16.msra.mxu1 %v1896_v57  ;;  %1388 = vmatpush.bf16.msra.mxu0 %v1920_v7 }
  0x65   : > { %1982 = vmatpush.bf16.msra.mxu2 %v1921_v25 }
  0x68   : > { %1302 = vmatpush.bf16.msra.mxu1 %v1895_v47  ;;  %1389 = vmatpush.bf16.msra.mxu0 %v1919_v21 }
  0x69   : > { %1983 = vmatpush.bf16.msra.mxu2 %v1920_v7 }
  0x6b   : > { %1197 = vmatmul.bf16.gmra.mxu1 %v2450_v18  ;;  %1284 = vmatmul.bf16.gmra.mxu0 %v2096_v26  ;;  %v1819_v26 = vpack.c.bf16 %v2486_v33, %v2396_v15 }
  0x6d   : > { %1984 = vmatpush.bf16.msra.mxu2 %v1919_v21  ;;  %1361 = vmatmul.bf16.vlgmr.msrb.gmra.mxu3 %v541_v11 }
  0x6e   : > { %1829 = vmatmul.msk.bf16.vlgmr.msrb.gmra.mxu2 %vm2324_vm13, %v2412_v24 }
  0x7b   : > { %1202 = vmatmul.bf16.gmra.mxu1 %v2526_v8  ;;  %1289 = vmatmul.bf16.gmra.mxu0 %v2103_v32  ;;  %v1837_v32 = vpack.c.bf16 0.0, %v253_v20 }
  0x7d   : > { %1366 = vmatmul.bf16.gmra.mxu3 %v2450_v18  ;;  %v1995_v18 = vld [vmem:[%s2700_s2] ss:$0 sm:$0xff] }
  0x7e   : > { %1832 = vmatmul.msk.bf16.gmra.mxu2 %vm2414_vm10, %v2265_v43 }
  0x8b   : > { %1817 = vmatmul.msk.bf16.vlgmr.msra.gmra.mxu1 %vm2203_vm4, %v1816_v48  ;;  %1841 = vmatmul.msk.bf16.vlgmr.msra.gmra.mxu0 %vm2203_vm4, %v2420_v3  ;;  %v1849_v48 = vpack.c.bf16 0.0, %v349_v29  ;;  %vm1848_vm4 = vmpackc.low %vm2005_vm9, %vm356_vm3 }
  0x8d   : > { %1371 = vmatmul.bf16.gmra.mxu3 %v2526_v8 }
  0x8e   : > { %1835 = vmatmul.msk.bf16.gmra.mxu2 %vm2259_vm8, %v2409_v23 }
  0x9b   : > { %1820 = vmatmul.msk.bf16.gmra.mxu1 %vm2425_vm11, %v1819_v26  ;;  %1844 = vmatmul.msk.bf16.gmra.mxu0 %vm2425_vm11, %v2497_v54 }
  0x9d   : > { %1376 = vmatmul.bf16.gmra.mxu3 %v568_v14 }
  0x9e   : > { %1838 = vmatmul.msk.bf16.gmra.mxu2 %vm1836_vm0, %v1837_v32 }
  0xa8   : > { %v1169_v42 = vpop.f32.mrf.mxu1  ;;  %v1159_v43 = vpop.f32.mrf.mxu0 }
  0xa9   : > { %v1160_v40 = vadd.f32 %v1995_v18, %v1159_v43 }
  0xab   : > { %1823 = vmatmul.msk.bf16.gmra.mxu1 %vm2502_vm2, %v1822_v39  ;;  %1847 = vmatmul.msk.bf16.gmra.mxu0 %vm2502_vm2, %v1801_v13  ;;  %v1170_v13 = vadd.f32 %v1995_v18, %v1169_v42 }
  0xae   : > { %1850 = vmatmul.msk.bf16.vlgmr.msra.gmra.mxu2 %vm1848_vm4, %v1849_v48 }
  0xb0   : > { %v1171_v4 = vpop.f32.mrf.mxu1  ;;  %v1161_v45 = vpop.f32.mrf.mxu0 }
  0xb1   : > { %v1217_v44 = vpop.f32.mrf.mxu2  ;;  %v1246_v10 = vpop.f32.mrf.mxu3  ;;  %v1162_v33 = vadd.f32 %v1995_v18, %v1161_v45  ;;  %v1172_v47 = vadd.f32 %v1995_v18, %v1171_v4 }
  0xb8   : > { %v1174_v52 = vpop.f32.mrf.mxu1  ;;  %v1164_v23 = vpop.f32.mrf.mxu0 }
  0xb9   : > { %v1219_v15 = vpop.f32.mrf.mxu2  ;;  %v2655_v24 = vpop.f32.mrf.mxu3  ;;  %v1165_v38 = vadd.f32 %v1995_v18, %v1164_v23  ;;  %v1175_v43 = vadd.f32 %v1995_v18, %v1174_v52 }
  0xbb   : > { %1826 = vmatmul.msk.bf16.gmra.mxu1 %vm2574_vm6, %v1825_v22 }
  0xc0   : > { %v1176_v58 = vpop.f32.mrf.mxu1  ;;  %v1166_v3 = vpop.f32.mrf.mxu0 }
  0xc1   : > { %v1222_v35 = vpop.f32.mrf.mxu2  ;;  %v1251_v6 = vpop.f32.mrf.mxu3  ;;  %v1167_v16 = vadd.f32 %v1995_v18, %v1166_v3  ;;  %v1177_v23 = vadd.f32 %v1995_v18, %v1176_v58 }
  0xc8   : > { %v1188_v27 = vpop.f32.mrf.mxu1  ;;  %v1275_v28 = vpop.f32.mrf.mxu0 }
  0xc9   : > { %v1224_v17 = vpop.f32.mrf.mxu2  ;;  %v1189_v30 = vadd.f32 %v1188_v27, %v1160_v40  ;;  %v2662_v1 = vpop.f32.mrf.mxu3 }
  0xcb   : > { %v1218_v0 = vadd.f32 %v1217_v44, %v1189_v30 }
  0xcd   : > { %v1247_v41 = vadd.f32 %v1246_v10, %v1218_v0 }
  0xcf   : > { %v1276_v49 = vadd.f32 %v1275_v28, %v1247_v41 }
  0xd0   : > { %v1190_v54 = vpop.f32.mrf.mxu1  ;;  %v1277_v34 = vpop.f32.mrf.mxu0 }
  0xd1   : > { %v1227_v51 = vpop.f32.mrf.mxu2  ;;  %v1191_v59 = vadd.f32 %v1190_v54, %v1162_v33  ;;  %v1256_v46 = vpop.f32.mrf.mxu3 }
  0xd3   : > { %v1220_v63 = vadd.f32 %v1219_v15, %v1191_v59 }
  0xd5   : > { %v1249_v0 = vadd.f32 %v2655_v24, %v1220_v63 }
  0xd7   : > { %v1278_v33 = vadd.f32 %v1277_v34, %v1249_v0 }
  0xd8   : > { %v1193_v53 = vpop.f32.mrf.mxu1  ;;  %v1280_v8 = vpop.f32.mrf.mxu0 }
  0xd9   : > { %v1229_v50 = vpop.f32.mrf.mxu2  ;;  %v1194_v31 = vadd.f32 %v1193_v53, %v1165_v38  ;;  %v2664_v5 = vpop.f32.mrf.mxu3 }
  0xdb   : > { %v1223_v12 = vadd.f32 %v1222_v35, %v1194_v31 }
  0xdd   : > { %v1252_v62 = vadd.f32 %v1251_v6, %v1223_v12 }
  0xdf   : > { %v1281_v56 = vadd.f32 %v1280_v8, %v1252_v62 }
  0xe0   : > { %v1195_v2 = vpop.f32.mrf.mxu1  ;;  %v1282_v9 = vpop.f32.mrf.mxu0 }
  0xe1   : > { %v1232_v55 = vpop.f32.mrf.mxu2  ;;  %v1196_v60 = vadd.f32 %v1195_v2, %v1167_v16  ;;  %v1261_v61 = vpop.f32.mrf.mxu3 }
  0xe3   : > { %v1225_v11 = vadd.f32 %v1224_v17, %v1196_v60 }
  0xe5   : > { %v1254_v63 = vadd.f32 %v2662_v1, %v1225_v11 }
  0xe8   : > { %v1198_v37 = vpop.f32.mrf.mxu1  ;;  %v1285_v36 = vpop.f32.mrf.mxu0 }
  0xe9   : > { %v1234_v20 = vpop.f32.mrf.mxu2  ;;  %v1199_v57 = vadd.f32 %v1198_v37, %v1170_v13  ;;  %v2670_v39 = vpop.f32.mrf.mxu3 }
  0xeb   : > { %v1228_v19 = vadd.f32 %v1227_v51, %v1199_v57 }
  0xed   : > { %v1257_v25 = vadd.f32 %v1256_v46, %v1228_v19 }
  0xef   : > { %v2666_v7 = vadd.f32 %v1285_v36, %v1257_v25 }
  0xf0   : > { %v1200_v26 = vpop.f32.mrf.mxu1  ;;  %v2668_v32 = vpop.f32.mrf.mxu0 }
  0xf1   : > { %v1333_v21 = vpop.f32.mrf.mxu2  ;;  %v1201_v14 = vadd.f32 %v1200_v26, %v1172_v47  ;;  %v1362_v15 = vpop.f32.mrf.mxu3 }
  0xf3   : > { %v1230_v29 = vadd.f32 %v1229_v50, %v1201_v14 }
  0xf8   : > { %v1203_v48 = vpop.f32.mrf.mxu1  ;;  %v1290_v44 = vpop.f32.mrf.mxu0 }
  0xf9   : > { %v1335_v42 = vpop.f32.mrf.mxu2  ;;  %v1204_v45 = vadd.f32 %v1203_v48, %v1175_v43  ;;  %v1364_v27 = vpop.f32.mrf.mxu3 }
  0xfb   : > { %v1233_v10 = vadd.f32 %v1232_v55, %v1204_v45  ;;  %v1283_v55 = vadd.f32 %v1282_v9, %v1254_v63 }
  0xfd   : > { %v1262_v22 = vadd.f32 %v1261_v61, %v1233_v10 }
  0xff   : > { %v2672_v4 = vadd.f32 %v1290_v44, %v1262_v22 }
 0x100   : > { %v1205_v3 = vpop.f32.mrf.mxu1  ;;  %v2674_v6 = vpop.f32.mrf.mxu0 }
 0x101   : > { %v1338_v35 = vpop.f32.mrf.mxu2  ;;  %v1206_v40 = vadd.f32 %v1205_v3, %v1177_v23  ;;  %v1367_v59 = vpop.f32.mrf.mxu3 }
 0x103   : > { %v1235_v17 = vadd.f32 %v1234_v20, %v1206_v40 }
 0x108   : > { %v1304_v28 = vpop.f32.mrf.mxu1  ;;  %v1391_v30 = vpop.f32.mrf.mxu0 }
 0x109   : > { %v1340_v52 = vpop.f32.mrf.mxu2  ;;  %v1305_v41 = vadd.f32 %v1304_v28, %v1276_v49  ;;  %v1369_v62 = vpop.f32.mrf.mxu3 }
 0x10b   : > { %v1334_v51 = vadd.f32 %v1333_v21, %v1305_v41 }
 0x10d   : > { %v1363_v46 = vadd.f32 %v1362_v15, %v1334_v51 }
 0x10f   : > { %v1392_v8 = vadd.f32 %v1391_v30, %v1363_v46 }
 0x110   : > { %v1306_v54 = vpop.f32.mrf.mxu1  ;;  %v1393_v58 = vpop.f32.mrf.mxu0 }
 0x111   : > { %v1307_v18 = vadd.f32 %v1306_v54, %v1278_v33  ;;  %v1343_v50 = vpop.f32.mrf.mxu2  ;;  %v1372_v61 = vpop.f32.mrf.mxu3 }
 0x113   : > { %v1336_v38 = vadd.f32 %v1335_v42, %v1307_v18 }
 0x115   : > { %v1365_v53 = vadd.f32 %v1364_v27, %v1336_v38 }
 0x117   : > { %v1394_v31 = vadd.f32 %v1393_v58, %v1365_v53 }
 0x118   : > { %v1309_v24 = vpop.f32.mrf.mxu1  ;;  %v1396_v49 = vpop.f32.mrf.mxu0 }
 0x119   : > { %v1946_v34 = vpack.c.bf16 %v1394_v31, %v1392_v8  ;;  %v1310_v12 = vadd.f32 %v1309_v24, %v1281_v56  ;;  %v1345_v16 = vpop.f32.mrf.mxu2  ;;  %v1259_v56 = vadd.f32 %v2664_v5, %v1230_v29  ;;  %v1374_v43 = vpop.f32.mrf.mxu3  ;;  %v1264_v29 = vadd.f32 %v2670_v39, %v1235_v17 }
 0x11b   : > { %1947 = vst [vmem:[%s2682_s21] sm:$0xff] %v1946_v34   ;;  %v1339_v2 = vadd.f32 %v1338_v35, %v1310_v12  ;;  %v1288_v11 = vadd.f32 %v2668_v32, %v1259_v56  ;;  %v1293_v27 = vadd.f32 %v2674_v6, %v1264_v29 }
 0x11d   : > { %v1368_v37 = vadd.f32 %v1367_v59, %v1339_v2 }
 0x11f   : > { %v1397_v19 = vadd.f32 %v1396_v49, %v1368_v37 }
 0x120   : > { %v1311_v60 = vpop.f32.mrf.mxu1  ;;  %v1398_v13 = vpop.f32.mrf.mxu0 }
 0x121   : > { %v1312_v20 = vadd.f32 %v1311_v60, %v1283_v55  ;;  %v1348_v47 = vpop.f32.mrf.mxu2  ;;  %v1377_v5 = vpop.f32.mrf.mxu3 }
 0x123   : > { %v1341_v36 = vadd.f32 %v1340_v52, %v1312_v20 }
 0x125   : > { %v1370_v57 = vadd.f32 %v1369_v62, %v1341_v36 }
 0x127   : > { %v1399_v25 = vadd.f32 %v1398_v13, %v1370_v57 }
 0x128   : > { %v1314_v21 = vpop.f32.mrf.mxu1  ;;  %v1401_v1 = vpop.f32.mrf.mxu0 }
 0x129   : > { %v1951_v26 = vpack.c.bf16 %v1399_v25, %v1397_v19  ;;  %v1315_v9 = vadd.f32 %v1314_v21, %v2666_v7  ;;  %v1350_v44 = vpop.f32.mrf.mxu2  ;;  %v1379_v33 = vpop.f32.mrf.mxu3 }
 0x12b   : > { %1966 = vst [vmem:[%s2682_s21 + $0x8] sm:$0xff] %v1951_v26   ;;  %v1344_v14 = vadd.f32 %v1343_v50, %v1315_v9 }
 0x12d   : > { %v1373_v45 = vadd.f32 %v1372_v61, %v1344_v14 }
 0x12f   : > { %v1402_v23 = vadd.f32 %v1401_v1, %v1373_v45 }
 0x130   : > { %v1316_v42 = vpop.f32.mrf.mxu1  ;;  %v1403_v22 = vpop.f32.mrf.mxu0 }
 0x131   : > { %v1317_v48 = vadd.f32 %v1316_v42, %v1288_v11  ;;  %v1406_v32 = vpop.f32.mrf.mxu2 }
 0x133   : > { %v1346_v10 = vadd.f32 %v1345_v16, %v1317_v48 }
 0x135   : > { %v1375_v15 = vadd.f32 %v1374_v43, %v1346_v10 }
 0x137   : > { %v1404_v35 = vadd.f32 %v1403_v22, %v1375_v15 }
 0x138   : > { %v1319_v3 = vpop.f32.mrf.mxu1 }
 0x139   : > { %v1956_v40 = vpack.c.bf16 %v1404_v35, %v1402_v23  ;;  %v1320_v7 = vadd.f32 %v1319_v3, %v2672_v4  ;;  %v1408_v54 = vpop.f32.mrf.mxu2 }
 0x13b   : > { %1967 = vst [vmem:[%s2682_s21 + $0x10] sm:$0xff] %v1956_v40   ;;  %v1349_v28 = vadd.f32 %v1348_v47, %v1320_v7 }
 0x13d   : > { %v1378_v0 = vadd.f32 %v1377_v5, %v1349_v28 }
 0x13f   : > { %v1407_v58 = vadd.f32 %v1406_v32, %v1378_v0 }
 0x140   : > { %v1321_v30 = vpop.f32.mrf.mxu1 }
 0x141   : > { %v1322_v52 = vadd.f32 %v1321_v30, %v1293_v27 }
 0x143   : > { %v1351_v41 = vadd.f32 %v1350_v44, %v1322_v52 }
 0x145   : > { %v1380_v51 = vadd.f32 %v1379_v33, %v1351_v41 }
 0x147   : > { %v1409_v18 = vadd.f32 %v1408_v54, %v1380_v51 }
 0x149   : > { %v1961_v59 = vpack.c.bf16 %v1409_v18, %v1407_v58 }
 0x14b   : > { %1968 = vst [vmem:[%s2682_s21 + $0x18] sm:$0xff] %v1961_v59  }
 0x14c PF: > { %s13_s12 = sadd.s32 1, %s2002_s12  }
 0x14d   : > { %p10_p4 = scmp.ge.s32.totalorder %s13_s12, 6  }
 0x14f   :  { %12 = sbr.rel (!%p10_p4) target bundleno = 1 (0x1), region = 62 }

// kernel: perceptual_loss.14
= control target key start
LH: loop header
LB: loop body
LE: loop exit
PB: predicated region body
PF: predicated region fallthrough
CT: control target
= control target key end

     0   :  { %s470_s9 = smov 0   ;;  %s472_s10 = smov 0   ;;  %s510_s0 = inlined_call_operand.vmem [shape: bf16[2,64,128], index: 0, kind: input, shape index: {}]   ;;  %s511_s1 = inlined_call_operand.vmem [shape: bf16[2,64,128], index: 1, kind: input, shape index: {}]   ;;  %s512_s2 = inlined_call_operand.vmem [shape: f32[2,8,128], index: 2, kind: output, shape index: {}]  }
   0x1   :  { %s474_s11 = smov 0  }
   0x2 LB: > { %s24_s12 = sadd.s32 1, %s449_s10  ;;  %p358_p0 = scmp.ge.s32.totalorder %s453_s11, 1  ;;  %s453_s11 = sphi %s474_s11, %s12_s11   ;;  %s449_s10 = sphi %s472_s10, %s514_s10   ;;  %s445_s9 = sphi %s470_s9, %s513_s9  }
   0x3   : > { %p26_p1 = scmp.ge.s32.totalorder %s24_s12, 2  ;;  %p148_p2 = scmp.lt.s32.totalorder %s453_s11, 3 }
   0x5   : > { %s516_s12 = smov (%p26_p1, %s24_s12), 0  ;;  %p149_p3 = pnand %p358_p0, %p148_p2 }
   0x6   : > { %p183_p4 = scmp.lt.s32.totalorder (!%p149_p3), %s445_s9, 1 }
   0x7   : > { %152 = sbr.rel (%p149_p3) target bundleno = 38 (0x26), region = 28 }
   0xc   : > { %s518_s9 = smov (!%p183_p4, %s445_s9), 1 }
   0xd   : > { %s366_s13 = sshll.u32 %s518_s9, 5  ;;  %s363_s20 = sshll.u32 %s518_s9, 3 }
   0xe   : > { %s190_s16 = scalar_lea.vmem %s510_s0, %s366_s13  ;;  %s200_s19 = scalar_lea.vmem %s511_s1, %s366_s13 }
   0xf   : > { %v369_v0 = vld [vmem:[%s190_s16] sm:$0xff]   ;;  %v400_v1 = vld [vmem:[%s190_s16 + $0x8] sm:$0xff]   ;;  %v401_v2 = vld [vmem:[%s190_s16 + $0x10] sm:$0xff]   ;;  %s205_s23 = scalar_lea.vmem %s512_s2, %s363_s20 }
  0x10   : > { %v370_v3 = vunpack.c.l.bf16 %v369_v0  ;;  %v371_v4 = vunpack.c.h.bf16 %v369_v0  ;;  %v374_v5 = vunpack.c.l.bf16 %v400_v1  ;;  %v375_v6 = vunpack.c.h.bf16 %v400_v1  ;;  %v385_v7 = vld [vmem:[%s200_s19] sm:$0xff]   ;;  %v403_v8 = vld [vmem:[%s200_s19 + $0x8] sm:$0xff]   ;;  %v404_v11 = vld [vmem:[%s200_s19 + $0x10] sm:$0xff]  }
  0x11   : > { %v378_v9 = vunpack.c.l.bf16 %v401_v2  ;;  %v386_v10 = vunpack.c.l.bf16 %v385_v7  ;;  %v402_v12 = vld [vmem:[%s190_s16 + $0x18] sm:$0xff]   ;;  %v387_v13 = vunpack.c.h.bf16 %v385_v7  ;;  %v390_v14 = vunpack.c.l.bf16 %v403_v8 }
  0x12   : > { %v391_v15 = vunpack.c.h.bf16 %v403_v8  ;;  %v394_v16 = vunpack.c.l.bf16 %v404_v11  ;;  %v379_v17 = vunpack.c.h.bf16 %v401_v2  ;;  %v405_v18 = vld [vmem:[%s200_s19 + $0x18] sm:$0xff]   ;;  %v395_v20 = vunpack.c.h.bf16 %v404_v11 }
  0x13   : > { %v243_v19 = vsub.f32 %v370_v3, %v386_v10  ;;  %v244_v21 = vsub.f32 %v371_v4, %v387_v13  ;;  %v245_v22 = vsub.f32 %v374_v5, %v390_v14  ;;  %v382_v24 = vunpack.c.l.bf16 %v402_v12 }
  0x14   : > { %v246_v23 = vsub.f32 %v375_v6, %v391_v15  ;;  %v398_v26 = vunpack.c.l.bf16 %v405_v18  ;;  %v247_v27 = vsub.f32 %v378_v9, %v394_v16  ;;  %v383_v30 = vunpack.c.h.bf16 %v402_v12 }
  0x15   : > { %v252_v25 = vand.u32 2147483647, %v243_v19  ;;  %v253_v28 = vand.u32 2147483647, %v244_v21  ;;  %v254_v29 = vand.u32 2147483647, %v245_v22  ;;  %v399_v33 = vunpack.c.h.bf16 %v405_v18 }
  0x16   : > { %v255_v31 = vand.u32 2147483647, %v246_v23  ;;  %v248_v34 = vsub.f32 %v379_v17, %v395_v20  ;;  %v249_v35 = vsub.f32 %v382_v24, %v398_v26  ;;  %v256_v36 = vand.u32 2147483647, %v247_v27 }
  0x17   : > { %v260_v32 = vadd.f32 %v253_v28, %v252_v25  ;;  %v250_v38 = vsub.f32 %v383_v30, %v399_v33 }
  0x18   : > { %v257_v39 = vand.u32 2147483647, %v248_v34  ;;  %v258_v41 = vand.u32 2147483647, %v249_v35 }
  0x19   : > { %v261_v37 = vadd.f32 %v260_v32, %v254_v29  ;;  %v259_v43 = vand.u32 2147483647, %v250_v38 }
  0x1b   : > { %v262_v40 = vadd.f32 %v261_v37, %v255_v31 }
  0x1d   : > { %v263_v42 = vadd.f32 %v262_v40, %v256_v36 }
  0x1f   : > { %v264_v44 = vadd.f32 %v263_v42, %v257_v39 }
  0x21   : > { %v265_v45 = vadd.f32 %v264_v44, %v258_v41 }
  0x23   : > { %v266_v46 = vadd.f32 %v265_v45, %v259_v43 }
  0x25   : > { %268 = vst [vmem:[%s205_s23] sm:$0xff] %v266_v46 }
  0x26 PF: > { %s12_s11 = sadd.s32 1, %s453_s11   ;;  %s513_s9 = smov %s449_s10 }
  0x27   : > { %p9_p5 = scmp.ge.s32.totalorder %s12_s11, 4   ;;  %s514_s10 = smov %s516_s12 }
  0x29   :  { %11 = sbr.rel (!%p9_p5) target bundleno = 2 (0x2), region = 65 }

// kernel: perceptual_loss.12
= control target key start
LH: loop header
LB: loop body
LE: loop exit
PB: predicated region body
PF: predicated region fallthrough
CT: control target
= control target key end

     0   :  { %s793_s9 = smov 0   ;;  %s795_s10 = smov 0   ;;  %s904_s0 = inlined_call_operand.vmem [shape: bf16[2,256,64], index: 0, kind: input, shape index: {}]   ;;  %s905_s1 = inlined_call_operand.vmem [shape: bf16[2,256,64], index: 1, kind: input, shape index: {}]   ;;  %s906_s2 = inlined_call_operand.vmem [shape: f32[2,8,64], index: 2, kind: output, shape index: {}]  }
   0x1   :  { %s797_s11 = smov 0  }
   0x2 LB: > { %s24_s12 = sadd.s32 1, %s771_s10  ;;  %p560_p0 = scmp.ge.s32.totalorder %s775_s11, 1  ;;  %s775_s11 = sphi %s797_s11, %s12_s11   ;;  %s771_s10 = sphi %s795_s10, %s908_s10   ;;  %s767_s9 = sphi %s793_s9, %s907_s9  }
   0x3   : > { %p26_p1 = scmp.ge.s32.totalorder %s24_s12, 2  ;;  %p148_p2 = scmp.lt.s32.totalorder %s775_s11, 3 }
   0x5   : > { %s910_s12 = smov (%p26_p1, %s24_s12), 0  ;;  %p149_p3 = pnand %p560_p0, %p148_p2 }
   0x6   : > { %p183_p4 = scmp.lt.s32.totalorder (!%p149_p3), %s767_s9, 1 }
   0x7   : > { %152 = sbr.rel (%p149_p3) target bundleno = 89 (0x59), region = 28 }
   0xc   : > { %s912_s9 = smov (!%p183_p4, %s767_s9), 1  ;;  %vm210_vm0 = vcmask 523264   ;;  %v777_v0 = vmov 0.0  }
   0xd   : > { %s565_s13 = sshll.u32 %s912_s9, 3  ;;  %s568_s17 = sshll.u32 %s912_s9, 7 }
   0xe   : > { %s814_s16 = scalar_lea.vmem %s906_s2, %s565_s13  ;;  %s821_s20 = scalar_lea.vmem %s904_s0, %s568_s17 }
   0xf   : > { %211 = vst.msk [vmem:[%s814_s16] sm:$0xff] %vm210_vm0, %v777_v0  ;;  %s826_s23 = scalar_lea.vmem %s905_s1, %s568_s17  ;;  %v571_v1 = vld [vmem:[%s821_s20] sm:$0xff]   ;;  %v698_v3 = vld [vmem:[%s821_s20 + $0x8] sm:$0xff]   ;;  %v699_v10 = vld [vmem:[%s821_s20 + $0x10] sm:$0xff]  }
  0x10   : > { %v635_v2 = vld [vmem:[%s826_s23] sm:$0xff]   ;;  %v713_v4 = vld [vmem:[%s826_s23 + $0x8] sm:$0xff]   ;;  %v572_v5 = vunpack.c.l.bf16 %v571_v1  ;;  %v573_v6 = vunpack.c.h.bf16 %v571_v1  ;;  %v576_v9 = vunpack.c.l.bf16 %v698_v3  ;;  %v714_v12 = vld [vmem:[%s826_s23 + $0x10] sm:$0xff]   ;;  %v577_v13 = vunpack.c.h.bf16 %v698_v3 }
  0x11   : > { %v636_v7 = vunpack.c.l.bf16 %v635_v2  ;;  %v637_v8 = vunpack.c.h.bf16 %v635_v2  ;;  %v640_v11 = vunpack.c.l.bf16 %v713_v4  ;;  %v641_v14 = vunpack.c.h.bf16 %v713_v4  ;;  %v700_v16 = vld [vmem:[%s821_s20 + $0x18] sm:$0xff]   ;;  %v701_v26 = vld [vmem:[%s821_s20 + $0x20] sm:$0xff]   ;;  %v702_v39 = vld [vmem:[%s821_s20 + $0x28] sm:$0xff]  }
  0x12   : > { %v580_v15 = vunpack.c.l.bf16 %v699_v10  ;;  %v644_v17 = vunpack.c.l.bf16 %v714_v12  ;;  %v715_v20 = vld [vmem:[%s826_s23 + $0x18] sm:$0xff]   ;;  %v581_v22 = vunpack.c.h.bf16 %v699_v10  ;;  %v645_v23 = vunpack.c.h.bf16 %v714_v12  ;;  %v716_v28 = vld [vmem:[%s826_s23 + $0x20] sm:$0xff]   ;;  %v717_v45 = vld [vmem:[%s826_s23 + $0x28] sm:$0xff]  }
  0x13   : > { %v340_v18 = vsub.f32 %v572_v5, %v636_v7  ;;  %v341_v19 = vsub.f32 %v573_v6, %v637_v8  ;;  %v342_v21 = vsub.f32 %v576_v9, %v640_v11  ;;  %v343_v24 = vsub.f32 %v577_v13, %v641_v14  ;;  %v703_v54 = vld [vmem:[%s821_s20 + $0x30] sm:$0xff]   ;;  %v704_v4 = vld [vmem:[%s821_s20 + $0x38] sm:$0xff]  }
  0x14   : > { %v584_v25 = vunpack.c.l.bf16 %v700_v16  ;;  %v648_v27 = vunpack.c.l.bf16 %v715_v20  ;;  %v344_v29 = vsub.f32 %v580_v15, %v644_v17  ;;  %v585_v33 = vunpack.c.h.bf16 %v700_v16  ;;  %v718_v60 = vld [vmem:[%s826_s23 + $0x30] sm:$0xff]   ;;  %v719_v10 = vld [vmem:[%s826_s23 + $0x38] sm:$0xff]  }
  0x15   : > { %v373_v30 = vand.u32 2147483647, %v340_v18  ;;  %v374_v31 = vand.u32 2147483647, %v341_v19  ;;  %v375_v32 = vand.u32 2147483647, %v342_v21  ;;  %v649_v34 = vunpack.c.h.bf16 %v715_v20 }
  0x16   : > { %v345_v35 = vsub.f32 %v581_v22, %v645_v23  ;;  %v376_v36 = vand.u32 2147483647, %v343_v24  ;;  %v588_v37 = vunpack.c.l.bf16 %v701_v26  ;;  %v652_v38 = vunpack.c.l.bf16 %v716_v28  ;;  %v705_v18 = vld [vmem:[%s821_s20 + $0x40] sm:$0xff]  }
  0x17   : > { %v346_v40 = vsub.f32 %v584_v25, %v648_v27  ;;  %v377_v41 = vand.u32 2147483647, %v344_v29  ;;  %v406_v42 = vsel %vm210_vm0, %v373_v30, 0.0  ;;  %v407_v43 = vsel %vm210_vm0, %v374_v31, 0.0  ;;  %v720_v24 = vld [vmem:[%s826_s23 + $0x40] sm:$0xff]  }
  0x18   : > { %v589_v44 = vunpack.c.h.bf16 %v701_v26  ;;  %v408_v46 = vadd.f32 %v407_v43, %v406_v42  ;;  %v409_v47 = vsel %vm210_vm0, %v375_v32, 0.0  ;;  %v653_v48 = vunpack.c.h.bf16 %v716_v28  ;;  %v706_v32 = vld [vmem:[%s821_s20 + $0x48] sm:$0xff]  }
  0x19   : > { %v347_v49 = vsub.f32 %v585_v33, %v649_v34  ;;  %v378_v50 = vand.u32 2147483647, %v345_v35  ;;  %v411_v51 = vsel %vm210_vm0, %v376_v36, 0.0  ;;  %v592_v52 = vunpack.c.l.bf16 %v702_v39 }
  0x1a   : > { %v410_v53 = vadd.f32 %v409_v47, %v408_v46  ;;  %v656_v55 = vunpack.c.l.bf16 %v717_v45  ;;  %v348_v56 = vsub.f32 %v588_v37, %v652_v38  ;;  %v379_v57 = vand.u32 2147483647, %v346_v40  ;;  %v721_v38 = vld [vmem:[%s826_s23 + $0x48] sm:$0xff]   ;;  %v707_v46 = vld [vmem:[%s821_s20 + $0x50] sm:$0xff]  }
  0x1b   : > { %v413_v58 = vsel %vm210_vm0, %v377_v41, 0.0  ;;  %v593_v59 = vunpack.c.h.bf16 %v702_v39  ;;  %v657_v62 = vunpack.c.h.bf16 %v717_v45  ;;  %v349_v63 = vsub.f32 %v589_v44, %v653_v48 }
  0x1c   : > { %v412_v61 = vadd.f32 %v411_v51, %v410_v53  ;;  %v380_v0 = vand.u32 2147483647, %v347_v49  ;;  %v415_v1 = vsel %vm210_vm0, %v378_v50, 0.0  ;;  %v596_v2 = vunpack.c.l.bf16 %v703_v54 }
  0x1d   : > { %v660_v5 = vunpack.c.l.bf16 %v718_v60  ;;  %v350_v6 = vsub.f32 %v592_v52, %v656_v55  ;;  %v381_v7 = vand.u32 2147483647, %v348_v56  ;;  %v417_v8 = vsel %vm210_vm0, %v379_v57, 0.0  ;;  %v722_v52 = vld [vmem:[%s826_s23 + $0x50] sm:$0xff]  }
  0x1e   : > { %v414_v3 = vadd.f32 %v413_v58, %v412_v61  ;;  %v597_v9 = vunpack.c.h.bf16 %v703_v54  ;;  %v661_v12 = vunpack.c.h.bf16 %v718_v60  ;;  %v351_v13 = vsub.f32 %v593_v59, %v657_v62  ;;  %v708_v60 = vld [vmem:[%s821_s20 + $0x58] sm:$0xff]  }
  0x1f   : > { %v382_v14 = vand.u32 2147483647, %v349_v63  ;;  %v419_v15 = vsel %vm210_vm0, %v380_v0, 0.0  ;;  %v600_v16 = vunpack.c.l.bf16 %v704_v4  ;;  %v664_v19 = vunpack.c.l.bf16 %v719_v10 }
  0x20   : > { %v416_v11 = vadd.f32 %v415_v1, %v414_v3  ;;  %v352_v20 = vsub.f32 %v596_v2, %v660_v5  ;;  %v383_v21 = vand.u32 2147483647, %v350_v6  ;;  %v421_v22 = vsel %vm210_vm0, %v381_v7, 0.0  ;;  %v723_v2 = vld [vmem:[%s826_s23 + $0x58] sm:$0xff]  }
  0x21   : > { %v601_v23 = vunpack.c.h.bf16 %v704_v4  ;;  %v665_v26 = vunpack.c.h.bf16 %v719_v10  ;;  %v353_v27 = vsub.f32 %v597_v9, %v661_v12  ;;  %v384_v28 = vand.u32 2147483647, %v351_v13  ;;  %v709_v10 = vld [vmem:[%s821_s20 + $0x60] sm:$0xff]  }
  0x22   : > { %v418_v17 = vadd.f32 %v417_v8, %v416_v11  ;;  %v423_v29 = vsel %vm210_vm0, %v382_v14, 0.0  ;;  %v604_v30 = vunpack.c.l.bf16 %v705_v18  ;;  %v668_v33 = vunpack.c.l.bf16 %v720_v24 }
  0x23   : > { %v354_v34 = vsub.f32 %v600_v16, %v664_v19  ;;  %v385_v35 = vand.u32 2147483647, %v352_v20  ;;  %v425_v36 = vsel %vm210_vm0, %v383_v21, 0.0  ;;  %v605_v37 = vunpack.c.h.bf16 %v705_v18  ;;  %v724_v16 = vld [vmem:[%s826_s23 + $0x60] sm:$0xff]  }
  0x24   : > { %v420_v25 = vadd.f32 %v419_v15, %v418_v17  ;;  %v669_v40 = vunpack.c.h.bf16 %v720_v24  ;;  %v355_v41 = vsub.f32 %v601_v23, %v665_v26  ;;  %v386_v42 = vand.u32 2147483647, %v353_v27  ;;  %v710_v24 = vld [vmem:[%s821_s20 + $0x68] sm:$0xff]  }
  0x25   : > { %v427_v43 = vsel %vm210_vm0, %v384_v28, 0.0  ;;  %v608_v44 = vunpack.c.l.bf16 %v706_v32  ;;  %v672_v47 = vunpack.c.l.bf16 %v721_v38  ;;  %v356_v48 = vsub.f32 %v604_v30, %v668_v33  ;;  %v725_v30 = vld [vmem:[%s826_s23 + $0x68] sm:$0xff]  }
  0x26   : > { %v422_v31 = vadd.f32 %v421_v22, %v420_v25  ;;  %v387_v49 = vand.u32 2147483647, %v354_v34  ;;  %v429_v50 = vsel %vm210_vm0, %v385_v35, 0.0  ;;  %v609_v51 = vunpack.c.h.bf16 %v706_v32 }
  0x27   : > { %v673_v54 = vunpack.c.h.bf16 %v721_v38  ;;  %v357_v55 = vsub.f32 %v605_v37, %v669_v40  ;;  %v388_v56 = vand.u32 2147483647, %v355_v41  ;;  %v431_v57 = vsel %vm210_vm0, %v386_v42, 0.0  ;;  %v711_v38 = vld [vmem:[%s821_s20 + $0x70] sm:$0xff]  }
  0x28   : > { %v424_v39 = vadd.f32 %v423_v29, %v422_v31  ;;  %v612_v58 = vunpack.c.l.bf16 %v707_v46  ;;  %v676_v61 = vunpack.c.l.bf16 %v722_v52  ;;  %v358_v62 = vsub.f32 %v608_v44, %v672_v47  ;;  %v726_v44 = vld [vmem:[%s826_s23 + $0x70] sm:$0xff]  }
  0x29   : > { %v389_v63 = vand.u32 2147483647, %v356_v48  ;;  %v433_v0 = vsel %vm210_vm0, %v387_v49, 0.0  ;;  %v613_v1 = vunpack.c.h.bf16 %v707_v46  ;;  %v677_v4 = vunpack.c.h.bf16 %v722_v52  ;;  %v712_v52 = vld [vmem:[%s821_s20 + $0x78] sm:$0xff]  }
  0x2a   : > { %v426_v45 = vadd.f32 %v425_v36, %v424_v39  ;;  %v359_v5 = vsub.f32 %v609_v51, %v673_v54  ;;  %v390_v6 = vand.u32 2147483647, %v357_v55  ;;  %v435_v7 = vsel %vm210_vm0, %v388_v56, 0.0 }
  0x2b   : > { %v616_v8 = vunpack.c.l.bf16 %v708_v60  ;;  %v680_v11 = vunpack.c.l.bf16 %v723_v2  ;;  %v360_v12 = vsub.f32 %v612_v58, %v676_v61  ;;  %v391_v13 = vand.u32 2147483647, %v358_v62  ;;  %v727_v58 = vld [vmem:[%s826_s23 + $0x78] sm:$0xff]  }
  0x2c   : > { %v428_v53 = vadd.f32 %v427_v43, %v426_v45  ;;  %v437_v14 = vsel %vm210_vm0, %v389_v63, 0.0  ;;  %v617_v15 = vunpack.c.h.bf16 %v708_v60  ;;  %v681_v18 = vunpack.c.h.bf16 %v723_v2 }
  0x2d   : > { %v361_v19 = vsub.f32 %v613_v1, %v677_v4  ;;  %v392_v20 = vand.u32 2147483647, %v359_v5  ;;  %v439_v21 = vsel %vm210_vm0, %v390_v6, 0.0  ;;  %v620_v22 = vunpack.c.l.bf16 %v709_v10 }
  0x2e   : > { %v430_v59 = vadd.f32 %v429_v50, %v428_v53  ;;  %v684_v25 = vunpack.c.l.bf16 %v724_v16  ;;  %v362_v26 = vsub.f32 %v616_v8, %v680_v11  ;;  %v393_v27 = vand.u32 2147483647, %v360_v12 }
  0x2f   : > { %v441_v28 = vsel %vm210_vm0, %v391_v13, 0.0  ;;  %v621_v29 = vunpack.c.h.bf16 %v709_v10  ;;  %v685_v32 = vunpack.c.h.bf16 %v724_v16  ;;  %v363_v33 = vsub.f32 %v617_v15, %v681_v18 }
  0x30   : > { %v432_v3 = vadd.f32 %v431_v57, %v430_v59  ;;  %v394_v34 = vand.u32 2147483647, %v361_v19  ;;  %v443_v35 = vsel %vm210_vm0, %v392_v20, 0.0  ;;  %v624_v36 = vunpack.c.l.bf16 %v710_v24 }
  0x31   : > { %v688_v39 = vunpack.c.l.bf16 %v725_v30  ;;  %v364_v40 = vsub.f32 %v620_v22, %v684_v25  ;;  %v395_v41 = vand.u32 2147483647, %v362_v26  ;;  %v445_v42 = vsel %vm210_vm0, %v393_v27, 0.0 }
  0x32   : > { %v434_v9 = vadd.f32 %v433_v0, %v432_v3  ;;  %v625_v43 = vunpack.c.h.bf16 %v710_v24  ;;  %v689_v46 = vunpack.c.h.bf16 %v725_v30  ;;  %v365_v47 = vsub.f32 %v621_v29, %v685_v32 }
  0x33   : > { %v396_v48 = vand.u32 2147483647, %v363_v33  ;;  %v447_v49 = vsel %vm210_vm0, %v394_v34, 0.0  ;;  %v628_v50 = vunpack.c.l.bf16 %v711_v38  ;;  %v692_v53 = vunpack.c.l.bf16 %v726_v44 }
  0x34   : > { %v436_v17 = vadd.f32 %v435_v7, %v434_v9  ;;  %v366_v54 = vsub.f32 %v624_v36, %v688_v39  ;;  %v397_v55 = vand.u32 2147483647, %v364_v40  ;;  %v449_v56 = vsel %vm210_vm0, %v395_v41, 0.0 }
  0x35   : > { %v629_v57 = vunpack.c.h.bf16 %v711_v38  ;;  %v693_v60 = vunpack.c.h.bf16 %v726_v44  ;;  %v367_v61 = vsub.f32 %v625_v43, %v689_v46  ;;  %v398_v62 = vand.u32 2147483647, %v365_v47 }
  0x36   : > { %v438_v23 = vadd.f32 %v437_v14, %v436_v17  ;;  %v451_v63 = vsel %vm210_vm0, %v396_v48, 0.0  ;;  %v632_v0 = vunpack.c.l.bf16 %v712_v52  ;;  %v696_v2 = vunpack.c.l.bf16 %v727_v58 }
  0x37   : > { %v368_v3 = vsub.f32 %v628_v50, %v692_v53  ;;  %v399_v4 = vand.u32 2147483647, %v366_v54  ;;  %v453_v5 = vsel %vm210_vm0, %v397_v55, 0.0  ;;  %v633_v6 = vunpack.c.h.bf16 %v712_v52 }
  0x38   : > { %v440_v31 = vadd.f32 %v439_v21, %v438_v23  ;;  %v697_v8 = vunpack.c.h.bf16 %v727_v58  ;;  %v369_v9 = vsub.f32 %v629_v57, %v693_v60  ;;  %v400_v10 = vand.u32 2147483647, %v367_v61 }
  0x39   : > { %v455_v11 = vsel %vm210_vm0, %v398_v62, 0.0  ;;  %v370_v13 = vsub.f32 %v632_v0, %v696_v2  ;;  %v401_v14 = vand.u32 2147483647, %v368_v3  ;;  %v457_v15 = vsel %vm210_vm0, %v399_v4, 0.0 }
  0x3a   : > { %v442_v37 = vadd.f32 %v441_v28, %v440_v31  ;;  %v371_v17 = vsub.f32 %v633_v6, %v697_v8  ;;  %v402_v18 = vand.u32 2147483647, %v369_v9  ;;  %v459_v19 = vsel %vm210_vm0, %v400_v10, 0.0  ;;  %v372_v31 = vld [vmem:[%s814_s16] sm:$0xff] }
  0x3b   : > { %v403_v21 = vand.u32 2147483647, %v370_v13  ;;  %v461_v22 = vsel %vm210_vm0, %v401_v14, 0.0 }
  0x3c   : > { %v444_v45 = vadd.f32 %v443_v35, %v442_v37  ;;  %v404_v24 = vand.u32 2147483647, %v371_v17  ;;  %v463_v25 = vsel %vm210_vm0, %v402_v18, 0.0 }
  0x3d   : > { %v465_v27 = vsel %vm210_vm0, %v403_v21, 0.0 }
  0x3e   : > { %v446_v51 = vadd.f32 %v445_v42, %v444_v45  ;;  %v467_v29 = vsel %vm210_vm0, %v404_v24, 0.0 }
  0x40   : > { %v448_v59 = vadd.f32 %v447_v49, %v446_v51 }
  0x42   : > { %v450_v1 = vadd.f32 %v449_v56, %v448_v59 }
  0x44   : > { %v452_v7 = vadd.f32 %v451_v63, %v450_v1 }
  0x46   : > { %v454_v12 = vadd.f32 %v453_v5, %v452_v7 }
  0x48   : > { %v456_v16 = vadd.f32 %v455_v11, %v454_v12 }
  0x4a   : > { %v458_v20 = vadd.f32 %v457_v15, %v456_v16 }
  0x4c   : > { %v460_v23 = vadd.f32 %v459_v19, %v458_v20 }
  0x4e   : > { %v462_v26 = vadd.f32 %v461_v22, %v460_v23 }
  0x50   : > { %v464_v28 = vadd.f32 %v463_v25, %v462_v26 }
  0x52   : > { %v466_v30 = vadd.f32 %v465_v27, %v464_v28 }
  0x54   : > { %v468_v32 = vadd.f32 %v467_v29, %v466_v30 }
  0x56   : > { %v469_v33 = vadd.f32 %v468_v32, %v372_v31 }
  0x58   : > { %470 = vst.msk [vmem:[%s814_s16] sm:$0xff] %vm210_vm0, %v469_v33 }
  0x59 PF: > { %s12_s11 = sadd.s32 1, %s775_s11   ;;  %s907_s9 = smov %s771_s10 }
  0x5a   : > { %p9_p5 = scmp.ge.s32.totalorder %s12_s11, 4   ;;  %s908_s10 = smov %s910_s12 }
  0x5c   :  { %11 = sbr.rel (!%p9_p5) target bundleno = 2 (0x2), region = 65 }

// kernel: perceptual_loss.15
= control target key start
LH: loop header
LB: loop body
LE: loop exit
PB: predicated region body
PF: predicated region fallthrough
CT: control target
= control target key end

     0   :  { %s568_s6 = smov 0   ;;  %s570_s7 = smov 0   ;;  %s631_s0 = inlined_call_operand.vmem [shape: bf16[4,64,128], index: 0, kind: input, shape index: {}]   ;;  %s632_s1 = inlined_call_operand.vmem [shape: f32[4,128,128], index: 1, kind: output, shape index: {}]  }
   0x1   :  { %s572_s8 = smov 0  }
   0x2 LB: > { %s23_s9 = sadd.s32 1, %s552_s7  ;;  %p460_p0 = scmp.ge.s32.totalorder %s556_s8, 1  ;;  %s556_s8 = sphi %s572_s8, %s11_s8   ;;  %s552_s7 = sphi %s570_s7, %s634_s7   ;;  %s548_s6 = sphi %s568_s6, %s633_s6  }
   0x3   : > { %p25_p1 = scmp.ge.s32.totalorder %s23_s9, 4  ;;  %p106_p2 = scmp.lt.s32.totalorder %s556_s8, 5 }
   0x5   : > { %s636_s9 = smov (%p25_p1, %s23_s9), 0  ;;  %p107_p3 = pnand %p460_p0, %p106_p2 }
   0x6   : > { %p131_p4 = scmp.lt.s32.totalorder (!%p107_p3), %s548_s6, 3 }
   0x7   : > { %110 = sbr.rel (%p107_p3) target bundleno = 444 (0x1bc), region = 24 }
   0xc   : > { %s638_s6 = smov (!%p131_p4, %s548_s6), 3  ;;  %vm230_vm0 = vcmask 523264  }
   0xd   : > { %s491_s10 = sshll.u32 %s638_s6, 5  ;;  %s492_s14 = sshll.u32 %s638_s6, 7 }
   0xe   : > { %s138_s13 = scalar_lea.vmem %s631_s0, %s491_s10  ;;  %s604_s17 = scalar_lea.vmem %s632_s1, %s492_s14 }
   0xf   : > { %v493_v0 = vld [vmem:[%s138_s13] sm:$0xff]  ;;  %v496_v1 = vld [vmem:[%s138_s13 + $0x18] sm:$0xff]  ;;  %v495_v2 = vld [vmem:[%s138_s13 + $0x10] sm:$0xff] }
  0x10   : > { %214 = vxpose.xlu0.c.b16.start [1/4] (short) %v493_v0, 128  ;;  %259 = vmatpush.bf16.msra.mxu0 %v496_v1  ;;  %v494_v3 = vld [vmem:[%s138_s13 + $0x8] sm:$0xff] }
  0x11   : > { %497 = vmatpush.bf16.msra.mxu1 %v496_v1  ;;  %498 = vmatpush.bf16.msra.mxu2 %v496_v1 }
  0x12   : > { %499 = vmatpush.bf16.msra.mxu3 %v496_v1 }
  0x14   : > { %260 = vmatpush.bf16.msra.mxu0 %v495_v2 }
  0x15   : > { %500 = vmatpush.bf16.msra.mxu1 %v495_v2  ;;  %501 = vmatpush.bf16.msra.mxu2 %v495_v2 }
  0x16   : > { %502 = vmatpush.bf16.msra.mxu3 %v495_v2 }
  0x18   : > { %261 = vmatpush.bf16.msra.mxu0 %v494_v3 }
  0x19   : > { %503 = vmatpush.bf16.msra.mxu1 %v494_v3  ;;  %504 = vmatpush.bf16.msra.mxu2 %v494_v3 }
  0x1a   : > { %505 = vmatpush.bf16.msra.mxu3 %v494_v3 }
  0x1c   : > { %262 = vmatpush.bf16.msra.mxu0 %v493_v0 }
  0x1d   : > { %506 = vmatpush.bf16.msra.mxu1 %v493_v0  ;;  %507 = vmatpush.bf16.msra.mxu2 %v493_v0 }
  0x1e   : > { %508 = vmatpush.bf16.msra.mxu3 %v493_v0 }
  0x20   : > { %215 = vxpose.xlu0.c.b16.cont [2/4] (short) %v494_v3, 128 }
  0x30   : > { %216 = vxpose.xlu0.c.b16.cont [3/4] (short) %v495_v2, 128 }
  0x40   : > { %217 = vxpose.xlu0.c.b16.end [4/4] (short) %v496_v1, 128 }
  0xbc   : > { %v222_v4 = vpop.trf.xlu0 }
  0xbd   : > { %481 = vmatmul.msk.bf16.vlgmr.msra.gmra.mxu0 %vm230_vm0, %v222_v4 }
  0xcc   : > { %v223_v5 = vpop.trf.xlu0 }
  0xcd   : > { %482 = vmatmul.msk.bf16.gmra.mxu0 %vm230_vm0, %v223_v5 }
  0xdc   : > { %v224_v6 = vpop.trf.xlu0 }
  0xdd   : > { %483 = vmatmul.msk.bf16.vlgmr.msra.gmra.mxu1 %vm230_vm0, %v224_v6 }
  0xec   : > { %v225_v7 = vpop.trf.xlu0 }
  0xed   : > { %484 = vmatmul.msk.bf16.gmra.mxu1 %vm230_vm0, %v225_v7 }
  0xfc   : > { %v226_v8 = vpop.trf.xlu0 }
  0xfd   : > { %485 = vmatmul.msk.bf16.vlgmr.msra.gmra.mxu2 %vm230_vm0, %v226_v8 }
 0x10c   : > { %v227_v9 = vpop.trf.xlu0 }
 0x10d   : > { %486 = vmatmul.msk.bf16.gmra.mxu2 %vm230_vm0, %v227_v9 }
 0x11c   : > { %v228_v10 = vpop.trf.xlu0 }
 0x11d   : > { %487 = vmatmul.msk.bf16.vlgmr.msra.gmra.mxu3 %vm230_vm0, %v228_v10 }
 0x12c   : > { %v229_v11 = vpop.trf.xlu0 }
 0x12d   : > { %488 = vmatmul.msk.bf16.gmra.mxu3 %vm230_vm0, %v229_v11 }
 0x13a   : > { %v264_v12 = vpop.f32.mrf.mxu0 }
 0x13b   : > { %v355_v13 = vmul.f32 0.00012207031, %v264_v12 }
 0x13d   : > { %371 = vst [vmem:[%s604_s17] sm:$0xff] %v355_v13 }
 0x142   : > { %v266_v14 = vpop.f32.mrf.mxu0 }
 0x143   : > { %v356_v15 = vmul.f32 0.00012207031, %v266_v14 }
 0x145   : > { %372 = vst [vmem:[%s604_s17 + $0x8] sm:$0xff] %v356_v15 }
 0x14a   : > { %v269_v16 = vpop.f32.mrf.mxu0 }
 0x14b   : > { %v357_v17 = vmul.f32 0.00012207031, %v269_v16 }
 0x14d   : > { %373 = vst [vmem:[%s604_s17 + $0x10] sm:$0xff] %v357_v17 }
 0x152   : > { %v271_v18 = vpop.f32.mrf.mxu0 }
 0x153   : > { %v358_v19 = vmul.f32 0.00012207031, %v271_v18 }
 0x155   : > { %374 = vst [vmem:[%s604_s17 + $0x18] sm:$0xff] %v358_v19 }
 0x15a   : > { %v274_v20 = vpop.f32.mrf.mxu1 }
 0x15b   : > { %v359_v21 = vmul.f32 0.00012207031, %v274_v20 }
 0x15d   : > { %375 = vst [vmem:[%s604_s17 + $0x20] sm:$0xff] %v359_v21 }
 0x162   : > { %v276_v22 = vpop.f32.mrf.mxu1 }
 0x163   : > { %v360_v23 = vmul.f32 0.00012207031, %v276_v22 }
 0x165   : > { %376 = vst [vmem:[%s604_s17 + $0x28] sm:$0xff] %v360_v23 }
 0x16a   : > { %v279_v24 = vpop.f32.mrf.mxu1 }
 0x16b   : > { %v361_v25 = vmul.f32 0.00012207031, %v279_v24 }
 0x16d   : > { %377 = vst [vmem:[%s604_s17 + $0x30] sm:$0xff] %v361_v25 }
 0x172   : > { %v281_v26 = vpop.f32.mrf.mxu1 }
 0x173   : > { %v362_v27 = vmul.f32 0.00012207031, %v281_v26 }
 0x175   : > { %378 = vst [vmem:[%s604_s17 + $0x38] sm:$0xff] %v362_v27 }
 0x180   : > { %v284_v28 = vpop.f32.mrf.mxu2 }
 0x181   : > { %v363_v29 = vmul.f32 0.00012207031, %v284_v28 }
 0x183   : > { %379 = vst [vmem:[%s604_s17 + $0x40] sm:$0xff] %v363_v29 }
 0x188   : > { %v286_v30 = vpop.f32.mrf.mxu2 }
 0x189   : > { %v364_v31 = vmul.f32 0.00012207031, %v286_v30 }
 0x18b   : > { %380 = vst [vmem:[%s604_s17 + $0x48] sm:$0xff] %v364_v31 }
 0x190   : > { %v289_v32 = vpop.f32.mrf.mxu2 }
 0x191   : > { %v365_v33 = vmul.f32 0.00012207031, %v289_v32 }
 0x193   : > { %381 = vst [vmem:[%s604_s17 + $0x50] sm:$0xff] %v365_v33 }
 0x198   : > { %v291_v34 = vpop.f32.mrf.mxu2 }
 0x199   : > { %v366_v35 = vmul.f32 0.00012207031, %v291_v34 }
 0x19b   : > { %382 = vst [vmem:[%s604_s17 + $0x58] sm:$0xff] %v366_v35 }
 0x1a0   : > { %v294_v36 = vpop.f32.mrf.mxu3 }
 0x1a1   : > { %v367_v37 = vmul.f32 0.00012207031, %v294_v36 }
 0x1a3   : > { %383 = vst [vmem:[%s604_s17 + $0x60] sm:$0xff] %v367_v37 }
 0x1a8   : > { %v296_v38 = vpop.f32.mrf.mxu3 }
 0x1a9   : > { %v368_v39 = vmul.f32 0.00012207031, %v296_v38 }
 0x1ab   : > { %384 = vst [vmem:[%s604_s17 + $0x68] sm:$0xff] %v368_v39 }
 0x1b0   : > { %v299_v40 = vpop.f32.mrf.mxu3 }
 0x1b1   : > { %v369_v41 = vmul.f32 0.00012207031, %v299_v40 }
 0x1b3   : > { %385 = vst [vmem:[%s604_s17 + $0x70] sm:$0xff] %v369_v41 }
 0x1b8   : > { %v301_v42 = vpop.f32.mrf.mxu3 }
 0x1b9   : > { %v370_v43 = vmul.f32 0.00012207031, %v301_v42 }
 0x1bb   : > { %386 = vst [vmem:[%s604_s17 + $0x78] sm:$0xff] %v370_v43 }
 0x1bc PF: > { %s11_s8 = sadd.s32 1, %s556_s8   ;;  %s633_s6 = smov %s552_s7 }
 0x1bd   : > { %p8_p5 = scmp.ge.s32.totalorder %s11_s8, 6   ;;  %s634_s7 = smov %s636_s9 }
 0x1bf   :  { %10 = sbr.rel (!%p8_p5) target bundleno = 2 (0x2), region = 62 }

// kernel: perceptual_loss.13
= control target key start
LH: loop header
LB: loop body
LE: loop exit
PB: predicated region body
PF: predicated region fallthrough
CT: control target
= control target key end

     0   :  { %s682_s6 = smov 0   ;;  %s684_s7 = smov 0   ;;  %s753_s0 = inlined_call_operand.vmem [shape: bf16[4,256,64], index: 0, kind: input, shape index: {}]   ;;  %s754_s1 = inlined_call_operand.vmem [shape: f32[4,64,64], index: 1, kind: output, shape index: {}]  }
   0x1   :  { %s686_s8 = smov 0  }
   0x2 LB: > { %s23_s9 = sadd.s32 1, %s665_s7  ;;  %p501_p0 = scmp.ge.s32.totalorder %s669_s8, 1  ;;  %s669_s8 = sphi %s686_s8, %s11_s8   ;;  %s665_s7 = sphi %s684_s7, %s756_s7   ;;  %s661_s6 = sphi %s682_s6, %s755_s6  }
   0x3   : > { %p25_p1 = scmp.ge.s32.totalorder %s23_s9, 4  ;;  %p106_p2 = scmp.lt.s32.totalorder %s669_s8, 5 }
   0x5   : > { %s758_s9 = smov (%p25_p1, %s23_s9), 0  ;;  %p107_p3 = pnand %p501_p0, %p106_p2 }
   0x6   : > { %p131_p4 = scmp.lt.s32.totalorder (!%p107_p3), %s661_s6, 3 }
   0x7   : > { %110 = sbr.rel (%p107_p3) target bundleno = 401 (0x191), region = 24 }
   0xc   : > { %s760_s6 = smov (!%p131_p4, %s661_s6), 3  ;;  %vm149_vm0 = vcmask 523264   ;;  %v671_v24 = vmov 0.0  }
   0xd   : > { %s572_s10 = sshll.u32 %s760_s6, 7  ;;  %150 = vst.msk [vmem:[#allocation2] sm:$0xff] %vm149_vm0, %v671_v24  ;;  %s573_s14 = sshll.u32 %s760_s6, 6 }
   0xe   : > { %s138_s13 = scalar_lea.vmem %s753_s0, %s572_s10  ;;  %151 = vst.msk [vmem:[#allocation2 + $0x8] sm:$0xff] %vm149_vm0, %v671_v24  ;;  %s719_s17 = scalar_lea.vmem %s754_s1, %s573_s14 }
   0xf   : > { %v574_v0 = vld [vmem:[%s138_s13] sm:$0xff]  ;;  %v575_v2 = vld [vmem:[%s138_s13 + $0x8] sm:$0xff]  ;;  %v576_v4 = vld [vmem:[%s138_s13 + $0x10] sm:$0xff]  ;;  %152 = vst.msk [vmem:[#allocation2 + $0x10] sm:$0xff] %vm149_vm0, %v671_v24 }
  0x10   : > { %v582_v1 = vld [vmem:[%s138_s13 + $0x40] sm:$0xff]  ;;  %v583_v3 = vld [vmem:[%s138_s13 + $0x48] sm:$0xff]  ;;  %v584_v5 = vld [vmem:[%s138_s13 + $0x50] sm:$0xff]  ;;  %153 = vst.msk [vmem:[#allocation2 + $0x18] sm:$0xff] %vm149_vm0, %v671_v24 }
  0x11   : > { %631 = vxpose.binary.xlu0.c.b16.start [1/16] (narrow) %v582_v1, %v574_v0, 64  ;;  %v577_v6 = vld [vmem:[%s138_s13 + $0x18] sm:$0xff]  ;;  %v578_v8 = vld [vmem:[%s138_s13 + $0x20] sm:$0xff]  ;;  %v580_v12 = vld [vmem:[%s138_s13 + $0x30] sm:$0xff]  ;;  %154 = vst.msk [vmem:[#allocation2 + $0x20] sm:$0xff] %vm149_vm0, %v671_v24 }
  0x12   : > { %v585_v7 = vld [vmem:[%s138_s13 + $0x58] sm:$0xff]  ;;  %v586_v9 = vld [vmem:[%s138_s13 + $0x60] sm:$0xff]  ;;  %v588_v13 = vld [vmem:[%s138_s13 + $0x70] sm:$0xff]  ;;  %155 = vst.msk [vmem:[#allocation2 + $0x28] sm:$0xff] %vm149_vm0, %v671_v24 }
  0x13   : > { %v581_v10 = vld [vmem:[%s138_s13 + $0x38] sm:$0xff]  ;;  %v579_v14 = vld [vmem:[%s138_s13 + $0x28] sm:$0xff]  ;;  %156 = vst.msk [vmem:[#allocation2 + $0x30] sm:$0xff] %vm149_vm0, %v671_v24 }
  0x14   : > { %v589_v11 = vld [vmem:[%s138_s13 + $0x78] sm:$0xff]  ;;  %326 = vmatpush.bf16.msra.mxu0 %v581_v10  ;;  %590 = vmatpush.bf16.msra.mxu2 %v581_v10  ;;  %v587_v15 = vld [vmem:[%s138_s13 + $0x68] sm:$0xff]  ;;  %157 = vst.msk [vmem:[#allocation2 + $0x38] sm:$0xff] %vm149_vm0, %v671_v24  ;;  %v190_v26 = vld [vmem:[#allocation2] sm:$0xff] }
  0x15   : > { %355 = vmatpush.bf16.msra.mxu1 %v589_v11  ;;  %598 = vmatpush.bf16.msra.mxu3 %v589_v11  ;;  %v191_v31 = vld [vmem:[#allocation2 + $0x8] sm:$0xff] }
  0x16   : > { %v192_v38 = vld [vmem:[#allocation2 + $0x10] sm:$0xff] }
  0x17   : > { %v193_v45 = vld [vmem:[#allocation2 + $0x18] sm:$0xff] }
  0x18   : > { %327 = vmatpush.bf16.msra.mxu0 %v580_v12  ;;  %591 = vmatpush.bf16.msra.mxu2 %v580_v12  ;;  %v194_v54 = vld [vmem:[#allocation2 + $0x20] sm:$0xff] }
  0x19   : > { %356 = vmatpush.bf16.msra.mxu1 %v588_v13  ;;  %599 = vmatpush.bf16.msra.mxu3 %v588_v13  ;;  %v195_v59 = vld [vmem:[#allocation2 + $0x28] sm:$0xff] }
  0x1c   : > { %328 = vmatpush.bf16.msra.mxu0 %v579_v14  ;;  %592 = vmatpush.bf16.msra.mxu2 %v579_v14 }
  0x1d   : > { %357 = vmatpush.bf16.msra.mxu1 %v587_v15  ;;  %600 = vmatpush.bf16.msra.mxu3 %v587_v15 }
  0x20   : > { %329 = vmatpush.bf16.msra.mxu0 %v578_v8  ;;  %593 = vmatpush.bf16.msra.mxu2 %v578_v8 }
  0x21   : > { %632 = vxpose.binary.xlu0.c.b16.cont [2/16] (narrow) %v583_v3, %v575_v2, 64 }
  0x22   : > { %358 = vmatpush.bf16.msra.mxu1 %v586_v9  ;;  %601 = vmatpush.bf16.msra.mxu3 %v586_v9 }
  0x24   : > { %330 = vmatpush.bf16.msra.mxu0 %v577_v6  ;;  %594 = vmatpush.bf16.msra.mxu2 %v577_v6 }
  0x26   : > { %359 = vmatpush.bf16.msra.mxu1 %v585_v7  ;;  %602 = vmatpush.bf16.msra.mxu3 %v585_v7 }
  0x28   : > { %331 = vmatpush.bf16.msra.mxu0 %v576_v4  ;;  %595 = vmatpush.bf16.msra.mxu2 %v576_v4 }
  0x2a   : > { %360 = vmatpush.bf16.msra.mxu1 %v584_v5  ;;  %603 = vmatpush.bf16.msra.mxu3 %v584_v5 }
  0x2c   : > { %332 = vmatpush.bf16.msra.mxu0 %v575_v2  ;;  %596 = vmatpush.bf16.msra.mxu2 %v575_v2  ;;  %v196_v2 = vld [vmem:[#allocation2 + $0x30] sm:$0xff] }
  0x2e   : > { %361 = vmatpush.bf16.msra.mxu1 %v583_v3  ;;  %604 = vmatpush.bf16.msra.mxu3 %v583_v3 }
  0x30   : > { %333 = vmatpush.bf16.msra.mxu0 %v574_v0  ;;  %597 = vmatpush.bf16.msra.mxu2 %v574_v0 }
  0x31   : > { %633 = vxpose.binary.xlu0.c.b16.cont [3/16] (narrow) %v584_v5, %v576_v4, 64 }
  0x32   : > { %362 = vmatpush.bf16.msra.mxu1 %v582_v1  ;;  %605 = vmatpush.bf16.msra.mxu3 %v582_v1 }
  0x41   : > { %634 = vxpose.binary.xlu0.c.b16.cont [4/16] (narrow) %v585_v7, %v577_v6, 64 }
  0x51   : > { %635 = vxpose.binary.xlu0.c.b16.cont [5/16] (narrow) %v586_v9, %v578_v8, 64  ;;  %v197_v9 = vld [vmem:[#allocation2 + $0x38] sm:$0xff] }
  0x61   : > { %636 = vxpose.binary.xlu0.c.b16.cont [6/16] (narrow) %v587_v15, %v579_v14, 64 }
  0x71   : > { %637 = vxpose.binary.xlu0.c.b16.cont [7/16] (narrow) %v588_v13, %v580_v12, 64 }
  0x81   : > { %638 = vxpose.binary.xlu0.c.b16.end [8/16] (narrow) %v589_v11, %v581_v10, 64 }
  0xbd   : > { %v639_v16 = vpop.trf.xlu0 }
  0xbe   : > { %334 = vmatmul.bf16.vlgmr.msra.gmra.mxu0 %v639_v16 }
  0xc5   : > { %v640_v17 = vpop.trf.xlu0 }
  0xc6   : > { %363 = vmatmul.bf16.vlgmr.msra.gmra.mxu1 %v640_v17 }
  0xcd   : > { %v641_v18 = vpop.trf.xlu0 }
  0xce   : > { %339 = vmatmul.bf16.gmra.mxu0 %v641_v18 }
  0xd5   : > { %v642_v19 = vpop.trf.xlu0 }
  0xd6   : > { %368 = vmatmul.bf16.gmra.mxu1 %v642_v19 }
  0xdd   : > { %v643_v20 = vpop.trf.xlu0 }
  0xde   : > { %344 = vmatmul.bf16.vlgmr.msra.gmra.mxu2 %v643_v20 }
  0xe5   : > { %v644_v21 = vpop.trf.xlu0 }
  0xe6   : > { %373 = vmatmul.bf16.vlgmr.msra.gmra.mxu3 %v644_v21 }
  0xed   : > { %v645_v22 = vpop.trf.xlu0 }
  0xee   : > { %349 = vmatmul.bf16.gmra.mxu2 %v645_v22 }
  0xf5   : > { %v646_v23 = vpop.trf.xlu0 }
  0xf6   : > { %378 = vmatmul.bf16.gmra.mxu3 %v646_v23 }
 0x13b   : > { %v335_v25 = vpop.f32.mrf.mxu0 }
 0x143   : > { %v364_v27 = vpop.f32.mrf.mxu1  ;;  %v337_v30 = vpop.f32.mrf.mxu0 }
 0x144   : > { %v365_v28 = vadd.f32 %v364_v27, %v335_v25 }
 0x146   : > { %v384_v29 = vadd.f32 %v365_v28, %v190_v26 }
 0x148   : > { %393 = vst.msk [vmem:[#allocation2] sm:$0xff] %vm149_vm0, %v384_v29 }
 0x14b   : > { %v366_v32 = vpop.f32.mrf.mxu1  ;;  %v340_v37 = vpop.f32.mrf.mxu0 }
 0x14c   : > { %v367_v33 = vadd.f32 %v366_v32, %v337_v30 }
 0x14e   : > { %v385_v34 = vadd.f32 %v367_v33, %v191_v31 }
 0x14f   : > { %v404_v35 = vld [vmem:[#allocation2] sm:$0xff] }
 0x150   : > { %v412_v36 = vmul.f32 6.1035156e-05, %v404_v35  ;;  %394 = vst.msk [vmem:[#allocation2 + $0x8] sm:$0xff] %vm149_vm0, %v385_v34 }
 0x152   : > { %420 = vst.msk [vmem:[%s719_s17] sm:$0xff] %vm149_vm0, %v412_v36 }
 0x153   : > { %v369_v39 = vpop.f32.mrf.mxu1  ;;  %v342_v44 = vpop.f32.mrf.mxu0 }
 0x154   : > { %v370_v40 = vadd.f32 %v369_v39, %v340_v37 }
 0x156   : > { %v386_v41 = vadd.f32 %v370_v40, %v192_v38 }
 0x157   : > { %v405_v42 = vld [vmem:[#allocation2 + $0x8] sm:$0xff] }
 0x158   : > { %v413_v43 = vmul.f32 6.1035156e-05, %v405_v42  ;;  %395 = vst.msk [vmem:[#allocation2 + $0x10] sm:$0xff] %vm149_vm0, %v386_v41 }
 0x15a   : > { %421 = vst.msk [vmem:[%s719_s17 + $0x8] sm:$0xff] %vm149_vm0, %v413_v43 }
 0x15b   : > { %v371_v46 = vpop.f32.mrf.mxu1 }
 0x15c   : > { %v372_v47 = vadd.f32 %v371_v46, %v342_v44 }
 0x15e   : > { %v387_v48 = vadd.f32 %v372_v47, %v193_v45 }
 0x15f   : > { %v406_v49 = vld [vmem:[#allocation2 + $0x10] sm:$0xff] }
 0x160   : > { %v414_v50 = vmul.f32 6.1035156e-05, %v406_v49  ;;  %396 = vst.msk [vmem:[#allocation2 + $0x18] sm:$0xff] %vm149_vm0, %v387_v48 }
 0x161   : > { %v345_v51 = vpop.f32.mrf.mxu2 }
 0x162   : > { %422 = vst.msk [vmem:[%s719_s17 + $0x10] sm:$0xff] %vm149_vm0, %v414_v50 }
 0x167   : > { %v407_v52 = vld [vmem:[#allocation2 + $0x18] sm:$0xff] }
 0x168   : > { %v415_v53 = vmul.f32 6.1035156e-05, %v407_v52 }
 0x169   : > { %v374_v55 = vpop.f32.mrf.mxu3  ;;  %v347_v58 = vpop.f32.mrf.mxu2 }
 0x16a   : > { %423 = vst.msk [vmem:[%s719_s17 + $0x18] sm:$0xff] %vm149_vm0, %v415_v53  ;;  %v375_v56 = vadd.f32 %v374_v55, %v345_v51 }
 0x16c   : > { %v388_v57 = vadd.f32 %v375_v56, %v194_v54 }
 0x16e   : > { %397 = vst.msk [vmem:[#allocation2 + $0x20] sm:$0xff] %vm149_vm0, %v388_v57 }
 0x171   : > { %v376_v60 = vpop.f32.mrf.mxu3  ;;  %v350_v1 = vpop.f32.mrf.mxu2 }
 0x172   : > { %v377_v61 = vadd.f32 %v376_v60, %v347_v58 }
 0x174   : > { %v389_v62 = vadd.f32 %v377_v61, %v195_v59 }
 0x175   : > { %v408_v63 = vld [vmem:[#allocation2 + $0x20] sm:$0xff] }
 0x176   : > { %v416_v0 = vmul.f32 6.1035156e-05, %v408_v63  ;;  %398 = vst.msk [vmem:[#allocation2 + $0x28] sm:$0xff] %vm149_vm0, %v389_v62 }
 0x178   : > { %424 = vst.msk [vmem:[%s719_s17 + $0x20] sm:$0xff] %vm149_vm0, %v416_v0 }
 0x179   : > { %v379_v3 = vpop.f32.mrf.mxu3  ;;  %v352_v8 = vpop.f32.mrf.mxu2 }
 0x17a   : > { %v380_v4 = vadd.f32 %v379_v3, %v350_v1 }
 0x17c   : > { %v390_v5 = vadd.f32 %v380_v4, %v196_v2 }
 0x17d   : > { %v409_v6 = vld [vmem:[#allocation2 + $0x28] sm:$0xff] }
 0x17e   : > { %v417_v7 = vmul.f32 6.1035156e-05, %v409_v6  ;;  %399 = vst.msk [vmem:[#allocation2 + $0x30] sm:$0xff] %vm149_vm0, %v390_v5 }
 0x180   : > { %425 = vst.msk [vmem:[%s719_s17 + $0x28] sm:$0xff] %vm149_vm0, %v417_v7 }
 0x181   : > { %v381_v10 = vpop.f32.mrf.mxu3 }
 0x182   : > { %v382_v11 = vadd.f32 %v381_v10, %v352_v8 }
 0x184   : > { %v391_v12 = vadd.f32 %v382_v11, %v197_v9 }
 0x185   : > { %v410_v13 = vld [vmem:[#allocation2 + $0x30] sm:$0xff] }
 0x186   : > { %v418_v14 = vmul.f32 6.1035156e-05, %v410_v13  ;;  %400 = vst.msk [vmem:[#allocation2 + $0x38] sm:$0xff] %vm149_vm0, %v391_v12 }
 0x188   : > { %426 = vst.msk [vmem:[%s719_s17 + $0x30] sm:$0xff] %vm149_vm0, %v418_v14 }
 0x18d   : > { %v411_v15 = vld [vmem:[#allocation2 + $0x38] sm:$0xff] }
 0x18e   : > { %v419_v16 = vmul.f32 6.1035156e-05, %v411_v15 }
 0x190   : > { %427 = vst.msk [vmem:[%s719_s17 + $0x38] sm:$0xff] %vm149_vm0, %v419_v16 }
 0x191 PF: > { %s11_s8 = sadd.s32 1, %s669_s8   ;;  %s755_s6 = smov %s665_s7 }
 0x192   : > { %p8_p5 = scmp.ge.s32.totalorder %s11_s8, 6   ;;  %s756_s7 = smov %s758_s9 }
 0x194   :  { %10 = sbr.rel (!%p8_p5) target bundleno = 2 (0x2), region = 62 }

</bundles_post_ra>
